<compile_context>
chip_gen: v7x
topology: tpu7x:2x2x1
jax: 0.10.0
libtpu: 0.0.40
codegen_flags: <defaults>
</compile_context>

<pallas_src>
import functools

import numpy as np

import jax
import jax.numpy as jnp
from jax.experimental import pallas as pl
from jax.experimental.pallas import tpu as pltpu

_INF = float("inf")


# ---------------------------------------------------------------------------
# Fused kernel: per batch element (grid step i):
#   pred_ref    : (C, HW)     logits
#   lab_col_ref : (C, HW, 1)  label one-hot, column orientation (masks sublanes)
#   d2_ref      : (HW, HW)    squared pixel distances (resident, constant index)
#   oh_ref      : (C, HW)     predicted argmax one-hot           (output)
#   fwd_ref     : (C, HW)     sqrt(min_{q in B} d2[p, q]) for p in A, +inf else
#   rev_ref     : (C, HW, 1)  sqrt(min_{p in A} d2[p, q]) for q in B, +inf else
# ---------------------------------------------------------------------------
def _thd_kernel(pred_ref, lab_col_ref, d2_ref, oh_ref, fwd_ref, rev_ref, *, chunk):
    ncls, hw = pred_ref.shape

    # argmax over classes (first-index tie-break). softmax omitted: it is a
    # strictly monotone map over the class axis, so the argmax is identical.
    p = pred_ref[...].astype(jnp.float32)
    cls_ids = jax.lax.broadcasted_iota(jnp.int32, p.shape, 0)          # (C, HW)
    pmax = jnp.max(p, axis=0, keepdims=True)                           # (1, HW)
    first_idx = jnp.min(jnp.where(p >= pmax, cls_ids, ncls),
                        axis=0, keepdims=True)                         # (1, HW)
    oh = (cls_ids == first_idx).astype(jnp.float32)                    # (C, HW)
    oh_ref[...] = oh

    # Forward accumulators (one lane-dense row per class); the reverse direction
    # completes per row-chunk (full lane reduce), so it needs no accumulator.
    f_acc = [jnp.full((1, hw), _INF, dtype=jnp.float32) for _ in range(ncls)]

    # Chunk the (HW, HW) matrix over rows: each chunk (chunk x HW f32) is loaded
    # from VMEM once and reused by every class and both reduction directions.
    for r0 in range(0, hw, chunk):
        d2c = d2_ref[pl.ds(r0, chunk), :]                              # (chunk, HW)
        for j in range(ncls):
            b_col = lab_col_ref[j, pl.ds(r0, chunk), :]                # (chunk, 1)
            a_row = oh[j:j + 1, :]                                     # (1, HW)

            # forward[p] = min over rows r in B of d2[r, p]   (d2 symmetric)
            f_acc[j] = jnp.minimum(
                f_acc[j],
                jnp.min(jnp.where(b_col > 0.5, d2c, _INF),
                        axis=0, keepdims=True))

            # reverse[q] = min over cols c in A of d2[q, c]   (complete per chunk)
            r_min = jnp.min(jnp.where(a_row > 0.5, d2c, _INF),
                            axis=1, keepdims=True)                     # (chunk, 1)
            rev_ref[j, pl.ds(r0, chunk), :] = jnp.where(
                b_col > 0.5, jnp.sqrt(r_min), _INF)

    for j in range(ncls):
        fwd_ref[pl.ds(j, 1), :] = jnp.where(
            oh[j:j + 1, :] > 0.5, jnp.sqrt(f_acc[j]), _INF)


# ---------------------------------------------------------------------------
# Host-side helpers (tiny, non-kernel-friendly pieces).
# ---------------------------------------------------------------------------
def _pairwise_sq_dists(h, w):
    hw = h * w
    idx = jnp.arange(hw, dtype=jnp.int32)
    r = (idx // w).astype(jnp.float32)
    c = (idx % w).astype(jnp.float32)
    dr = r[:, None] - r[None, :]
    dc = c[:, None] - c[None, :]
    return dr * dr + dc * dc                        # (HW, HW) f32


def _percentile_of_valid(sorted_vals, counts, q):
    """np.percentile('linear') over the first `counts` entries of each sorted row."""
    pos = jnp.maximum((counts.astype(jnp.float32) - 1.0) * (float(q) / 100.0), 0.0)
    lo = jnp.floor(pos).astype(jnp.int32)
    hi = jnp.minimum(lo + 1, jnp.maximum(counts - 1, 0))
    frac = pos - lo.astype(jnp.float32)
    v_lo = jnp.take_along_axis(sorted_vals, lo[..., None], axis=-1)[..., 0]
    v_hi = jnp.take_along_axis(sorted_vals, hi[..., None], axis=-1)[..., 0]
    return v_lo + frac * (v_hi - v_lo)


@functools.partial(jax.jit, static_argnames=("percentile", "ignore_class_index"))
def truncated_hausdorff_distance(predictions, labels_onehot, *,
                                 percentile, ignore_class_index):
    """Forward pass: returns (MHD, FHD, RHD), each of shape (num_classes + 2,)."""
    n, c, h, w = predictions.shape
    hw = h * w
    pred_flat = predictions.reshape(n, c, hw).astype(jnp.float32)
    b_onehot = labels_onehot.reshape(n, c, hw).astype(jnp.float32)
    lab_col = b_onehot.reshape(n, c, hw, 1)         # free (row-major) reshape

    # Fixed squared pixel-distance matrix, shared by every (batch, class) step.
    d2 = _pairwise_sq_dists(h, w)

    chunk = 64 if hw % 64 == 0 else hw

    oh_out, fwd_min, rev_col = pl.pallas_call(
        functools.partial(_thd_kernel, chunk=chunk),
        out_shape=(jax.ShapeDtypeStruct((n, c, hw), jnp.float32),
                   jax.ShapeDtypeStruct((n, c, hw), jnp.float32),
                   jax.ShapeDtypeStruct((n, c, hw, 1), jnp.float32)),
        grid=(n,),
        in_specs=[
            pl.BlockSpec((None, c, hw), lambda i: (i, 0, 0)),
            pl.BlockSpec((None, c, hw, 1), lambda i: (i, 0, 0, 0)),
            pl.BlockSpec((hw, hw), lambda i: (0, 0)),          # resident
        ],
        out_specs=(
            pl.BlockSpec((None, c, hw), lambda i: (i, 0, 0)),
            pl.BlockSpec((None, c, hw), lambda i: (i, 0, 0)),
            pl.BlockSpec((None, c, hw, 1), lambda i: (i, 0, 0, 0)),
        ),
        compiler_params=pltpu.CompilerParams(dimension_semantics=("parallel",)),
    )(pred_flat, lab_col, d2)

    rev_min = rev_col.reshape(n, c, hw)

    # TODO(synk): np.percentile (sort + dynamic-length interpolation) and the
    # final per-class bookkeeping have no clean Pallas TPU equivalent; they run
    # in plain JAX on the tiny (N, C, HW) kernel outputs.
    n_a = jnp.sum(oh_out, axis=-1).astype(jnp.int32)            # (N, C)
    n_b = jnp.sum(b_onehot, axis=-1).astype(jnp.int32)          # (N, C)

    fwd_pct = _percentile_of_valid(jnp.sort(fwd_min, axis=-1), n_a, percentile)
    rev_pct = _percentile_of_valid(jnp.sort(rev_min, axis=-1), n_b, percentile)

    inf = jnp.inf
    rev_pct = jnp.where(n_b == 0, inf, rev_pct)   # reference would error here; keep finite flow
    empty_a = n_a == 0                            # reference adds +inf and skips when A is empty
    fwd_pct = jnp.where(empty_a, inf, fwd_pct)
    rev_pct = jnp.where(empty_a, inf, rev_pct)
    mhd_ij = jnp.where(empty_a, inf, jnp.maximum(fwd_pct, rev_pct))

    keep = jnp.arange(c) != ignore_class_index    # ignored class contributes 0

    def _aggregate(per_ij):
        per_cls = jnp.sum(jnp.where(keep[None, :], per_ij, 0.0), axis=0) / n
        return jnp.concatenate(
            [per_cls, jnp.mean(per_cls)[None], jnp.mean(per_cls[1:])[None]]
        ).astype(jnp.float32)

    return _aggregate(mhd_ij), _aggregate(fwd_pct), _aggregate(rev_pct)


# ---------------------------------------------------------------------------
# Pure-numpy reference (faithful port of the PyTorch module).
# ---------------------------------------------------------------------------
def _reference_thd(logits, labels_onehot, percentile, ignore_class_index):
    logits = np.asarray(logits, dtype=np.float64)
    labels_onehot = np.asarray(labels_onehot, dtype=np.float64)
    n, c, _, _ = logits.shape
    cls = np.argmax(logits, axis=1)                # softmax preserves argmax
    fhd = np.zeros(c + 2, dtype=np.float64)
    rhd = np.zeros(c + 2, dtype=np.float64)
    mhd = np.zeros(c + 2, dtype=np.float64)
    for i in range(n):
        for j in range(c):
            if j == ignore_class_index:
                continue
            a_pts = np.argwhere(cls[i] == j).astype(np.float64)
            b_pts = np.argwhere(labels_onehot[i, j] > 0.5).astype(np.float64)
            if a_pts.shape[0] == 0:
                fhd[j] += np.inf; rhd[j] += np.inf; mhd[j] += np.inf
                continue
            d = np.sqrt(((a_pts[:, None, :] - b_pts[None, :, :]) ** 2).sum(-1))
            fwd = np.percentile(d.min(axis=1), percentile)
            rev = np.percentile(d.min(axis=0), percentile)
            fhd[j] += fwd; rhd[j] += rev; mhd[j] += max(fwd, rev)
    for arr in (fhd, rhd, mhd):
        arr[:c] /= n
        arr[c] = arr[:c].mean()
        arr[c + 1] = arr[1:c].mean()
    return mhd, fhd, rhd


if __name__ == "__main__":
    key = jax.random.PRNGKey(0)
    k1, k2 = jax.random.split(key)

    N, C, H, W = 2, 4, 16, 16
    PERCENTILE = 95.0
    IGNORE_CLASS = 0

    logits = jax.random.normal(k1, (N, C, H, W), dtype=jnp.float32)
    label_ids = jax.random.randint(k2, (N, H, W), 0, C)
    labels_onehot = jax.nn.one_hot(label_ids, C, axis=1, dtype=jnp.float32)

    mhd, fhd, rhd = truncated_hausdorff_distance(
        logits, labels_onehot,
        percentile=PERCENTILE, ignore_class_index=IGNORE_CLASS)
    mhd, fhd, rhd = jax.block_until_ready((mhd, fhd, rhd))

    mhd_ref, fhd_ref, rhd_ref = _reference_thd(
        logits, labels_onehot, PERCENTILE, IGNORE_CLASS)

    assert np.allclose(np.asarray(mhd), mhd_ref, rtol=1e-3, atol=1e-3), (mhd, mhd_ref)
    assert np.allclose(np.asarray(fhd), fhd_ref, rtol=1e-3, atol=1e-3), (fhd, fhd_ref)
    assert np.allclose(np.asarray(rhd), rhd_ref, rtol=1e-3, atol=1e-3), (rhd, rhd_ref)

    print("KERNEL_OK")
</pallas_src>

<mosaic_0001>
module attributes {stable_mosaic.version = 11 : i64} {
  func.func @_thd_kernel(%arg0: i32, %arg1: memref<1x4x256xf32, #tpu.memory_space<vmem>>, %arg2: memref<1x4x256x1xf32, #tpu.memory_space<vmem>>, %arg3: memref<256x256xf32, #tpu.memory_space<vmem>>, %arg4: memref<1x4x256xf32, #tpu.memory_space<vmem>>, %arg5: memref<1x4x256xf32, #tpu.memory_space<vmem>>, %arg6: memref<1x4x256x1xf32, #tpu.memory_space<vmem>>) attributes {dimension_semantics = [#tpu.dimension_semantics<parallel>], iteration_bounds = array<i64: 2>, scalar_prefetch = 0 : i64, scratch_operands = 0 : i64, tpu.core_type = #tpu.core_type<tc>, window_params = [{transform_indices = @transform_0, window_bounds = array<i64: 1, 4, 256>}, {transform_indices = @transform_1, window_bounds = array<i64: 1, 4, 256, 1>}, {pipeline_mode = #tpu.pipeline_mode<synchronous>, transform_indices = @transform_2, window_bounds = array<i64: 256, 256>}, {transform_indices = @transform_3, window_bounds = array<i64: 1, 4, 256>}, {transform_indices = @transform_4, window_bounds = array<i64: 1, 4, 256>}, {transform_indices = @transform_5, window_bounds = array<i64: 1, 4, 256, 1>}]} {
    %c0 = arith.constant 0 : index
    %c0_0 = arith.constant 0 : index
    %c0_1 = arith.constant 0 : index
    %0 = vector.load %arg1[%c0, %c0_0, %c0_1] : memref<1x4x256xf32, #tpu.memory_space<vmem>>, vector<1x4x256xf32>
    %1 = vector.shape_cast %0 : vector<1x4x256xf32> to vector<4x256xf32>
    %2 = tpu.iota {dimensions = array<i32: 0>} : vector<4x256xi32>
    %cst = arith.constant dense<0xFF800000> : vector<256xf32>
    %3 = vector.multi_reduction <maximumf>, %1, %cst [0] : vector<4x256xf32> to vector<256xf32>
    %4 = vector.shape_cast %3 : vector<256xf32> to vector<1x256xf32>
    %5 = vector.broadcast %4 : vector<1x256xf32> to vector<4x256xf32>
    %6 = arith.cmpf oge, %1, %5 : vector<4x256xf32>
    %c4_i32 = arith.constant 4 : i32
    %7 = vector.broadcast %c4_i32 : i32 to vector<4x256xi32>
    %8 = arith.select %6, %2, %7 : vector<4x256xi1>, vector<4x256xi32>
    %cst_2 = arith.constant dense<2147483647> : vector<256xi32>
    %9 = vector.multi_reduction <minsi>, %8, %cst_2 [0] : vector<4x256xi32> to vector<256xi32>
    %10 = vector.shape_cast %9 : vector<256xi32> to vector<1x256xi32>
    %11 = vector.broadcast %10 : vector<1x256xi32> to vector<4x256xi32>
    %12 = arith.cmpi eq, %2, %11 : vector<4x256xi32>
    %13 = arith.extui %12 : vector<4x256xi1> to vector<4x256xi32>
    %14 = arith.sitofp %13 : vector<4x256xi32> to vector<4x256xf32>
    %c0_3 = arith.constant 0 : index
    %c0_4 = arith.constant 0 : index
    %c0_5 = arith.constant 0 : index
    %15 = vector.load %arg4[%c0_3, %c0_4, %c0_5] : memref<1x4x256xf32, #tpu.memory_space<vmem>>, vector<1x4x256xf32>
    %16 = vector.shape_cast %15 : vector<1x4x256xf32> to vector<4x256xf32>
    %17 = vector.shape_cast %14 : vector<4x256xf32> to vector<1x4x256xf32>
    tpu.vector_store %arg4[%c0_3, %c0_4, %c0_5], %17 {strides = array<i32>} : memref<1x4x256xf32, #tpu.memory_space<vmem>>, vector<1x4x256xf32>,
    %cst_6 = arith.constant 0x7F800000 : f32
    %18 = vector.broadcast %cst_6 : f32 to vector<1x256xf32>
    %cst_7 = arith.constant 0x7F800000 : f32
    %19 = vector.broadcast %cst_7 : f32 to vector<1x256xf32>
    %cst_8 = arith.constant 0x7F800000 : f32
    %20 = vector.broadcast %cst_8 : f32 to vector<1x256xf32>
    %cst_9 = arith.constant 0x7F800000 : f32
    %21 = vector.broadcast %cst_9 : f32 to vector<1x256xf32>
    %c0_10 = arith.constant 0 : index
    %c0_11 = arith.constant 0 : index
    %22 = vector.load %arg3[%c0_10, %c0_11] : memref<256x256xf32, #tpu.memory_space<vmem>>, vector<64x256xf32>
    %c0_12 = arith.constant 0 : index
    %c0_13 = arith.constant 0 : index
    %c0_14 = arith.constant 0 : index
    %c0_15 = arith.constant 0 : index
    %23 = vector.load %arg2[%c0_12, %c0_13, %c0_14, %c0_15] : memref<1x4x256x1xf32, #tpu.memory_space<vmem>>, vector<1x1x64x1xf32>
    %24 = vector.shape_cast %23 : vector<1x1x64x1xf32> to vector<64x1xf32>
    %25 = vector.extract_strided_slice %14 {offsets = [0, 0], sizes = [1, 256], strides = [1, 1]} : vector<4x256xf32> to vector<1x256xf32>
    %cst_16 = arith.constant 5.000000e-01 : f32
    %26 = vector.broadcast %cst_16 : f32 to vector<64x1xf32>
    %27 = arith.cmpf ogt, %24, %26 : vector<64x1xf32>
    %cst_17 = arith.constant 0x7F800000 : f32
    %28 = vector.shape_cast %27 : vector<64x1xi1> to vector<64x1xi1>
    %29 = vector.broadcast %28 : vector<64x1xi1> to vector<64x256xi1>
    %30 = vector.broadcast %cst_17 : f32 to vector<64x256xf32>
    %31 = arith.select %29, %22, %30 : vector<64x256xi1>, vector<64x256xf32>
    %cst_18 = arith.constant dense<0x7F800000> : vector<256xf32>
    %32 = vector.multi_reduction <minimumf>, %31, %cst_18 [0] : vector<64x256xf32> to vector<256xf32>
    %33 = vector.shape_cast %32 : vector<256xf32> to vector<1x256xf32>
    %34 = arith.minimumf %18, %33 : vector<1x256xf32>
    %cst_19 = arith.constant 5.000000e-01 : f32
    %35 = vector.broadcast %cst_19 : f32 to vector<1x256xf32>
    %36 = arith.cmpf ogt, %25, %35 : vector<1x256xf32>
    %cst_20 = arith.constant 0x7F800000 : f32
    %37 = vector.shape_cast %36 : vector<1x256xi1> to vector<1x256xi1>
    %38 = vector.broadcast %37 : vector<1x256xi1> to vector<64x256xi1>
    %39 = vector.broadcast %cst_20 : f32 to vector<64x256xf32>
    %40 = arith.select %38, %22, %39 : vector<64x256xi1>, vector<64x256xf32>
    %cst_21 = arith.constant dense<0x7F800000> : vector<64xf32>
    %41 = vector.multi_reduction <minimumf>, %40, %cst_21 [1] : vector<64x256xf32> to vector<64xf32>
    %42 = vector.shape_cast %41 : vector<64xf32> to vector<64x1xf32>
    %cst_22 = arith.constant 5.000000e-01 : f32
    %43 = vector.broadcast %cst_22 : f32 to vector<64x1xf32>
    %44 = arith.cmpf ogt, %24, %43 : vector<64x1xf32>
    %45 = math.sqrt %42 : vector<64x1xf32>
    %cst_23 = arith.constant 0x7F800000 : f32
    %46 = vector.broadcast %cst_23 : f32 to vector<64x1xf32>
    %47 = arith.select %44, %45, %46 : vector<64x1xi1>, vector<64x1xf32>
    %c0_24 = arith.constant 0 : index
    %c0_25 = arith.constant 0 : index
    %c0_26 = arith.constant 0 : index
    %c0_27 = arith.constant 0 : index
    %48 = vector.load %arg6[%c0_24, %c0_25, %c0_26, %c0_27] : memref<1x4x256x1xf32, #tpu.memory_space<vmem>>, vector<1x1x64x1xf32>
    %49 = vector.shape_cast %48 : vector<1x1x64x1xf32> to vector<64x1xf32>
    %50 = vector.shape_cast %47 : vector<64x1xf32> to vector<1x1x64x1xf32>
    tpu.vector_store %arg6[%c0_24, %c0_25, %c0_26, %c0_27], %50 {strides = array<i32>} : memref<1x4x256x1xf32, #tpu.memory_space<vmem>>, vector<1x1x64x1xf32>,
    %c0_28 = arith.constant 0 : index
    %c1 = arith.constant 1 : index
    %c0_29 = arith.constant 0 : index
    %c0_30 = arith.constant 0 : index
    %51 = vector.load %arg2[%c0_28, %c1, %c0_29, %c0_30] : memref<1x4x256x1xf32, #tpu.memory_space<vmem>>, vector<1x1x64x1xf32>
    %52 = vector.shape_cast %51 : vector<1x1x64x1xf32> to vector<64x1xf32>
    %53 = vector.extract_strided_slice %14 {offsets = [1, 0], sizes = [1, 256], strides = [1, 1]} : vector<4x256xf32> to vector<1x256xf32>
    %cst_31 = arith.constant 5.000000e-01 : f32
    %54 = vector.broadcast %cst_31 : f32 to vector<64x1xf32>
    %55 = arith.cmpf ogt, %52, %54 : vector<64x1xf32>
    %cst_32 = arith.constant 0x7F800000 : f32
    %56 = vector.shape_cast %55 : vector<64x1xi1> to vector<64x1xi1>
    %57 = vector.broadcast %56 : vector<64x1xi1> to vector<64x256xi1>
    %58 = vector.broadcast %cst_32 : f32 to vector<64x256xf32>
    %59 = arith.select %57, %22, %58 : vector<64x256xi1>, vector<64x256xf32>
    %cst_33 = arith.constant dense<0x7F800000> : vector<256xf32>
    %60 = vector.multi_reduction <minimumf>, %59, %cst_33 [0] : vector<64x256xf32> to vector<256xf32>
    %61 = vector.shape_cast %60 : vector<256xf32> to vector<1x256xf32>
    %62 = arith.minimumf %19, %61 : vector<1x256xf32>
    %cst_34 = arith.constant 5.000000e-01 : f32
    %63 = vector.broadcast %cst_34 : f32 to vector<1x256xf32>
    %64 = arith.cmpf ogt, %53, %63 : vector<1x256xf32>
    %cst_35 = arith.constant 0x7F800000 : f32
    %65 = vector.shape_cast %64 : vector<1x256xi1> to vector<1x256xi1>
    %66 = vector.broadcast %65 : vector<1x256xi1> to vector<64x256xi1>
    %67 = vector.broadcast %cst_35 : f32 to vector<64x256xf32>
    %68 = arith.select %66, %22, %67 : vector<64x256xi1>, vector<64x256xf32>
    %cst_36 = arith.constant dense<0x7F800000> : vector<64xf32>
    %69 = vector.multi_reduction <minimumf>, %68, %cst_36 [1] : vector<64x256xf32> to vector<64xf32>
    %70 = vector.shape_cast %69 : vector<64xf32> to vector<64x1xf32>
    %cst_37 = arith.constant 5.000000e-01 : f32
    %71 = vector.broadcast %cst_37 : f32 to vector<64x1xf32>
    %72 = arith.cmpf ogt, %52, %71 : vector<64x1xf32>
    %73 = math.sqrt %70 : vector<64x1xf32>
    %cst_38 = arith.constant 0x7F800000 : f32
    %74 = vector.broadcast %cst_38 : f32 to vector<64x1xf32>
    %75 = arith.select %72, %73, %74 : vector<64x1xi1>, vector<64x1xf32>
    %c0_39 = arith.constant 0 : index
    %c1_40 = arith.constant 1 : index
    %c0_41 = arith.constant 0 : index
    %c0_42 = arith.constant 0 : index
    %76 = vector.load %arg6[%c0_39, %c1_40, %c0_41, %c0_42] : memref<1x4x256x1xf32, #tpu.memory_space<vmem>>, vector<1x1x64x1xf32>
    %77 = vector.shape_cast %76 : vector<1x1x64x1xf32> to vector<64x1xf32>
    %78 = vector.shape_cast %75 : vector<64x1xf32> to vector<1x1x64x1xf32>
    tpu.vector_store %arg6[%c0_39, %c1_40, %c0_41, %c0_42], %78 {strides = array<i32>} : memref<1x4x256x1xf32, #tpu.memory_space<vmem>>, vector<1x1x64x1xf32>,
    %c0_43 = arith.constant 0 : index
    %c2 = arith.constant 2 : index
    %c0_44 = arith.constant 0 : index
    %c0_45 = arith.constant 0 : index
    %79 = vector.load %arg2[%c0_43, %c2, %c0_44, %c0_45] : memref<1x4x256x1xf32, #tpu.memory_space<vmem>>, vector<1x1x64x1xf32>
    %80 = vector.shape_cast %79 : vector<1x1x64x1xf32> to vector<64x1xf32>
    %81 = vector.extract_strided_slice %14 {offsets = [2, 0], sizes = [1, 256], strides = [1, 1]} : vector<4x256xf32> to vector<1x256xf32>
    %cst_46 = arith.constant 5.000000e-01 : f32
    %82 = vector.broadcast %cst_46 : f32 to vector<64x1xf32>
    %83 = arith.cmpf ogt, %80, %82 : vector<64x1xf32>
    %cst_47 = arith.constant 0x7F800000 : f32
    %84 = vector.shape_cast %83 : vector<64x1xi1> to vector<64x1xi1>
    %85 = vector.broadcast %84 : vector<64x1xi1> to vector<64x256xi1>
    %86 = vector.broadcast %cst_47 : f32 to vector<64x256xf32>
    %87 = arith.select %85, %22, %86 : vector<64x256xi1>, vector<64x256xf32>
    %cst_48 = arith.constant dense<0x7F800000> : vector<256xf32>
    %88 = vector.multi_reduction <minimumf>, %87, %cst_48 [0] : vector<64x256xf32> to vector<256xf32>
    %89 = vector.shape_cast %88 : vector<256xf32> to vector<1x256xf32>
    %90 = arith.minimumf %20, %89 : vector<1x256xf32>
    %cst_49 = arith.constant 5.000000e-01 : f32
    %91 = vector.broadcast %cst_49 : f32 to vector<1x256xf32>
    %92 = arith.cmpf ogt, %81, %91 : vector<1x256xf32>
    %cst_50 = arith.constant 0x7F800000 : f32
    %93 = vector.shape_cast %92 : vector<1x256xi1> to vector<1x256xi1>
    %94 = vector.broadcast %93 : vector<1x256xi1> to vector<64x256xi1>
    %95 = vector.broadcast %cst_50 : f32 to vector<64x256xf32>
    %96 = arith.select %94, %22, %95 : vector<64x256xi1>, vector<64x256xf32>
    %cst_51 = arith.constant dense<0x7F800000> : vector<64xf32>
    %97 = vector.multi_reduction <minimumf>, %96, %cst_51 [1] : vector<64x256xf32> to vector<64xf32>
    %98 = vector.shape_cast %97 : vector<64xf32> to vector<64x1xf32>
    %cst_52 = arith.constant 5.000000e-01 : f32
    %99 = vector.broadcast %cst_52 : f32 to vector<64x1xf32>
    %100 = arith.cmpf ogt, %80, %99 : vector<64x1xf32>
    %101 = math.sqrt %98 : vector<64x1xf32>
    %cst_53 = arith.constant 0x7F800000 : f32
    %102 = vector.broadcast %cst_53 : f32 to vector<64x1xf32>
    %103 = arith.select %100, %101, %102 : vector<64x1xi1>, vector<64x1xf32>
    %c0_54 = arith.constant 0 : index
    %c2_55 = arith.constant 2 : index
    %c0_56 = arith.constant 0 : index
    %c0_57 = arith.constant 0 : index
    %104 = vector.load %arg6[%c0_54, %c2_55, %c0_56, %c0_57] : memref<1x4x256x1xf32, #tpu.memory_space<vmem>>, vector<1x1x64x1xf32>
    %105 = vector.shape_cast %104 : vector<1x1x64x1xf32> to vector<64x1xf32>
    %106 = vector.shape_cast %103 : vector<64x1xf32> to vector<1x1x64x1xf32>
    tpu.vector_store %arg6[%c0_54, %c2_55, %c0_56, %c0_57], %106 {strides = array<i32>} : memref<1x4x256x1xf32, #tpu.memory_space<vmem>>, vector<1x1x64x1xf32>,
    %c0_58 = arith.constant 0 : index
    %c3 = arith.constant 3 : index
    %c0_59 = arith.constant 0 : index
    %c0_60 = arith.constant 0 : index
    %107 = vector.load %arg2[%c0_58, %c3, %c0_59, %c0_60] : memref<1x4x256x1xf32, #tpu.memory_space<vmem>>, vector<1x1x64x1xf32>
    %108 = vector.shape_cast %107 : vector<1x1x64x1xf32> to vector<64x1xf32>
    %109 = vector.extract_strided_slice %14 {offsets = [3, 0], sizes = [1, 256], strides = [1, 1]} : vector<4x256xf32> to vector<1x256xf32>
    %cst_61 = arith.constant 5.000000e-01 : f32
    %110 = vector.broadcast %cst_61 : f32 to vector<64x1xf32>
    %111 = arith.cmpf ogt, %108, %110 : vector<64x1xf32>
    %cst_62 = arith.constant 0x7F800000 : f32
    %112 = vector.shape_cast %111 : vector<64x1xi1> to vector<64x1xi1>
    %113 = vector.broadcast %112 : vector<64x1xi1> to vector<64x256xi1>
    %114 = vector.broadcast %cst_62 : f32 to vector<64x256xf32>
    %115 = arith.select %113, %22, %114 : vector<64x256xi1>, vector<64x256xf32>
    %cst_63 = arith.constant dense<0x7F800000> : vector<256xf32>
    %116 = vector.multi_reduction <minimumf>, %115, %cst_63 [0] : vector<64x256xf32> to vector<256xf32>
    %117 = vector.shape_cast %116 : vector<256xf32> to vector<1x256xf32>
    %118 = arith.minimumf %21, %117 : vector<1x256xf32>
    %cst_64 = arith.constant 5.000000e-01 : f32
    %119 = vector.broadcast %cst_64 : f32 to vector<1x256xf32>
    %120 = arith.cmpf ogt, %109, %119 : vector<1x256xf32>
    %cst_65 = arith.constant 0x7F800000 : f32
    %121 = vector.shape_cast %120 : vector<1x256xi1> to vector<1x256xi1>
    %122 = vector.broadcast %121 : vector<1x256xi1> to vector<64x256xi1>
    %123 = vector.broadcast %cst_65 : f32 to vector<64x256xf32>
    %124 = arith.select %122, %22, %123 : vector<64x256xi1>, vector<64x256xf32>
    %cst_66 = arith.constant dense<0x7F800000> : vector<64xf32>
    %125 = vector.multi_reduction <minimumf>, %124, %cst_66 [1] : vector<64x256xf32> to vector<64xf32>
    %126 = vector.shape_cast %125 : vector<64xf32> to vector<64x1xf32>
    %cst_67 = arith.constant 5.000000e-01 : f32
    %127 = vector.broadcast %cst_67 : f32 to vector<64x1xf32>
    %128 = arith.cmpf ogt, %108, %127 : vector<64x1xf32>
    %129 = math.sqrt %126 : vector<64x1xf32>
    %cst_68 = arith.constant 0x7F800000 : f32
    %130 = vector.broadcast %cst_68 : f32 to vector<64x1xf32>
    %131 = arith.select %128, %129, %130 : vector<64x1xi1>, vector<64x1xf32>
    %c0_69 = arith.constant 0 : index
    %c3_70 = arith.constant 3 : index
    %c0_71 = arith.constant 0 : index
    %c0_72 = arith.constant 0 : index
    %132 = vector.load %arg6[%c0_69, %c3_70, %c0_71, %c0_72] : memref<1x4x256x1xf32, #tpu.memory_space<vmem>>, vector<1x1x64x1xf32>
    %133 = vector.shape_cast %132 : vector<1x1x64x1xf32> to vector<64x1xf32>
    %134 = vector.shape_cast %131 : vector<64x1xf32> to vector<1x1x64x1xf32>
    tpu.vector_store %arg6[%c0_69, %c3_70, %c0_71, %c0_72], %134 {strides = array<i32>} : memref<1x4x256x1xf32, #tpu.memory_space<vmem>>, vector<1x1x64x1xf32>,
    %c64 = arith.constant 64 : index
    %c0_73 = arith.constant 0 : index
    %135 = vector.load %arg3[%c64, %c0_73] : memref<256x256xf32, #tpu.memory_space<vmem>>, vector<64x256xf32>
    %c0_74 = arith.constant 0 : index
    %c0_75 = arith.constant 0 : index
    %c64_76 = arith.constant 64 : index
    %c0_77 = arith.constant 0 : index
    %136 = vector.load %arg2[%c0_74, %c0_75, %c64_76, %c0_77] : memref<1x4x256x1xf32, #tpu.memory_space<vmem>>, vector<1x1x64x1xf32>
    %137 = vector.shape_cast %136 : vector<1x1x64x1xf32> to vector<64x1xf32>
    %138 = vector.extract_strided_slice %14 {offsets = [0, 0], sizes = [1, 256], strides = [1, 1]} : vector<4x256xf32> to vector<1x256xf32>
    %cst_78 = arith.constant 5.000000e-01 : f32
    %139 = vector.broadcast %cst_78 : f32 to vector<64x1xf32>
    %140 = arith.cmpf ogt, %137, %139 : vector<64x1xf32>
    %cst_79 = arith.constant 0x7F800000 : f32
    %141 = vector.shape_cast %140 : vector<64x1xi1> to vector<64x1xi1>
    %142 = vector.broadcast %141 : vector<64x1xi1> to vector<64x256xi1>
    %143 = vector.broadcast %cst_79 : f32 to vector<64x256xf32>
    %144 = arith.select %142, %135, %143 : vector<64x256xi1>, vector<64x256xf32>
    %cst_80 = arith.constant dense<0x7F800000> : vector<256xf32>
    %145 = vector.multi_reduction <minimumf>, %144, %cst_80 [0] : vector<64x256xf32> to vector<256xf32>
    %146 = vector.shape_cast %145 : vector<256xf32> to vector<1x256xf32>
    %147 = arith.minimumf %34, %146 : vector<1x256xf32>
    %cst_81 = arith.constant 5.000000e-01 : f32
    %148 = vector.broadcast %cst_81 : f32 to vector<1x256xf32>
    %149 = arith.cmpf ogt, %138, %148 : vector<1x256xf32>
    %cst_82 = arith.constant 0x7F800000 : f32
    %150 = vector.shape_cast %149 : vector<1x256xi1> to vector<1x256xi1>
    %151 = vector.broadcast %150 : vector<1x256xi1> to vector<64x256xi1>
    %152 = vector.broadcast %cst_82 : f32 to vector<64x256xf32>
    %153 = arith.select %151, %135, %152 : vector<64x256xi1>, vector<64x256xf32>
    %cst_83 = arith.constant dense<0x7F800000> : vector<64xf32>
    %154 = vector.multi_reduction <minimumf>, %153, %cst_83 [1] : vector<64x256xf32> to vector<64xf32>
    %155 = vector.shape_cast %154 : vector<64xf32> to vector<64x1xf32>
    %cst_84 = arith.constant 5.000000e-01 : f32
    %156 = vector.broadcast %cst_84 : f32 to vector<64x1xf32>
    %157 = arith.cmpf ogt, %137, %156 : vector<64x1xf32>
    %158 = math.sqrt %155 : vector<64x1xf32>
    %cst_85 = arith.constant 0x7F800000 : f32
    %159 = vector.broadcast %cst_85 : f32 to vector<64x1xf32>
    %160 = arith.select %157, %158, %159 : vector<64x1xi1>, vector<64x1xf32>
    %c0_86 = arith.constant 0 : index
    %c0_87 = arith.constant 0 : index
    %c64_88 = arith.constant 64 : index
    %c0_89 = arith.constant 0 : index
    %161 = vector.load %arg6[%c0_86, %c0_87, %c64_88, %c0_89] : memref<1x4x256x1xf32, #tpu.memory_space<vmem>>, vector<1x1x64x1xf32>
    %162 = vector.shape_cast %161 : vector<1x1x64x1xf32> to vector<64x1xf32>
    %163 = vector.shape_cast %160 : vector<64x1xf32> to vector<1x1x64x1xf32>
    tpu.vector_store %arg6[%c0_86, %c0_87, %c64_88, %c0_89], %163 {strides = array<i32>} : memref<1x4x256x1xf32, #tpu.memory_space<vmem>>, vector<1x1x64x1xf32>,
    %c0_90 = arith.constant 0 : index
    %c1_91 = arith.constant 1 : index
    %c64_92 = arith.constant 64 : index
    %c0_93 = arith.constant 0 : index
    %164 = vector.load %arg2[%c0_90, %c1_91, %c64_92, %c0_93] : memref<1x4x256x1xf32, #tpu.memory_space<vmem>>, vector<1x1x64x1xf32>
    %165 = vector.shape_cast %164 : vector<1x1x64x1xf32> to vector<64x1xf32>
    %166 = vector.extract_strided_slice %14 {offsets = [1, 0], sizes = [1, 256], strides = [1, 1]} : vector<4x256xf32> to vector<1x256xf32>
    %cst_94 = arith.constant 5.000000e-01 : f32
    %167 = vector.broadcast %cst_94 : f32 to vector<64x1xf32>
    %168 = arith.cmpf ogt, %165, %167 : vector<64x1xf32>
    %cst_95 = arith.constant 0x7F800000 : f32
    %169 = vector.shape_cast %168 : vector<64x1xi1> to vector<64x1xi1>
    %170 = vector.broadcast %169 : vector<64x1xi1> to vector<64x256xi1>
    %171 = vector.broadcast %cst_95 : f32 to vector<64x256xf32>
    %172 = arith.select %170, %135, %171 : vector<64x256xi1>, vector<64x256xf32>
    %cst_96 = arith.constant dense<0x7F800000> : vector<256xf32>
    %173 = vector.multi_reduction <minimumf>, %172, %cst_96 [0] : vector<64x256xf32> to vector<256xf32>
    %174 = vector.shape_cast %173 : vector<256xf32> to vector<1x256xf32>
    %175 = arith.minimumf %62, %174 : vector<1x256xf32>
    %cst_97 = arith.constant 5.000000e-01 : f32
    %176 = vector.broadcast %cst_97 : f32 to vector<1x256xf32>
    %177 = arith.cmpf ogt, %166, %176 : vector<1x256xf32>
    %cst_98 = arith.constant 0x7F800000 : f32
    %178 = vector.shape_cast %177 : vector<1x256xi1> to vector<1x256xi1>
    %179 = vector.broadcast %178 : vector<1x256xi1> to vector<64x256xi1>
    %180 = vector.broadcast %cst_98 : f32 to vector<64x256xf32>
    %181 = arith.select %179, %135, %180 : vector<64x256xi1>, vector<64x256xf32>
    %cst_99 = arith.constant dense<0x7F800000> : vector<64xf32>
    %182 = vector.multi_reduction <minimumf>, %181, %cst_99 [1] : vector<64x256xf32> to vector<64xf32>
    %183 = vector.shape_cast %182 : vector<64xf32> to vector<64x1xf32>
    %cst_100 = arith.constant 5.000000e-01 : f32
    %184 = vector.broadcast %cst_100 : f32 to vector<64x1xf32>
    %185 = arith.cmpf ogt, %165, %184 : vector<64x1xf32>
    %186 = math.sqrt %183 : vector<64x1xf32>
    %cst_101 = arith.constant 0x7F800000 : f32
    %187 = vector.broadcast %cst_101 : f32 to vector<64x1xf32>
    %188 = arith.select %185, %186, %187 : vector<64x1xi1>, vector<64x1xf32>
    %c0_102 = arith.constant 0 : index
    %c1_103 = arith.constant 1 : index
    %c64_104 = arith.constant 64 : index
    %c0_105 = arith.constant 0 : index
    %189 = vector.load %arg6[%c0_102, %c1_103, %c64_104, %c0_105] : memref<1x4x256x1xf32, #tpu.memory_space<vmem>>, vector<1x1x64x1xf32>
    %190 = vector.shape_cast %189 : vector<1x1x64x1xf32> to vector<64x1xf32>
    %191 = vector.shape_cast %188 : vector<64x1xf32> to vector<1x1x64x1xf32>
    tpu.vector_store %arg6[%c0_102, %c1_103, %c64_104, %c0_105], %191 {strides = array<i32>} : memref<1x4x256x1xf32, #tpu.memory_space<vmem>>, vector<1x1x64x1xf32>,
    %c0_106 = arith.constant 0 : index
    %c2_107 = arith.constant 2 : index
    %c64_108 = arith.constant 64 : index
    %c0_109 = arith.constant 0 : index
    %192 = vector.load %arg2[%c0_106, %c2_107, %c64_108, %c0_109] : memref<1x4x256x1xf32, #tpu.memory_space<vmem>>, vector<1x1x64x1xf32>
    %193 = vector.shape_cast %192 : vector<1x1x64x1xf32> to vector<64x1xf32>
    %194 = vector.extract_strided_slice %14 {offsets = [2, 0], sizes = [1, 256], strides = [1, 1]} : vector<4x256xf32> to vector<1x256xf32>
    %cst_110 = arith.constant 5.000000e-01 : f32
    %195 = vector.broadcast %cst_110 : f32 to vector<64x1xf32>
    %196 = arith.cmpf ogt, %193, %195 : vector<64x1xf32>
    %cst_111 = arith.constant 0x7F800000 : f32
    %197 = vector.shape_cast %196 : vector<64x1xi1> to vector<64x1xi1>
    %198 = vector.broadcast %197 : vector<64x1xi1> to vector<64x256xi1>
    %199 = vector.broadcast %cst_111 : f32 to vector<64x256xf32>
    %200 = arith.select %198, %135, %199 : vector<64x256xi1>, vector<64x256xf32>
    %cst_112 = arith.constant dense<0x7F800000> : vector<256xf32>
    %201 = vector.multi_reduction <minimumf>, %200, %cst_112 [0] : vector<64x256xf32> to vector<256xf32>
    %202 = vector.shape_cast %201 : vector<256xf32> to vector<1x256xf32>
    %203 = arith.minimumf %90, %202 : vector<1x256xf32>
    %cst_113 = arith.constant 5.000000e-01 : f32
    %204 = vector.broadcast %cst_113 : f32 to vector<1x256xf32>
    %205 = arith.cmpf ogt, %194, %204 : vector<1x256xf32>
    %cst_114 = arith.constant 0x7F800000 : f32
    %206 = vector.shape_cast %205 : vector<1x256xi1> to vector<1x256xi1>
    %207 = vector.broadcast %206 : vector<1x256xi1> to vector<64x256xi1>
    %208 = vector.broadcast %cst_114 : f32 to vector<64x256xf32>
    %209 = arith.select %207, %135, %208 : vector<64x256xi1>, vector<64x256xf32>
    %cst_115 = arith.constant dense<0x7F800000> : vector<64xf32>
    %210 = vector.multi_reduction <minimumf>, %209, %cst_115 [1] : vector<64x256xf32> to vector<64xf32>
    %211 = vector.shape_cast %210 : vector<64xf32> to vector<64x1xf32>
    %cst_116 = arith.constant 5.000000e-01 : f32
    %212 = vector.broadcast %cst_116 : f32 to vector<64x1xf32>
    %213 = arith.cmpf ogt, %193, %212 : vector<64x1xf32>
    %214 = math.sqrt %211 : vector<64x1xf32>
    %cst_117 = arith.constant 0x7F800000 : f32
    %215 = vector.broadcast %cst_117 : f32 to vector<64x1xf32>
    %216 = arith.select %213, %214, %215 : vector<64x1xi1>, vector<64x1xf32>
    %c0_118 = arith.constant 0 : index
    %c2_119 = arith.constant 2 : index
    %c64_120 = arith.constant 64 : index
    %c0_121 = arith.constant 0 : index
    %217 = vector.load %arg6[%c0_118, %c2_119, %c64_120, %c0_121] : memref<1x4x256x1xf32, #tpu.memory_space<vmem>>, vector<1x1x64x1xf32>
    %218 = vector.shape_cast %217 : vector<1x1x64x1xf32> to vector<64x1xf32>
    %219 = vector.shape_cast %216 : vector<64x1xf32> to vector<1x1x64x1xf32>
    tpu.vector_store %arg6[%c0_118, %c2_119, %c64_120, %c0_121], %219 {strides = array<i32>} : memref<1x4x256x1xf32, #tpu.memory_space<vmem>>, vector<1x1x64x1xf32>,
    %c0_122 = arith.constant 0 : index
    %c3_123 = arith.constant 3 : index
    %c64_124 = arith.constant 64 : index
    %c0_125 = arith.constant 0 : index
    %220 = vector.load %arg2[%c0_122, %c3_123, %c64_124, %c0_125] : memref<1x4x256x1xf32, #tpu.memory_space<vmem>>, vector<1x1x64x1xf32>
    %221 = vector.shape_cast %220 : vector<1x1x64x1xf32> to vector<64x1xf32>
    %222 = vector.extract_strided_slice %14 {offsets = [3, 0], sizes = [1, 256], strides = [1, 1]} : vector<4x256xf32> to vector<1x256xf32>
    %cst_126 = arith.constant 5.000000e-01 : f32
    %223 = vector.broadcast %cst_126 : f32 to vector<64x1xf32>
    %224 = arith.cmpf ogt, %221, %223 : vector<64x1xf32>
    %cst_127 = arith.constant 0x7F800000 : f32
    %225 = vector.shape_cast %224 : vector<64x1xi1> to vector<64x1xi1>
    %226 = vector.broadcast %225 : vector<64x1xi1> to vector<64x256xi1>
    %227 = vector.broadcast %cst_127 : f32 to vector<64x256xf32>
    %228 = arith.select %226, %135, %227 : vector<64x256xi1>, vector<64x256xf32>
    %cst_128 = arith.constant dense<0x7F800000> : vector<256xf32>
    %229 = vector.multi_reduction <minimumf>, %228, %cst_128 [0] : vector<64x256xf32> to vector<256xf32>
    %230 = vector.shape_cast %229 : vector<256xf32> to vector<1x256xf32>
    %231 = arith.minimumf %118, %230 : vector<1x256xf32>
    %cst_129 = arith.constant 5.000000e-01 : f32
    %232 = vector.broadcast %cst_129 : f32 to vector<1x256xf32>
    %233 = arith.cmpf ogt, %222, %232 : vector<1x256xf32>
    %cst_130 = arith.constant 0x7F800000 : f32
    %234 = vector.shape_cast %233 : vector<1x256xi1> to vector<1x256xi1>
    %235 = vector.broadcast %234 : vector<1x256xi1> to vector<64x256xi1>
    %236 = vector.broadcast %cst_130 : f32 to vector<64x256xf32>
    %237 = arith.select %235, %135, %236 : vector<64x256xi1>, vector<64x256xf32>
    %cst_131 = arith.constant dense<0x7F800000> : vector<64xf32>
    %238 = vector.multi_reduction <minimumf>, %237, %cst_131 [1] : vector<64x256xf32> to vector<64xf32>
    %239 = vector.shape_cast %238 : vector<64xf32> to vector<64x1xf32>
    %cst_132 = arith.constant 5.000000e-01 : f32
    %240 = vector.broadcast %cst_132 : f32 to vector<64x1xf32>
    %241 = arith.cmpf ogt, %221, %240 : vector<64x1xf32>
    %242 = math.sqrt %239 : vector<64x1xf32>
    %cst_133 = arith.constant 0x7F800000 : f32
    %243 = vector.broadcast %cst_133 : f32 to vector<64x1xf32>
    %244 = arith.select %241, %242, %243 : vector<64x1xi1>, vector<64x1xf32>
    %c0_134 = arith.constant 0 : index
    %c3_135 = arith.constant 3 : index
    %c64_136 = arith.constant 64 : index
    %c0_137 = arith.constant 0 : index
    %245 = vector.load %arg6[%c0_134, %c3_135, %c64_136, %c0_137] : memref<1x4x256x1xf32, #tpu.memory_space<vmem>>, vector<1x1x64x1xf32>
    %246 = vector.shape_cast %245 : vector<1x1x64x1xf32> to vector<64x1xf32>
    %247 = vector.shape_cast %244 : vector<64x1xf32> to vector<1x1x64x1xf32>
    tpu.vector_store %arg6[%c0_134, %c3_135, %c64_136, %c0_137], %247 {strides = array<i32>} : memref<1x4x256x1xf32, #tpu.memory_space<vmem>>, vector<1x1x64x1xf32>,
    %c128 = arith.constant 128 : index
    %c0_138 = arith.constant 0 : index
    %248 = vector.load %arg3[%c128, %c0_138] : memref<256x256xf32, #tpu.memory_space<vmem>>, vector<64x256xf32>
    %c0_139 = arith.constant 0 : index
    %c0_140 = arith.constant 0 : index
    %c128_141 = arith.constant 128 : index
    %c0_142 = arith.constant 0 : index
    %249 = vector.load %arg2[%c0_139, %c0_140, %c128_141, %c0_142] : memref<1x4x256x1xf32, #tpu.memory_space<vmem>>, vector<1x1x64x1xf32>
    %250 = vector.shape_cast %249 : vector<1x1x64x1xf32> to vector<64x1xf32>
    %251 = vector.extract_strided_slice %14 {offsets = [0, 0], sizes = [1, 256], strides = [1, 1]} : vector<4x256xf32> to vector<1x256xf32>
    %cst_143 = arith.constant 5.000000e-01 : f32
    %252 = vector.broadcast %cst_143 : f32 to vector<64x1xf32>
    %253 = arith.cmpf ogt, %250, %252 : vector<64x1xf32>
    %cst_144 = arith.constant 0x7F800000 : f32
    %254 = vector.shape_cast %253 : vector<64x1xi1> to vector<64x1xi1>
    %255 = vector.broadcast %254 : vector<64x1xi1> to vector<64x256xi1>
    %256 = vector.broadcast %cst_144 : f32 to vector<64x256xf32>
    %257 = arith.select %255, %248, %256 : vector<64x256xi1>, vector<64x256xf32>
    %cst_145 = arith.constant dense<0x7F800000> : vector<256xf32>
    %258 = vector.multi_reduction <minimumf>, %257, %cst_145 [0] : vector<64x256xf32> to vector<256xf32>
    %259 = vector.shape_cast %258 : vector<256xf32> to vector<1x256xf32>
    %260 = arith.minimumf %147, %259 : vector<1x256xf32>
    %cst_146 = arith.constant 5.000000e-01 : f32
    %261 = vector.broadcast %cst_146 : f32 to vector<1x256xf32>
    %262 = arith.cmpf ogt, %251, %261 : vector<1x256xf32>
    %cst_147 = arith.constant 0x7F800000 : f32
    %263 = vector.shape_cast %262 : vector<1x256xi1> to vector<1x256xi1>
    %264 = vector.broadcast %263 : vector<1x256xi1> to vector<64x256xi1>
    %265 = vector.broadcast %cst_147 : f32 to vector<64x256xf32>
    %266 = arith.select %264, %248, %265 : vector<64x256xi1>, vector<64x256xf32>
    %cst_148 = arith.constant dense<0x7F800000> : vector<64xf32>
    %267 = vector.multi_reduction <minimumf>, %266, %cst_148 [1] : vector<64x256xf32> to vector<64xf32>
    %268 = vector.shape_cast %267 : vector<64xf32> to vector<64x1xf32>
    %cst_149 = arith.constant 5.000000e-01 : f32
    %269 = vector.broadcast %cst_149 : f32 to vector<64x1xf32>
    %270 = arith.cmpf ogt, %250, %269 : vector<64x1xf32>
    %271 = math.sqrt %268 : vector<64x1xf32>
    %cst_150 = arith.constant 0x7F800000 : f32
    %272 = vector.broadcast %cst_150 : f32 to vector<64x1xf32>
    %273 = arith.select %270, %271, %272 : vector<64x1xi1>, vector<64x1xf32>
    %c0_151 = arith.constant 0 : index
    %c0_152 = arith.constant 0 : index
    %c128_153 = arith.constant 128 : index
    %c0_154 = arith.constant 0 : index
    %274 = vector.load %arg6[%c0_151, %c0_152, %c128_153, %c0_154] : memref<1x4x256x1xf32, #tpu.memory_space<vmem>>, vector<1x1x64x1xf32>
    %275 = vector.shape_cast %274 : vector<1x1x64x1xf32> to vector<64x1xf32>
    %276 = vector.shape_cast %273 : vector<64x1xf32> to vector<1x1x64x1xf32>
    tpu.vector_store %arg6[%c0_151, %c0_152, %c128_153, %c0_154], %276 {strides = array<i32>} : memref<1x4x256x1xf32, #tpu.memory_space<vmem>>, vector<1x1x64x1xf32>,
    %c0_155 = arith.constant 0 : index
    %c1_156 = arith.constant 1 : index
    %c128_157 = arith.constant 128 : index
    %c0_158 = arith.constant 0 : index
    %277 = vector.load %arg2[%c0_155, %c1_156, %c128_157, %c0_158] : memref<1x4x256x1xf32, #tpu.memory_space<vmem>>, vector<1x1x64x1xf32>
    %278 = vector.shape_cast %277 : vector<1x1x64x1xf32> to vector<64x1xf32>
    %279 = vector.extract_strided_slice %14 {offsets = [1, 0], sizes = [1, 256], strides = [1, 1]} : vector<4x256xf32> to vector<1x256xf32>
    %cst_159 = arith.constant 5.000000e-01 : f32
    %280 = vector.broadcast %cst_159 : f32 to vector<64x1xf32>
    %281 = arith.cmpf ogt, %278, %280 : vector<64x1xf32>
    %cst_160 = arith.constant 0x7F800000 : f32
    %282 = vector.shape_cast %281 : vector<64x1xi1> to vector<64x1xi1>
    %283 = vector.broadcast %282 : vector<64x1xi1> to vector<64x256xi1>
    %284 = vector.broadcast %cst_160 : f32 to vector<64x256xf32>
    %285 = arith.select %283, %248, %284 : vector<64x256xi1>, vector<64x256xf32>
    %cst_161 = arith.constant dense<0x7F800000> : vector<256xf32>
    %286 = vector.multi_reduction <minimumf>, %285, %cst_161 [0] : vector<64x256xf32> to vector<256xf32>
    %287 = vector.shape_cast %286 : vector<256xf32> to vector<1x256xf32>
    %288 = arith.minimumf %175, %287 : vector<1x256xf32>
    %cst_162 = arith.constant 5.000000e-01 : f32
    %289 = vector.broadcast %cst_162 : f32 to vector<1x256xf32>
    %290 = arith.cmpf ogt, %279, %289 : vector<1x256xf32>
    %cst_163 = arith.constant 0x7F800000 : f32
    %291 = vector.shape_cast %290 : vector<1x256xi1> to vector<1x256xi1>
    %292 = vector.broadcast %291 : vector<1x256xi1> to vector<64x256xi1>
    %293 = vector.broadcast %cst_163 : f32 to vector<64x256xf32>
    %294 = arith.select %292, %248, %293 : vector<64x256xi1>, vector<64x256xf32>
    %cst_164 = arith.constant dense<0x7F800000> : vector<64xf32>
    %295 = vector.multi_reduction <minimumf>, %294, %cst_164 [1] : vector<64x256xf32> to vector<64xf32>
    %296 = vector.shape_cast %295 : vector<64xf32> to vector<64x1xf32>
    %cst_165 = arith.constant 5.000000e-01 : f32
    %297 = vector.broadcast %cst_165 : f32 to vector<64x1xf32>
    %298 = arith.cmpf ogt, %278, %297 : vector<64x1xf32>
    %299 = math.sqrt %296 : vector<64x1xf32>
    %cst_166 = arith.constant 0x7F800000 : f32
    %300 = vector.broadcast %cst_166 : f32 to vector<64x1xf32>
    %301 = arith.select %298, %299, %300 : vector<64x1xi1>, vector<64x1xf32>
    %c0_167 = arith.constant 0 : index
    %c1_168 = arith.constant 1 : index
    %c128_169 = arith.constant 128 : index
    %c0_170 = arith.constant 0 : index
    %302 = vector.load %arg6[%c0_167, %c1_168, %c128_169, %c0_170] : memref<1x4x256x1xf32, #tpu.memory_space<vmem>>, vector<1x1x64x1xf32>
    %303 = vector.shape_cast %302 : vector<1x1x64x1xf32> to vector<64x1xf32>
    %304 = vector.shape_cast %301 : vector<64x1xf32> to vector<1x1x64x1xf32>
    tpu.vector_store %arg6[%c0_167, %c1_168, %c128_169, %c0_170], %304 {strides = array<i32>} : memref<1x4x256x1xf32, #tpu.memory_space<vmem>>, vector<1x1x64x1xf32>,
    %c0_171 = arith.constant 0 : index
    %c2_172 = arith.constant 2 : index
    %c128_173 = arith.constant 128 : index
    %c0_174 = arith.constant 0 : index
    %305 = vector.load %arg2[%c0_171, %c2_172, %c128_173, %c0_174] : memref<1x4x256x1xf32, #tpu.memory_space<vmem>>, vector<1x1x64x1xf32>
    %306 = vector.shape_cast %305 : vector<1x1x64x1xf32> to vector<64x1xf32>
    %307 = vector.extract_strided_slice %14 {offsets = [2, 0], sizes = [1, 256], strides = [1, 1]} : vector<4x256xf32> to vector<1x256xf32>
    %cst_175 = arith.constant 5.000000e-01 : f32
    %308 = vector.broadcast %cst_175 : f32 to vector<64x1xf32>
    %309 = arith.cmpf ogt, %306, %308 : vector<64x1xf32>
    %cst_176 = arith.constant 0x7F800000 : f32
    %310 = vector.shape_cast %309 : vector<64x1xi1> to vector<64x1xi1>
    %311 = vector.broadcast %310 : vector<64x1xi1> to vector<64x256xi1>
    %312 = vector.broadcast %cst_176 : f32 to vector<64x256xf32>
    %313 = arith.select %311, %248, %312 : vector<64x256xi1>, vector<64x256xf32>
    %cst_177 = arith.constant dense<0x7F800000> : vector<256xf32>
    %314 = vector.multi_reduction <minimumf>, %313, %cst_177 [0] : vector<64x256xf32> to vector<256xf32>
    %315 = vector.shape_cast %314 : vector<256xf32> to vector<1x256xf32>
    %316 = arith.minimumf %203, %315 : vector<1x256xf32>
    %cst_178 = arith.constant 5.000000e-01 : f32
    %317 = vector.broadcast %cst_178 : f32 to vector<1x256xf32>
    %318 = arith.cmpf ogt, %307, %317 : vector<1x256xf32>
    %cst_179 = arith.constant 0x7F800000 : f32
    %319 = vector.shape_cast %318 : vector<1x256xi1> to vector<1x256xi1>
    %320 = vector.broadcast %319 : vector<1x256xi1> to vector<64x256xi1>
    %321 = vector.broadcast %cst_179 : f32 to vector<64x256xf32>
    %322 = arith.select %320, %248, %321 : vector<64x256xi1>, vector<64x256xf32>
    %cst_180 = arith.constant dense<0x7F800000> : vector<64xf32>
    %323 = vector.multi_reduction <minimumf>, %322, %cst_180 [1] : vector<64x256xf32> to vector<64xf32>
    %324 = vector.shape_cast %323 : vector<64xf32> to vector<64x1xf32>
    %cst_181 = arith.constant 5.000000e-01 : f32
    %325 = vector.broadcast %cst_181 : f32 to vector<64x1xf32>
    %326 = arith.cmpf ogt, %306, %325 : vector<64x1xf32>
    %327 = math.sqrt %324 : vector<64x1xf32>
    %cst_182 = arith.constant 0x7F800000 : f32
    %328 = vector.broadcast %cst_182 : f32 to vector<64x1xf32>
    %329 = arith.select %326, %327, %328 : vector<64x1xi1>, vector<64x1xf32>
    %c0_183 = arith.constant 0 : index
    %c2_184 = arith.constant 2 : index
    %c128_185 = arith.constant 128 : index
    %c0_186 = arith.constant 0 : index
    %330 = vector.load %arg6[%c0_183, %c2_184, %c128_185, %c0_186] : memref<1x4x256x1xf32, #tpu.memory_space<vmem>>, vector<1x1x64x1xf32>
    %331 = vector.shape_cast %330 : vector<1x1x64x1xf32> to vector<64x1xf32>
    %332 = vector.shape_cast %329 : vector<64x1xf32> to vector<1x1x64x1xf32>
    tpu.vector_store %arg6[%c0_183, %c2_184, %c128_185, %c0_186], %332 {strides = array<i32>} : memref<1x4x256x1xf32, #tpu.memory_space<vmem>>, vector<1x1x64x1xf32>,
    %c0_187 = arith.constant 0 : index
    %c3_188 = arith.constant 3 : index
    %c128_189 = arith.constant 128 : index
    %c0_190 = arith.constant 0 : index
    %333 = vector.load %arg2[%c0_187, %c3_188, %c128_189, %c0_190] : memref<1x4x256x1xf32, #tpu.memory_space<vmem>>, vector<1x1x64x1xf32>
    %334 = vector.shape_cast %333 : vector<1x1x64x1xf32> to vector<64x1xf32>
    %335 = vector.extract_strided_slice %14 {offsets = [3, 0], sizes = [1, 256], strides = [1, 1]} : vector<4x256xf32> to vector<1x256xf32>
    %cst_191 = arith.constant 5.000000e-01 : f32
    %336 = vector.broadcast %cst_191 : f32 to vector<64x1xf32>
    %337 = arith.cmpf ogt, %334, %336 : vector<64x1xf32>
    %cst_192 = arith.constant 0x7F800000 : f32
    %338 = vector.shape_cast %337 : vector<64x1xi1> to vector<64x1xi1>
    %339 = vector.broadcast %338 : vector<64x1xi1> to vector<64x256xi1>
    %340 = vector.broadcast %cst_192 : f32 to vector<64x256xf32>
    %341 = arith.select %339, %248, %340 : vector<64x256xi1>, vector<64x256xf32>
    %cst_193 = arith.constant dense<0x7F800000> : vector<256xf32>
    %342 = vector.multi_reduction <minimumf>, %341, %cst_193 [0] : vector<64x256xf32> to vector<256xf32>
    %343 = vector.shape_cast %342 : vector<256xf32> to vector<1x256xf32>
    %344 = arith.minimumf %231, %343 : vector<1x256xf32>
    %cst_194 = arith.constant 5.000000e-01 : f32
    %345 = vector.broadcast %cst_194 : f32 to vector<1x256xf32>
    %346 = arith.cmpf ogt, %335, %345 : vector<1x256xf32>
    %cst_195 = arith.constant 0x7F800000 : f32
    %347 = vector.shape_cast %346 : vector<1x256xi1> to vector<1x256xi1>
    %348 = vector.broadcast %347 : vector<1x256xi1> to vector<64x256xi1>
    %349 = vector.broadcast %cst_195 : f32 to vector<64x256xf32>
    %350 = arith.select %348, %248, %349 : vector<64x256xi1>, vector<64x256xf32>
    %cst_196 = arith.constant dense<0x7F800000> : vector<64xf32>
    %351 = vector.multi_reduction <minimumf>, %350, %cst_196 [1] : vector<64x256xf32> to vector<64xf32>
    %352 = vector.shape_cast %351 : vector<64xf32> to vector<64x1xf32>
    %cst_197 = arith.constant 5.000000e-01 : f32
    %353 = vector.broadcast %cst_197 : f32 to vector<64x1xf32>
    %354 = arith.cmpf ogt, %334, %353 : vector<64x1xf32>
    %355 = math.sqrt %352 : vector<64x1xf32>
    %cst_198 = arith.constant 0x7F800000 : f32
    %356 = vector.broadcast %cst_198 : f32 to vector<64x1xf32>
    %357 = arith.select %354, %355, %356 : vector<64x1xi1>, vector<64x1xf32>
    %c0_199 = arith.constant 0 : index
    %c3_200 = arith.constant 3 : index
    %c128_201 = arith.constant 128 : index
    %c0_202 = arith.constant 0 : index
    %358 = vector.load %arg6[%c0_199, %c3_200, %c128_201, %c0_202] : memref<1x4x256x1xf32, #tpu.memory_space<vmem>>, vector<1x1x64x1xf32>
    %359 = vector.shape_cast %358 : vector<1x1x64x1xf32> to vector<64x1xf32>
    %360 = vector.shape_cast %357 : vector<64x1xf32> to vector<1x1x64x1xf32>
    tpu.vector_store %arg6[%c0_199, %c3_200, %c128_201, %c0_202], %360 {strides = array<i32>} : memref<1x4x256x1xf32, #tpu.memory_space<vmem>>, vector<1x1x64x1xf32>,
    %c192 = arith.constant 192 : index
    %c0_203 = arith.constant 0 : index
    %361 = vector.load %arg3[%c192, %c0_203] : memref<256x256xf32, #tpu.memory_space<vmem>>, vector<64x256xf32>
    %c0_204 = arith.constant 0 : index
    %c0_205 = arith.constant 0 : index
    %c192_206 = arith.constant 192 : index
    %c0_207 = arith.constant 0 : index
    %362 = vector.load %arg2[%c0_204, %c0_205, %c192_206, %c0_207] : memref<1x4x256x1xf32, #tpu.memory_space<vmem>>, vector<1x1x64x1xf32>
    %363 = vector.shape_cast %362 : vector<1x1x64x1xf32> to vector<64x1xf32>
    %364 = vector.extract_strided_slice %14 {offsets = [0, 0], sizes = [1, 256], strides = [1, 1]} : vector<4x256xf32> to vector<1x256xf32>
    %cst_208 = arith.constant 5.000000e-01 : f32
    %365 = vector.broadcast %cst_208 : f32 to vector<64x1xf32>
    %366 = arith.cmpf ogt, %363, %365 : vector<64x1xf32>
    %cst_209 = arith.constant 0x7F800000 : f32
    %367 = vector.shape_cast %366 : vector<64x1xi1> to vector<64x1xi1>
    %368 = vector.broadcast %367 : vector<64x1xi1> to vector<64x256xi1>
    %369 = vector.broadcast %cst_209 : f32 to vector<64x256xf32>
    %370 = arith.select %368, %361, %369 : vector<64x256xi1>, vector<64x256xf32>
    %cst_210 = arith.constant dense<0x7F800000> : vector<256xf32>
    %371 = vector.multi_reduction <minimumf>, %370, %cst_210 [0] : vector<64x256xf32> to vector<256xf32>
    %372 = vector.shape_cast %371 : vector<256xf32> to vector<1x256xf32>
    %373 = arith.minimumf %260, %372 : vector<1x256xf32>
    %cst_211 = arith.constant 5.000000e-01 : f32
    %374 = vector.broadcast %cst_211 : f32 to vector<1x256xf32>
    %375 = arith.cmpf ogt, %364, %374 : vector<1x256xf32>
    %cst_212 = arith.constant 0x7F800000 : f32
    %376 = vector.shape_cast %375 : vector<1x256xi1> to vector<1x256xi1>
    %377 = vector.broadcast %376 : vector<1x256xi1> to vector<64x256xi1>
    %378 = vector.broadcast %cst_212 : f32 to vector<64x256xf32>
    %379 = arith.select %377, %361, %378 : vector<64x256xi1>, vector<64x256xf32>
    %cst_213 = arith.constant dense<0x7F800000> : vector<64xf32>
    %380 = vector.multi_reduction <minimumf>, %379, %cst_213 [1] : vector<64x256xf32> to vector<64xf32>
    %381 = vector.shape_cast %380 : vector<64xf32> to vector<64x1xf32>
    %cst_214 = arith.constant 5.000000e-01 : f32
    %382 = vector.broadcast %cst_214 : f32 to vector<64x1xf32>
    %383 = arith.cmpf ogt, %363, %382 : vector<64x1xf32>
    %384 = math.sqrt %381 : vector<64x1xf32>
    %cst_215 = arith.constant 0x7F800000 : f32
    %385 = vector.broadcast %cst_215 : f32 to vector<64x1xf32>
    %386 = arith.select %383, %384, %385 : vector<64x1xi1>, vector<64x1xf32>
    %c0_216 = arith.constant 0 : index
    %c0_217 = arith.constant 0 : index
    %c192_218 = arith.constant 192 : index
    %c0_219 = arith.constant 0 : index
    %387 = vector.load %arg6[%c0_216, %c0_217, %c192_218, %c0_219] : memref<1x4x256x1xf32, #tpu.memory_space<vmem>>, vector<1x1x64x1xf32>
    %388 = vector.shape_cast %387 : vector<1x1x64x1xf32> to vector<64x1xf32>
    %389 = vector.shape_cast %386 : vector<64x1xf32> to vector<1x1x64x1xf32>
    tpu.vector_store %arg6[%c0_216, %c0_217, %c192_218, %c0_219], %389 {strides = array<i32>} : memref<1x4x256x1xf32, #tpu.memory_space<vmem>>, vector<1x1x64x1xf32>,
    %c0_220 = arith.constant 0 : index
    %c1_221 = arith.constant 1 : index
    %c192_222 = arith.constant 192 : index
    %c0_223 = arith.constant 0 : index
    %390 = vector.load %arg2[%c0_220, %c1_221, %c192_222, %c0_223] : memref<1x4x256x1xf32, #tpu.memory_space<vmem>>, vector<1x1x64x1xf32>
    %391 = vector.shape_cast %390 : vector<1x1x64x1xf32> to vector<64x1xf32>
    %392 = vector.extract_strided_slice %14 {offsets = [1, 0], sizes = [1, 256], strides = [1, 1]} : vector<4x256xf32> to vector<1x256xf32>
    %cst_224 = arith.constant 5.000000e-01 : f32
    %393 = vector.broadcast %cst_224 : f32 to vector<64x1xf32>
    %394 = arith.cmpf ogt, %391, %393 : vector<64x1xf32>
    %cst_225 = arith.constant 0x7F800000 : f32
    %395 = vector.shape_cast %394 : vector<64x1xi1> to vector<64x1xi1>
    %396 = vector.broadcast %395 : vector<64x1xi1> to vector<64x256xi1>
    %397 = vector.broadcast %cst_225 : f32 to vector<64x256xf32>
    %398 = arith.select %396, %361, %397 : vector<64x256xi1>, vector<64x256xf32>
    %cst_226 = arith.constant dense<0x7F800000> : vector<256xf32>
    %399 = vector.multi_reduction <minimumf>, %398, %cst_226 [0] : vector<64x256xf32> to vector<256xf32>
    %400 = vector.shape_cast %399 : vector<256xf32> to vector<1x256xf32>
    %401 = arith.minimumf %288, %400 : vector<1x256xf32>
    %cst_227 = arith.constant 5.000000e-01 : f32
    %402 = vector.broadcast %cst_227 : f32 to vector<1x256xf32>
    %403 = arith.cmpf ogt, %392, %402 : vector<1x256xf32>
    %cst_228 = arith.constant 0x7F800000 : f32
    %404 = vector.shape_cast %403 : vector<1x256xi1> to vector<1x256xi1>
    %405 = vector.broadcast %404 : vector<1x256xi1> to vector<64x256xi1>
    %406 = vector.broadcast %cst_228 : f32 to vector<64x256xf32>
    %407 = arith.select %405, %361, %406 : vector<64x256xi1>, vector<64x256xf32>
    %cst_229 = arith.constant dense<0x7F800000> : vector<64xf32>
    %408 = vector.multi_reduction <minimumf>, %407, %cst_229 [1] : vector<64x256xf32> to vector<64xf32>
    %409 = vector.shape_cast %408 : vector<64xf32> to vector<64x1xf32>
    %cst_230 = arith.constant 5.000000e-01 : f32
    %410 = vector.broadcast %cst_230 : f32 to vector<64x1xf32>
    %411 = arith.cmpf ogt, %391, %410 : vector<64x1xf32>
    %412 = math.sqrt %409 : vector<64x1xf32>
    %cst_231 = arith.constant 0x7F800000 : f32
    %413 = vector.broadcast %cst_231 : f32 to vector<64x1xf32>
    %414 = arith.select %411, %412, %413 : vector<64x1xi1>, vector<64x1xf32>
    %c0_232 = arith.constant 0 : index
    %c1_233 = arith.constant 1 : index
    %c192_234 = arith.constant 192 : index
    %c0_235 = arith.constant 0 : index
    %415 = vector.load %arg6[%c0_232, %c1_233, %c192_234, %c0_235] : memref<1x4x256x1xf32, #tpu.memory_space<vmem>>, vector<1x1x64x1xf32>
    %416 = vector.shape_cast %415 : vector<1x1x64x1xf32> to vector<64x1xf32>
    %417 = vector.shape_cast %414 : vector<64x1xf32> to vector<1x1x64x1xf32>
    tpu.vector_store %arg6[%c0_232, %c1_233, %c192_234, %c0_235], %417 {strides = array<i32>} : memref<1x4x256x1xf32, #tpu.memory_space<vmem>>, vector<1x1x64x1xf32>,
    %c0_236 = arith.constant 0 : index
    %c2_237 = arith.constant 2 : index
    %c192_238 = arith.constant 192 : index
    %c0_239 = arith.constant 0 : index
    %418 = vector.load %arg2[%c0_236, %c2_237, %c192_238, %c0_239] : memref<1x4x256x1xf32, #tpu.memory_space<vmem>>, vector<1x1x64x1xf32>
    %419 = vector.shape_cast %418 : vector<1x1x64x1xf32> to vector<64x1xf32>
    %420 = vector.extract_strided_slice %14 {offsets = [2, 0], sizes = [1, 256], strides = [1, 1]} : vector<4x256xf32> to vector<1x256xf32>
    %cst_240 = arith.constant 5.000000e-01 : f32
    %421 = vector.broadcast %cst_240 : f32 to vector<64x1xf32>
    %422 = arith.cmpf ogt, %419, %421 : vector<64x1xf32>
    %cst_241 = arith.constant 0x7F800000 : f32
    %423 = vector.shape_cast %422 : vector<64x1xi1> to vector<64x1xi1>
    %424 = vector.broadcast %423 : vector<64x1xi1> to vector<64x256xi1>
    %425 = vector.broadcast %cst_241 : f32 to vector<64x256xf32>
    %426 = arith.select %424, %361, %425 : vector<64x256xi1>, vector<64x256xf32>
    %cst_242 = arith.constant dense<0x7F800000> : vector<256xf32>
    %427 = vector.multi_reduction <minimumf>, %426, %cst_242 [0] : vector<64x256xf32> to vector<256xf32>
    %428 = vector.shape_cast %427 : vector<256xf32> to vector<1x256xf32>
    %429 = arith.minimumf %316, %428 : vector<1x256xf32>
    %cst_243 = arith.constant 5.000000e-01 : f32
    %430 = vector.broadcast %cst_243 : f32 to vector<1x256xf32>
    %431 = arith.cmpf ogt, %420, %430 : vector<1x256xf32>
    %cst_244 = arith.constant 0x7F800000 : f32
    %432 = vector.shape_cast %431 : vector<1x256xi1> to vector<1x256xi1>
    %433 = vector.broadcast %432 : vector<1x256xi1> to vector<64x256xi1>
    %434 = vector.broadcast %cst_244 : f32 to vector<64x256xf32>
    %435 = arith.select %433, %361, %434 : vector<64x256xi1>, vector<64x256xf32>
    %cst_245 = arith.constant dense<0x7F800000> : vector<64xf32>
    %436 = vector.multi_reduction <minimumf>, %435, %cst_245 [1] : vector<64x256xf32> to vector<64xf32>
    %437 = vector.shape_cast %436 : vector<64xf32> to vector<64x1xf32>
    %cst_246 = arith.constant 5.000000e-01 : f32
    %438 = vector.broadcast %cst_246 : f32 to vector<64x1xf32>
    %439 = arith.cmpf ogt, %419, %438 : vector<64x1xf32>
    %440 = math.sqrt %437 : vector<64x1xf32>
    %cst_247 = arith.constant 0x7F800000 : f32
    %441 = vector.broadcast %cst_247 : f32 to vector<64x1xf32>
    %442 = arith.select %439, %440, %441 : vector<64x1xi1>, vector<64x1xf32>
    %c0_248 = arith.constant 0 : index
    %c2_249 = arith.constant 2 : index
    %c192_250 = arith.constant 192 : index
    %c0_251 = arith.constant 0 : index
    %443 = vector.load %arg6[%c0_248, %c2_249, %c192_250, %c0_251] : memref<1x4x256x1xf32, #tpu.memory_space<vmem>>, vector<1x1x64x1xf32>
    %444 = vector.shape_cast %443 : vector<1x1x64x1xf32> to vector<64x1xf32>
    %445 = vector.shape_cast %442 : vector<64x1xf32> to vector<1x1x64x1xf32>
    tpu.vector_store %arg6[%c0_248, %c2_249, %c192_250, %c0_251], %445 {strides = array<i32>} : memref<1x4x256x1xf32, #tpu.memory_space<vmem>>, vector<1x1x64x1xf32>,
    %c0_252 = arith.constant 0 : index
    %c3_253 = arith.constant 3 : index
    %c192_254 = arith.constant 192 : index
    %c0_255 = arith.constant 0 : index
    %446 = vector.load %arg2[%c0_252, %c3_253, %c192_254, %c0_255] : memref<1x4x256x1xf32, #tpu.memory_space<vmem>>, vector<1x1x64x1xf32>
    %447 = vector.shape_cast %446 : vector<1x1x64x1xf32> to vector<64x1xf32>
    %448 = vector.extract_strided_slice %14 {offsets = [3, 0], sizes = [1, 256], strides = [1, 1]} : vector<4x256xf32> to vector<1x256xf32>
    %cst_256 = arith.constant 5.000000e-01 : f32
    %449 = vector.broadcast %cst_256 : f32 to vector<64x1xf32>
    %450 = arith.cmpf ogt, %447, %449 : vector<64x1xf32>
    %cst_257 = arith.constant 0x7F800000 : f32
    %451 = vector.shape_cast %450 : vector<64x1xi1> to vector<64x1xi1>
    %452 = vector.broadcast %451 : vector<64x1xi1> to vector<64x256xi1>
    %453 = vector.broadcast %cst_257 : f32 to vector<64x256xf32>
    %454 = arith.select %452, %361, %453 : vector<64x256xi1>, vector<64x256xf32>
    %cst_258 = arith.constant dense<0x7F800000> : vector<256xf32>
    %455 = vector.multi_reduction <minimumf>, %454, %cst_258 [0] : vector<64x256xf32> to vector<256xf32>
    %456 = vector.shape_cast %455 : vector<256xf32> to vector<1x256xf32>
    %457 = arith.minimumf %344, %456 : vector<1x256xf32>
    %cst_259 = arith.constant 5.000000e-01 : f32
    %458 = vector.broadcast %cst_259 : f32 to vector<1x256xf32>
    %459 = arith.cmpf ogt, %448, %458 : vector<1x256xf32>
    %cst_260 = arith.constant 0x7F800000 : f32
    %460 = vector.shape_cast %459 : vector<1x256xi1> to vector<1x256xi1>
    %461 = vector.broadcast %460 : vector<1x256xi1> to vector<64x256xi1>
    %462 = vector.broadcast %cst_260 : f32 to vector<64x256xf32>
    %463 = arith.select %461, %361, %462 : vector<64x256xi1>, vector<64x256xf32>
    %cst_261 = arith.constant dense<0x7F800000> : vector<64xf32>
    %464 = vector.multi_reduction <minimumf>, %463, %cst_261 [1] : vector<64x256xf32> to vector<64xf32>
    %465 = vector.shape_cast %464 : vector<64xf32> to vector<64x1xf32>
    %cst_262 = arith.constant 5.000000e-01 : f32
    %466 = vector.broadcast %cst_262 : f32 to vector<64x1xf32>
    %467 = arith.cmpf ogt, %447, %466 : vector<64x1xf32>
    %468 = math.sqrt %465 : vector<64x1xf32>
    %cst_263 = arith.constant 0x7F800000 : f32
    %469 = vector.broadcast %cst_263 : f32 to vector<64x1xf32>
    %470 = arith.select %467, %468, %469 : vector<64x1xi1>, vector<64x1xf32>
    %c0_264 = arith.constant 0 : index
    %c3_265 = arith.constant 3 : index
    %c192_266 = arith.constant 192 : index
    %c0_267 = arith.constant 0 : index
    %471 = vector.load %arg6[%c0_264, %c3_265, %c192_266, %c0_267] : memref<1x4x256x1xf32, #tpu.memory_space<vmem>>, vector<1x1x64x1xf32>
    %472 = vector.shape_cast %471 : vector<1x1x64x1xf32> to vector<64x1xf32>
    %473 = vector.shape_cast %470 : vector<64x1xf32> to vector<1x1x64x1xf32>
    tpu.vector_store %arg6[%c0_264, %c3_265, %c192_266, %c0_267], %473 {strides = array<i32>} : memref<1x4x256x1xf32, #tpu.memory_space<vmem>>, vector<1x1x64x1xf32>,
    %474 = vector.extract_strided_slice %14 {offsets = [0, 0], sizes = [1, 256], strides = [1, 1]} : vector<4x256xf32> to vector<1x256xf32>
    %cst_268 = arith.constant 5.000000e-01 : f32
    %475 = vector.broadcast %cst_268 : f32 to vector<1x256xf32>
    %476 = arith.cmpf ogt, %474, %475 : vector<1x256xf32>
    %477 = math.sqrt %373 : vector<1x256xf32>
    %cst_269 = arith.constant 0x7F800000 : f32
    %478 = vector.broadcast %cst_269 : f32 to vector<1x256xf32>
    %479 = arith.select %476, %477, %478 : vector<1x256xi1>, vector<1x256xf32>
    %c0_270 = arith.constant 0 : index
    %c0_271 = arith.constant 0 : index
    %c0_272 = arith.constant 0 : index
    %480 = vector.load %arg5[%c0_270, %c0_271, %c0_272] : memref<1x4x256xf32, #tpu.memory_space<vmem>>, vector<1x1x256xf32>
    %481 = vector.shape_cast %480 : vector<1x1x256xf32> to vector<1x256xf32>
    %482 = vector.shape_cast %479 : vector<1x256xf32> to vector<1x1x256xf32>
    tpu.vector_store %arg5[%c0_270, %c0_271, %c0_272], %482 {strides = array<i32>} : memref<1x4x256xf32, #tpu.memory_space<vmem>>, vector<1x1x256xf32>,
    %483 = vector.extract_strided_slice %14 {offsets = [1, 0], sizes = [1, 256], strides = [1, 1]} : vector<4x256xf32> to vector<1x256xf32>
    %cst_273 = arith.constant 5.000000e-01 : f32
    %484 = vector.broadcast %cst_273 : f32 to vector<1x256xf32>
    %485 = arith.cmpf ogt, %483, %484 : vector<1x256xf32>
    %486 = math.sqrt %401 : vector<1x256xf32>
    %cst_274 = arith.constant 0x7F800000 : f32
    %487 = vector.broadcast %cst_274 : f32 to vector<1x256xf32>
    %488 = arith.select %485, %486, %487 : vector<1x256xi1>, vector<1x256xf32>
    %c0_275 = arith.constant 0 : index
    %c1_276 = arith.constant 1 : index
    %c0_277 = arith.constant 0 : index
    %489 = vector.load %arg5[%c0_275, %c1_276, %c0_277] : memref<1x4x256xf32, #tpu.memory_space<vmem>>, vector<1x1x256xf32>
    %490 = vector.shape_cast %489 : vector<1x1x256xf32> to vector<1x256xf32>
    %491 = vector.shape_cast %488 : vector<1x256xf32> to vector<1x1x256xf32>
    tpu.vector_store %arg5[%c0_275, %c1_276, %c0_277], %491 {strides = array<i32>} : memref<1x4x256xf32, #tpu.memory_space<vmem>>, vector<1x1x256xf32>,
    %492 = vector.extract_strided_slice %14 {offsets = [2, 0], sizes = [1, 256], strides = [1, 1]} : vector<4x256xf32> to vector<1x256xf32>
    %cst_278 = arith.constant 5.000000e-01 : f32
    %493 = vector.broadcast %cst_278 : f32 to vector<1x256xf32>
    %494 = arith.cmpf ogt, %492, %493 : vector<1x256xf32>
    %495 = math.sqrt %429 : vector<1x256xf32>
    %cst_279 = arith.constant 0x7F800000 : f32
    %496 = vector.broadcast %cst_279 : f32 to vector<1x256xf32>
    %497 = arith.select %494, %495, %496 : vector<1x256xi1>, vector<1x256xf32>
    %c0_280 = arith.constant 0 : index
    %c2_281 = arith.constant 2 : index
    %c0_282 = arith.constant 0 : index
    %498 = vector.load %arg5[%c0_280, %c2_281, %c0_282] : memref<1x4x256xf32, #tpu.memory_space<vmem>>, vector<1x1x256xf32>
    %499 = vector.shape_cast %498 : vector<1x1x256xf32> to vector<1x256xf32>
    %500 = vector.shape_cast %497 : vector<1x256xf32> to vector<1x1x256xf32>
    tpu.vector_store %arg5[%c0_280, %c2_281, %c0_282], %500 {strides = array<i32>} : memref<1x4x256xf32, #tpu.memory_space<vmem>>, vector<1x1x256xf32>,
    %501 = vector.extract_strided_slice %14 {offsets = [3, 0], sizes = [1, 256], strides = [1, 1]} : vector<4x256xf32> to vector<1x256xf32>
    %cst_283 = arith.constant 5.000000e-01 : f32
    %502 = vector.broadcast %cst_283 : f32 to vector<1x256xf32>
    %503 = arith.cmpf ogt, %501, %502 : vector<1x256xf32>
    %504 = math.sqrt %457 : vector<1x256xf32>
    %cst_284 = arith.constant 0x7F800000 : f32
    %505 = vector.broadcast %cst_284 : f32 to vector<1x256xf32>
    %506 = arith.select %503, %504, %505 : vector<1x256xi1>, vector<1x256xf32>
    %c0_285 = arith.constant 0 : index
    %c3_286 = arith.constant 3 : index
    %c0_287 = arith.constant 0 : index
    %507 = vector.load %arg5[%c0_285, %c3_286, %c0_287] : memref<1x4x256xf32, #tpu.memory_space<vmem>>, vector<1x1x256xf32>
    %508 = vector.shape_cast %507 : vector<1x1x256xf32> to vector<1x256xf32>
    %509 = vector.shape_cast %506 : vector<1x256xf32> to vector<1x1x256xf32>
    tpu.vector_store %arg5[%c0_285, %c3_286, %c0_287], %509 {strides = array<i32>} : memref<1x4x256xf32, #tpu.memory_space<vmem>>, vector<1x1x256xf32>,
    return
  }
  func.func @transform_0(%arg0: i32) -> (i32, i32, i32) {
    %c0_i32 = arith.constant 0 : i32
    %c0_i32_0 = arith.constant 0 : i32
    %c0_i32_1 = arith.constant 0 : i32
    return %arg0, %c0_i32, %c0_i32_0 : i32, i32, i32
  }
  func.func @transform_1(%arg0: i32) -> (i32, i32, i32, i32) {
    %c0_i32 = arith.constant 0 : i32
    %c0_i32_0 = arith.constant 0 : i32
    %c0_i32_1 = arith.constant 0 : i32
    %c0_i32_2 = arith.constant 0 : i32
    return %arg0, %c0_i32, %c0_i32_0, %c0_i32_1 : i32, i32, i32, i32
  }
  func.func @transform_2(%arg0: i32) -> (i32, i32) {
    %c0_i32 = arith.constant 0 : i32
    %c0_i32_0 = arith.constant 0 : i32
    %c0_i32_1 = arith.constant 0 : i32
    return %c0_i32, %c0_i32_0 : i32, i32
  }
  func.func @transform_3(%arg0: i32) -> (i32, i32, i32) {
    %c0_i32 = arith.constant 0 : i32
    %c0_i32_0 = arith.constant 0 : i32
    %c0_i32_1 = arith.constant 0 : i32
    return %arg0, %c0_i32, %c0_i32_0 : i32, i32, i32
  }
  func.func @transform_4(%arg0: i32) -> (i32, i32, i32) {
    %c0_i32 = arith.constant 0 : i32
    %c0_i32_0 = arith.constant 0 : i32
    %c0_i32_1 = arith.constant 0 : i32
    return %arg0, %c0_i32, %c0_i32_0 : i32, i32, i32
  }
  func.func @transform_5(%arg0: i32) -> (i32, i32, i32, i32) {
    %c0_i32 = arith.constant 0 : i32
    %c0_i32_0 = arith.constant 0 : i32
    %c0_i32_1 = arith.constant 0 : i32
    %c0_i32_2 = arith.constant 0 : i32
    return %arg0, %c0_i32, %c0_i32_0, %c0_i32_1 : i32, i32, i32, i32
  }
}

</mosaic_0001>

<bundles_post_ra>
// kernel: truncated_hausdorff_distance.1
= control target key start
LH: loop header
LB: loop body
LE: loop exit
PB: predicated region body
PF: predicated region fallthrough
CT: control target
= control target key end

     0   :  { %s4733_s18 = smov 0   ;;  %s10954_s0 = inlined_call_operand.vmem [shape: f32[2,4,256], index: 0, kind: input, shape index: {}]   ;;  %s10955_s1 = inlined_call_operand.vmem [shape: f32[2,4,256,1], index: 1, kind: input, shape index: {}]   ;;  %s10956_s2 = inlined_call_operand.vmem [shape: f32[256,256], index: 2, kind: input, shape index: {}]   ;;  %s10957_s3 = inlined_call_operand.vmem [shape: f32[2,4,256], index: 3, kind: output, shape index: {0}]   ;;  %s10958_s4 = inlined_call_operand.vmem [shape: f32[2,4,256], index: 4, kind: output, shape index: {1}]   ;;  %s10959_s5 = inlined_call_operand.vmem [shape: f32[2,4,256,1], index: 5, kind: output, shape index: {2}]  }
   0x1 LB: > { %s4119_s19 = sadd.s32 4294967295, %s4697_s18   ;;  %p4123_p0 = scmp.ge.s32.totalorder %s4697_s18, 1  ;;  %s4697_s18 = sphi %s4733_s18, %s16_s18  }
   0x2   : > { %p202_p1 = scmp.lt.s32.totalorder %s4697_s18, 3 }
   0x4   : > { %p203_p2 = pnand %p4123_p0, %p202_p1 }
   0x6   : > { %206 = sbr.rel (%p203_p2) target bundleno = 822 (0x336), region = 32 }
   0xd   : > { %p245_p3 = scmp.lt.s32.totalorder %s4119_s19, 1  ;;  %v10961_v0 = vmov 0   ;;  %vm276_vm0 = vcmask 1043456   ;;  %v10960_v5 = vlaneseq  ;;  %v4700_v7 = vmov 839922192   ;;  %v4781_v46 = vld [vmem:[%s10956_s2 + $0x10] sm:$0xff] }
   0xe   : > { %4350 = vset.pattern.permute.xlu1 %v10961_v0  ;;  %4351 = vset.pattern.permute.xlu0 %v10961_v0  ;;  %v297_v8 = vunpack.c.l.s4 %v4700_v7  ;;  %v4701_v42 = vmov 0.0   ;;  %v4792_v49 = vld [vmem:[%s10956_s2] sm:$0xff]  ;;  %v4797_v50 = vld [vmem:[%s10956_s2 + $0x18] sm:$0xff]  ;;  %v4821_v55 = vld [vmem:[%s10956_s2 + $0x8] sm:$0xff] }
   0xf   : > { %s11987_s19 = smov (!%p245_p3, %s4119_s19), 1  ;;  %v4755_v13 = vshrl.u32 %v10960_v5, 7  ;;  %v4807_v52 = vld [vmem:[%s10956_s2 + $0x40] sm:$0xff]  ;;  %v4826_v56 = vld [vmem:[%s10956_s2 + $0x48] sm:$0xff] }
  0x10   : > { %s4746_s20 = sshll.u32 %s11987_s19, 3  ;;  %v298_v14 = vunpack.c.0.s8 %v297_v8  ;;  %v4812_v53 = vld [vmem:[%s10956_s2 + $0x20] sm:$0xff]  ;;  %v4831_v57 = vld [vmem:[%s10956_s2 + $0x28] sm:$0xff]  ;;  %s4334_s16 = sshll.u32 %s11987_s19, 10 }
  0x11   : > { %s249_s23 = scalar_lea.vmem %s10954_s0, %s4746_s20  ;;  %11218 = vst [vmem:[#allocation2_spill] sm:$0xff] %v4755_v13  ;;  %v456_v40 = vsub.s32 0, %v4755_v13  ;;  %s259_s26 = scalar_lea.vmem %s10957_s3, %s4746_s20  ;;  %v678_v58 = vsub.s32 1, %v4755_v13  ;;  %v4867_v8 = vld [vmem:[%s10956_s2 + $0x68] sm:$0xff] }
  0x12   : > { %v270_v1 = vld [vmem:[%s249_s23] sm:$0xff]  ;;  %v301_v19 = vsub.s32 %v298_v14, %v4755_v13  ;;  %s5747_s28 = scalar_lea.vmem %s10955_s1, %s4334_s16  ;;  %s6474_s6 = scalar_lea.vmem %s10959_s5, %s4334_s16 }
  0x13   : > { %v274_v2 = vcombine.high %v270_v1, %v270_v1  ;;  %v277_v3 = vsel %vm276_vm0, %v270_v1, -inf  ;;  %s10805_s10 = scalar_lea.vmem %s10958_s4, %s4746_s20 }
  0x14   : > { %v278_v4 = vrot.slane %v277_v3, 4  ;;  %v302_v23 = vrot.slane %v4755_v13, %v301_v19 }
  0x15   : > { %v284_v6 = vsel %vm276_vm0, %v274_v2, -inf }
  0x16   : > { %v279_v9 = vmax.f32 %v277_v3, %v278_v4  ;;  %v285_v10 = vrot.slane %v284_v6, 4  ;;  %v4862_v4 = vld [vmem:[%s10956_s2 + $0x60] sm:$0xff] }
  0x18   : > { %v280_v11 = vrot.slane %v279_v9, 2  ;;  %v286_v12 = vmax.f32 %v284_v6, %v285_v10  ;;  %v4877_v10 = vld [vmem:[%s10956_s2 + $0x38] sm:$0xff] }
  0x1a   : > { %v281_v15 = vmax.f32 %v279_v9, %v280_v11  ;;  %v287_v16 = vrot.slane %v286_v12, 2  ;;  %v4872_v9 = vld [vmem:[%s10956_s2 + $0x30] sm:$0xff] }
  0x1c   : > { %v282_v17 = vrot.slane %v281_v15, 1  ;;  %v288_v18 = vmax.f32 %v286_v12, %v287_v16 }
  0x1e   : > { %v283_v20 = vmax.f32 %v281_v15, %v282_v17  ;;  %v289_v21 = vrot.slane %v288_v18, 1 }
  0x20   : > { %v290_v22 = vmax.f32 %v288_v18, %v289_v21  ;;  %v4907_v21 = vld [vmem:[%s10956_s2 + $0x58] sm:$0xff] }
  0x22   : > { %v293_v24 = vcombine.low %v283_v20, %v290_v22  ;;  %v4902_v20 = vld [vmem:[%s10956_s2 + $0x50] sm:$0xff] }
  0x24   : > { %vm295_vm1 = vcmp.ge.f32.partialorder %v270_v1, %v293_v24 }
  0x25   : > { %v303_v25 = vsel %vm295_vm1, %v302_v23, 4 }
  0x26   : > { %v304_v26 = vcombine.high %v303_v25, %v303_v25  ;;  %v305_v27 = vsel %vm276_vm0, %v303_v25, 2147483647 }
  0x27   : > { %v306_v28 = vrot.slane %v305_v27, 4 }
  0x28   : > { %v315_v29 = vsel %vm276_vm0, %v304_v26, 2147483647 }
  0x29   : > { %vm307_vm2 = vcmp.lt.s32.totalorder %v305_v27, %v306_v28  ;;  %v316_v30 = vrot.slane %v315_v29, 4 }
  0x2a   : > { %v308_v31 = vsel %vm307_vm2, %v305_v27, %v306_v28  ;;  %v4924_v28 = vld [vmem:[%s10956_s2 + $0x70] sm:$0xff] }
  0x2b   : > { %v309_v32 = vrot.slane %v308_v31, 2  ;;  %vm317_vm3 = vcmp.lt.s32.totalorder %v315_v29, %v316_v30 }
  0x2c   : > { %v318_v33 = vsel %vm317_vm3, %v315_v29, %v316_v30  ;;  %v4929_v29 = vld [vmem:[%s10956_s2 + $0x78] sm:$0xff]  ;;  %v900_v30 = vsub.s32 2, %v4755_v13 }
  0x2d   : > { %vm310_vm4 = vcmp.lt.s32.totalorder %v308_v31, %v309_v32  ;;  %v319_v34 = vrot.slane %v318_v33, 2 }
  0x2e   : > { %v311_v35 = vsel %vm310_vm4, %v308_v31, %v309_v32 }
  0x2f   : > { %v312_v36 = vrot.slane %v311_v35, 1  ;;  %vm320_vm5 = vcmp.lt.s32.totalorder %v318_v33, %v319_v34 }
  0x30   : > { %v321_v37 = vsel %vm320_vm5, %v318_v33, %v319_v34 }
  0x31   : > { %vm313_vm6 = vcmp.lt.s32.totalorder %v311_v35, %v312_v36  ;;  %v322_v38 = vrot.slane %v321_v37, 1 }
  0x32   : > { %v314_v39 = vsel %vm313_vm6, %v311_v35, %v312_v36 }
  0x33   : > { %vm323_vm7 = vcmp.lt.s32.totalorder %v321_v37, %v322_v38  ;;  %vm325_vm8 = vcmp.eq.s32.totalorder %v4755_v13, %v314_v39 }
  0x34   : > { %v324_v41 = vsel %vm323_vm7, %v321_v37, %v322_v38  ;;  %v4763_v43 = vsel %vm325_vm8, 1.0, %v4701_v42 }
  0x35   : > { %11219 = vst [vmem:[#allocation3_spill] sm:$0xff] %v4763_v43  ;;  %vm326_vm9 = vcmp.eq.s32.totalorder %v4755_v13, %v324_v41  ;;  %vm10997_vm10 = vcmp.gt.f32.partialorder %v4763_v43, 0.5 }
  0x36   : > { %v4771_v44 = vsel %vm326_vm9, 1.0, %v4701_v42  ;;  %v4776_v45 = vsel %vm10997_vm10, 1, %v10961_v0 }
  0x37   : > { %11220 = vst [vmem:[#allocation4_spill] sm:$0xff] %v4771_v44  ;;  %vm10994_vm11 = vcmp.gt.f32.partialorder %v4771_v44, 0.5  ;;  %v4785_v47 = vrot.slane %v4776_v45, %v456_v40  ;;  %v333_v48 = vcombine.low %v4763_v43, %v4771_v44  ;;  %v4880_v11 = vrot.slane %v4776_v45, %v678_v58 }
  0x38   : > { %v4802_v51 = vsel %vm10994_vm11, 1, %v10961_v0  ;;  %v4945_v37 = vrot.slane %v4776_v45, %v900_v30  ;;  %v2973_v0 = vld [vmem:[%s10956_s2 + $0x190] sm:$0xff] }
  0x39   : > { %v4815_v54 = vrot.slane %v4802_v51, %v456_v40  ;;  %vm462_vm12 = vcmp.eq.s32.totalorder %v4785_v47, 1  ;;  %335 = vst [vmem:[%s259_s26] sm:$0xff] %v333_v48  ;;  %v4883_v12 = vrot.slane %v4802_v51, %v678_v58  ;;  %vm684_vm14 = vcmp.eq.s32.totalorder %v4880_v11, 1 }
  0x3a   : > { %v466_v59 = vsel %vm462_vm12, %v4781_v46, inf  ;;  %v464_v60 = vsel %vm462_vm12, %v4792_v49, inf  ;;  %v472_v61 = vsel %vm462_vm12, %v4807_v52, inf  ;;  %v468_v62 = vsel %vm462_vm12, %v4812_v53, inf  ;;  %11221 = vst [vmem:[#allocation5_spill] sm:$0xff] %v4945_v37 }
  0x3b   : > { %vm463_vm13 = vcmp.eq.s32.totalorder %v4815_v54, 1  ;;  %v476_v16 = vsel %vm462_vm12, %v4862_v4, inf  ;;  %v470_v18 = vsel %vm462_vm12, %v4872_v9, inf  ;;  %vm685_vm15 = vcmp.eq.s32.totalorder %v4883_v12, 1  ;;  %v6321_v54 = vld [vmem:[%s5747_s28 + $0x140] sm:$0xff] }
  0x3c   : > { %v467_v63 = vsel %vm463_vm13, %v4797_v50, inf  ;;  %v465_v1 = vsel %vm463_vm13, %v4821_v55, inf  ;;  %v473_v2 = vsel %vm463_vm13, %v4826_v56, inf  ;;  %v469_v3 = vsel %vm463_vm13, %v4831_v57, inf  ;;  %11328 = vst [vmem:[#allocation89_spill] sm:$0xff] %v6321_v54 }
  0x3d   : > { %v483_v6 = vmin.f32 %v466_v59, %v467_v63  ;;  %v480_v7 = vmin.f32 %v464_v60, %v465_v1  ;;  %v492_v14 = vmin.f32 %v472_v61, %v473_v2  ;;  %v486_v15 = vmin.f32 %v468_v62, %v469_v3 }
  0x3e   : > { %v477_v17 = vsel %vm463_vm13, %v4867_v8, inf  ;;  %v471_v19 = vsel %vm463_vm13, %v4877_v10, inf  ;;  %v688_v24 = vsel %vm684_vm14, %v4781_v46, inf  ;;  %v689_v25 = vsel %vm685_vm15, %v4797_v50, inf }
  0x3f   : > { %484 = vmin.xlane.f32.xlu1 %v483_v6  ;;  %481 = vmin.xlane.f32.xlu0 %v480_v7  ;;  %v498_v22 = vmin.f32 %v476_v16, %v477_v17  ;;  %v489_v23 = vmin.f32 %v470_v18, %v471_v19  ;;  %v474_v26 = vsel %vm462_vm12, %v4902_v20, inf  ;;  %v475_v27 = vsel %vm463_vm13, %v4907_v21, inf }
  0x40   : > { %v705_v31 = vmin.f32 %v688_v24, %v689_v25  ;;  %v495_v32 = vmin.f32 %v474_v26, %v475_v27  ;;  %v694_v33 = vsel %vm684_vm14, %v4807_v52, inf  ;;  %v695_v34 = vsel %vm685_vm15, %v4826_v56, inf }
  0x41   : > { %v478_v35 = vsel %vm462_vm12, %v4924_v28, inf  ;;  %v479_v36 = vsel %vm463_vm13, %v4929_v29, inf  ;;  %v4948_v38 = vrot.slane %v4802_v51, %v900_v30  ;;  %v714_v39 = vmin.f32 %v694_v33, %v695_v34 }
  0x42   : > { %v501_v40 = vmin.f32 %v478_v35, %v479_v36  ;;  %v698_v41 = vsel %vm684_vm14, %v4862_v4, inf  ;;  %v699_v42 = vsel %vm685_vm15, %v4867_v8, inf  ;;  %v686_v48 = vsel %vm684_vm14, %v4792_v49, inf }
  0x43   : > { %493 = vmin.xlane.f32.xlu1 %v492_v14  ;;  %487 = vmin.xlane.f32.xlu0 %v486_v15  ;;  %11222 = vst [vmem:[#allocation6_spill] sm:$0xff] %v4948_v38  ;;  %v687_v58 = vsel %vm685_vm15, %v4821_v55, inf  ;;  %vm11013_vm0 = vcmp.eq.s32.totalorder %v4945_v37, 1  ;;  %vm11012_vm1 = vcmp.eq.s32.totalorder %v4948_v38, 1  ;;  %v720_v59 = vmin.f32 %v698_v41, %v699_v42  ;;  %v6047_v38 = vld [vmem:[%s5747_s28 + $0x310] sm:$0xff] }
  0x44   : > { %v702_v60 = vmin.f32 %v686_v48, %v687_v58  ;;  %v910_v61 = vsel %vm11013_vm0, %v4781_v46, inf  ;;  %v911_v62 = vsel %vm11012_vm1, %v4797_v50, inf  ;;  %v690_v63 = vsel %vm684_vm14, %v4812_v53, inf  ;;  %v5048_v48 = vld [vmem:[%s10956_s2 + $0x90] sm:$0xff]  ;;  %11287 = vst [vmem:[#allocation58_spill] sm:$0xff] %v6047_v38 }
  0x45   : > { %v691_v1 = vsel %vm685_vm15, %v4831_v57, inf  ;;  %v1122_v2 = vsub.s32 3, %v4755_v13  ;;  %v927_v3 = vmin.f32 %v910_v61, %v911_v62  ;;  %v916_v7 = vsel %vm11013_vm0, %v4807_v52, inf }
  0x46   : > { %v708_v6 = vmin.f32 %v690_v63, %v691_v1  ;;  %v917_v14 = vsel %vm11012_vm1, %v4826_v56, inf  ;;  %v692_v15 = vsel %vm684_vm14, %v4872_v9, inf  ;;  %v693_v16 = vsel %vm685_vm15, %v4877_v10, inf  ;;  %v5070_v63 = vld [vmem:[%s10956_s2 + $0xc0] sm:$0xff]  ;;  %v5075_v1 = vld [vmem:[%s10956_s2 + $0xc8] sm:$0xff] }
  0x47   : > { %499 = vmin.xlane.f32.xlu1 %v498_v22  ;;  %490 = vmin.xlane.f32.xlu0 %v489_v23  ;;  %v4990_v17 = vrot.slane %v4776_v45, %v1122_v2  ;;  %v4993_v18 = vrot.slane %v4802_v51, %v1122_v2  ;;  %v936_v19 = vmin.f32 %v916_v7, %v917_v14  ;;  %v920_v23 = vsel %vm11013_vm0, %v4862_v4, inf }
  0x48   : > { %v711_v22 = vmin.f32 %v692_v15, %v693_v16  ;;  %v921_v24 = vsel %vm11012_vm1, %v4867_v8, inf  ;;  %v696_v45 = vsel %vm684_vm14, %v4902_v20, inf  ;;  %v697_v51 = vsel %vm685_vm15, %v4907_v21, inf  ;;  %v5092_v16 = vld [vmem:[%s10956_s2 + $0xe0] sm:$0xff] }
  0x49   : > { %11223 = vst [vmem:[#allocation7_spill] sm:$0xff] %v4990_v17  ;;  %11224 = vst [vmem:[#allocation8_spill] sm:$0xff] %v4993_v18  ;;  %vm11026_vm2 = vcmp.eq.s32.totalorder %v4990_v17, 1  ;;  %vm11021_vm3 = vcmp.eq.s32.totalorder %v4993_v18, 1  ;;  %v942_v25 = vmin.f32 %v920_v23, %v921_v24  ;;  %v717_v26 = vmin.f32 %v696_v45, %v697_v51  ;;  %v6140_v18 = vld [vmem:[%s10956_s2 + $0x1a8] sm:$0xff]  ;;  %v2982_v17 = vld [vmem:[%s10956_s2 + $0x1d8] sm:$0xff] }
  0x4a   : > { %v1132_v27 = vsel %vm11026_vm2, %v4781_v46, inf  ;;  %v1133_v30 = vsel %vm11021_vm3, %v4797_v50, inf  ;;  %v1138_v46 = vsel %vm11026_vm2, %v4807_v52, inf  ;;  %v1139_v50 = vsel %vm11021_vm3, %v4826_v56, inf }
  0x4b   : > { %706 = vmin.xlane.f32.xlu1 %v705_v31  ;;  %496 = vmin.xlane.f32.xlu0 %v495_v32  ;;  %v700_v31 = vsel %vm684_vm14, %v4924_v28, inf  ;;  %v701_v32 = vsel %vm685_vm15, %v4929_v29, inf  ;;  %v1149_v33 = vmin.f32 %v1132_v27, %v1133_v30  ;;  %v908_v35 = vsel %vm11013_vm0, %v4792_v49, inf }
  0x4c   : > { %v723_v34 = vmin.f32 %v700_v31, %v701_v32  ;;  %v909_v36 = vsel %vm11012_vm1, %v4821_v55, inf  ;;  %v1142_v52 = vsel %vm11026_vm2, %v4862_v4, inf  ;;  %v1143_v56 = vsel %vm11021_vm3, %v4867_v8, inf  ;;  %v5053_v4 = vld [vmem:[%s10956_s2 + $0x98] sm:$0xff] }
  0x4d   : > { %v912_v41 = vsel %vm11013_vm0, %v4812_v53, inf  ;;  %v913_v42 = vsel %vm11012_vm1, %v4831_v57, inf  ;;  %v1164_v8 = vmin.f32 %v1142_v52, %v1143_v56  ;;  %v914_v61 = vsel %vm11013_vm0, %v4872_v9, inf }
  0x4e   : > { %v930_v58 = vmin.f32 %v912_v41, %v913_v42  ;;  %v915_v62 = vsel %vm11012_vm1, %v4877_v10, inf  ;;  %v1368_v7 = vsel %vm463_vm13, %v5075_v1, inf  ;;  %v918_v14 = vsel %vm11013_vm0, %v4902_v20, inf }
  0x4f   : > { %715 = vmin.xlane.f32.xlu1 %v714_v39  ;;  %502 = vmin.xlane.f32.xlu0 %v501_v40  ;;  %v1158_v39 = vmin.f32 %v1138_v46, %v1139_v50  ;;  %v924_v40 = vmin.f32 %v908_v35, %v909_v36  ;;  %v919_v15 = vsel %vm11012_vm1, %v4907_v21, inf  ;;  %v1371_v24 = vsel %vm462_vm12, %v5092_v16, inf }
  0x50   : > { %v939_v23 = vmin.f32 %v918_v14, %v919_v15  ;;  %v922_v51 = vsel %vm11013_vm0, %v4924_v28, inf  ;;  %v1573_v30 = vsel %vm684_vm14, %v5048_v48, inf  ;;  %v1574_v31 = vsel %vm685_vm15, %v5053_v4, inf  ;;  %v5196_v15 = vld [vmem:[%s10956_s2 + $0xa0] sm:$0xff] }
  0x51   : > { %v1130_v32 = vsel %vm11026_vm2, %v4792_v49, inf  ;;  %v1579_v50 = vsel %vm684_vm14, %v5070_v63, inf  ;;  %v1580_v35 = vsel %vm685_vm15, %v5075_v1, inf  ;;  %v1134_v49 = vsel %vm11026_vm2, %v4812_v53, inf }
  0x52   : > { %v1599_v36 = vmin.f32 %v1579_v50, %v1580_v35  ;;  %v1136_v53 = vsel %vm11026_vm2, %v4872_v9, inf  ;;  %v1785_v42 = vsel %vm11013_vm0, %v5048_v48, inf  ;;  %v1140_v9 = vsel %vm11026_vm2, %v4902_v20, inf }
  0x53   : > { %721 = vmin.xlane.f32.xlu1 %v720_v59  ;;  %703 = vmin.xlane.f32.xlu0 %v702_v60  ;;  %v1361_v59 = vsel %vm462_vm12, %v5048_v48, inf  ;;  %v1362_v60 = vsel %vm463_vm13, %v5053_v4, inf  ;;  %v1144_v20 = vsel %vm11026_vm2, %v4924_v28, inf  ;;  %v1795_v28 = vsel %vm11013_vm0, %v5092_v16, inf }
  0x54   : > { %v1378_v2 = vmin.f32 %v1361_v59, %v1362_v60  ;;  %v1791_v60 = vsel %vm11013_vm0, %v5070_v63, inf  ;;  %v2007_v35 = vsel %vm11026_vm2, %v5092_v16, inf }
  0x57   : > { %928 = vmin.xlane.f32.xlu1 %v927_v3  ;;  %709 = vmin.xlane.f32.xlu0 %v708_v6  ;;  %v933_v3 = vmin.f32 %v914_v61, %v915_v62  ;;  %v1367_v6 = vsel %vm462_vm12, %v5070_v63, inf  ;;  %v1792_v61 = vsel %vm11012_vm1, %v5075_v1, inf  ;;  %v5174_v62 = vld [vmem:[%s10956_s2 + $0x80] sm:$0xff] }
  0x58   : > { %v5528_v5 = vsel %vm11026_vm2, %v5174_v62, inf }
  0x5b   : > { %937 = vmin.xlane.f32.xlu1 %v936_v19  ;;  %712 = vmin.xlane.f32.xlu0 %v711_v22  ;;  %v5097_v19 = vld [vmem:[%s10956_s2 + $0xe8] sm:$0xff]  ;;  %v1387_v22 = vmin.f32 %v1367_v6, %v1368_v7  ;;  %v1359_v7 = vsel %vm462_vm12, %v5174_v62, inf }
  0x5c   : > { %v1372_v45 = vsel %vm463_vm13, %v5097_v19, inf  ;;  %v1584_v52 = vsel %vm685_vm15, %v5097_v19, inf }
  0x5f   : > { %943 = vmin.xlane.f32.xlu1 %v942_v25  ;;  %718 = vmin.xlane.f32.xlu0 %v717_v26  ;;  %v923_v25 = vsel %vm11012_vm1, %v4929_v29, inf  ;;  %v1393_v26 = vmin.f32 %v1371_v24, %v1372_v45  ;;  %v1997_v45 = vsel %vm11026_vm2, %v5048_v48, inf  ;;  %v5223_v48 = vld [vmem:[%s10956_s2 + $0xb8] sm:$0xff] }
  0x60   : > { %v945_v27 = vmin.f32 %v922_v51, %v923_v25  ;;  %v1998_v51 = vsel %vm11021_vm3, %v5053_v4, inf  ;;  %v1363_v25 = vsel %vm462_vm12, %v5196_v15, inf }
  0x63   : > { %1150 = vmin.xlane.f32.xlu1 %v1149_v33  ;;  %724 = vmin.xlane.f32.xlu0 %v723_v34  ;;  %v1131_v33 = vsel %vm11021_vm3, %v4821_v55, inf  ;;  %v1590_v34 = vmin.f32 %v1573_v30, %v1574_v31  ;;  %v1135_v55 = vsel %vm11021_vm3, %v4831_v57, inf  ;;  %v1137_v57 = vsel %vm11021_vm3, %v4877_v10, inf }
  0x64   : > { %v1146_v46 = vmin.f32 %v1130_v32, %v1131_v33  ;;  %v1155_v41 = vmin.f32 %v1136_v53, %v1137_v57  ;;  %v1141_v10 = vsel %vm11021_vm3, %v4907_v21, inf  ;;  %v1145_v21 = vsel %vm11021_vm3, %v4929_v29, inf }
  0x65   : > { %v1161_v59 = vmin.f32 %v1140_v9, %v1141_v10  ;;  %v1167_v6 = vmin.f32 %v1144_v20, %v1145_v21  ;;  %v1796_v29 = vsel %vm11012_vm1, %v5097_v19, inf  ;;  %v2003_v31 = vsel %vm11026_vm2, %v5070_v63, inf  ;;  %v5245_v63 = vld [vmem:[%s10956_s2 + $0xd8] sm:$0xff]  ;;  %v2116_v9 = vld [vmem:[%s10956_s2 + $0x148] sm:$0xff]  ;;  %v5300_v10 = vld [vmem:[%s10956_s2 + $0x160] sm:$0xff] }
  0x66   : > { %v2004_v32 = vsel %vm11021_vm3, %v5075_v1, inf  ;;  %v2232_v20 = vsel %vm463_vm13, %v2116_v9, inf  ;;  %v1571_v21 = vsel %vm684_vm14, %v5174_v62, inf }
  0x67   : > { %1159 = vmin.xlane.f32.xlu1 %v1158_v39  ;;  %925 = vmin.xlane.f32.xlu0 %v924_v40  ;;  %v1152_v39 = vmin.f32 %v1134_v49, %v1135_v55  ;;  %v1583_v40 = vsel %vm684_vm14, %v5092_v16, inf  ;;  %v2023_v1 = vmin.f32 %v2003_v31, %v2004_v32  ;;  %v2008_v49 = vsel %vm11021_vm3, %v5097_v19, inf  ;;  %v5256_v55 = vld [vmem:[%s10956_s2 + $0x110] sm:$0xff]  ;;  %v5267_v16 = vld [vmem:[%s10956_s2 + $0x118] sm:$0xff] }
  0x68   : > { %v1605_v56 = vmin.f32 %v1583_v40, %v1584_v52  ;;  %v5272_v19 = vld [vmem:[%s10956_s2 + $0xf0] sm:$0xff]  ;;  %v5277_v40 = vld [vmem:[%s10956_s2 + $0xf8] sm:$0xff]  ;;  %v2029_v52 = vmin.f32 %v2007_v35, %v2008_v49  ;;  %v2225_v53 = vsel %vm462_vm12, %v5256_v55, inf  ;;  %v5366_v49 = vsel %vm684_vm14, %v5300_v10, inf }
  0x6b   : > { %1165 = vmin.xlane.f32.xlu1 %v1164_v8  ;;  %931 = vmin.xlane.f32.xlu0 %v930_v58  ;;  %v1786_v8 = vsel %vm11012_vm1, %v5053_v4, inf  ;;  %v2014_v4 = vmin.f32 %v1997_v45, %v1998_v51  ;;  %v1578_v45 = vsel %vm685_vm15, %v5223_v48, inf }
  0x6c   : > { %v1802_v58 = vmin.f32 %v1785_v42, %v1786_v8  ;;  %v1374_v42 = vsel %vm463_vm13, %v5277_v40, inf  ;;  %v2115_v8 = vld [vmem:[%s10956_s2 + $0x140] sm:$0xff] }
  0x6d   : > { %v5343_v51 = vsel %vm684_vm14, %v2115_v8, inf }
  0x6f   : > { %1379 = vmin.xlane.f32.xlu1 %v1378_v2  ;;  %934 = vmin.xlane.f32.xlu0 %v933_v3  ;;  %v5179_v2 = vld [vmem:[%s10956_s2 + $0x88] sm:$0xff]  ;;  %v1811_v3 = vmin.f32 %v1791_v60, %v1792_v61  ;;  %v2231_v61 = vsel %vm462_vm12, %v2115_v8, inf }
  0x70   : > { %v1360_v14 = vsel %vm463_vm13, %v5179_v2, inf }
  0x71   : > { %v1375_v24 = vmin.f32 %v1359_v7, %v1360_v14  ;;  %v2437_v14 = vsel %vm684_vm14, %v5256_v55, inf }
  0x73   : > { %1388 = vmin.xlane.f32.xlu1 %v1387_v22  ;;  %940 = vmin.xlane.f32.xlu0 %v939_v23  ;;  %v5201_v22 = vld [vmem:[%s10956_s2 + $0xa8] sm:$0xff]  ;;  %v1817_v23 = vmin.f32 %v1795_v28, %v1796_v29  ;;  %v1575_v29 = vsel %vm684_vm14, %v5196_v15, inf }
  0x74   : > { %v1576_v7 = vsel %vm685_vm15, %v5201_v22, inf }
  0x77   : > { %1394 = vmin.xlane.f32.xlu1 %v1393_v26  ;;  %946 = vmin.xlane.f32.xlu0 %v945_v27  ;;  %v1364_v26 = vsel %vm463_vm13, %v5201_v22, inf  ;;  %v5218_v27 = vld [vmem:[%s10956_s2 + $0xb0] sm:$0xff] }
  0x78   : > { %v1381_v30 = vmin.f32 %v1363_v25, %v1364_v26  ;;  %v1365_v33 = vsel %vm462_vm12, %v5218_v27, inf  ;;  %v5347_v25 = vsel %vm685_vm15, %v2116_v9, inf }
  0x7b   : > { %1591 = vmin.xlane.f32.xlu1 %v1590_v34  ;;  %1147 = vmin.xlane.f32.xlu0 %v1146_v46  ;;  %v1366_v34 = vsel %vm463_vm13, %v5223_v48, inf  ;;  %v5240_v46 = vld [vmem:[%s10956_s2 + $0xd0] sm:$0xff] }
  0x7c   : > { %v1384_v50 = vmin.f32 %v1365_v33, %v1366_v34  ;;  %v5352_v26 = vsel %vm684_vm14, %v5240_v46, inf  ;;  %v1593_v33 = vmin.f32 %v1575_v29, %v1576_v7  ;;  %v5449_v29 = vsel %vm11021_vm3, %v5267_v16, inf }
  0x7d   : > { %v5454_v7 = vsel %vm11013_vm0, %v5240_v46, inf  ;;  %v5588_v43 = vsel %vm11026_vm2, %v5240_v46, inf }
  0x7e   : > { %11233 = vst [vmem:[#allocation17_spill] sm:$0xff] %v5588_v43  ;;  %v5686_v43 = vld [vmem:[%s10956_s2 + $0x158] sm:$0xff] }
  0x7f   : > { %1600 = vmin.xlane.f32.xlu1 %v1599_v36  ;;  %1153 = vmin.xlane.f32.xlu0 %v1152_v39  ;;  %v1369_v36 = vsel %vm462_vm12, %v5240_v46, inf  ;;  %v1370_v39 = vsel %vm463_vm13, %v5245_v63, inf }
  0x80   : > { %v1390_v57 = vmin.f32 %v1369_v36, %v1370_v39  ;;  %v5376_v39 = vsel %vm684_vm14, %v5272_v19, inf }
  0x83   : > { %1606 = vmin.xlane.f32.xlu1 %v1605_v56  ;;  %1156 = vmin.xlane.f32.xlu0 %v1155_v41  ;;  %v2226_v56 = vsel %vm463_vm13, %v5267_v16, inf  ;;  %v1373_v41 = vsel %vm462_vm12, %v5272_v19, inf }
  0x84   : > { %v1396_v60 = vmin.f32 %v1373_v41, %v1374_v42  ;;  %v5401_v41 = vsel %vm11012_vm1, %v5179_v2, inf  ;;  %v5405_v42 = vsel %vm11013_vm0, %v2115_v8, inf }
  0x87   : > { %1803 = vmin.xlane.f32.xlu1 %v1802_v58  ;;  %1162 = vmin.xlane.f32.xlu0 %v1161_v59  ;;  %v5305_v58 = vld [vmem:[%s10956_s2 + $0x168] sm:$0xff]  ;;  %v2242_v59 = vmin.f32 %v2225_v53, %v2226_v56  ;;  %v5386_v53 = vsel %vm11013_vm0, %v5256_v55, inf  ;;  %v5396_v56 = vsel %vm11013_vm0, %v5174_v62, inf }
  0x88   : > { %v2236_v28 = vsel %vm463_vm13, %v5305_v58, inf  ;;  %v5371_v36 = vsel %vm685_vm15, %v5305_v58, inf }
  0x8b   : > { %1812 = vmin.xlane.f32.xlu1 %v1811_v3  ;;  %1168 = vmin.xlane.f32.xlu0 %v1167_v6  ;;  %v1572_v3 = vsel %vm685_vm15, %v5179_v2, inf  ;;  %v2235_v6 = vsel %vm462_vm12, %v5300_v10, inf }
  0x8c   : > { %v1587_v31 = vmin.f32 %v1571_v21, %v1572_v3  ;;  %v2257_v32 = vmin.f32 %v2235_v6, %v2236_v28  ;;  %v5429_v21 = vsel %vm11012_vm1, %v5305_v58, inf  ;;  %v5434_v3 = vsel %vm11013_vm0, %v5218_v27, inf }
  0x8d   : > { %v5439_v6 = vsel %vm11012_vm1, %v5223_v48, inf  ;;  %v5444_v28 = vsel %vm11026_vm2, %v5256_v55, inf  ;;  %v5463_v55 = vsel %vm11026_vm2, %v2115_v8, inf  ;;  %v2980_v8 = vld [vmem:[%s10956_s2 + $0x1c8] sm:$0xff] }
  0x8e   : > { %v5565_v35 = vsel %vm463_vm13, %v2980_v8, inf }
  0x8f   : > { %1818 = vmin.xlane.f32.xlu1 %v1817_v23  ;;  %1376 = vmin.xlane.f32.xlu0 %v1375_v24  ;;  %v2438_v23 = vsel %vm685_vm15, %v5267_v16, inf  ;;  %v1577_v24 = vsel %vm684_vm14, %v5218_v27, inf  ;;  %11228 = vst [vmem:[#allocation12_spill] sm:$0xff] %v5565_v35  ;;  %v5784_v35 = vld [vmem:[%s5747_s28 + $0x10] sm:$0xff] }
  0x90   : > { %v2454_v34 = vmin.f32 %v2437_v14, %v2438_v23  ;;  %v5459_v14 = vsel %vm11012_vm1, %v5245_v63, inf  ;;  %v5472_v23 = vsel %vm11013_vm0, %v5272_v19, inf  ;;  %vm362_vm4 = vcmp.gt.f32.partialorder %v5784_v35, 0.5 }
  0x93   : > { %2015 = vmin.xlane.f32.xlu1 %v2014_v4  ;;  %1382 = vmin.xlane.f32.xlu0 %v1381_v30  ;;  %v5357_v4 = vsel %vm685_vm15, %v5245_v63, inf  ;;  %v2251_v30 = vmin.f32 %v2231_v61, %v2232_v20  ;;  %v5419_v61 = vsel %vm11012_vm1, %v5201_v22, inf  ;;  %v5424_v20 = vsel %vm11013_vm0, %v5300_v10, inf }
  0x94   : > { %v11236_v13 = vmin.f32 %v5352_v26, %v5357_v4  ;;  %v5640_v4 = vld [vmem:[%s10956_s2 + $0x120] sm:$0xff]  ;;  %v5668_v26 = vld [vmem:[%s10956_s2 + $0x150] sm:$0xff] }
  0x97   : > { %2024 = vmin.xlane.f32.xlu1 %v2023_v1  ;;  %1385 = vmin.xlane.f32.xlu0 %v1384_v50  ;;  %v1596_v1 = vmin.f32 %v1577_v24, %v1578_v45  ;;  %v5477_v24 = vsel %vm11012_vm1, %v5277_v40, inf  ;;  %v5570_v50 = vsel %vm11026_vm2, %v5218_v27, inf  ;;  %v5593_v27 = vsel %vm11021_vm3, %v5245_v63, inf }
  0x98   : > { %11225 = vst [vmem:[#allocation9_spill] sm:$0xff] %v5477_v24  ;;  %11229 = vst [vmem:[#allocation13_spill] sm:$0xff] %v5570_v50  ;;  %v5603_v24 = vsel %vm684_vm14, %v2973_v0, inf  ;;  %v5612_v63 = vsel %vm11026_vm2, %v5272_v19, inf  ;;  %v5691_v19 = vld [vmem:[%s10956_s2 + $0x170] sm:$0xff] }
  0x99   : > { %11234 = vst [vmem:[#allocation18_spill] sm:$0xff] %v5593_v27  ;;  %11237 = vst [vmem:[#allocation19_spill] sm:$0xff] %v5603_v24  ;;  %v5681_v27 = vsel %vm685_vm15, %v2980_v8, inf }
  0x9a   : > { %11239 = vst [vmem:[#allocation21_spill] sm:$0xff] %v5612_v63  ;;  %11241 = vst [vmem:[#allocation23_spill] sm:$0xff] %v5681_v27 }
  0x9b   : > { %2030 = vmin.xlane.f32.xlu1 %v2029_v52  ;;  %1391 = vmin.xlane.f32.xlu0 %v1390_v57  ;;  %v5381_v52 = vsel %vm685_vm15, %v5277_v40, inf  ;;  %v5391_v57 = vsel %vm11012_vm1, %v5267_v16, inf  ;;  %v5467_v16 = vsel %vm11021_vm3, %v2116_v9, inf }
  0x9c   : > { %v11243_v8 = vmin.f32 %v5376_v39, %v5381_v52 }
  0x9f   : > { %2243 = vmin.xlane.f32.xlu1 %v2242_v59  ;;  %1397 = vmin.xlane.f32.xlu0 %v1396_v60  ;;  %v5409_v59 = vsel %vm11012_vm1, %v2116_v9, inf  ;;  %v5414_v60 = vsel %vm11013_vm0, %v5196_v15, inf  ;;  %v2979_v9 = vld [vmem:[%s10956_s2 + $0x1c0] sm:$0xff] }
  0xa0   : > { %v5561_v45 = vsel %vm462_vm12, %v2979_v9, inf }
  0xa1   : > { %11227 = vst [vmem:[#allocation11_spill] sm:$0xff] %v5561_v45  ;;  %v11253_v45 = vmin.f32 %v5386_v53, %v5391_v57  ;;  %v5805_v57 = vsel %vm684_vm14, %v5640_v4, inf }
  0xa2   : > { %11255 = vst [vmem:[#allocation33_spill] sm:$0xff] %v5805_v57  ;;  %v5983_v57 = vld [vmem:[%s5747_s28 + $0x238] sm:$0xff] }
  0xa3   : > { %2252 = vmin.xlane.f32.xlu1 %v2251_v30  ;;  %1588 = vmin.xlane.f32.xlu0 %v1587_v31  ;;  %v2974_v30 = vld [vmem:[%s10956_s2 + $0x198] sm:$0xff]  ;;  %v5557_v31 = vsel %vm11021_vm3, %v5201_v22, inf  ;;  %11277 = vst [vmem:[#allocation50_spill] sm:$0xff] %v5983_v57 }
  0xa4   : > { %v5547_v62 = vsel %vm463_vm13, %v2974_v30, inf  ;;  %11226 = vst [vmem:[#allocation10_spill] sm:$0xff] %v5557_v31  ;;  %v5607_v46 = vsel %vm685_vm15, %v2974_v30, inf  ;;  %v5645_v30 = vld [vmem:[%s10956_s2 + $0x128] sm:$0xff]  ;;  %v5663_v31 = vld [vmem:[%s10956_s2 + $0x138] sm:$0xff] }
  0xa5   : > { %11238 = vst [vmem:[#allocation20_spill] sm:$0xff] %v5607_v46  ;;  %v5730_v39 = vsel %vm463_vm13, %v5645_v30, inf  ;;  %v5829_v27 = vsel %vm685_vm15, %v5663_v31, inf }
  0xa6   : > { %11258 = vst [vmem:[#allocation36_spill] sm:$0xff] %v5829_v27  ;;  %v5905_v27 = vld [vmem:[%s5747_s28 + $0x138] sm:$0xff] }
  0xa7   : > { %2258 = vmin.xlane.f32.xlu1 %v2257_v32  ;;  %1594 = vmin.xlane.f32.xlu0 %v1593_v33  ;;  %v5518_v32 = vsel %vm11026_vm2, %v5300_v10, inf  ;;  %v5523_v33 = vsel %vm11021_vm3, %v5305_v58, inf  ;;  %v2983_v10 = vld [vmem:[%s10956_s2 + $0x1e0] sm:$0xff]  ;;  %v5543_v58 = vsel %vm462_vm12, %v2973_v0, inf }
  0xa8   : > { %v5579_v22 = vsel %vm462_vm12, %v2983_v10, inf  ;;  %v5622_v0 = vld [vmem:[%s10956_s2 + $0x100] sm:$0xff]  ;;  %v5716_v46 = vsel %vm684_vm14, %v2983_v10, inf  ;;  %v5740_v10 = vsel %vm463_vm13, %v5663_v31, inf }
  0xa9   : > { %11231 = vst [vmem:[#allocation15_spill] sm:$0xff] %v5579_v22  ;;  %11246 = vst [vmem:[#allocation26_spill] sm:$0xff] %v5740_v10  ;;  %v11254_v22 = vmin.f32 %v5396_v56, %v5401_v41  ;;  %v5810_v56 = vsel %vm685_vm15, %v5645_v30, inf  ;;  %v5813_v41 = vld [vmem:[%s5747_s28 + $0x18] sm:$0xff]  ;;  %v5913_v10 = vsel %vm11013_vm0, %v5622_v0, inf }
  0xaa   : > { %11256 = vst [vmem:[#allocation34_spill] sm:$0xff] %v5810_v56  ;;  %vm363_vm5 = vcmp.gt.f32.partialorder %v5813_v41, 0.5  ;;  %11269 = vst [vmem:[#allocation44_spill] sm:$0xff] %v5913_v10  ;;  %v5980_v56 = vld [vmem:[%s5747_s28 + $0x228] sm:$0xff]  ;;  %v11280_v10 = vmin.f32 %v5444_v28, %v5449_v29 }
  0xab   : > { %2455 = vmin.xlane.f32.xlu1 %v2454_v34  ;;  %1597 = vmin.xlane.f32.xlu0 %v1596_v1  ;;  %v5533_v34 = vsel %vm11021_vm3, %v5179_v2, inf  ;;  %v2984_v1 = vld [vmem:[%s10956_s2 + $0x1e8] sm:$0xff]  ;;  %v5552_v2 = vsel %vm11026_vm2, %v5196_v15, inf  ;;  %v5575_v15 = vsel %vm11021_vm3, %v5223_v48, inf  ;;  %v11235_v48 = vmin.f32 %v5343_v51, %v5347_v25  ;;  %v5696_v25 = vld [vmem:[%s10956_s2 + $0x178] sm:$0xff] }
  0xac   : > { %11230 = vst [vmem:[#allocation14_spill] sm:$0xff] %v5575_v15  ;;  %v5583_v44 = vsel %vm463_vm13, %v2984_v1, inf  ;;  %v5617_v51 = vsel %vm11021_vm3, %v5277_v40, inf  ;;  %v5635_v40 = vld [vmem:[%s10956_s2 + $0x108] sm:$0xff]  ;;  %v5767_v24 = vsel %vm463_vm13, %v5696_v25, inf  ;;  %v5776_v15 = vsel %vm684_vm14, %v5622_v0, inf }
  0xad   : > { %11232 = vst [vmem:[#allocation16_spill] sm:$0xff] %v5583_v44  ;;  %11240 = vst [vmem:[#allocation22_spill] sm:$0xff] %v5617_v51  ;;  %v5707_v51 = vsel %vm462_vm12, %v5622_v0, inf  ;;  %v5712_v63 = vsel %vm463_vm13, %v5635_v40, inf  ;;  %v5781_v50 = vsel %vm685_vm15, %v5635_v40, inf  ;;  %v5847_v44 = vsel %vm684_vm14, %v5691_v19, inf }
  0xae   : > { %11244 = vst [vmem:[#allocation24_spill] sm:$0xff] %v5707_v51  ;;  %11245 = vst [vmem:[#allocation25_spill] sm:$0xff] %v5712_v63  ;;  %v5832_v51 = vld [vmem:[%s5747_s28 + $0x38] sm:$0xff]  ;;  %v5842_v63 = vsel %vm685_vm15, %v5686_v43, inf  ;;  %v6044_v28 = vsel %vm11021_vm3, %v5635_v40, inf  ;;  %v11355_v12 = vld [vmem:[#allocation20_spill] sm:$0xff] }
  0xaf   : > { %2464 = vmin.xlane.f32.xlu1 %v11235_v48  ;;  %1603 = vmin.xlane.f32.xlu0 %v11236_v13  ;;  %v5658_v13 = vld [vmem:[%s10956_s2 + $0x130] sm:$0xff]  ;;  %v5677_v48 = vsel %vm684_vm14, %v2979_v9, inf  ;;  %v11242_v9 = vmin.f32 %v5366_v49, %v5371_v36  ;;  %v5720_v49 = vsel %vm685_vm15, %v2984_v1, inf  ;;  %v5725_v36 = vsel %vm462_vm12, %v5640_v4, inf  ;;  %11250 = vst [vmem:[#allocation30_spill] sm:$0xff] %v5767_v24  ;;  %11251 = vst [vmem:[#allocation31_spill] sm:$0xff] %v5776_v15 }
  0xb0   : > { %v5735_v52 = vsel %vm462_vm12, %v5658_v13, inf  ;;  %v5752_v1 = vsel %vm462_vm12, %v5668_v26, inf  ;;  %11252 = vst [vmem:[#allocation32_spill] sm:$0xff] %v5781_v50  ;;  %v5824_v53 = vsel %vm684_vm14, %v5658_v13, inf  ;;  %11260 = vst [vmem:[#allocation38_spill] sm:$0xff] %v5842_v63  ;;  %v5852_v50 = vsel %vm685_vm15, %v5696_v25, inf }
  0xb1   : > { %11247 = vst [vmem:[#allocation27_spill] sm:$0xff] %v5752_v1  ;;  %11257 = vst [vmem:[#allocation35_spill] sm:$0xff] %v5824_v53  ;;  %v5855_v15 = vld [vmem:[%s5747_s28 + $0x100] sm:$0xff]  ;;  %v11263_v24 = vmin.f32 %v5405_v42, %v5409_v59  ;;  %v5873_v42 = vld [vmem:[%s5747_s28 + $0x110] sm:$0xff]  ;;  %vm10999_vm7 = vcmp.gt.f32.partialorder %v5832_v51, 0.5  ;;  %v5918_v63 = vsel %vm11012_vm1, %v5635_v40, inf }
  0xb2   : > { %11261 = vst [vmem:[#allocation39_spill] sm:$0xff] %v5847_v44  ;;  %11262 = vst [vmem:[#allocation40_spill] sm:$0xff] %v5852_v50  ;;  %v5876_v59 = vld [vmem:[%s5747_s28 + $0x118] sm:$0xff]  ;;  %vm10998_vm8 = vcmp.gt.f32.partialorder %v5855_v15, 0.5  ;;  %vm11005_vm9 = vcmp.gt.f32.partialorder %v5873_v42, 0.5  ;;  %v11272_v50 = vmin.f32 %v5434_v3, %v5439_v6  ;;  %v5955_v3 = vsel %vm11012_vm1, %v5663_v31, inf }
  0xb3   : > { %2470 = vmin.xlane.f32.xlu1 %v11242_v9  ;;  %1609 = vmin.xlane.f32.xlu0 %v11243_v8  ;;  %v5757_v9 = vsel %vm463_vm13, %v5686_v43, inf  ;;  %v5762_v8 = vsel %vm462_vm12, %v5691_v19, inf  ;;  %11270 = vst [vmem:[#allocation45_spill] sm:$0xff] %v5918_v63  ;;  %vm11014_vm11 = vcmp.gt.f32.partialorder %v5876_v59, 0.5  ;;  %v5960_v6 = vld [vmem:[%s5747_s28 + $0x218] sm:$0xff]  ;;  %v5977_v53 = vsel %vm11012_vm1, %v5686_v43, inf }
  0xb4   : > { %11248 = vst [vmem:[#allocation28_spill] sm:$0xff] %v5757_v9  ;;  %11249 = vst [vmem:[#allocation29_spill] sm:$0xff] %v5762_v8  ;;  %v11264_v8 = vmin.f32 %v5414_v60, %v5419_v61  ;;  %v11265_v9 = vmov 0   ;;  %v11271_v61 = vmin.f32 %v5424_v20, %v5429_v21  ;;  %v5941_v20 = vsel %vm11012_vm1, %v5645_v30, inf  ;;  %v5945_v21 = vld [vmem:[%s5747_s28 + $0x210] sm:$0xff] }
  0xb5   : > { %v5866_v1 = vsel %vm362_vm4, 1, %v11265_v9  ;;  %v5881_v60 = vsel %vm363_vm5, 1, %v11265_v9  ;;  %v5931_v44 = vsel %vm10998_vm8, 1, %v11265_v9  ;;  %11274 = vst [vmem:[#allocation47_spill] sm:$0xff] %v5941_v20  ;;  %vm11066_vm8 = vcmp.gt.f32.partialorder %v5905_v27, 0.5  ;;  %11276 = vst [vmem:[#allocation49_spill] sm:$0xff] %v5977_v53 }
  0xb6   : > { %11266 = vst [vmem:[#allocation41_spill] sm:$0xff] %v5881_v60  ;;  %v5899_v60 = vsel %vm10999_vm7, 1, %v11265_v9  ;;  %11273 = vst [vmem:[#allocation46_spill] sm:$0xff] %v5931_v44  ;;  %v5967_v44 = vsel %vm11005_vm9, 1, %v11265_v9  ;;  %v5995_v63 = vsel %vm11012_vm1, %v5696_v25, inf  ;;  %vm11018_vm9 = vcmp.gt.f32.partialorder %v5945_v21, 0.5 }
  0xb7   : > { %2667 = vmin.xlane.f32.xlu1 %v11253_v45  ;;  %1800 = vmin.xlane.f32.xlu0 %v11254_v22  ;;  %v5816_v45 = vld [vmem:[%s5747_s28 + $0x28] sm:$0xff]  ;;  %v5837_v22 = vsel %vm684_vm14, %v5668_v26, inf  ;;  %11268 = vst [vmem:[#allocation43_spill] sm:$0xff] %v5899_v60  ;;  %v5936_v60 = vsel %vm11013_vm0, %v5640_v4, inf  ;;  %11275 = vst [vmem:[#allocation48_spill] sm:$0xff] %v5967_v44  ;;  %v5990_v44 = vsel %vm11013_vm0, %v5691_v19, inf }
  0xb8   : > { %11259 = vst [vmem:[#allocation37_spill] sm:$0xff] %v5837_v22  ;;  %vm365_vm6 = vcmp.gt.f32.partialorder %v5816_v45, 0.5  ;;  %v5972_v22 = vsel %vm11013_vm0, %v5668_v26, inf  ;;  %11278 = vst [vmem:[#allocation51_spill] sm:$0xff] %v5990_v44  ;;  %v6007_v37 = vsel %vm11014_vm11, 1, %v11265_v9  ;;  %vm11064_vm1 = vcmp.gt.f32.partialorder %v5960_v6, 0.5 }
  0xb9   : > { %11279 = vst [vmem:[#allocation52_spill] sm:$0xff] %v5995_v63  ;;  %v6022_v29 = vsel %vm11066_vm8, 1, %v11265_v9  ;;  %vm11030_vm11 = vcmp.gt.f32.partialorder %v5983_v57, 0.5  ;;  %11286 = vst [vmem:[#allocation57_spill] sm:$0xff] %v6044_v28  ;;  %v6067_v40 = vsel %vm11021_vm3, %v5663_v31, inf  ;;  %v6070_v63 = vld [vmem:[%s5747_s28 + $0x318] sm:$0xff] }
  0xba   : > { %11282 = vst [vmem:[#allocation53_spill] sm:$0xff] %v6022_v29  ;;  %11291 = vst [vmem:[#allocation62_spill] sm:$0xff] %v6067_v40  ;;  %v6086_v31 = vsel %vm11026_vm2, %v5668_v26, inf  ;;  %v6091_v29 = vsel %vm11021_vm3, %v5686_v43, inf  ;;  %v6112_v43 = vld [vmem:[%s10956_s2 + $0x180] sm:$0xff]  ;;  %v6117_v26 = vld [vmem:[%s10956_s2 + $0x188] sm:$0xff] }
  0xbb   : > { %2676 = vmin.xlane.f32.xlu1 %v11263_v24  ;;  %1806 = vmin.xlane.f32.xlu0 %v11264_v8  ;;  %v5888_v24 = vsel %vm365_vm6, 1, %v11265_v9  ;;  %v5892_v8 = vld [vmem:[%s5747_s28 + $0x128] sm:$0xff]  ;;  %11296 = vst [vmem:[#allocation63_spill] sm:$0xff] %v6086_v31  ;;  %11297 = vst [vmem:[#allocation64_spill] sm:$0xff] %v6091_v29  ;;  %v6156_v40 = vsel %vm11030_vm11, 1, %v11265_v9  ;;  %v11304_v29 = vmin.f32 %v5518_v32, %v5523_v33  ;;  %v6188_v32 = vld [vmem:[%s5747_s28 + $0x40] sm:$0xff] }
  0xbc   : > { %11267 = vst [vmem:[#allocation42_spill] sm:$0xff] %v5888_v24  ;;  %v5908_v24 = vld [vmem:[%s5747_s28 + $0x200] sm:$0xff]  ;;  %vm11067_vm10 = vcmp.gt.f32.partialorder %v5892_v8, 0.5  ;;  %11303 = vst [vmem:[#allocation70_spill] sm:$0xff] %v6156_v40  ;;  %v11305_v40 = vmin.f32 %v5528_v5, %v5533_v34  ;;  %v6233_v28 = vld [vmem:[%s5747_s28 + $0x68] sm:$0xff]  ;;  %v6317_v47 = vsel %vm685_vm15, %v6117_v26, inf }
  0xbd   : > { %vm11017_vm7 = vcmp.gt.f32.partialorder %v5908_v24, 0.5  ;;  %v6014_v20 = vsel %vm11067_vm10, 1, %v11265_v9  ;;  %v6246_v57 = vld [vmem:[%s10956_s2 + $0x1f0] sm:$0xff]  ;;  %v6251_v53 = vld [vmem:[%s10956_s2 + $0x1f8] sm:$0xff]  ;;  %11327 = vst [vmem:[#allocation88_spill] sm:$0xff] %v6317_v47  ;;  %v11344_v47 = vld [vmem:[#allocation15_spill] sm:$0xff] }
  0xbf   : > { %2682 = vmin.xlane.f32.xlu1 %v11271_v61  ;;  %1809 = vmin.xlane.f32.xlu0 %v11272_v50  ;;  %v5950_v50 = vsel %vm11013_vm0, %v5658_v13, inf  ;;  %v11281_v61 = vmin.f32 %v5454_v7, %v5459_v14  ;;  %vm11044_vm0 = vcmp.gt.f32.partialorder %v5980_v56, 0.5  ;;  %v6027_v7 = vld [vmem:[%s5747_s28 + $0x300] sm:$0xff]  ;;  %v6052_v14 = vsel %vm11026_vm2, %v5640_v4, inf }
  0xc0   : > { %11283 = vst [vmem:[#allocation54_spill] sm:$0xff] %v6027_v7  ;;  %11288 = vst [vmem:[#allocation59_spill] sm:$0xff] %v6052_v14  ;;  %v11292_v4 = vmin.f32 %v5463_v55, %v5467_v16  ;;  %v6095_v55 = vld [vmem:[%s5747_s28 + $0x328] sm:$0xff]  ;;  %v6102_v16 = vsel %vm11026_vm2, %v5691_v19, inf  ;;  %v2977_v19 = vld [vmem:[%s10956_s2 + $0x1b0] sm:$0xff] }
  0xc1   : > { %11298 = vst [vmem:[#allocation65_spill] sm:$0xff] %v6102_v16  ;;  %v6211_v31 = vsel %vm462_vm12, %v2977_v19, inf  ;;  %v6217_v16 = vld [vmem:[%s5747_s28 + $0x58] sm:$0xff] }
  0xc2   : > { %11311 = vst [vmem:[#allocation76_spill] sm:$0xff] %v6211_v31 }
  0xc3   : > { %2879 = vmin.xlane.f32.xlu1 %v11280_v10  ;;  %1815 = vmin.xlane.f32.xlu0 %v11281_v61  ;;  %v6034_v10 = vsel %vm11017_vm7, 1, %v11265_v9  ;;  %v6039_v61 = vsel %vm11026_vm2, %v5622_v0, inf  ;;  %v6062_v0 = vsel %vm11026_vm2, %v5658_v13, inf  ;;  %v6081_v13 = vsel %vm11018_vm9, 1, %v11265_v9 }
  0xc4   : > { %11284 = vst [vmem:[#allocation55_spill] sm:$0xff] %v6034_v10  ;;  %11285 = vst [vmem:[#allocation56_spill] sm:$0xff] %v6039_v61  ;;  %v6057_v10 = vsel %vm11021_vm3, %v5645_v30, inf  ;;  %v11293_v30 = vld [vmem:[#allocation9_spill] sm:$0xff]  ;;  %vm11039_vm7 = vcmp.gt.f32.partialorder %v6027_v7, 0.5  ;;  %vm11043_vm9 = vcmp.gt.f32.partialorder %v6047_v38, 0.5  ;;  %v11317_v61 = vmin.f32 %v5543_v58, %v5547_v62 }
  0xc5   : > { %11289 = vst [vmem:[#allocation60_spill] sm:$0xff] %v6057_v10  ;;  %11290 = vst [vmem:[#allocation61_spill] sm:$0xff] %v6062_v0  ;;  %v11294_v44 = vmin.f32 %v5472_v23, %v11293_v30  ;;  %v6107_v23 = vsel %vm11021_vm3, %v5696_v25, inf  ;;  %v6128_v25 = vsel %vm11064_vm1, 1, %v11265_v9  ;;  %vm11045_vm3 = vcmp.gt.f32.partialorder %v6070_v63, 0.5  ;;  %v2978_v0 = vld [vmem:[%s10956_s2 + $0x1b8] sm:$0xff] }
  0xc6   : > { %11295 = vst [vmem:[#allocation9_spill] sm:$0xff] %v6081_v13  ;;  %11299 = vst [vmem:[#allocation66_spill] sm:$0xff] %v6107_v23  ;;  %v6149_v30 = vsel %vm11044_vm0, 1, %v11265_v9  ;;  %vm11054_vm2 = vcmp.gt.f32.partialorder %v6095_v55, 0.5  ;;  %v6184_v10 = vsel %vm463_vm13, %v6117_v26, inf  ;;  %v6197_v34 = vsel %vm11039_vm7, 1, %v11265_v9 }
  0xc7   : > { %2888 = vmin.xlane.f32.xlu1 %v11292_v4  ;;  %1821 = vmin.xlane.f32.xlu0 %v11294_v44  ;;  %v6121_v4 = vld [vmem:[%s5747_s28 + $0x338] sm:$0xff]  ;;  %11301 = vst [vmem:[#allocation68_spill] sm:$0xff] %v6128_v25  ;;  %v6135_v44 = vld [vmem:[%s10956_s2 + $0x1a0] sm:$0xff]  ;;  %11302 = vst [vmem:[#allocation69_spill] sm:$0xff] %v6149_v30  ;;  %v6179_v30 = vsel %vm462_vm12, %v6112_v43, inf  ;;  %v6230_v13 = vsel %vm463_vm13, %v2982_v17, inf }
  0xc8   : > { %11300 = vst [vmem:[#allocation67_spill] sm:$0xff] %v6121_v4  ;;  %v2981_v25 = vld [vmem:[%s10956_s2 + $0x1d0] sm:$0xff]  ;;  %11306 = vst [vmem:[#allocation71_spill] sm:$0xff] %v6179_v30  ;;  %vm11053_vm11 = vcmp.gt.f32.partialorder %v6121_v4, 0.5  ;;  %v6241_v7 = vsel %vm11043_vm9, 1, %v11265_v9  ;;  %vm11055_vm7 = vcmp.gt.f32.partialorder %v6188_v32, 0.5 }
  0xc9   : > { %11307 = vst [vmem:[#allocation72_spill] sm:$0xff] %v6184_v10  ;;  %11308 = vst [vmem:[#allocation73_spill] sm:$0xff] %v6197_v34  ;;  %v6214_v23 = vld [vmem:[%s5747_s28 + $0x50] sm:$0xff]  ;;  %v6222_v34 = vsel %vm463_vm13, %v2978_v0, inf  ;;  %v6226_v14 = vsel %vm462_vm12, %v2981_v25, inf  ;;  %v11318_v10 = vld [vmem:[#allocation10_spill] sm:$0xff] }
  0xca   : > { %11312 = vst [vmem:[#allocation77_spill] sm:$0xff] %v6214_v23  ;;  %11313 = vst [vmem:[#allocation78_spill] sm:$0xff] %v6222_v34  ;;  %v11319_v30 = vmin.f32 %v5552_v2, %v11318_v10  ;;  %v6265_v38 = vsel %vm11045_vm3, 1, %v11265_v9  ;;  %vm11062_vm9 = vcmp.gt.f32.partialorder %v6214_v23, 0.5  ;;  %vm11061_vm0 = vcmp.gt.f32.partialorder %v6217_v16, 0.5  ;;  %v6270_v58 = vld [vmem:[%s5747_s28 + $0x78] sm:$0xff] }
  0xcb   : > { %2894 = vmin.xlane.f32.xlu1 %v11304_v29  ;;  %2012 = vmin.xlane.f32.xlu0 %v11305_v40  ;;  %v6202_v29 = vsel %vm462_vm12, %v6135_v44, inf  ;;  %v6207_v40 = vsel %vm463_vm13, %v6140_v18, inf  ;;  %11314 = vst [vmem:[#allocation79_spill] sm:$0xff] %v6226_v14  ;;  %11315 = vst [vmem:[#allocation80_spill] sm:$0xff] %v6230_v13  ;;  %vm11063_vm3 = vcmp.gt.f32.partialorder %v6233_v28, 0.5  ;;  %v6295_v10 = vsel %vm462_vm12, %v6246_v57, inf }
  0xcc   : > { %v6190_v5 = vpop.xlane.xlu1 %484  ;;  %v6192_v33 = vpop.xlane.xlu0 %481  ;;  %11309 = vst [vmem:[#allocation74_spill] sm:$0xff] %v6202_v29  ;;  %11310 = vst [vmem:[#allocation75_spill] sm:$0xff] %v6207_v40  ;;  %v6306_v13 = vld [vmem:[%s5747_s28 + $0x8] sm:$0xff]  ;;  %vm11065_vm12 = vcmp.gt.f32.partialorder %v6270_v58, 0.5  ;;  %v11330_v34 = vld [vmem:[#allocation12_spill] sm:$0xff]  ;;  %v6337_v26 = vsel %vm685_vm15, %v6140_v18, inf }
  0xcd   : > { %4353 = vrsqrt.f32 %v6190_v5  ;;  %11316 = vst [vmem:[#allocation81_spill] sm:$0xff] %v6241_v7  ;;  %11320 = vst [vmem:[#allocation10_spill] sm:$0xff] %v6265_v38  ;;  %v6290_v7 = vsel %vm11053_vm11, 1, %v11265_v9  ;;  %v11329_v14 = vld [vmem:[#allocation11_spill] sm:$0xff]  ;;  %v11332_v38 = vld [vmem:[#allocation13_spill] sm:$0xff]  ;;  %v6341_v4 = vsel %vm684_vm14, %v2977_v19, inf }
  0xce   : > { %4355 = vrsqrt.f32 %v6192_v33  ;;  %11321 = vst [vmem:[#allocation82_spill] sm:$0xff] %v6270_v58  ;;  %11323 = vst [vmem:[#allocation84_spill] sm:$0xff] %v6290_v7  ;;  %v6312_v7 = vsel %vm684_vm14, %v6112_v43, inf  ;;  %v11331_v31 = vmin.f32 %v11329_v14, %v11330_v34  ;;  %v11333_v40 = vld [vmem:[#allocation14_spill] sm:$0xff]  ;;  %v6332_v43 = vsel %vm684_vm14, %v6135_v44, inf }
  0xcf   : > { %3107 = vmin.xlane.f32.xlu1 %v11317_v61  ;;  %2018 = vmin.xlane.f32.xlu0 %v11319_v30  ;;  %v6281_v61 = vsel %vm11054_vm2, 1, %v11265_v9  ;;  %11324 = vst [vmem:[#allocation85_spill] sm:$0xff] %v6295_v10  ;;  %v6303_v30 = vld [vmem:[%s5747_s28] sm:$0xff]  ;;  %11326 = vst [vmem:[#allocation87_spill] sm:$0xff] %v6312_v7  ;;  %v11334_v29 = vmin.f32 %v11332_v38, %v11333_v40  ;;  %v6345_v14 = vsel %vm685_vm15, %v2978_v0, inf  ;;  %v6356_v18 = vsel %vm11055_vm7, 1, %v11265_v9 }
  0xd0   : > { %v6272_v62 = vpop.xlane.xlu1 %493  ;;  %v6274_v2 = vpop.xlane.xlu0 %487  ;;  %11322 = vst [vmem:[#allocation83_spill] sm:$0xff] %v6281_v61  ;;  %v6300_v61 = vsel %vm463_vm13, %v6251_v53, inf  ;;  %11335 = vst [vmem:[#allocation11_spill] sm:$0xff] %v6332_v43  ;;  %v6360_v19 = vsel %vm684_vm14, %v2981_v25, inf  ;;  %v6364_v0 = vsel %vm685_vm15, %v2982_v17, inf  ;;  %vm360_vm13 = vcmp.gt.f32.partialorder %v6303_v30, 0.5 }
  0xd1   : > { %4357 = vrsqrt.f32 %v6272_v62  ;;  %11325 = vst [vmem:[#allocation86_spill] sm:$0xff] %v6300_v61  ;;  %11336 = vst [vmem:[#allocation12_spill] sm:$0xff] %v6337_v26  ;;  %vm11079_vm11 = vcmp.gt.f32.partialorder %v6306_v13, 0.5  ;;  %vm568_vm2 = vcmask 7168   ;;  %vm11078_vm7 = vcmp.gt.f32.partialorder %v6321_v54, 0.5  ;;  %v6378_v25 = vld [vmem:[%s5747_s28 + $0x150] sm:$0xff] }
  0xd2   : > { %4359 = vrsqrt.f32 %v6274_v2  ;;  %11337 = vst [vmem:[#allocation13_spill] sm:$0xff] %v6341_v4  ;;  %11338 = vst [vmem:[#allocation14_spill] sm:$0xff] %v6345_v14  ;;  %v6386_v40 = vsel %vm11061_vm0, 1, %v11265_v9  ;;  %v6391_v44 = vld [vmem:[%s5747_s28 + $0x20] sm:$0xff]  ;;  %v11345_v7 = vld [vmem:[#allocation16_spill] sm:$0xff]  ;;  %v6402_v17 = vsel %vm11063_vm3, 1, %v11265_v9 }
  0xd3   : > { %3116 = vmin.xlane.f32.xlu1 %v11331_v31  ;;  %2021 = vmin.xlane.f32.xlu0 %v11334_v29  ;;  %11339 = vst [vmem:[#allocation90_spill] sm:$0xff] %v6356_v18  ;;  %11340 = vst [vmem:[#allocation91_spill] sm:$0xff] %v6360_v19  ;;  %v6374_v29 = vsel %vm11062_vm9, 1, %v11265_v9  ;;  %v11346_v18 = vmin.f32 %v11344_v47, %v11345_v7  ;;  %v11347_v61 = vld [vmem:[#allocation17_spill] sm:$0xff]  ;;  %v11348_v10 = vld [vmem:[#allocation18_spill] sm:$0xff]  ;;  %vm506_vm0 = vcmp.eq.f32.partialorder %v6192_v33, inf }
  0xd4   : > { %v6347_v38 = vpop.xlane.xlu1 %499  ;;  %v6349_v31 = vpop.xlane.xlu0 %490  ;;  %11341 = vst [vmem:[#allocation92_spill] sm:$0xff] %v6364_v0  ;;  %11342 = vst [vmem:[#allocation93_spill] sm:$0xff] %v6374_v29  ;;  %v11349_v23 = vmin.f32 %v11347_v61, %v11348_v10  ;;  %vm508_vm9 = vcmp.eq.f32.partialorder %v6192_v33, 0.0  ;;  %vm11080_vm3 = vcmp.gt.f32.partialorder %v6378_v25, 0.5  ;;  %v509_v10 = vand.u32 2147483648, %v6192_v33  ;;  %v11354_v0 = vld [vmem:[#allocation19_spill] sm:$0xff] }
  0xd5   : > { %4361 = vrsqrt.f32 %v6347_v38  ;;  %11343 = vst [vmem:[#allocation94_spill] sm:$0xff] %v6386_v40  ;;  %11350 = vst [vmem:[#allocation15_spill] sm:$0xff] %v6402_v17  ;;  %vm513_vm1 = vcmp.eq.f32.partialorder %v6190_v5, inf  ;;  %v6430_v40 = vsel %vm685_vm15, %v6251_v53, inf  ;;  %vm364_vm8 = vcmp.gt.f32.partialorder %v6391_v44, 0.5  ;;  %v11357_v19 = vld [vmem:[#allocation21_spill] sm:$0xff] }
  0xd6   : > { %4363 = vrsqrt.f32 %v6349_v31  ;;  %11353 = vst [vmem:[#allocation18_spill] sm:$0xff] %v6430_v40  ;;  %vm520_vm10 = vcmp.eq.f32.partialorder %v6274_v2, inf  ;;  %v11356_v53 = vmin.f32 %v11354_v0, %v11355_v12  ;;  %v11358_v17 = vld [vmem:[#allocation22_spill] sm:$0xff]  ;;  %v523_v4 = vand.u32 2147483648, %v6274_v2  ;;  %v11363_v40 = vld [vmem:[#allocation24_spill] sm:$0xff] }
  0xd7   : > { %v4354_v29 = vpop.eup %4353  ;;  %3122 = vmin.xlane.f32.xlu1 %v11346_v18  ;;  %2027 = vmin.xlane.f32.xlu0 %v11349_v23  ;;  %v6415_v23 = vsel %vm11065_vm12, 1, %v11265_v9  ;;  %v6425_v18 = vsel %vm684_vm14, %v6246_v57, inf  ;;  %vm515_vm12 = vcmp.eq.f32.partialorder %v6190_v5, 0.0  ;;  %v516_v57 = vand.u32 2147483648, %v6190_v5 }
  0xd8   : > { %v4356_v34 = vpop.eup %4355  ;;  %v6408_v7 = vpop.xlane.xlu1 %706  ;;  %11351 = vst [vmem:[#allocation16_spill] sm:$0xff] %v6415_v23  ;;  %v512_v61 = vmul.f32 %v4354_v29, %v6190_v5  ;;  %11352 = vst [vmem:[#allocation17_spill] sm:$0xff] %v6425_v18  ;;  %v6435_v23 = vld [vmem:[%s5747_s28 + $0x30] sm:$0xff]  ;;  %v11359_v14 = vmin.f32 %v11357_v19, %v11358_v17  ;;  %vm522_vm14 = vcmp.eq.f32.partialorder %v6274_v2, 0.0  ;;  %vm534_vm15 = vcmp.eq.f32.partialorder %v6272_v62, inf  ;;  %v6460_v19 = vld [vmem:[%s5747_s28 + $0x158] sm:$0xff] }
  0xd9   : > { %v6410_v47 = vpop.xlane.xlu0 %496  ;;  %4365 = vrsqrt.f32 %v6408_v7  ;;  %v505_v11 = vmul.f32 %v4356_v34, %v6192_v33  ;;  %v11364_v18 = vld [vmem:[#allocation25_spill] sm:$0xff]  ;;  %v551_v35 = vand.u32 2147483648, %v6347_v38  ;;  %v738_v41 = vand.u32 2147483648, %v6408_v7 }
  0xda   : > { %4367 = vrsqrt.f32 %v6410_v47  ;;  %v514_v34 = vsel %vm513_vm1, %v6190_v5, %v512_v61  ;;  %vm366_vm1 = vcmp.gt.f32.partialorder %v6435_v23, 0.5  ;;  %v6485_v5 = vld [vmem:[%s5747_s28 + $0x108] sm:$0xff]  ;;  %v11365_v54 = vmin.f32 %v11363_v40, %v11364_v18  ;;  %v6871_v23 = vld [vmem:[%s5747_s28 + $0x358] sm:$0xff] }
  0xdb   : > { %v4358_v29 = vpop.eup %4357  ;;  %3319 = vmin.xlane.f32.xlu1 %v11356_v53  ;;  %2033 = vmin.xlane.f32.xlu0 %v11359_v14  ;;  %v507_v17 = vsel %vm506_vm0, %v6192_v33, %v505_v11  ;;  %v517_v61 = vsel %vm515_vm12, %v516_v57, %v514_v34  ;;  %v6481_v11 = vsel %vm11078_vm7, 1, %v11265_v9  ;;  %vm536_vm0 = vcmp.eq.f32.partialorder %v6272_v62, 0.0  ;;  %v6490_v57 = vld [vmem:[%s5747_s28 + $0x168] sm:$0xff] }
  0xdc   : > { %v4360_v26 = vpop.eup %4359  ;;  %v6453_v43 = vpop.xlane.xlu1 %715  ;;  %v533_v12 = vmul.f32 %v4358_v29, %v6272_v62  ;;  %11360 = vst [vmem:[#allocation19_spill] sm:$0xff] %v6481_v11  ;;  %vm527_vm12 = vcmp.eq.f32.partialorder %v6349_v31, inf  ;;  %v510_v29 = vsel %vm508_vm9, %v509_v10, %v507_v17  ;;  %v11361_v14 = vld [vmem:[#allocation23_spill] sm:$0xff]  ;;  %vm529_vm7 = vcmp.eq.f32.partialorder %v6349_v31, 0.0 }
  0xdd   : > { %v6455_v0 = vpop.xlane.xlu0 %502  ;;  %4369 = vrsqrt.f32 %v6453_v43  ;;  %v519_v53 = vmul.f32 %v4360_v26, %v6274_v2  ;;  %v537_v26 = vand.u32 2147483648, %v6272_v62  ;;  %v11362_v11 = vmin.f32 %v5677_v48, %v11361_v14 }
  0xde   : > { %4371 = vrsqrt.f32 %v6455_v0  ;;  %vm11082_vm9 = vcmp.gt.f32.partialorder %v6460_v19, 0.5  ;;  %v560_v33 = vsel %vm360_vm13, %v510_v29, inf  ;;  %v561_v48 = vsel %vm11079_vm11, %v517_v61, inf }
  0xdf   : > { %v4362_v34 = vpop.eup %4361  ;;  %3328 = vmin.xlane.f32.xlu1 %v11362_v11  ;;  %2240 = vmin.xlane.f32.xlu0 %v11365_v54  ;;  %v521_v58 = vsel %vm520_vm10, %v6274_v2, %v519_v53  ;;  %v530_v18 = vand.u32 2147483648, %v6349_v31  ;;  %569 = vst.msk [vmem:[%s6474_s6] sm:$0xff] %vm568_vm2, %v560_v33  ;;  %570 = vst.msk [vmem:[%s6474_s6 + $0x8] sm:$0xff] %vm568_vm2, %v561_v48  ;;  %v535_v17 = vsel %vm534_vm15, %v6272_v62, %v533_v12  ;;  %v6536_v2 = vld [vmem:[%s5747_s28 + $0x178] sm:$0xff]  ;;  %v6546_v12 = vld [vmem:[%s5747_s28 + $0x120] sm:$0xff] }
  0xe0   : > { %v4364_v10 = vpop.eup %4363  ;;  %v6510_v14 = vpop.xlane.xlu1 %721  ;;  %v524_v40 = vsel %vm522_vm14, %v523_v4, %v521_v58  ;;  %v547_v61 = vmul.f32 %v4362_v34, %v6347_v38  ;;  %vm587_vm10 = vcmp.gt.f32.partialorder %v6485_v5, 0.5  ;;  %v6532_v58 = vsel %vm11080_vm3, 1, %v11265_v9  ;;  %v11409_v5 = vld [vmem:[#allocation39_spill] sm:$0xff] }
  0xe1   : > { %v6512_v54 = vpop.xlane.xlu0 %703  ;;  %v562_v53 = vsel %vm362_vm4, %v524_v40, inf  ;;  %v526_v4 = vmul.f32 %v4364_v10, %v6349_v31  ;;  %vm11081_vm14 = vcmp.gt.f32.partialorder %v6490_v57, 0.5  ;;  %vm548_vm15 = vcmp.eq.f32.partialorder %v6347_v38, inf }
  0xe2   : > { %4373 = vrsqrt.f32 %v6512_v54  ;;  %571 = vst.msk [vmem:[%s6474_s6 + $0x10] sm:$0xff] %vm568_vm2, %v562_v53  ;;  %vm541_vm11 = vcmp.eq.f32.partialorder %v6410_v47, inf  ;;  %vm550_vm4 = vcmp.eq.f32.partialorder %v6347_v38, 0.0  ;;  %v11366_v29 = vmin.f32 %v5716_v46, %v5720_v49 }
  0xe3   : > { %v4366_v11 = vpop.eup %4365  ;;  %4375 = vrsqrt.f32 %v6510_v14  ;;  %v11367_v34 = vmin.f32 %v5725_v36, %v5730_v39  ;;  %v528_v33 = vsel %vm527_vm12, %v6349_v31, %v526_v4  ;;  %v538_v48 = vsel %vm536_vm0, %v537_v26, %v535_v17  ;;  %v6569_v36 = vld [vmem:[%s5747_s28 + $0x240] sm:$0xff] }
  0xe4   : > { %3334 = vmin.xlane.f32.xlu1 %v11366_v29  ;;  %v549_v10 = vsel %vm548_vm15, %v6347_v38, %v547_v61  ;;  %v4368_v40 = vpop.eup %4367  ;;  %v6561_v53 = vpop.xlane.xlu1 %928  ;;  %v531_v49 = vsel %vm529_vm7, %v530_v18, %v528_v33  ;;  %vm11085_vm3 = vcmp.gt.f32.partialorder %v6536_v2, 0.5  ;;  %v564_v39 = vsel %vm364_vm8, %v538_v48, inf  ;;  %v6588_v38 = vld [vmem:[%s5747_s28 + $0x250] sm:$0xff]  ;;  %v11368_v4 = vld [vmem:[#allocation26_spill] sm:$0xff] }
  0xe5   : > { %2246 = vmin.xlane.f32.xlu0 %v11367_v34  ;;  %v6563_v46 = vpop.xlane.xlu0 %709  ;;  %v552_v62 = vsel %vm550_vm4, %v551_v35, %v549_v10  ;;  %v734_v26 = vmul.f32 %v4366_v11, %v6408_v7  ;;  %v563_v17 = vsel %vm363_vm5, %v531_v49, inf  ;;  %v540_v61 = vmul.f32 %v4368_v40, %v6410_v47  ;;  %573 = vst.msk [vmem:[%s6474_s6 + $0x20] sm:$0xff] %vm568_vm2, %v564_v39 }
  0xe6   : > { %vm543_vm0 = vcmp.eq.f32.partialorder %v6410_v47, 0.0  ;;  %v544_v31 = vand.u32 2147483648, %v6410_v47  ;;  %vm11086_vm7 = vcmp.gt.f32.partialorder %v6546_v12, 0.5  ;;  %4377 = vrsqrt.f32 %v6563_v46  ;;  %572 = vst.msk [vmem:[%s6474_s6 + $0x18] sm:$0xff] %vm568_vm2, %v563_v17  ;;  %v6637_v17 = vld [vmem:[%s5747_s28 + $0x130] sm:$0xff] }
  0xe7   : > { %vm735_vm12 = vcmp.eq.f32.partialorder %v6408_v7, inf  ;;  %vm737_vm5 = vcmp.eq.f32.partialorder %v6408_v7, 0.0  ;;  %v4370_v18 = vpop.eup %4369  ;;  %4379 = vrsqrt.f32 %v6561_v53  ;;  %v11369_v35 = vmin.f32 %v5735_v52, %v11368_v4 }
  0xe8   : > { %v542_v11 = vsel %vm541_vm11, %v6410_v47, %v540_v61  ;;  %vm11083_vm15 = vcmp.gt.f32.partialorder %v6569_v36, 0.5  ;;  %v566_v29 = vsel %vm366_vm1, %v552_v62, inf  ;;  %v736_v34 = vsel %vm735_vm12, %v6408_v7, %v734_v26  ;;  %v4372_v33 = vpop.eup %4371  ;;  %v6604_v48 = vpop.xlane.xlu1 %937  ;;  %v6634_v26 = vld [vmem:[%s5747_s28 + $0x258] sm:$0xff]  ;;  %v11370_v61 = vld [vmem:[#allocation27_spill] sm:$0xff] }
  0xe9   : > { %2249 = vmin.xlane.f32.xlu0 %v11369_v35  ;;  %v6606_v10 = vpop.xlane.xlu0 %712  ;;  %v545_v52 = vsel %vm543_vm0, %v544_v31, %v542_v11  ;;  %v6613_v40 = vsel %vm11082_vm9, 1, %v11265_v9  ;;  %575 = vst.msk [vmem:[%s6474_s6 + $0x30] sm:$0xff] %vm568_vm2, %v566_v29  ;;  %v739_v49 = vsel %vm737_vm5, %v738_v41, %v736_v34  ;;  %v755_v7 = vmul.f32 %v4370_v18, %v6453_v43  ;;  %v11371_v31 = vld [vmem:[#allocation28_spill] sm:$0xff] }
  0xea   : > { %v565_v39 = vsel %vm365_vm6, %v545_v52, inf  ;;  %v554_v62 = vmul.f32 %v4372_v33, %v6455_v0  ;;  %vm555_vm11 = vcmp.eq.f32.partialorder %v6455_v0, inf  ;;  %vm11084_vm4 = vcmp.gt.f32.partialorder %v6588_v38, 0.5 }
  0xeb   : > { %4381 = vrsqrt.f32 %v6606_v10  ;;  %574 = vst.msk [vmem:[%s6474_s6 + $0x28] sm:$0xff] %vm568_vm2, %v565_v39  ;;  %vm557_vm0 = vcmp.eq.f32.partialorder %v6455_v0, 0.0  ;;  %v558_v47 = vand.u32 2147483648, %v6455_v0  ;;  %v6631_v45 = vsel %vm11081_vm14, 1, %v11265_v9 }
  0xec   : > { %v11372_v41 = vmin.f32 %v11370_v61, %v11371_v31  ;;  %v556_v18 = vsel %vm555_vm11, %v6455_v0, %v554_v62  ;;  %vm728_vm6 = vcmp.eq.f32.partialorder %v6512_v54, inf  ;;  %v783_v4 = vsel %vm587_vm10, %v739_v49, inf  ;;  %v4374_v35 = vpop.eup %4373  ;;  %v6647_v11 = vpop.xlane.xlu1 %943  ;;  %v11376_v61 = vld [vmem:[#allocation30_spill] sm:$0xff] }
  0xed   : > { %vm756_vm12 = vcmp.eq.f32.partialorder %v6453_v43, inf  ;;  %v6649_v29 = vpop.xlane.xlu0 %718  ;;  %v559_v34 = vsel %vm557_vm0, %v558_v47, %v556_v18  ;;  %vm730_vm5 = vcmp.eq.f32.partialorder %v6512_v54, 0.0  ;;  %v731_v33 = vand.u32 2147483648, %v6512_v54  ;;  %4145 = vst.msk [vmem:[%s6474_s6 + $0x108] sm:$0xff] %vm568_vm2, %v783_v4  ;;  %v4376_v52 = vpop.eup %4375  ;;  %v6685_v4 = vld [vmem:[%s5747_s28 + $0x268] sm:$0xff] }
  0xee   : > { %2255 = vmin.xlane.f32.xlu0 %v11372_v41  ;;  %v757_v0 = vsel %vm756_vm12, %v6453_v43, %v755_v7  ;;  %vm11373_vm11 = vcmp.gt.f32.partialorder %v5832_v51, 0.5  ;;  %v727_v39 = vmul.f32 %v4374_v35, %v6512_v54  ;;  %v6662_v62 = vsel %vm11085_vm3, 1, %v11265_v9  ;;  %v6674_v51 = vld [vmem:[%s5747_s28 + $0x208] sm:$0xff]  ;;  %v11375_v7 = vld [vmem:[#allocation29_spill] sm:$0xff] }
  0xef   : > { %v567_v49 = vsel %vm11373_vm11, %v559_v34, inf  ;;  %11374 = vst [vmem:[#allocation20_spill] sm:$0xff] %v6662_v62  ;;  %vm11087_vm0 = vcmp.gt.f32.partialorder %v6634_v26, 0.5  ;;  %v759_v47 = vand.u32 2147483648, %v6453_v43  ;;  %vm592_vm14 = vcmp.gt.f32.partialorder %v6637_v17, 0.5  ;;  %v7006_v17 = vld [vmem:[%s5747_s28 + $0x378] sm:$0xff] }
  0xf0   : > { %4383 = vrsqrt.f32 %v6649_v29  ;;  %576 = vst.msk [vmem:[%s6474_s6 + $0x38] sm:$0xff] %vm568_vm2, %v567_v49  ;;  %vm742_vm12 = vcmp.eq.f32.partialorder %v6563_v46, inf  ;;  %vm744_vm11 = vcmp.eq.f32.partialorder %v6563_v46, 0.0  ;;  %vm758_vm9 = vcmp.eq.f32.partialorder %v6453_v43, 0.0  ;;  %v4378_v43 = vpop.eup %4377  ;;  %v6687_v34 = vpop.xlane.xlu1 %1150 }
  0xf1   : > { %4385 = vrsqrt.f32 %v6604_v48  ;;  %v11377_v31 = vmin.f32 %v11375_v7, %v11376_v61  ;;  %v729_v41 = vsel %vm728_vm6, %v6512_v54, %v727_v39  ;;  %v745_v18 = vand.u32 2147483648, %v6563_v46  ;;  %v6689_v49 = vpop.xlane.xlu0 %724 }
  0xf2   : > { %v760_v35 = vsel %vm758_vm9, %v759_v47, %v757_v0  ;;  %v732_v7 = vsel %vm730_vm5, %v731_v33, %v729_v41  ;;  %v6696_v61 = vsel %vm11083_vm15, 1, %v11265_v9  ;;  %v769_v0 = vmul.f32 %v4376_v52, %v6510_v14  ;;  %v4380_v47 = vpop.eup %4379  ;;  %v6725_v52 = vld [vmem:[%s5747_s28 + $0x278] sm:$0xff]  ;;  %v11382_v41 = vld [vmem:[#allocation31_spill] sm:$0xff] }
  0xf3   : > { %2261 = vmin.xlane.f32.xlu0 %v11377_v31  ;;  %11378 = vst [vmem:[#allocation21_spill] sm:$0xff] %v6696_v61  ;;  %v786_v39 = vsel %vm11086_vm7, %v760_v35, inf  ;;  %vm11379_vm9 = vcmp.gt.f32.partialorder %v5855_v15, 0.5  ;;  %v741_v62 = vmul.f32 %v4378_v43, %v6563_v46  ;;  %vm749_vm6 = vcmp.eq.f32.partialorder %v6606_v10, inf  ;;  %v11383_v35 = vld [vmem:[#allocation32_spill] sm:$0xff] }
  0xf4   : > { %v782_v31 = vsel %vm11379_vm9, %v732_v7, inf  ;;  %vm751_vm5 = vcmp.eq.f32.partialorder %v6606_v10, 0.0  ;;  %4148 = vst.msk [vmem:[%s6474_s6 + $0x120] sm:$0xff] %vm568_vm2, %v786_v39  ;;  %vm809_vm15 = vcmp.gt.f32.partialorder %v6674_v51, 0.5  ;;  %4387 = vrsqrt.f32 %v6689_v49  ;;  %v6737_v39 = vpop.xlane.xlu1 %1159  ;;  %v7042_v51 = vld [vmem:[%s5747_s28 + $0x330] sm:$0xff] }
  0xf5   : > { %4144 = vst.msk [vmem:[%s6474_s6 + $0x100] sm:$0xff] %vm568_vm2, %v782_v31  ;;  %v752_v54 = vand.u32 2147483648, %v6606_v10  ;;  %v6716_v15 = vsel %vm360_vm13, 1, %v11265_v9  ;;  %v6721_v33 = vsel %vm11084_vm4, 1, %v11265_v9  ;;  %vm1696_vm9 = vcmp.gt.f32.partialorder %v6685_v4, 0.5  ;;  %v4382_v7 = vpop.eup %4381  ;;  %383 = vperm.xlu1 %4350, %v5866_v1   ;;  %v6739_v31 = vpop.xlane.xlu0 %925 }
  0xf6   : > { %11380 = vst [vmem:[#allocation22_spill] sm:$0xff] %v6716_v15  ;;  %11381 = vst [vmem:[#allocation23_spill] sm:$0xff] %v6721_v33  ;;  %4389 = vrsqrt.f32 %v6647_v11  ;;  %v11384_v43 = vmin.f32 %v11382_v41, %v11383_v35  ;;  %v743_v30 = vsel %vm742_vm12, %v6563_v46, %v741_v62  ;;  %vm763_vm13 = vcmp.eq.f32.partialorder %v6649_v29, inf }
  0xf7   : > { %vm770_vm4 = vcmp.eq.f32.partialorder %v6510_v14, inf  ;;  %v746_v41 = vsel %vm744_vm11, %v745_v18, %v743_v30  ;;  %vm765_vm3 = vcmp.eq.f32.partialorder %v6649_v29, 0.0  ;;  %v956_v35 = vmul.f32 %v4380_v47, %v6561_v53  ;;  %v6766_v18 = vld [vmem:[%s5747_s28 + $0x340] sm:$0xff]  ;;  %v11389_v47 = vld [vmem:[#allocation33_spill] sm:$0xff] }
  0xf8   : > { %2452 = vmin.xlane.f32.xlu0 %v11384_v43  ;;  %v771_v62 = vsel %vm770_vm4, %v6510_v14, %v769_v0  ;;  %vm11385_vm12 = vcmp.gt.f32.partialorder %v5873_v42, 0.5  ;;  %v748_v1 = vmul.f32 %v4382_v7, %v6606_v10  ;;  %v766_v33 = vand.u32 2147483648, %v6649_v29  ;;  %v6770_v0 = vld [vmem:[%s5747_s28 + $0x220] sm:$0xff] }
  0xf9   : > { %v784_v43 = vsel %vm11385_vm12, %v746_v41, inf  ;;  %vm11088_vm7 = vcmp.gt.f32.partialorder %v6725_v52, 0.5  ;;  %v773_v15 = vand.u32 2147483648, %v6510_v14  ;;  %4391 = vrsqrt.f32 %v6739_v31  ;;  %v11390_v30 = vld [vmem:[#allocation34_spill] sm:$0xff] }
  0xfa   : > { %4146 = vst.msk [vmem:[%s6474_s6 + $0x110] sm:$0xff] %vm568_vm2, %v784_v43  ;;  %vm11386_vm4 = vcmp.gt.f32.partialorder %v6306_v13, 0.5  ;;  %v6763_v42 = vsel %vm11087_vm0, 1, %v11265_v9  ;;  %vm772_vm11 = vcmp.eq.f32.partialorder %v6510_v14, 0.0  ;;  %4393 = vrsqrt.f32 %v6687_v34  ;;  %v4384_v43 = vpop.eup %4383  ;;  %v6781_v14 = vpop.xlane.xlu1 %1165 }
  0xfb   : > { %v6758_v46 = vsel %vm11386_vm4, 1, %v11265_v9  ;;  %11388 = vst [vmem:[#allocation25_spill] sm:$0xff] %v6763_v42  ;;  %v11391_v7 = vmin.f32 %v11389_v47, %v11390_v30  ;;  %v750_v13 = vsel %vm749_vm6, %v6606_v10, %v748_v1  ;;  %v774_v41 = vsel %vm772_vm11, %v773_v15, %v771_v62  ;;  %v11392_v42 = vld [vmem:[#allocation41_spill] sm:$0xff]  ;;  %v4386_v62 = vpop.eup %4385 }
  0xfc   : > { %11387 = vst [vmem:[#allocation24_spill] sm:$0xff] %v6758_v46  ;;  %vm957_vm12 = vcmp.eq.f32.partialorder %v6561_v53, inf  ;;  %386 = vperm.xlu1 %4350, %v11392_v42   ;;  %v6783_v46 = vpop.xlane.xlu0 %931  ;;  %v753_v47 = vsel %vm751_vm5, %v752_v54, %v750_v13  ;;  %vm777_vm4 = vcmp.eq.f32.partialorder %v6689_v49, inf  ;;  %v788_v1 = vsel %vm592_vm14, %v774_v41, inf  ;;  %v11396_v13 = vld [vmem:[#allocation36_spill] sm:$0xff] }
  0xfd   : > { %2458 = vmin.xlane.f32.xlu0 %v11391_v7  ;;  %v958_v15 = vsel %vm957_vm12, %v6561_v53, %v956_v35  ;;  %vm11393_vm6 = vcmp.gt.f32.partialorder %v5876_v59, 0.5  ;;  %v762_v30 = vmul.f32 %v4384_v43, %v6649_v29  ;;  %vm779_vm11 = vcmp.eq.f32.partialorder %v6689_v49, 0.0  ;;  %4150 = vst.msk [vmem:[%s6474_s6 + $0x130] sm:$0xff] %vm568_vm2, %v788_v1  ;;  %v6811_v35 = vld [vmem:[%s5747_s28 + $0x230] sm:$0xff]  ;;  %v11395_v7 = vld [vmem:[#allocation35_spill] sm:$0xff] }
  0xfe   : > { %v785_v42 = vsel %vm11393_vm6, %v753_v47, inf  ;;  %vm1903_vm0 = vcmp.gt.f32.partialorder %v6766_v18, 0.5  ;;  %v960_v10 = vand.u32 2147483648, %v6561_v53  ;;  %vm812_vm5 = vcmp.gt.f32.partialorder %v6770_v0, 0.5  ;;  %v6826_v47 = vld [vmem:[%s5747_s28 + $0x350] sm:$0xff]  ;;  %v4388_v1 = vpop.eup %4387 }
  0xff   : > { %4395 = vrsqrt.f32 %v6783_v46  ;;  %4147 = vst.msk [vmem:[%s6474_s6 + $0x118] sm:$0xff] %vm568_vm2, %v785_v42  ;;  %v780_v59 = vand.u32 2147483648, %v6689_v49  ;;  %v6807_v54 = vsel %vm364_vm8, 1, %v11265_v9  ;;  %vm959_vm12 = vcmp.eq.f32.partialorder %v6561_v53, 0.0  ;;  %v11399_v42 = vld [vmem:[#allocation42_spill] sm:$0xff] }
 0x100   : > { %11394 = vst [vmem:[#allocation26_spill] sm:$0xff] %v6807_v54  ;;  %4397 = vrsqrt.f32 %v6737_v39  ;;  %v11397_v41 = vmin.f32 %v11395_v7, %v11396_v13  ;;  %v764_v43 = vsel %vm763_vm13, %v6649_v29, %v762_v30  ;;  %v6823_v44 = vsel %vm1696_vm9, 1, %v11265_v9  ;;  %392 = vperm.xlu1 %4350, %v11399_v42   ;;  %v6829_v54 = vpop.xlane.xlu1 %1379  ;;  %v6831_v7 = vpop.xlane.xlu0 %934 }
 0x101   : > { %11398 = vst [vmem:[#allocation27_spill] sm:$0xff] %v6823_v44  ;;  %v961_v53 = vsel %vm959_vm12, %v960_v10, %v958_v15  ;;  %v767_v30 = vsel %vm765_vm3, %v766_v33, %v764_v43  ;;  %vm950_vm8 = vcmp.eq.f32.partialorder %v6739_v31, inf  ;;  %v4390_v44 = vpop.eup %4389  ;;  %4399 = vrsqrt.f32 %v6781_v14  ;;  %v11404_v43 = vld [vmem:[#allocation38_spill] sm:$0xff] }
 0x102   : > { %2461 = vmin.xlane.f32.xlu0 %v11397_v41  ;;  %v1005_v13 = vsel %vm809_vm15, %v961_v53, inf  ;;  %v977_v41 = vmul.f32 %v4386_v62, %v6604_v48  ;;  %vm11400_vm13 = vcmp.gt.f32.partialorder %v5892_v8, 0.5  ;;  %v776_v10 = vmul.f32 %v4388_v1, %v6689_v49  ;;  %v11403_v62 = vld [vmem:[#allocation37_spill] sm:$0xff] }
 0x103   : > { %v787_v15 = vsel %vm11400_vm13, %v767_v30, inf  ;;  %vm952_vm6 = vcmp.eq.f32.partialorder %v6739_v31, 0.0  ;;  %4161 = vst.msk [vmem:[%s6474_s6 + $0x208] sm:$0xff] %vm568_vm2, %v1005_v13  ;;  %vm814_vm3 = vcmp.gt.f32.partialorder %v6811_v35, 0.5  ;;  %4401 = vrsqrt.f32 %v6831_v7  ;;  %v4392_v42 = vpop.eup %4391  ;;  %v11406_v30 = vld [vmem:[#allocation43_spill] sm:$0xff]  ;;  %v7143_v35 = vld [vmem:[%s5747_s28 + $0x90] sm:$0xff] }
 0x104   : > { %4149 = vst.msk [vmem:[%s6474_s6 + $0x128] sm:$0xff] %vm568_vm2, %v787_v15  ;;  %v953_v29 = vand.u32 2147483648, %v6739_v31  ;;  %v6854_v8 = vsel %vm366_vm1, 1, %v11265_v9  ;;  %v6859_v33 = vsel %vm11088_vm7, 1, %v11265_v9  ;;  %vm11089_vm12 = vcmp.gt.f32.partialorder %v6826_v47, 0.5  ;;  %398 = vperm.xlu1 %4350, %v11406_v30   ;;  %v6875_v13 = vpop.xlane.xlu1 %1388  ;;  %v6877_v15 = vpop.xlane.xlu0 %940 }
 0x105   : > { %11401 = vst [vmem:[#allocation28_spill] sm:$0xff] %v6854_v8  ;;  %11402 = vst [vmem:[#allocation29_spill] sm:$0xff] %v6859_v33  ;;  %v11405_v53 = vmin.f32 %v11403_v62, %v11404_v43  ;;  %v778_v1 = vsel %vm777_vm4, %v6689_v49, %v776_v10  ;;  %vm964_vm13 = vcmp.eq.f32.partialorder %v6783_v46, inf  ;;  %vm966_vm1 = vcmp.eq.f32.partialorder %v6783_v46, 0.0  ;;  %v4394_v33 = vpop.eup %4393 }
 0x106   : > { %vm978_vm7 = vcmp.eq.f32.partialorder %v6604_v48, inf  ;;  %v781_v10 = vsel %vm779_vm11, %v780_v59, %v778_v1  ;;  %v967_v62 = vand.u32 2147483648, %v6783_v46  ;;  %vm11407_vm4 = vcmp.gt.f32.partialorder %v5905_v27, 0.5  ;;  %v6904_v27 = vld [vmem:[%s5747_s28 + $0x308] sm:$0xff] }
 0x107   : > { %2467 = vmin.xlane.f32.xlu0 %v11405_v53  ;;  %v979_v43 = vsel %vm978_vm7, %v6604_v48, %v977_v41  ;;  %v991_v53 = vmul.f32 %v4390_v44, %v6647_v11  ;;  %v789_v8 = vsel %vm11407_vm4, %v781_v10, inf  ;;  %v949_v30 = vmul.f32 %v4392_v42, %v6739_v31  ;;  %v11410_v44 = vld [vmem:[#allocation40_spill] sm:$0xff]  ;;  %v11412_v10 = vld [vmem:[#allocation46_spill] sm:$0xff] }
 0x108   : > { %v6890_v61 = vsel %vm587_vm10, 1, %v11265_v9  ;;  %v981_v49 = vand.u32 2147483648, %v6604_v48  ;;  %4403 = vrsqrt.f32 %v6877_v15  ;;  %4151 = vst.msk [vmem:[%s6474_s6 + $0x138] sm:$0xff] %vm568_vm2, %v789_v8  ;;  %v6899_v59 = vsel %vm1903_vm0, 1, %v11265_v9  ;;  %603 = vperm.xlu1 %4350, %v11412_v10  }
 0x109   : > { %11408 = vst [vmem:[#allocation30_spill] sm:$0xff] %v6899_v59  ;;  %vm11091_vm7 = vcmp.gt.f32.partialorder %v6871_v23, 0.5  ;;  %vm980_vm11 = vcmp.eq.f32.partialorder %v6604_v48, 0.0  ;;  %4405 = vrsqrt.f32 %v6829_v54  ;;  %v11411_v41 = vmin.f32 %v11409_v5, %v11410_v44  ;;  %v4396_v42 = vpop.eup %4395  ;;  %v6915_v48 = vpop.xlane.xlu1 %1394  ;;  %v6923_v44 = vld [vmem:[%s5747_s28 + $0x368] sm:$0xff] }
 0x10a   : > { %v951_v8 = vsel %vm950_vm8, %v6739_v31, %v949_v30  ;;  %v982_v1 = vsel %vm980_vm11, %v981_v49, %v979_v43  ;;  %vm992_vm10 = vcmp.eq.f32.partialorder %v6647_v11, inf  ;;  %v6917_v59 = vpop.xlane.xlu0 %946  ;;  %vm971_vm4 = vcmp.eq.f32.partialorder %v6831_v7, inf  ;;  %v6928_v49 = vpop.eup %4397 }
 0x10b   : > { %2473 = vmin.xlane.f32.xlu0 %v11411_v41  ;;  %v954_v5 = vsel %vm952_vm6, %v953_v29, %v951_v8  ;;  %v1008_v43 = vsel %vm812_vm5, %v982_v1, inf  ;;  %v993_v30 = vsel %vm992_vm10, %v6647_v11, %v991_v53  ;;  %vm11413_vm8 = vcmp.gt.f32.partialorder %v5908_v24, 0.5  ;;  %v6948_v53 = vpop.eup %4399  ;;  %v11415_v8 = vld [vmem:[#allocation44_spill] sm:$0xff]  ;;  %v11416_v1 = vld [vmem:[#allocation45_spill] sm:$0xff] }
 0x10c   : > { %v1004_v41 = vsel %vm11413_vm8, %v954_v5, inf  ;;  %v963_v10 = vmul.f32 %v4396_v42, %v6783_v46  ;;  %vm973_vm11 = vcmp.eq.f32.partialorder %v6831_v7, 0.0  ;;  %4164 = vst.msk [vmem:[%s6474_s6 + $0x220] sm:$0xff] %vm568_vm2, %v1008_v43  ;;  %v995_v31 = vand.u32 2147483648, %v6647_v11 }
 0x10d   : > { %vm1031_vm6 = vcmp.gt.f32.partialorder %v6904_v27, 0.5  ;;  %4407 = vrsqrt.f32 %v6917_v59  ;;  %4160 = vst.msk [vmem:[%s6474_s6 + $0x200] sm:$0xff] %vm568_vm2, %v1004_v41  ;;  %v974_v29 = vand.u32 2147483648, %v6831_v7  ;;  %vm11414_vm10 = vcmp.gt.f32.partialorder %v6546_v12, 0.5  ;;  %v11419_v41 = vld [vmem:[#allocation48_spill] sm:$0xff] }
 0x10e   : > { %v6945_v24 = vsel %vm11414_vm10, 1, %v11265_v9  ;;  %vm994_vm8 = vcmp.eq.f32.partialorder %v6647_v11, 0.0  ;;  %v11417_v42 = vmin.f32 %v11415_v8, %v11416_v1  ;;  %v965_v5 = vsel %vm964_vm13, %v6783_v46, %v963_v10  ;;  %v4402_v11 = vpop.eup %4401  ;;  %609 = vperm.xlu1 %4350, %v11419_v41   ;;  %v6964_v8 = vpop.xlane.xlu1 %1591 }
 0x10f   : > { %v6959_v43 = vsel %vm11089_vm12, 1, %v11265_v9  ;;  %vm11090_vm10 = vcmp.gt.f32.partialorder %v6923_v44, 0.5  ;;  %v996_v12 = vsel %vm994_vm8, %v995_v31, %v993_v30  ;;  %4409 = vrsqrt.f32 %v6875_v13  ;;  %v6966_v1 = vpop.xlane.xlu0 %1147 }
 0x110   : > { %2664 = vmin.xlane.f32.xlu0 %v11417_v42  ;;  %11418 = vst [vmem:[#allocation31_spill] sm:$0xff] %v6959_v43  ;;  %v968_v10 = vsel %vm966_vm1, %v967_v62, %v965_v5  ;;  %v1010_v42 = vsel %vm814_vm3, %v996_v12, inf  ;;  %v1178_v43 = vmul.f32 %v4394_v33, %v6687_v34  ;;  %vm11420_vm13 = vcmp.gt.f32.partialorder %v5945_v21, 0.5  ;;  %v6995_v62 = vld [vmem:[%s5747_s28 + $0x320] sm:$0xff]  ;;  %v11421_v5 = vld [vmem:[#allocation47_spill] sm:$0xff] }
 0x111   : > { %v1006_v30 = vsel %vm11420_vm13, %v968_v10, inf  ;;  %v970_v31 = vmul.f32 %v4402_v11, %v6831_v7  ;;  %vm985_vm8 = vcmp.eq.f32.partialorder %v6877_v15, inf  ;;  %vm987_vm12 = vcmp.eq.f32.partialorder %v6877_v15, 0.0  ;;  %4166 = vst.msk [vmem:[%s6474_s6 + $0x230] sm:$0xff] %vm568_vm2, %v1010_v42 }
 0x112   : > { %4411 = vrsqrt.f32 %v6966_v1  ;;  %4162 = vst.msk [vmem:[%s6474_s6 + $0x210] sm:$0xff] %vm568_vm2, %v1006_v30  ;;  %v988_v46 = vand.u32 2147483648, %v6877_v15  ;;  %v6987_v21 = vsel %vm592_vm14, 1, %v11265_v9  ;;  %v6992_v33 = vsel %vm11091_vm7, 1, %v11265_v9  ;;  %v4404_v41 = vpop.eup %4403  ;;  %612 = vperm.xlu1 %4350, %v6007_v37   ;;  %v7010_v10 = vpop.xlane.xlu1 %1600 }
 0x113   : > { %4413 = vrsqrt.f32 %v6915_v48  ;;  %v11422_v12 = vmin.f32 %v5936_v60, %v11421_v5  ;;  %v972_v11 = vsel %vm971_vm4, %v6831_v7, %v970_v31  ;;  %vm999_vm14 = vcmp.eq.f32.partialorder %v6917_v59, inf  ;;  %v7012_v42 = vpop.xlane.xlu0 %1153  ;;  %v7019_v5 = vpop.eup %4405 }
 0x114   : > { %vm1179_vm1 = vcmp.eq.f32.partialorder %v6687_v34, inf  ;;  %v975_v60 = vsel %vm973_vm11, %v974_v29, %v972_v11  ;;  %vm1001_vm4 = vcmp.eq.f32.partialorder %v6917_v59, 0.0  ;;  %v1002_v30 = vand.u32 2147483648, %v6917_v59 }
 0x115   : > { %2670 = vmin.xlane.f32.xlu0 %v11422_v12  ;;  %v1180_v31 = vsel %vm1179_vm1, %v6687_v34, %v1178_v43  ;;  %vm11423_vm13 = vcmp.gt.f32.partialorder %v5960_v6, 0.5  ;;  %v984_v12 = vmul.f32 %v4404_v41, %v6877_v15  ;;  %v7027_v7 = vsel %vm809_vm15, 1, %v11265_v9  ;;  %v7053_v41 = vld [vmem:[%s5747_s28 + $0x80] sm:$0xff] }
 0x116   : > { %v1007_v37 = vsel %vm11423_vm13, %v975_v60, inf  ;;  %11424 = vst [vmem:[#allocation32_spill] sm:$0xff] %v7027_v7  ;;  %v1182_v29 = vand.u32 2147483648, %v6687_v34  ;;  %vm1034_vm11 = vcmp.gt.f32.partialorder %v6995_v62, 0.5  ;;  %4415 = vrsqrt.f32 %v7012_v42  ;;  %618 = vperm.xlu1 %4350, %v6014_v20  }
 0x117   : > { %4163 = vst.msk [vmem:[%s6474_s6 + $0x218] sm:$0xff] %vm568_vm2, %v1007_v37  ;;  %v7037_v6 = vsel %vm11090_vm10, 1, %v11265_v9  ;;  %vm1910_vm1 = vcmp.gt.f32.partialorder %v7006_v17, 0.5  ;;  %vm1181_vm13 = vcmp.eq.f32.partialorder %v6687_v34, 0.0  ;;  %4417 = vrsqrt.f32 %v6964_v8  ;;  %v4408_v37 = vpop.eup %4407  ;;  %v7056_v34 = vpop.xlane.xlu1 %1606 }
 0x118   : > { %11425 = vst [vmem:[#allocation33_spill] sm:$0xff] %v7037_v6  ;;  %v11426_v43 = vmin.f32 %v5950_v50, %v5955_v3  ;;  %v986_v11 = vsel %vm985_vm8, %v6877_v15, %v984_v12  ;;  %vm1172_vm15 = vcmp.eq.f32.partialorder %v6966_v1, inf  ;;  %v1183_v60 = vsel %vm1181_vm13, %v1182_v29, %v1180_v31  ;;  %v7058_v6 = vpop.xlane.xlu0 %1156 }
 0x119   : > { %v989_v50 = vsel %vm987_vm12, %v988_v46, %v986_v11  ;;  %vm1174_vm10 = vcmp.eq.f32.partialorder %v6966_v1, 0.0  ;;  %v1227_v3 = vsel %vm1031_vm6, %v1183_v60, inf  ;;  %v1199_v12 = vmul.f32 %v6928_v49, %v6737_v39  ;;  %v7075_v15 = vpop.eup %4409  ;;  %v11430_v46 = vld [vmem:[#allocation49_spill] sm:$0xff] }
 0x11a   : > { %2673 = vmin.xlane.f32.xlu0 %v11426_v43  ;;  %4419 = vrsqrt.f32 %v7010_v10  ;;  %vm11427_vm8 = vcmp.gt.f32.partialorder %v5980_v56, 0.5  ;;  %v998_v31 = vmul.f32 %v4408_v37, %v6917_v59  ;;  %v1175_v29 = vand.u32 2147483648, %v6966_v1  ;;  %4177 = vst.msk [vmem:[%s6474_s6 + $0x308] sm:$0xff] %vm568_vm2, %v1227_v3  ;;  %v11432_v60 = vld [vmem:[#allocation53_spill] sm:$0xff] }
 0x11b   : > { %v1009_v20 = vsel %vm11427_vm8, %v989_v50, inf  ;;  %vm1036_vm12 = vcmp.gt.f32.partialorder %v7042_v51, 0.5  ;;  %4421 = vrsqrt.f32 %v7058_v6  ;;  %v7083_v49 = vsel %vm812_vm5, 1, %v11265_v9  ;;  %624 = vperm.xlu1 %4350, %v11432_v60   ;;  %v7101_v37 = vpop.xlane.xlu1 %1803 }
 0x11c   : > { %4165 = vst.msk [vmem:[%s6474_s6 + $0x228] sm:$0xff] %vm568_vm2, %v1009_v20  ;;  %11428 = vst [vmem:[#allocation34_spill] sm:$0xff] %v7083_v49  ;;  %v7088_v56 = vsel %vm1910_vm1, 1, %v11265_v9  ;;  %vm2131_vm13 = vcmp.gt.f32.partialorder %v7053_v41, 0.5  ;;  %v11431_v43 = vmin.f32 %v5972_v22, %v11430_v46  ;;  %v1000_v11 = vsel %vm999_vm14, %v6917_v59, %v998_v31  ;;  %v4412_v0 = vpop.eup %4411  ;;  %v7103_v50 = vpop.xlane.xlu0 %1162  ;;  %v8242_v41 = vld [vmem:[%s5747_s28 + $0x3b8] sm:$0xff] }
 0x11d   : > { %11429 = vst [vmem:[#allocation41_spill] sm:$0xff] %v7088_v56  ;;  %vm1186_vm8 = vcmp.eq.f32.partialorder %v7012_v42, inf  ;;  %vm1188_vm5 = vcmp.eq.f32.partialorder %v7012_v42, 0.0  ;;  %vm1200_vm7 = vcmp.eq.f32.partialorder %v6737_v39, inf  ;;  %v1003_v22 = vsel %vm1001_vm4, %v1002_v30, %v1000_v11  ;;  %v7111_v46 = vpop.eup %4413  ;;  %v7119_v30 = vld [vmem:[%s5747_s28 + $0x48] sm:$0xff] }
 0x11e   : > { %2679 = vmin.xlane.f32.xlu0 %v11431_v43  ;;  %v1189_v3 = vand.u32 2147483648, %v7012_v42  ;;  %v1201_v20 = vsel %vm1200_vm7, %v6737_v39, %v1199_v12  ;;  %v1213_v31 = vmul.f32 %v6948_v53, %v6781_v14  ;;  %4423 = vrsqrt.f32 %v7056_v34  ;;  %v11433_v43 = vld [vmem:[#allocation50_spill] sm:$0xff]  ;;  %v11437_v11 = vld [vmem:[#allocation51_spill] sm:$0xff] }
 0x11f   : > { %vm11434_vm14 = vcmp.gt.f32.partialorder %v11433_v43, 0.5  ;;  %v1171_v56 = vmul.f32 %v4412_v0, %v6966_v1  ;;  %v1203_v59 = vand.u32 2147483648, %v6737_v39  ;;  %4425 = vrsqrt.f32 %v7103_v50  ;;  %v11438_v0 = vld [vmem:[#allocation52_spill] sm:$0xff] }
 0x120   : > { %v1011_v60 = vsel %vm11434_vm14, %v1003_v22, inf  ;;  %v7127_v53 = vsel %vm814_vm3, 1, %v11265_v9  ;;  %v7132_v12 = vsel %vm2131_vm13, 1, %v11265_v9  ;;  %vm1202_vm7 = vcmp.eq.f32.partialorder %v6737_v39, 0.0  ;;  %v7147_v39 = vpop.xlane.xlu1 %1812 }
 0x121   : > { %4167 = vst.msk [vmem:[%s6474_s6 + $0x238] sm:$0xff] %vm568_vm2, %v1011_v60  ;;  %11435 = vst [vmem:[#allocation35_spill] sm:$0xff] %v7127_v53  ;;  %v11439_v22 = vmin.f32 %v11437_v11, %v11438_v0  ;;  %v1173_v43 = vsel %vm1172_vm15, %v6966_v1, %v1171_v56  ;;  %vm1193_vm4 = vcmp.eq.f32.partialorder %v7058_v6, inf  ;;  %v1204_v60 = vsel %vm1202_vm7, %v1203_v59, %v1201_v20  ;;  %v11440_v53 = vld [vmem:[#allocation55_spill] sm:$0xff]  ;;  %v7149_v11 = vpop.xlane.xlu0 %1168 }
 0x122   : > { %11436 = vst [vmem:[#allocation36_spill] sm:$0xff] %v7132_v12  ;;  %vm1214_vm3 = vcmp.eq.f32.partialorder %v6781_v14, inf  ;;  %v4416_v12 = vpop.eup %4415  ;;  %825 = vperm.xlu1 %4350, %v11440_v53   ;;  %v1176_v56 = vsel %vm1174_vm10, %v1175_v29, %v1173_v43  ;;  %vm1195_vm15 = vcmp.eq.f32.partialorder %v7058_v6, 0.0  ;;  %v1230_v0 = vsel %vm1034_vm11, %v1204_v60, inf  ;;  %v11441_v53 = vld [vmem:[#allocation54_spill] sm:$0xff]  ;;  %v11444_v60 = vld [vmem:[#allocation56_spill] sm:$0xff] }
 0x123   : > { %2685 = vmin.xlane.f32.xlu0 %v11439_v22  ;;  %v1215_v20 = vsel %vm1214_vm3, %v6781_v14, %v1213_v31  ;;  %vm1268_vm14 = vcmp.gt.f32.partialorder %v7119_v30, 0.5  ;;  %v7158_v59 = vpop.eup %4417  ;;  %vm11442_vm7 = vcmp.gt.f32.partialorder %v11441_v53, 0.5  ;;  %v1185_v49 = vmul.f32 %v4416_v12, %v7012_v42  ;;  %4180 = vst.msk [vmem:[%s6474_s6 + $0x320] sm:$0xff] %vm568_vm2, %v1230_v0  ;;  %v7168_v43 = vld [vmem:[%s5747_s28 + $0x60] sm:$0xff] }
 0x124   : > { %v1226_v22 = vsel %vm11442_vm7, %v1176_v56, inf  ;;  %v1196_v1 = vand.u32 2147483648, %v7058_v6  ;;  %v1217_v29 = vand.u32 2147483648, %v6781_v14  ;;  %4427 = vrsqrt.f32 %v7149_v11  ;;  %v7180_v12 = vpop.eup %4419  ;;  %v11445_v56 = vld [vmem:[#allocation57_spill] sm:$0xff] }
 0x125   : > { %4176 = vst.msk [vmem:[%s6474_s6 + $0x300] sm:$0xff] %vm568_vm2, %v1226_v22  ;;  %v7176_v31 = vsel %vm1031_vm6, 1, %v11265_v9  ;;  %vm11101_vm10 = vcmp.gt.f32.partialorder %v7143_v35, 0.5  ;;  %vm1216_vm3 = vcmp.eq.f32.partialorder %v6781_v14, 0.0  ;;  %v11446_v0 = vmin.f32 %v11444_v60, %v11445_v56  ;;  %v7194_v22 = vld [vmem:[%s5747_s28 + $0x98] sm:$0xff]  ;;  %v4422_v7 = vpop.eup %4421  ;;  %v7200_v56 = vpop.xlane.xlu1 %1818 }
 0x126   : > { %11443 = vst [vmem:[#allocation42_spill] sm:$0xff] %v7176_v31  ;;  %v1187_v53 = vsel %vm1186_vm8, %v7012_v42, %v1185_v49  ;;  %v7191_v27 = vsel %vm11101_vm10, 1, %v11265_v9  ;;  %11448 = vst [vmem:[#allocation38_spill] sm:$0xff] %v7194_v22  ;;  %v1218_v31 = vsel %vm1216_vm3, %v1217_v29, %v1215_v20  ;;  %v1407_v14 = vmul.f32 %v7019_v5, %v6829_v54  ;;  %v11449_v60 = vld [vmem:[#allocation9_spill] sm:$0xff]  ;;  %v7202_v49 = vpop.xlane.xlu0 %1376  ;;  %v11450_v5 = vld [vmem:[#allocation58_spill] sm:$0xff] }
 0x127   : > { %2876 = vmin.xlane.f32.xlu0 %v11446_v0  ;;  %11447 = vst [vmem:[#allocation37_spill] sm:$0xff] %v7191_v27  ;;  %4429 = vrsqrt.f32 %v7101_v37  ;;  %831 = vperm.xlu1 %4350, %v11449_v60   ;;  %v1190_v0 = vsel %vm1188_vm5, %v1189_v3, %v1187_v53  ;;  %vm1207_vm6 = vcmp.eq.f32.partialorder %v7103_v50, inf  ;;  %v1232_v20 = vsel %vm1036_vm12, %v1218_v31, inf  ;;  %v11453_v3 = vld [vmem:[#allocation59_spill] sm:$0xff]  ;;  %v11454_v31 = vld [vmem:[#allocation60_spill] sm:$0xff] }
 0x128   : > { %vm1271_vm8 = vcmp.gt.f32.partialorder %v7168_v43, 0.5  ;;  %vm11451_vm7 = vcmp.gt.f32.partialorder %v11450_v5, 0.5  ;;  %v1192_v27 = vmul.f32 %v4422_v7, %v7058_v6  ;;  %vm1209_vm3 = vcmp.eq.f32.partialorder %v7103_v50, 0.0  ;;  %4182 = vst.msk [vmem:[%s6474_s6 + $0x330] sm:$0xff] %vm568_vm2, %v1232_v20  ;;  %v7227_v7 = vpop.eup %4423 }
 0x129   : > { %v1228_v29 = vsel %vm11451_vm7, %v1190_v0, inf  ;;  %v1210_v60 = vand.u32 2147483648, %v7103_v50  ;;  %4431 = vrsqrt.f32 %v7202_v49  ;;  %v7223_v42 = vsel %vm1034_vm11, 1, %v11265_v9  ;;  %v4426_v5 = vpop.eup %4425 }
 0x12a   : > { %4178 = vst.msk [vmem:[%s6474_s6 + $0x310] sm:$0xff] %vm568_vm2, %v1228_v29  ;;  %11452 = vst [vmem:[#allocation43_spill] sm:$0xff] %v7223_v42  ;;  %vm11092_vm5 = vcmp.gt.f32.partialorder %v7194_v22, 0.5  ;;  %vm1408_vm7 = vcmp.eq.f32.partialorder %v6829_v54, inf  ;;  %4433 = vrsqrt.f32 %v7147_v39  ;;  %v11455_v53 = vmin.f32 %v11453_v3, %v11454_v31  ;;  %v11457_v29 = vld [vmem:[#allocation68_spill] sm:$0xff]  ;;  %v7243_v42 = vpop.xlane.xlu1 %2015  ;;  %v7245_v3 = vpop.xlane.xlu0 %1382  ;;  %v11525_v22 = vld [vmem:[#allocation93_spill] sm:$0xff] }
 0x12b   : > { %v1194_v0 = vsel %vm1193_vm4, %v7058_v6, %v1192_v27  ;;  %v7239_v62 = vsel %vm11092_vm5, 1, %v11265_v9  ;;  %v1409_v20 = vsel %vm1408_vm7, %v6829_v54, %v1407_v14  ;;  %834 = vperm.xlu1 %4350, %v11457_v29   ;;  %vm1221_vm11 = vcmp.eq.f32.partialorder %v7149_v11, inf  ;;  %v7251_v27 = vld [vmem:[%s5747_s28 + $0xa8] sm:$0xff]  ;;  %v7262_v6 = vld [vmem:[%s5747_s28 + $0x70] sm:$0xff] }
 0x12c   : > { %2882 = vmin.xlane.f32.xlu0 %v11455_v53  ;;  %11456 = vst [vmem:[#allocation39_spill] sm:$0xff] %v7239_v62  ;;  %v1197_v31 = vsel %vm1195_vm15, %v1196_v1, %v1194_v0  ;;  %11458 = vst [vmem:[#allocation40_spill] sm:$0xff] %v7251_v27  ;;  %v1411_v53 = vand.u32 2147483648, %v6829_v54  ;;  %v1428_v14 = vmul.f32 %v7075_v15, %v6875_v13  ;;  %vm11459_vm4 = vcmp.gt.f32.partialorder %v6070_v63, 0.5  ;;  %v11461_v0 = vld [vmem:[#allocation61_spill] sm:$0xff] }
 0x12d   : > { %v1229_v62 = vsel %vm11459_vm4, %v1197_v31, inf  ;;  %v1206_v29 = vmul.f32 %v4426_v5, %v7103_v50  ;;  %vm1223_vm7 = vcmp.eq.f32.partialorder %v7149_v11, 0.0  ;;  %vm1410_vm5 = vcmp.eq.f32.partialorder %v6829_v54, 0.0  ;;  %v11462_v5 = vld [vmem:[#allocation62_spill] sm:$0xff] }
 0x12e   : > { %4435 = vrsqrt.f32 %v7245_v3  ;;  %4179 = vst.msk [vmem:[%s6474_s6 + $0x318] sm:$0xff] %vm568_vm2, %v1229_v62  ;;  %v1224_v1 = vand.u32 2147483648, %v7149_v11  ;;  %v7271_v63 = vsel %vm1036_vm12, 1, %v11265_v9  ;;  %v1412_v15 = vsel %vm1410_vm5, %v1411_v53, %v1409_v20  ;;  %v4428_v51 = vpop.eup %4427  ;;  %v7284_v20 = vpop.xlane.xlu1 %2024 }
 0x12f   : > { %11460 = vst [vmem:[#allocation46_spill] sm:$0xff] %v7271_v63  ;;  %v11463_v31 = vmin.f32 %v11461_v0, %v11462_v5  ;;  %v1208_v54 = vsel %vm1207_vm6, %v7103_v50, %v1206_v29  ;;  %vm11094_vm15 = vcmp.gt.f32.partialorder %v7251_v27, 0.5  ;;  %v1456_v62 = vsel %vm1268_vm14, %v1412_v15, inf  ;;  %v11464_v63 = vld [vmem:[#allocation69_spill] sm:$0xff]  ;;  %v7286_v53 = vpop.xlane.xlu0 %1385 }
 0x130   : > { %vm1429_vm4 = vcmp.eq.f32.partialorder %v6875_v13, inf  ;;  %840 = vperm.xlu1 %4350, %v11464_v63   ;;  %v1211_v29 = vsel %vm1209_vm3, %v1210_v60, %v1208_v54  ;;  %v7293_v0 = vsel %vm11094_vm15, 1, %v11265_v9  ;;  %1464 = vst.msk [vmem:[%s6474_s6 + $0x48] sm:$0xff] %vm568_vm2, %v1456_v62  ;;  %v1432_v5 = vand.u32 2147483648, %v6875_v13  ;;  %v7305_v60 = vld [vmem:[%s5747_s28 + $0xb8] sm:$0xff]  ;;  %v11469_v62 = vld [vmem:[#allocation64_spill] sm:$0xff] }
 0x131   : > { %2885 = vmin.xlane.f32.xlu0 %v11463_v31  ;;  %11465 = vst [vmem:[#allocation44_spill] sm:$0xff] %v7293_v0  ;;  %v1430_v15 = vsel %vm1429_vm4, %v6875_v13, %v1428_v14  ;;  %vm1273_vm12 = vcmp.gt.f32.partialorder %v7262_v6, 0.5  ;;  %4437 = vrsqrt.f32 %v7200_v56  ;;  %vm11466_vm6 = vcmp.gt.f32.partialorder %v6095_v55, 0.5  ;;  %11467 = vst [vmem:[#allocation45_spill] sm:$0xff] %v7305_v60  ;;  %v7309_v31 = vld [vmem:[%s5747_s28 + $0x148] sm:$0xff]  ;;  %v7311_v54 = vpop.eup %4429  ;;  %v7434_v6 = vld [vmem:[%s5747_s28 + $0x190] sm:$0xff] }
 0x132   : > { %v1231_v63 = vsel %vm11466_vm6, %v1211_v29, inf  ;;  %v1220_v50 = vmul.f32 %v4428_v51, %v7149_v11  ;;  %vm1431_vm3 = vcmp.eq.f32.partialorder %v6875_v13, 0.0  ;;  %4439 = vrsqrt.f32 %v7286_v53  ;;  %v11468_v14 = vld [vmem:[#allocation63_spill] sm:$0xff]  ;;  %11489 = vst [vmem:[#allocation52_spill] sm:$0xff] %v7434_v6 }
 0x133   : > { %4181 = vst.msk [vmem:[%s6474_s6 + $0x328] sm:$0xff] %vm568_vm2, %v1231_v63  ;;  %vm1401_vm5 = vcmp.eq.f32.partialorder %v7202_v49, inf  ;;  %vm1403_vm4 = vcmp.eq.f32.partialorder %v7202_v49, 0.0  ;;  %v1433_v55 = vsel %vm1431_vm3, %v1432_v5, %v1430_v15  ;;  %v11470_v51 = vmin.f32 %v11468_v14, %v11469_v62  ;;  %v4432_v27 = vpop.eup %4431  ;;  %v11472_v15 = vld [vmem:[#allocation70_spill] sm:$0xff]  ;;  %v7334_v5 = vpop.xlane.xlu1 %2030  ;;  %v11473_v62 = vld [vmem:[#allocation67_spill] sm:$0xff] }
 0x134   : > { %v1222_v13 = vsel %vm1221_vm11, %v7149_v11, %v1220_v50  ;;  %v1404_v29 = vand.u32 2147483648, %v7202_v49  ;;  %v7328_v63 = vsel %vm1268_vm14, 1, %v11265_v9  ;;  %v1459_v0 = vsel %vm1271_vm8, %v1433_v55, inf  ;;  %846 = vperm.xlu1 %4350, %v11472_v15   ;;  %v7336_v14 = vpop.xlane.xlu0 %1391  ;;  %v7346_v55 = vpop.eup %4433 }
 0x135   : > { %2891 = vmin.xlane.f32.xlu0 %v11470_v51  ;;  %11471 = vst [vmem:[#allocation48_spill] sm:$0xff] %v7328_v63  ;;  %4441 = vrsqrt.f32 %v7243_v42  ;;  %v1225_v50 = vsel %vm1223_vm7, %v1224_v1, %v1222_v13  ;;  %vm11100_vm11 = vcmp.gt.f32.partialorder %v7305_v60, 0.5  ;;  %1467 = vst.msk [vmem:[%s6474_s6 + $0x60] sm:$0xff] %vm568_vm2, %v1459_v0  ;;  %v1442_v30 = vmul.f32 %v7111_v46, %v6915_v48  ;;  %v11477_v1 = vld [vmem:[#allocation66_spill] sm:$0xff]  ;;  %v11481_v63 = vld [vmem:[#allocation73_spill] sm:$0xff] }
 0x136   : > { %vm1480_vm14 = vcmp.gt.f32.partialorder %v7309_v31, 0.5  ;;  %vm11474_vm6 = vcmp.gt.f32.partialorder %v11473_v62, 0.5  ;;  %v1400_v15 = vmul.f32 %v4432_v27, %v7202_v49  ;;  %vm1415_vm3 = vcmp.eq.f32.partialorder %v7245_v3, inf  ;;  %v11476_v27 = vld [vmem:[#allocation65_spill] sm:$0xff]  ;;  %v7376_v62 = vld [vmem:[%s5747_s28 + $0x180] sm:$0xff] }
 0x137   : > { %v1233_v51 = vsel %vm11474_vm6, %v1225_v50, inf  ;;  %vm1417_vm7 = vcmp.eq.f32.partialorder %v7245_v3, 0.0  ;;  %4443 = vrsqrt.f32 %v7336_v14  ;;  %v1418_v46 = vand.u32 2147483648, %v7245_v3  ;;  %11480 = vst [vmem:[#allocation53_spill] sm:$0xff] %v7376_v62  ;;  %v11495_v60 = vld [vmem:[#allocation10_spill] sm:$0xff] }
 0x138   : > { %4183 = vst.msk [vmem:[%s6474_s6 + $0x338] sm:$0xff] %vm568_vm2, %v1233_v51  ;;  %v7360_v11 = vsel %vm11100_vm11, 1, %v11265_v9  ;;  %vm1443_vm15 = vcmp.eq.f32.partialorder %v6915_v48, inf  ;;  %4445 = vrsqrt.f32 %v7284_v20  ;;  %v11478_v0 = vmin.f32 %v11476_v27, %v11477_v1  ;;  %1047 = vperm.xlu1 %4350, %v11481_v63   ;;  %v7380_v27 = vpop.xlane.xlu1 %2243  ;;  %v7382_v1 = vpop.xlane.xlu0 %1397  ;;  %v7396_v63 = vld [vmem:[%s5747_s28 + $0x160] sm:$0xff] }
 0x139   : > { %11475 = vst [vmem:[#allocation47_spill] sm:$0xff] %v7360_v11  ;;  %v1402_v13 = vsel %vm1401_vm5, %v7202_v49, %v1400_v15  ;;  %v7373_v50 = vsel %vm1271_vm8, 1, %v11265_v9  ;;  %v1444_v51 = vsel %vm1443_vm15, %v6915_v48, %v1442_v30  ;;  %v4436_v11 = vpop.eup %4435  ;;  %vm1422_vm5 = vcmp.eq.f32.partialorder %v7286_v53, inf }
 0x13a   : > { %2897 = vmin.xlane.f32.xlu0 %v11478_v0  ;;  %11479 = vst [vmem:[#allocation49_spill] sm:$0xff] %v7373_v50  ;;  %v1405_v15 = vsel %vm1403_vm4, %v1404_v29, %v1402_v13  ;;  %v1446_v43 = vand.u32 2147483648, %v6915_v48  ;;  %v1619_v0 = vmul.f32 %v7158_v59, %v6964_v8  ;;  %vm11482_vm8 = vcmp.gt.f32.partialorder %v6188_v32, 0.5  ;;  %v11483_v29 = vld [vmem:[#allocation71_spill] sm:$0xff] }
 0x13b   : > { %v1455_v30 = vsel %vm11482_vm8, %v1405_v15, inf  ;;  %v1414_v50 = vmul.f32 %v4436_v11, %v7245_v3  ;;  %vm1424_vm15 = vcmp.eq.f32.partialorder %v7286_v53, 0.0  ;;  %vm1445_vm6 = vcmp.eq.f32.partialorder %v6915_v48, 0.0  ;;  %v7403_v59 = vpop.eup %4437  ;;  %v11484_v11 = vld [vmem:[#allocation72_spill] sm:$0xff] }
 0x13c   : > { %4447 = vrsqrt.f32 %v7382_v1  ;;  %1463 = vst.msk [vmem:[%s6474_s6 + $0x40] sm:$0xff] %vm568_vm2, %v1455_v30  ;;  %v1425_v49 = vand.u32 2147483648, %v7286_v53  ;;  %vm11099_vm4 = vcmp.gt.f32.partialorder %v7376_v62, 0.5  ;;  %v1447_v32 = vsel %vm1445_vm6, %v1446_v43, %v1444_v51  ;;  %v4440_v51 = vpop.eup %4439  ;;  %v11487_v43 = vld [vmem:[#allocation81_spill] sm:$0xff] }
 0x13d   : > { %v11485_v13 = vmin.f32 %v11483_v29, %v11484_v11  ;;  %v1416_v48 = vsel %vm1415_vm3, %v7245_v3, %v1414_v50  ;;  %v7414_v15 = vsel %vm1273_vm12, 1, %v11265_v9  ;;  %v1461_v30 = vsel %vm1273_vm12, %v1447_v32, inf  ;;  %1053 = vperm.xlu1 %4350, %v11487_v43   ;;  %v7420_v29 = vpop.xlane.xlu1 %2252  ;;  %v7422_v11 = vpop.xlane.xlu0 %1588 }
 0x13e   : > { %11486 = vst [vmem:[#allocation50_spill] sm:$0xff] %v7414_v15  ;;  %vm1620_vm8 = vcmp.eq.f32.partialorder %v6964_v8, inf  ;;  %v1419_v50 = vsel %vm1417_vm7, %v1418_v46, %v1416_v48  ;;  %1469 = vst.msk [vmem:[%s6474_s6 + $0x70] sm:$0xff] %vm568_vm2, %v1461_v30  ;;  %v1623_v43 = vand.u32 2147483648, %v6964_v8  ;;  %vm1483_vm12 = vcmp.gt.f32.partialorder %v7396_v63, 0.5  ;;  %v11490_v15 = vld [vmem:[#allocation77_spill] sm:$0xff] }
 0x13f   : > { %3104 = vmin.xlane.f32.xlu0 %v11485_v13  ;;  %v7429_v13 = vsel %vm11099_vm4, 1, %v11265_v9  ;;  %v1621_v32 = vsel %vm1620_vm8, %v6964_v8, %v1619_v0  ;;  %4449 = vrsqrt.f32 %v7334_v5  ;;  %vm11491_vm3 = vcmp.gt.f32.partialorder %v11490_v15, 0.5  ;;  %v7445_v48 = vld [vmem:[%s5747_s28 + $0x170] sm:$0xff]  ;;  %v7447_v30 = vpop.eup %4441  ;;  %v11492_v15 = vld [vmem:[#allocation74_spill] sm:$0xff] }
 0x140   : > { %11488 = vst [vmem:[#allocation51_spill] sm:$0xff] %v7429_v13  ;;  %v1457_v3 = vsel %vm11491_vm3, %v1419_v50, inf  ;;  %v1421_v46 = vmul.f32 %v4440_v51, %v7286_v53  ;;  %vm1622_vm7 = vcmp.eq.f32.partialorder %v6964_v8, 0.0  ;;  %4451 = vrsqrt.f32 %v7422_v11  ;;  %v11493_v50 = vld [vmem:[#allocation75_spill] sm:$0xff] }
 0x141   : > { %1465 = vst.msk [vmem:[%s6474_s6 + $0x50] sm:$0xff] %vm568_vm2, %v1457_v3  ;;  %vm1436_vm6 = vcmp.eq.f32.partialorder %v7336_v14, inf  ;;  %vm1438_vm8 = vcmp.eq.f32.partialorder %v7336_v14, 0.0  ;;  %v1624_v0 = vsel %vm1622_vm7, %v1623_v43, %v1621_v32  ;;  %v11494_v51 = vmin.f32 %v11492_v15, %v11493_v50  ;;  %v4444_v62 = vpop.eup %4443  ;;  %1056 = vperm.xlu1 %4350, %v11495_v60   ;;  %v7465_v32 = vpop.xlane.xlu1 %2258  ;;  %v7484_v60 = vld [vmem:[%s5747_s28 + $0x198] sm:$0xff] }
 0x142   : > { %v1423_v8 = vsel %vm1422_vm5, %v7286_v53, %v1421_v46  ;;  %v1439_v13 = vand.u32 2147483648, %v7336_v14  ;;  %vm11097_vm3 = vcmp.gt.f32.partialorder %v7434_v6, 0.5  ;;  %v1668_v3 = vsel %vm1480_vm14, %v1624_v0, inf  ;;  %v7467_v43 = vpop.xlane.xlu0 %1594  ;;  %11498 = vst [vmem:[#allocation56_spill] sm:$0xff] %v7484_v60  ;;  %v7489_v53 = vpop.eup %4445 }
 0x143   : > { %3110 = vmin.xlane.f32.xlu0 %v11494_v51  ;;  %v1426_v15 = vsel %vm1424_vm15, %v1425_v49, %v1423_v8  ;;  %v7474_v46 = vsel %vm11097_vm3, 1, %v11265_v9  ;;  %v7479_v0 = vsel %vm1480_vm14, 1, %v11265_v9  ;;  %4193 = vst.msk [vmem:[%s6474_s6 + $0x148] sm:$0xff] %vm568_vm2, %v1668_v3  ;;  %v1640_v50 = vmul.f32 %v7180_v12, %v7010_v10  ;;  %v7503_v51 = vld [vmem:[%s5747_s28 + $0x248] sm:$0xff]  ;;  %v11501_v8 = vld [vmem:[#allocation78_spill] sm:$0xff] }
 0x144   : > { %11496 = vst [vmem:[#allocation55_spill] sm:$0xff] %v7474_v46  ;;  %11497 = vst [vmem:[#allocation54_spill] sm:$0xff] %v7479_v0  ;;  %vm1485_vm5 = vcmp.gt.f32.partialorder %v7445_v48, 0.5  ;;  %4453 = vrsqrt.f32 %v7380_v27  ;;  %vm11499_vm15 = vcmp.gt.f32.partialorder %v6217_v16, 0.5  ;;  %v1435_v31 = vmul.f32 %v4444_v62, %v7336_v14  ;;  %v11500_v16 = vld [vmem:[#allocation76_spill] sm:$0xff]  ;;  %v11503_v0 = vld [vmem:[#allocation83_spill] sm:$0xff] }
 0x145   : > { %v1458_v49 = vsel %vm11499_vm15, %v1426_v15, inf  ;;  %vm1450_vm14 = vcmp.eq.f32.partialorder %v7382_v1, inf  ;;  %4455 = vrsqrt.f32 %v7467_v43  ;;  %vm1452_vm7 = vcmp.eq.f32.partialorder %v7382_v1, 0.0  ;;  %1062 = vperm.xlu1 %4350, %v11503_v0   ;;  %v7515_v46 = vpop.xlane.xlu1 %2455  ;;  %v11506_v0 = vld [vmem:[#allocation80_spill] sm:$0xff] }
 0x146   : > { %1466 = vst.msk [vmem:[%s6474_s6 + $0x58] sm:$0xff] %vm568_vm2, %v1458_v49  ;;  %v1453_v12 = vand.u32 2147483648, %v7382_v1  ;;  %vm1641_vm3 = vcmp.eq.f32.partialorder %v7010_v10, inf  ;;  %4457 = vrsqrt.f32 %v7420_v29  ;;  %v11502_v3 = vmin.f32 %v11500_v16, %v11501_v8  ;;  %v4448_v49 = vpop.eup %4447  ;;  %v7517_v6 = vpop.xlane.xlu0 %1597  ;;  %v7629_v48 = vld [vmem:[%s5747_s28 + $0x270] sm:$0xff] }
 0x147   : > { %v1437_v62 = vsel %vm1436_vm6, %v7336_v14, %v1435_v31  ;;  %vm2346_vm15 = vcmp.gt.f32.partialorder %v7484_v60, 0.5  ;;  %v1642_v15 = vsel %vm1641_vm3, %v7010_v10, %v1640_v50  ;;  %vm1613_vm4 = vcmp.eq.f32.partialorder %v7422_v11, inf }
 0x148   : > { %3113 = vmin.xlane.f32.xlu0 %v11502_v3  ;;  %v1440_v16 = vsel %vm1438_vm8, %v1439_v13, %v1437_v62  ;;  %v1644_v8 = vand.u32 2147483648, %v7010_v10  ;;  %v1654_v31 = vmul.f32 %v7227_v7, %v7056_v34  ;;  %vm11504_vm6 = vcmp.gt.f32.partialorder %v6233_v28, 0.5  ;;  %v11505_v7 = vld [vmem:[#allocation79_spill] sm:$0xff] }
 0x149   : > { %v1460_v50 = vsel %vm11504_vm6, %v1440_v16, inf  ;;  %v1449_v3 = vmul.f32 %v4448_v49, %v7382_v1  ;;  %vm1615_vm3 = vcmp.eq.f32.partialorder %v7422_v11, 0.0  ;;  %vm1643_vm11 = vcmp.eq.f32.partialorder %v7010_v10, 0.0  ;;  %v7536_v28 = vpop.eup %4449 }
 0x14a   : > { %vm1692_vm10 = vcmp.gt.f32.partialorder %v7503_v51, 0.5  ;;  %4459 = vrsqrt.f32 %v7517_v6  ;;  %1468 = vst.msk [vmem:[%s6474_s6 + $0x68] sm:$0xff] %vm568_vm2, %v1460_v50  ;;  %v1616_v14 = vand.u32 2147483648, %v7422_v11  ;;  %v1645_v13 = vsel %vm1643_vm11, %v1644_v8, %v1642_v15  ;;  %v4452_v8 = vpop.eup %4451  ;;  %v11509_v50 = vld [vmem:[#allocation84_spill] sm:$0xff] }
 0x14b   : > { %vm1655_vm8 = vcmp.eq.f32.partialorder %v7056_v34, inf  ;;  %v11507_v62 = vmin.f32 %v11505_v7, %v11506_v0  ;;  %v1451_v10 = vsel %vm1450_vm14, %v7382_v1, %v1449_v3  ;;  %v7547_v49 = vsel %vm2346_vm15, 1, %v11265_v9  ;;  %1068 = vperm.xlu1 %4350, %v11509_v50   ;;  %v7554_v7 = vpop.xlane.xlu1 %2464  ;;  %v7556_v3 = vpop.xlane.xlu0 %1603  ;;  %v7577_v1 = vld [vmem:[%s5747_s28 + $0x260] sm:$0xff] }
 0x14c   : > { %11508 = vst [vmem:[#allocation57_spill] sm:$0xff] %v7547_v49  ;;  %v1671_v15 = vsel %vm1483_vm12, %v1645_v13, inf  ;;  %v1656_v16 = vsel %vm1655_vm8, %v7056_v34, %v1654_v31  ;;  %4461 = vrsqrt.f32 %v7465_v32  ;;  %v1454_v0 = vsel %vm1452_vm7, %v1453_v12, %v1451_v10  ;;  %v7568_v31 = vld [vmem:[%s5747_s28 + $0x1a8] sm:$0xff]  ;;  %v11512_v49 = vld [vmem:[#allocation82_spill] sm:$0xff] }
 0x14d   : > { %3119 = vmin.xlane.f32.xlu0 %v11507_v62  ;;  %v7563_v13 = vsel %vm1483_vm12, 1, %v11265_v9  ;;  %4196 = vst.msk [vmem:[%s6474_s6 + $0x160] sm:$0xff] %vm568_vm2, %v1671_v15  ;;  %11511 = vst [vmem:[#allocation58_spill] sm:$0xff] %v7568_v31  ;;  %v1658_v62 = vand.u32 2147483648, %v7056_v34  ;;  %vm11513_vm11 = vcmp.gt.f32.partialorder %v11512_v49, 0.5  ;;  %v1612_v60 = vmul.f32 %v4452_v8, %v7422_v11  ;;  %v11514_v49 = vld [vmem:[#allocation85_spill] sm:$0xff] }
 0x14e   : > { %11510 = vst [vmem:[#allocation9_spill] sm:$0xff] %v7563_v13  ;;  %v1462_v50 = vsel %vm11513_vm11, %v1454_v0, inf  ;;  %vm1627_vm14 = vcmp.eq.f32.partialorder %v7467_v43, inf  ;;  %vm1657_vm7 = vcmp.eq.f32.partialorder %v7056_v34, 0.0  ;;  %4463 = vrsqrt.f32 %v7556_v3  ;;  %v7584_v10 = vpop.eup %4453  ;;  %v11515_v15 = vld [vmem:[#allocation86_spill] sm:$0xff] }
 0x14f   : > { %1470 = vst.msk [vmem:[%s6474_s6 + $0x78] sm:$0xff] %vm568_vm2, %v1462_v50  ;;  %vm1629_vm12 = vcmp.eq.f32.partialorder %v7467_v43, 0.0  ;;  %v1630_v63 = vand.u32 2147483648, %v7467_v43  ;;  %v1659_v12 = vsel %vm1657_vm7, %v1658_v62, %v1656_v16  ;;  %v11516_v8 = vmin.f32 %v11514_v49, %v11515_v15  ;;  %v4456_v16 = vpop.eup %4455  ;;  %v11517_v62 = vld [vmem:[#allocation90_spill] sm:$0xff]  ;;  %v7599_v49 = vpop.xlane.xlu1 %2470 }
 0x150   : > { %v1614_v34 = vsel %vm1613_vm4, %v7422_v11, %v1612_v60  ;;  %vm2348_vm6 = vcmp.gt.f32.partialorder %v7568_v31, 0.5  ;;  %v1673_v0 = vsel %vm1485_vm5, %v1659_v12, inf  ;;  %v1831_v50 = vmul.f32 %v7311_v54, %v7101_v37  ;;  %1284 = vperm.xlu1 %4350, %v11517_v62   ;;  %v7601_v15 = vpop.xlane.xlu0 %1609  ;;  %v11520_v62 = vld [vmem:[#allocation89_spill] sm:$0xff] }
 0x151   : > { %3125 = vmin.xlane.f32.xlu0 %v11516_v8  ;;  %4465 = vrsqrt.f32 %v7515_v46  ;;  %v1617_v60 = vsel %vm1615_vm3, %v1616_v14, %v1614_v34  ;;  %v7608_v12 = vsel %vm2348_vm6, 1, %v11265_v9  ;;  %v7613_v54 = vsel %vm1485_vm5, 1, %v11265_v9  ;;  %4198 = vst.msk [vmem:[%s6474_s6 + $0x170] sm:$0xff] %vm568_vm2, %v1673_v0  ;;  %v7618_v8 = vpop.eup %4457  ;;  %v7624_v34 = vld [vmem:[%s5747_s28 + $0x1b8] sm:$0xff] }
 0x152   : > { %11518 = vst [vmem:[#allocation59_spill] sm:$0xff] %v7608_v12  ;;  %11519 = vst [vmem:[#allocation60_spill] sm:$0xff] %v7613_v54  ;;  %vm1695_vm4 = vcmp.gt.f32.partialorder %v7577_v1, 0.5  ;;  %vm11521_vm8 = vcmp.gt.f32.partialorder %v11520_v62, 0.5  ;;  %v1626_v14 = vmul.f32 %v4456_v16, %v7467_v43  ;;  %vm1832_vm3 = vcmp.eq.f32.partialorder %v7101_v37, inf  ;;  %v11523_v16 = vld [vmem:[#allocation88_spill] sm:$0xff] }
 0x153   : > { %v1667_v11 = vsel %vm11521_vm8, %v1617_v60, inf  ;;  %v1835_v12 = vand.u32 2147483648, %v7101_v37  ;;  %4467 = vrsqrt.f32 %v7601_v15  ;;  %vm1634_vm5 = vcmp.eq.f32.partialorder %v7517_v6, inf  ;;  %v11522_v60 = vld [vmem:[#allocation87_spill] sm:$0xff] }
 0x154   : > { %4192 = vst.msk [vmem:[%s6474_s6 + $0x140] sm:$0xff] %vm568_vm2, %v1667_v11  ;;  %v1833_v0 = vsel %vm1832_vm3, %v7101_v37, %v1831_v50  ;;  %vm1834_vm11 = vcmp.eq.f32.partialorder %v7101_v37, 0.0  ;;  %v11524_v62 = vmin.f32 %v11522_v60, %v11523_v16  ;;  %v1628_v54 = vsel %vm1627_vm14, %v7467_v43, %v1626_v14  ;;  %v4460_v31 = vpop.eup %4459  ;;  %1290 = vperm.xlu1 %4350, %v11525_v22   ;;  %v7646_v50 = vpop.xlane.xlu1 %2667 }
 0x155   : > { %vm1636_vm7 = vcmp.eq.f32.partialorder %v7517_v6, 0.0  ;;  %v1637_v13 = vand.u32 2147483648, %v7517_v6  ;;  %v1836_v11 = vsel %vm1834_vm11, %v1835_v12, %v1833_v0  ;;  %v7648_v37 = vpop.xlane.xlu0 %1800  ;;  %v1631_v60 = vsel %vm1629_vm12, %v1630_v63, %v1628_v54 }
 0x156   : > { %3316 = vmin.xlane.f32.xlu0 %v11524_v62  ;;  %vm11105_vm8 = vcmp.gt.f32.partialorder %v7624_v34, 0.5  ;;  %v1880_v14 = vsel %vm1692_vm10, %v1836_v11, inf  ;;  %v1852_v16 = vmul.f32 %v7346_v55, %v7147_v39  ;;  %vm1697_vm14 = vcmp.gt.f32.partialorder %v7629_v48, 0.5  ;;  %v7669_v63 = vpop.eup %4461  ;;  %v11529_v55 = vld [vmem:[#allocation12_spill] sm:$0xff] }
 0x157   : > { %4469 = vrsqrt.f32 %v7554_v7  ;;  %vm11526_vm3 = vcmp.gt.f32.partialorder %v6378_v25, 0.5  ;;  %v1633_v12 = vmul.f32 %v4460_v31, %v7517_v6  ;;  %v7665_v43 = vsel %vm1692_vm10, 1, %v11265_v9  ;;  %4209 = vst.msk [vmem:[%s6474_s6 + $0x248] sm:$0xff] %vm568_vm2, %v1880_v14  ;;  %v11528_v25 = vld [vmem:[#allocation11_spill] sm:$0xff] }
 0x158   : > { %v1669_v22 = vsel %vm11526_vm3, %v1631_v60, inf  ;;  %11527 = vst [vmem:[#allocation68_spill] sm:$0xff] %v7665_v43  ;;  %4471 = vrsqrt.f32 %v7648_v37  ;;  %vm1648_vm12 = vcmp.eq.f32.partialorder %v7556_v3, inf  ;;  %vm1650_vm11 = vcmp.eq.f32.partialorder %v7556_v3, 0.0  ;;  %v4464_v11 = vpop.eup %4463  ;;  %v11532_v60 = vld [vmem:[#allocation94_spill] sm:$0xff]  ;;  %v7692_v14 = vpop.xlane.xlu1 %2676 }
 0x159   : > { %4194 = vst.msk [vmem:[%s6474_s6 + $0x150] sm:$0xff] %vm568_vm2, %v1669_v22  ;;  %vm1853_vm3 = vcmp.eq.f32.partialorder %v7147_v39, inf  ;;  %v11530_v51 = vmin.f32 %v11528_v25, %v11529_v55  ;;  %v1635_v31 = vsel %vm1634_vm5, %v7517_v6, %v1633_v12  ;;  %v1651_v54 = vand.u32 2147483648, %v7556_v3  ;;  %1293 = vperm.xlu1 %4350, %v11532_v60   ;;  %v7694_v22 = vpop.xlane.xlu0 %1806  ;;  %v7699_v25 = vld [vmem:[%s5747_s28 + $0x280] sm:$0xff]  ;;  %v7710_v60 = vld [vmem:[%s5747_s28 + $0x348] sm:$0xff] }
 0x15a   : > { %v7687_v0 = vsel %vm11105_vm8, 1, %v11265_v9  ;;  %v1854_v62 = vsel %vm1853_vm3, %v7147_v39, %v1852_v16  ;;  %4473 = vrsqrt.f32 %v7599_v49  ;;  %v1638_v12 = vsel %vm1636_vm7, %v1637_v13, %v1635_v31  ;;  %v11534_v13 = vld [vmem:[#allocation13_spill] sm:$0xff]  ;;  %v11535_v31 = vld [vmem:[#allocation14_spill] sm:$0xff] }
 0x15b   : > { %3322 = vmin.xlane.f32.xlu0 %v11530_v51  ;;  %11531 = vst [vmem:[#allocation61_spill] sm:$0xff] %v7687_v0  ;;  %v1856_v55 = vand.u32 2147483648, %v7147_v39  ;;  %v1866_v16 = vmul.f32 %v7403_v59, %v7200_v56  ;;  %vm11533_vm10 = vcmp.gt.f32.partialorder %v6460_v19, 0.5  ;;  %v1647_v43 = vmul.f32 %v4464_v11, %v7556_v3  ;;  %v7712_v6 = vpop.eup %4465  ;;  %v11537_v0 = vld [vmem:[#allocation15_spill] sm:$0xff] }
 0x15c   : > { %v1670_v51 = vsel %vm11533_vm10, %v1638_v12, inf  ;;  %vm1662_vm5 = vcmp.eq.f32.partialorder %v7601_v15, inf  ;;  %vm1855_vm3 = vcmp.eq.f32.partialorder %v7147_v39, 0.0  ;;  %4475 = vrsqrt.f32 %v7694_v22 }
 0x15d   : > { %4195 = vst.msk [vmem:[%s6474_s6 + $0x158] sm:$0xff] %vm568_vm2, %v1670_v51  ;;  %vm1664_vm7 = vcmp.eq.f32.partialorder %v7601_v15, 0.0  ;;  %v1665_v19 = vand.u32 2147483648, %v7601_v15  ;;  %v1857_v59 = vsel %vm1855_vm3, %v1856_v55, %v1854_v62  ;;  %v11536_v11 = vmin.f32 %v11534_v13, %v11535_v31  ;;  %v4468_v51 = vpop.eup %4467  ;;  %1299 = vperm.xlu1 %4350, %v11537_v0   ;;  %v7730_v62 = vpop.xlane.xlu1 %2682 }
 0x15e   : > { %v1649_v39 = vsel %vm1648_vm12, %v7556_v3, %v1647_v43  ;;  %vm2555_vm10 = vcmp.gt.f32.partialorder %v7699_v25, 0.5  ;;  %v1883_v12 = vsel %vm1695_vm4, %v1857_v59, inf  ;;  %vm1867_vm8 = vcmp.eq.f32.partialorder %v7200_v56, inf  ;;  %v7732_v55 = vpop.xlane.xlu0 %1809 }
 0x15f   : > { %3325 = vmin.xlane.f32.xlu0 %v11536_v11  ;;  %v1652_v13 = vsel %vm1650_vm11, %v1651_v54, %v1649_v39  ;;  %v7739_v43 = vsel %vm1695_vm4, 1, %v11265_v9  ;;  %4212 = vst.msk [vmem:[%s6474_s6 + $0x260] sm:$0xff] %vm568_vm2, %v1883_v12  ;;  %v1868_v59 = vsel %vm1867_vm8, %v7200_v56, %v1866_v16  ;;  %v1870_v31 = vand.u32 2147483648, %v7200_v56  ;;  %v7751_v54 = vld [vmem:[%s5747_s28 + $0x290] sm:$0xff]  ;;  %v11540_v11 = vld [vmem:[#allocation91_spill] sm:$0xff] }
 0x160   : > { %11538 = vst [vmem:[#allocation62_spill] sm:$0xff] %v7739_v43  ;;  %vm1904_vm12 = vcmp.gt.f32.partialorder %v7710_v60, 0.5  ;;  %4477 = vrsqrt.f32 %v7646_v50  ;;  %vm11539_vm3 = vcmp.gt.f32.partialorder %v6490_v57, 0.5  ;;  %v1661_v3 = vmul.f32 %v4468_v51, %v7601_v15  ;;  %v11541_v39 = vld [vmem:[#allocation92_spill] sm:$0xff] }
 0x161   : > { %v1672_v0 = vsel %vm11539_vm3, %v1652_v13, inf  ;;  %vm1869_vm4 = vcmp.eq.f32.partialorder %v7200_v56, 0.0  ;;  %4479 = vrsqrt.f32 %v7732_v55  ;;  %vm1825_vm8 = vcmp.eq.f32.partialorder %v7648_v37, inf  ;;  %v7763_v16 = vpop.eup %4469 }
 0x162   : > { %4197 = vst.msk [vmem:[%s6474_s6 + $0x168] sm:$0xff] %vm568_vm2, %v1672_v0  ;;  %v7761_v1 = vsel %vm2555_vm10, 1, %v11265_v9  ;;  %v1871_v57 = vsel %vm1869_vm4, %v1870_v31, %v1868_v59  ;;  %v11542_v12 = vmin.f32 %v11540_v11, %v11541_v39  ;;  %v1663_v56 = vsel %vm1662_vm5, %v7601_v15, %v1661_v3  ;;  %v4472_v0 = vpop.eup %4471  ;;  %v11543_v59 = vld [vmem:[#allocation16_spill] sm:$0xff]  ;;  %v7776_v31 = vpop.xlane.xlu1 %2879 }
 0x163   : > { %vm1827_vm11 = vcmp.eq.f32.partialorder %v7648_v37, 0.0  ;;  %v1828_v51 = vand.u32 2147483648, %v7648_v37  ;;  %v1885_v13 = vsel %vm1697_vm14, %v1871_v57, inf  ;;  %1305 = vperm.xlu1 %4350, %v11543_v59   ;;  %v7778_v43 = vpop.xlane.xlu0 %1815  ;;  %v1666_v11 = vsel %vm1664_vm7, %v1665_v19, %v1663_v56 }
 0x164   : > { %3331 = vmin.xlane.f32.xlu0 %v11542_v12  ;;  %vm11106_vm5 = vcmp.gt.f32.partialorder %v7751_v54, 0.5  ;;  %v7786_v3 = vsel %vm1697_vm14, 1, %v11265_v9  ;;  %4214 = vst.msk [vmem:[%s6474_s6 + $0x270] sm:$0xff] %vm568_vm2, %v1885_v13  ;;  %v2043_v57 = vmul.f32 %v7447_v30, %v7243_v42  ;;  %4481 = vrsqrt.f32 %v7692_v14  ;;  %v7797_v19 = vpop.eup %4473  ;;  %v11547_v30 = vld [vmem:[#allocation18_spill] sm:$0xff] }
 0x165   : > { %11544 = vst [vmem:[#allocation69_spill] sm:$0xff] %v7786_v3  ;;  %vm11545_vm3 = vcmp.gt.f32.partialorder %v6536_v2, 0.5  ;;  %v1824_v15 = vmul.f32 %v4472_v0, %v7648_v37  ;;  %vm1839_vm7 = vcmp.eq.f32.partialorder %v7694_v22, inf  ;;  %4483 = vrsqrt.f32 %v7778_v43  ;;  %v11546_v2 = vld [vmem:[#allocation17_spill] sm:$0xff] }
 0x166   : > { %v1674_v39 = vsel %vm11545_vm3, %v1666_v11, inf  ;;  %vm1841_vm14 = vcmp.eq.f32.partialorder %v7694_v22, 0.0  ;;  %v1842_v48 = vand.u32 2147483648, %v7694_v22  ;;  %vm2044_vm4 = vcmp.eq.f32.partialorder %v7243_v42, inf  ;;  %v7818_v0 = vld [vmem:[%s5747_s28 + $0x298] sm:$0xff]  ;;  %v4476_v11 = vpop.eup %4475 }
 0x167   : > { %4199 = vst.msk [vmem:[%s6474_s6 + $0x178] sm:$0xff] %vm568_vm2, %v1674_v39  ;;  %4485 = vrsqrt.f32 %v7730_v62  ;;  %v11548_v12 = vmin.f32 %v11546_v2, %v11547_v30  ;;  %v1826_v56 = vsel %vm1825_vm8, %v7648_v37, %v1824_v15  ;;  %v7815_v13 = vsel %vm11106_vm5, 1, %v11265_v9  ;;  %v11550_v39 = vld [vmem:[#allocation19_spill] sm:$0xff]  ;;  %v7822_v2 = vpop.xlane.xlu1 %2888  ;;  %v7824_v30 = vpop.xlane.xlu0 %1821 }
 0x168   : > { %11549 = vst [vmem:[#allocation63_spill] sm:$0xff] %v7815_v13  ;;  %v2045_v59 = vsel %vm2044_vm4, %v7243_v42, %v2043_v57  ;;  %1496 = vperm.xlu1 %4350, %v11550_v39   ;;  %v1829_v15 = vsel %vm1827_vm11, %v1828_v51, %v1826_v56  ;;  %vm1846_vm8 = vcmp.eq.f32.partialorder %v7732_v55, inf  ;;  %v2064_v3 = vmul.f32 %v7489_v53, %v7284_v20  ;;  %v4220_v39 = vld [vmem:[%s5747_s28 + $0x360] sm:$0xff] }
 0x169   : > { %3337 = vmin.xlane.f32.xlu0 %v11548_v12  ;;  %v2047_v12 = vand.u32 2147483648, %v7243_v42  ;;  %vm11551_vm3 = vcmp.gt.f32.partialorder %v6569_v36, 0.5  ;;  %v1838_v13 = vmul.f32 %v4476_v11, %v7694_v22  ;;  %vm1848_vm4 = vcmp.eq.f32.partialorder %v7732_v55, 0.0 }
 0x16a   : > { %v1879_v57 = vsel %vm11551_vm3, %v1829_v15, inf  ;;  %vm2046_vm5 = vcmp.eq.f32.partialorder %v7243_v42, 0.0  ;;  %4487 = vrsqrt.f32 %v7824_v30  ;;  %v1849_v37 = vand.u32 2147483648, %v7732_v55  ;;  %v7843_v36 = vpop.eup %4477 }
 0x16b   : > { %4208 = vst.msk [vmem:[%s6474_s6 + $0x240] sm:$0xff] %vm568_vm2, %v1879_v57  ;;  %vm2558_vm11 = vcmp.gt.f32.partialorder %v7818_v0, 0.5  ;;  %v2048_v53 = vsel %vm2046_vm5, %v2047_v12, %v2045_v59  ;;  %v1840_v51 = vsel %vm1839_vm7, %v7694_v22, %v1838_v13  ;;  %v7851_v42 = vsel %vm1904_vm12, 1, %v11265_v9  ;;  %v4480_v11 = vpop.eup %4479  ;;  %v7857_v59 = vpop.xlane.xlu1 %2894  ;;  %v7866_v12 = vld [vmem:[%s5747_s28 + $0x2a8] sm:$0xff] }
 0x16c   : > { %v2092_v56 = vsel %vm1904_vm12, %v2048_v53, inf  ;;  %vm2065_vm3 = vcmp.eq.f32.partialorder %v7284_v20, inf  ;;  %1502 = vperm.xlu1 %4350, %v6532_v58   ;;  %11552 = vst [vmem:[#allocation64_spill] sm:$0xff] %v7857_v59  ;;  %v7859_v15 = vpop.xlane.xlu0 %2012  ;;  %v1843_v13 = vsel %vm1841_vm14, %v1842_v48, %v1840_v51  ;;  %vm1907_vm5 = vcmp.gt.f32.partialorder %v4220_v39, 0.5 }
 0x16d   : > { %4225 = vst.msk [vmem:[%s6474_s6 + $0x348] sm:$0xff] %vm568_vm2, %v2092_v56  ;;  %v2066_v60 = vsel %vm2065_vm3, %v7284_v20, %v2064_v3  ;;  %v2068_v57 = vand.u32 2147483648, %v7284_v20  ;;  %4489 = vrsqrt.f32 %v7776_v31  ;;  %vm11553_vm12 = vcmp.gt.f32.partialorder %v6588_v38, 0.5 }
 0x16e   : > { %v1881_v58 = vsel %vm11553_vm12, %v1843_v13, inf  ;;  %v1845_v53 = vmul.f32 %v4480_v11, %v7732_v55  ;;  %vm2067_vm7 = vcmp.eq.f32.partialorder %v7284_v20, 0.0  ;;  %4491 = vrsqrt.f32 %v7859_v15  ;;  %v7884_v48 = vpop.eup %4481 }
 0x16f   : > { %4210 = vst.msk [vmem:[%s6474_s6 + $0x250] sm:$0xff] %vm568_vm2, %v1881_v58  ;;  %vm1860_vm14 = vcmp.eq.f32.partialorder %v7778_v43, inf  ;;  %v7882_v22 = vsel %vm2558_vm11, 1, %v11265_v9  ;;  %v2069_v3 = vsel %vm2067_vm7, %v2068_v57, %v2066_v60  ;;  %vm1862_vm3 = vcmp.eq.f32.partialorder %v7778_v43, 0.0  ;;  %v4484_v51 = vpop.eup %4483  ;;  %v7893_v56 = vpop.xlane.xlu1 %3107 }
 0x170   : > { %v1847_v38 = vsel %vm1846_vm8, %v7732_v55, %v1845_v53  ;;  %vm11107_vm12 = vcmp.gt.f32.partialorder %v7866_v12, 0.5  ;;  %v2095_v20 = vsel %vm1907_vm5, %v2069_v3, inf  ;;  %1505 = vperm.xlu1 %4350, %v6613_v40   ;;  %11554 = vst [vmem:[#allocation70_spill] sm:$0xff] %v7893_v56  ;;  %v7895_v11 = vpop.xlane.xlu0 %2018  ;;  %v1863_v60 = vand.u32 2147483648, %v7778_v43  ;;  %v4222_v53 = vld [vmem:[%s5747_s28 + $0x370] sm:$0xff] }
 0x171   : > { %v1850_v13 = vsel %vm1848_vm4, %v1849_v37, %v1847_v38  ;;  %v7903_v57 = vsel %vm11107_vm12, 1, %v11265_v9  ;;  %4228 = vst.msk [vmem:[%s6474_s6 + $0x360] sm:$0xff] %vm568_vm2, %v2095_v20  ;;  %v2078_v40 = vmul.f32 %v7536_v28, %v7334_v5  ;;  %v7909_v58 = vpop.eup %4485  ;;  %4493 = vrsqrt.f32 %v7822_v2  ;;  %v7932_v38 = vld [vmem:[%s5747_s28 + $0x2b8] sm:$0xff] }
 0x172   : > { %vm11555_vm8 = vcmp.gt.f32.partialorder %v6634_v26, 0.5  ;;  %v1859_v37 = vmul.f32 %v4484_v51, %v7778_v43  ;;  %vm1874_vm4 = vcmp.eq.f32.partialorder %v7824_v30, inf  ;;  %4495 = vrsqrt.f32 %v7895_v11 }
 0x173   : > { %v1882_v55 = vsel %vm11555_vm8, %v1850_v13, inf  ;;  %vm1876_vm7 = vcmp.eq.f32.partialorder %v7824_v30, 0.0  ;;  %v1877_v28 = vand.u32 2147483648, %v7824_v30  ;;  %vm2079_vm12 = vcmp.eq.f32.partialorder %v7334_v5, inf  ;;  %v7936_v13 = vpop.xlane.xlu1 %3116 }
 0x174   : > { %4211 = vst.msk [vmem:[%s6474_s6 + $0x258] sm:$0xff] %vm568_vm2, %v1882_v55  ;;  %4497 = vrsqrt.f32 %v7857_v59  ;;  %v1861_v26 = vsel %vm1860_vm14, %v7778_v43, %v1859_v37  ;;  %v7929_v3 = vsel %vm1907_vm5, 1, %v11265_v9  ;;  %v2080_v20 = vsel %vm2079_vm12, %v7334_v5, %v2078_v40  ;;  %v4488_v51 = vpop.eup %4487  ;;  %1511 = vperm.xlu1 %4350, %v6631_v45   ;;  %11557 = vst [vmem:[#allocation65_spill] sm:$0xff] %v7936_v13  ;;  %v7938_v55 = vpop.xlane.xlu0 %2021  ;;  %v2124_v45 = vld [vmem:[%s5747_s28 + $0x88] sm:$0xff] }
 0x175   : > { %11556 = vst [vmem:[#allocation67_spill] sm:$0xff] %v7929_v3  ;;  %v1864_v37 = vsel %vm1862_vm3, %v1863_v60, %v1861_v26  ;;  %vm2037_vm14 = vcmp.eq.f32.partialorder %v7859_v15, inf  ;;  %vm1909_vm8 = vcmp.gt.f32.partialorder %v4222_v53, 0.5  ;;  %v2082_v39 = vand.u32 2147483648, %v7334_v5 }
 0x176   : > { %v1884_v3 = vsel %vm1696_vm9, %v1864_v37, inf  ;;  %v1873_v40 = vmul.f32 %v4488_v51, %v7824_v30  ;;  %vm2039_vm5 = vcmp.eq.f32.partialorder %v7859_v15, 0.0  ;;  %vm2081_vm12 = vcmp.eq.f32.partialorder %v7334_v5, 0.0 }
 0x177   : > { %4499 = vrsqrt.f32 %v7938_v55  ;;  %4213 = vst.msk [vmem:[%s6474_s6 + $0x268] sm:$0xff] %vm568_vm2, %v1884_v3  ;;  %vm11120_vm3 = vcmp.gt.f32.partialorder %v7932_v38, 0.5  ;;  %v2083_v43 = vsel %vm2081_vm12, %v2082_v39, %v2080_v20  ;;  %v2271_v60 = vmul.f32 %v7584_v10, %v7380_v27  ;;  %v7956_v4 = vpop.eup %4489  ;;  %v11559_v10 = vld [vmem:[#allocation20_spill] sm:$0xff]  ;;  %v7970_v37 = vpop.xlane.xlu1 %3122 }
 0x178   : > { %v1875_v26 = vsel %vm1874_vm4, %v7824_v30, %v1873_v40  ;;  %v2040_v5 = vand.u32 2147483648, %v7859_v15  ;;  %v7965_v3 = vsel %vm11120_vm3, 1, %v11265_v9  ;;  %v2097_v51 = vsel %vm1909_vm8, %v2083_v43, inf  ;;  %v4492_v20 = vpop.eup %4491  ;;  %1517 = vperm.xlu1 %4350, %v11559_v10   ;;  %11560 = vst [vmem:[#allocation73_spill] sm:$0xff] %v7970_v37  ;;  %v7972_v39 = vpop.xlane.xlu0 %2027  ;;  %v7986_v10 = vld [vmem:[%s5747_s28 + $0x380] sm:$0xff] }
 0x179   : > { %11558 = vst [vmem:[#allocation66_spill] sm:$0xff] %v7965_v3  ;;  %4501 = vrsqrt.f32 %v7893_v56  ;;  %v1878_v40 = vsel %vm1876_vm7, %v1877_v28, %v1875_v26  ;;  %v7978_v59 = vsel %vm1909_vm8, 1, %v11265_v9  ;;  %4230 = vst.msk [vmem:[%s6474_s6 + $0x370] sm:$0xff] %vm568_vm2, %v2097_v51  ;;  %vm2132_vm9 = vcmp.gt.f32.partialorder %v2124_v45, 0.5 }
 0x17a   : > { %vm11561_vm4 = vcmp.gt.f32.partialorder %v6725_v52, 0.5  ;;  %v2036_v56 = vmul.f32 %v4492_v20, %v7859_v15  ;;  %vm2272_vm12 = vcmp.eq.f32.partialorder %v7380_v27, inf  ;;  %v2275_v3 = vand.u32 2147483648, %v7380_v27  ;;  %v11562_v20 = vld [vmem:[#allocation21_spill] sm:$0xff] }
 0x17b   : > { %v1886_v43 = vsel %vm11561_vm4, %v1878_v40, inf  ;;  %4503 = vrsqrt.f32 %v7972_v39  ;;  %vm2051_vm7 = vcmp.eq.f32.partialorder %v7895_v11, inf  ;;  %v2273_v30 = vsel %vm2272_vm12, %v7380_v27, %v2271_v60  ;;  %v7996_v52 = vpop.eup %4493 }
 0x17c   : > { %4215 = vst.msk [vmem:[%s6474_s6 + $0x278] sm:$0xff] %vm568_vm2, %v1886_v43  ;;  %vm2274_vm8 = vcmp.eq.f32.partialorder %v7380_v27, 0.0  ;;  %v2038_v53 = vsel %vm2037_vm14, %v7859_v15, %v2036_v56  ;;  %vm2053_vm4 = vcmp.eq.f32.partialorder %v7895_v11, 0.0  ;;  %v2054_v28 = vand.u32 2147483648, %v7895_v11  ;;  %v4496_v51 = vpop.eup %4495  ;;  %1708 = vperm.xlu1 %4350, %v11562_v20   ;;  %v8005_v27 = vpop.xlane.xlu1 %3319  ;;  %v2127_v15 = vld [vmem:[%s5747_s28 + $0xa0] sm:$0xff] }
 0x17d   : > { %v2276_v26 = vsel %vm2274_vm8, %v2275_v3, %v2273_v30  ;;  %4505 = vrsqrt.f32 %v7936_v13  ;;  %11563 = vst [vmem:[#allocation71_spill] sm:$0xff] %v8005_v27  ;;  %v8007_v60 = vpop.xlane.xlu0 %2033  ;;  %v2041_v56 = vsel %vm2039_vm5, %v2040_v5, %v2038_v53  ;;  %vm11116_vm14 = vcmp.gt.f32.partialorder %v7986_v10, 0.5  ;;  %v11564_v3 = vld [vmem:[#allocation22_spill] sm:$0xff]  ;;  %v11568_v13 = vld [vmem:[#allocation24_spill] sm:$0xff] }
 0x17e   : > { %v2320_v40 = vsel %vm2132_vm9, %v2276_v26, inf  ;;  %v8013_v43 = vpop.eup %4497  ;;  %v2091_v30 = vsel %vm1903_vm0, %v2041_v56, inf  ;;  %v2050_v20 = vmul.f32 %v4496_v51, %v7895_v11  ;;  %vm2058_vm12 = vcmp.eq.f32.partialorder %v7938_v55, inf  ;;  %v8044_v56 = vld [vmem:[%s5747_s28 + $0x390] sm:$0xff] }
 0x17f   : > { %377 = vperm.xlu0 %4351, %v11564_v3   ;;  %vm2060_vm8 = vcmp.eq.f32.partialorder %v7938_v55, 0.0  ;;  %2328 = vst.msk [vmem:[%s6474_s6 + $0x88] sm:$0xff] %vm568_vm2, %v2320_v40  ;;  %4507 = vrsqrt.f32 %v8007_v60  ;;  %4224 = vst.msk [vmem:[%s6474_s6 + $0x340] sm:$0xff] %vm568_vm2, %v2091_v30  ;;  %v2061_v5 = vand.u32 2147483648, %v7938_v55  ;;  %v8031_v18 = vsel %vm11116_vm14, 1, %v11265_v9  ;;  %v11566_v3 = vld [vmem:[#allocation23_spill] sm:$0xff] }
 0x180   : > { %v2292_v53 = vmul.f32 %v7618_v8, %v7420_v29  ;;  %4509 = vrsqrt.f32 %v7970_v37  ;;  %v2052_v26 = vsel %vm2051_vm7, %v7895_v11, %v2050_v20  ;;  %v8041_v51 = vsel %vm2132_vm9, 1, %v11265_v9  ;;  %1714 = vperm.xlu1 %4350, %v11566_v3   ;;  %v8048_v30 = vpop.xlane.xlu1 %3328 }
 0x181   : > { %11565 = vst [vmem:[#allocation72_spill] sm:$0xff] %v8041_v51  ;;  %vm2293_vm0 = vcmp.eq.f32.partialorder %v7420_v29, inf  ;;  %v4500_v40 = vpop.eup %4499  ;;  %11567 = vst [vmem:[#allocation81_spill] sm:$0xff] %v8048_v30  ;;  %v8050_v8 = vpop.xlane.xlu0 %2240  ;;  %v2055_v37 = vsel %vm2053_vm4, %v2054_v28, %v2052_v26  ;;  %vm2135_vm5 = vcmp.gt.f32.partialorder %v2127_v15, 0.5  ;;  %v2296_v20 = vand.u32 2147483648, %v7420_v29  ;;  %v2129_v26 = vld [vmem:[%s5747_s28 + $0xb0] sm:$0xff] }
 0x182   : > { %v2294_v45 = vsel %vm2293_vm0, %v7420_v29, %v2292_v53  ;;  %vm11569_vm9 = vcmp.gt.f32.partialorder %v6826_v47, 0.5  ;;  %v2057_v3 = vmul.f32 %v4500_v40, %v7938_v55  ;;  %vm2072_vm7 = vcmp.eq.f32.partialorder %v7972_v39, inf  ;;  %v8080_v53 = vld [vmem:[%s5747_s28 + $0x398] sm:$0xff] }
 0x183   : > { %380 = vperm.xlu0 %4351, %v11568_v13   ;;  %v2093_v51 = vsel %vm11569_vm9, %v2055_v37, inf  ;;  %vm2295_vm14 = vcmp.eq.f32.partialorder %v7420_v29, 0.0  ;;  %v8062_v11 = vpop.eup %4501  ;;  %4511 = vrsqrt.f32 %v8050_v8  ;;  %vm2074_vm4 = vcmp.eq.f32.partialorder %v7972_v39, 0.0  ;;  %v11572_v40 = vld [vmem:[#allocation25_spill] sm:$0xff] }
 0x184   : > { %11570 = vst [vmem:[#allocation77_spill] sm:$0xff] %v8062_v11  ;;  %4226 = vst.msk [vmem:[%s6474_s6 + $0x350] sm:$0xff] %vm568_vm2, %v2093_v51  ;;  %vm11119_vm0 = vcmp.gt.f32.partialorder %v8044_v56, 0.5  ;;  %v2297_v47 = vsel %vm2295_vm14, %v2296_v20, %v2294_v45  ;;  %v2059_v13 = vsel %vm2058_vm12, %v7938_v55, %v2057_v3  ;;  %v2075_v37 = vand.u32 2147483648, %v7972_v39  ;;  %1717 = vperm.xlu1 %4350, %v11572_v40   ;;  %v8085_v45 = vpop.xlane.xlu1 %3334  ;;  %v11575_v11 = vld [vmem:[#allocation26_spill] sm:$0xff] }
 0x185   : > { %v8076_v29 = vsel %vm11119_vm0, 1, %v11265_v9  ;;  %v2323_v28 = vsel %vm2135_vm5, %v2297_v47, inf  ;;  %v4504_v51 = vpop.eup %4503  ;;  %4513 = vrsqrt.f32 %v8005_v27  ;;  %11573 = vst [vmem:[#allocation75_spill] sm:$0xff] %v8085_v45  ;;  %v8087_v20 = vpop.xlane.xlu0 %2246  ;;  %v2062_v3 = vsel %vm2060_vm8, %v2061_v5, %v2059_v13  ;;  %v11578_v5 = vld [vmem:[#allocation27_spill] sm:$0xff] }
 0x186   : > { %11571 = vst [vmem:[#allocation74_spill] sm:$0xff] %v8076_v29  ;;  %v8093_v29 = vsel %vm2135_vm5, 1, %v11265_v9  ;;  %2331 = vst.msk [vmem:[%s6474_s6 + $0xa0] sm:$0xff] %vm568_vm2, %v2323_v28  ;;  %v2306_v47 = vmul.f32 %v7669_v63, %v7465_v32  ;;  %vm11576_vm14 = vcmp.gt.f32.partialorder %v6871_v23, 0.5  ;;  %v2071_v27 = vmul.f32 %v4504_v51, %v7972_v39 }
 0x187   : > { %11574 = vst [vmem:[#allocation10_spill] sm:$0xff] %v8093_v29  ;;  %389 = vperm.xlu0 %4351, %v11575_v11   ;;  %v2094_v40 = vsel %vm11576_vm14, %v2062_v3, inf  ;;  %vm2086_vm12 = vcmp.eq.f32.partialorder %v8007_v60, inf  ;;  %vm2088_vm8 = vcmp.eq.f32.partialorder %v8007_v60, 0.0  ;;  %v8105_v55 = vpop.eup %4505  ;;  %4515 = vrsqrt.f32 %v8087_v20  ;;  %v8127_v3 = vld [vmem:[%s5747_s28 + $0x3a8] sm:$0xff] }
 0x188   : > { %11577 = vst [vmem:[#allocation76_spill] sm:$0xff] %v8105_v55  ;;  %4227 = vst.msk [vmem:[%s6474_s6 + $0x358] sm:$0xff] %vm568_vm2, %v2094_v40  ;;  %v2089_v63 = vand.u32 2147483648, %v8007_v60  ;;  %vm11123_vm5 = vcmp.gt.f32.partialorder %v8080_v53, 0.5  ;;  %vm2137_vm9 = vcmp.gt.f32.partialorder %v2129_v26, 0.5  ;;  %4517 = vrsqrt.f32 %v8048_v30  ;;  %1723 = vperm.xlu1 %4350, %v11578_v5   ;;  %v384_v11 = vpop.permute.xlu1 %383  ;;  %v11580_v5 = vld [vmem:[#allocation28_spill] sm:$0xff] }
 0x189   : > { %v2073_v23 = vsel %vm2072_vm7, %v7972_v39, %v2071_v27  ;;  %vm2265_vm14 = vcmp.eq.f32.partialorder %v8050_v8, inf  ;;  %vm2307_vm0 = vcmp.eq.f32.partialorder %v7465_v32, inf  ;;  %v4508_v15 = vpop.eup %4507  ;;  %v8119_v13 = vpop.xlane.xlu0 %2249  ;;  %vm2267_vm3 = vcmp.eq.f32.partialorder %v8050_v8, 0.0  ;;  %v8193_v26 = vld [vmem:[%s10956_s2 + $0x20] sm:$0xff] }
 0x18a   : > { %v2076_v28 = vsel %vm2074_vm4, %v2075_v37, %v2073_v23  ;;  %v2268_v51 = vand.u32 2147483648, %v8050_v8  ;;  %v2308_v27 = vsel %vm2307_vm0, %v7465_v32, %v2306_v47  ;;  %v8129_v40 = vpop.eup %4509  ;;  %4519 = vrsqrt.f32 %v8119_v13 }
 0x18b   : > { %11579 = vst [vmem:[#allocation78_spill] sm:$0xff] %v8129_v40  ;;  %395 = vperm.xlu0 %4351, %v11580_v5   ;;  %vm11581_vm7 = vcmp.gt.f32.partialorder %v6923_v44, 0.5  ;;  %v2085_v39 = vmul.f32 %v4508_v15, %v8007_v60  ;;  %v2310_v37 = vand.u32 2147483648, %v7465_v32  ;;  %4521 = vrsqrt.f32 %v8085_v45  ;;  %v8151_v44 = vld [vmem:[%s5747_s28 + $0x188] sm:$0xff]  ;;  %v11584_v5 = vld [vmem:[#allocation29_spill] sm:$0xff] }
 0x18c   : > { %v2096_v30 = vsel %vm11581_vm7, %v2076_v28, inf  ;;  %v8143_v47 = vsel %vm11123_vm5, 1, %v11265_v9  ;;  %v8147_v23 = vsel %vm2137_vm9, 1, %v11265_v9  ;;  %vm2309_vm4 = vcmp.eq.f32.partialorder %v7465_v32, 0.0  ;;  %1729 = vperm.xlu1 %4350, %v11584_v5   ;;  %v387_v45 = vpop.permute.xlu1 %386  ;;  %v11590_v5 = vld [vmem:[#allocation30_spill] sm:$0xff] }
 0x18d   : > { %4229 = vst.msk [vmem:[%s6474_s6 + $0x368] sm:$0xff] %vm568_vm2, %v2096_v30  ;;  %11582 = vst [vmem:[#allocation83_spill] sm:$0xff] %v8143_v47  ;;  %v2087_v15 = vsel %vm2086_vm12, %v8007_v60, %v2085_v39  ;;  %vm2279_vm0 = vcmp.eq.f32.partialorder %v8087_v20, inf  ;;  %v2311_v30 = vsel %vm2309_vm4, %v2310_v37, %v2308_v27  ;;  %vm2772_vm7 = vcmp.gt.f32.partialorder %v8127_v3, 0.5  ;;  %v4512_v28 = vpop.eup %4511  ;;  %v8159_v40 = vpop.xlane.xlu0 %2255 }
 0x18e   : > { %11583 = vst [vmem:[#allocation79_spill] sm:$0xff] %v8147_v23  ;;  %vm402_vm5 = vcmp.eq.s32.totalorder %v384_v11, 1  ;;  %v2090_v32 = vsel %vm2088_vm8, %v2089_v63, %v2087_v15  ;;  %v2325_v55 = vsel %vm2137_vm9, %v2311_v30, inf  ;;  %v2483_v39 = vmul.f32 %v7712_v6, %v7515_v46  ;;  %v8206_v30 = vld [vmem:[%s10956_s2 + $0x28] sm:$0xff] }
 0x18f   : > { %4523 = vrsqrt.f32 %v8159_v40  ;;  %606 = vperm.xlu0 %4351, %v6890_v61   ;;  %v2098_v27 = vsel %vm1910_vm1, %v2090_v32, inf  ;;  %v2264_v37 = vmul.f32 %v4512_v28, %v8050_v8  ;;  %2333 = vst.msk [vmem:[%s6474_s6 + $0xb0] sm:$0xff] %vm568_vm2, %v2325_v55  ;;  %vm2344_vm12 = vcmp.gt.f32.partialorder %v8151_v44, 0.5  ;;  %v8174_v60 = vpop.eup %4513 }
 0x190   : > { %11585 = vst [vmem:[#allocation80_spill] sm:$0xff] %v8174_v60  ;;  %4231 = vst.msk [vmem:[%s6474_s6 + $0x378] sm:$0xff] %vm568_vm2, %v2098_v27  ;;  %vm2281_vm8 = vcmp.eq.f32.partialorder %v8087_v20, 0.0  ;;  %v2282_v6 = vand.u32 2147483648, %v8087_v20  ;;  %v8183_v61 = vsel %vm2772_vm7, 1, %v11265_v9  ;;  %v8188_v17 = vsel %vm2344_vm12, 1, %v11265_v9  ;;  %1920 = vperm.xlu1 %4350, %v11590_v5   ;;  %v393_v32 = vpop.permute.xlu1 %392 }
 0x191   : > { %11586 = vst [vmem:[#allocation84_spill] sm:$0xff] %v8183_v61  ;;  %11587 = vst [vmem:[#allocation82_spill] sm:$0xff] %v8188_v17  ;;  %v8197_v55 = vsel %vm402_vm5, %v8193_v26, inf  ;;  %vm403_vm1 = vcmp.eq.s32.totalorder %v387_v45, 1  ;;  %v2266_v63 = vsel %vm2265_vm14, %v8050_v8, %v2264_v37  ;;  %vm2484_vm9 = vcmp.eq.f32.partialorder %v7515_v46, inf  ;;  %v4516_v15 = vpop.eup %4515  ;;  %v8213_v27 = vpop.xlane.xlu0 %2261  ;;  %v8230_v8 = vld [vmem:[%s10956_s2 + $0x30] sm:$0xff] }
 0x192   : > { %11588 = vst [vmem:[#allocation85_spill] sm:$0xff] %v8197_v55  ;;  %v8210_v28 = vsel %vm402_vm5, %v8206_v30, inf  ;;  %v2269_v37 = vsel %vm2267_vm3, %v2268_v51, %v2266_v63  ;;  %vm2286_vm14 = vcmp.eq.f32.partialorder %v8119_v13, inf  ;;  %v2485_v55 = vsel %vm2484_vm9, %v7515_v46, %v2483_v39  ;;  %v8219_v60 = vpop.eup %4517  ;;  %v8247_v63 = vld [vmem:[%s10956_s2 + $0x38] sm:$0xff] }
 0x193   : > { %11589 = vst [vmem:[#allocation86_spill] sm:$0xff] %v8210_v28  ;;  %11591 = vst [vmem:[#allocation90_spill] sm:$0xff] %v8219_v60  ;;  %4525 = vrsqrt.f32 %v8213_v27  ;;  %615 = vperm.xlu0 %4351, %v6945_v24   ;;  %v2319_v11 = vsel %vm2131_vm13, %v2269_v37, inf  ;;  %v2278_v5 = vmul.f32 %v4516_v15, %v8087_v20  ;;  %v2487_v28 = vand.u32 2147483648, %v7515_v46 }
 0x194   : > { %v8234_v51 = vsel %vm403_vm1, %v8230_v8, inf  ;;  %2327 = vst.msk [vmem:[%s6474_s6 + $0x80] sm:$0xff] %vm568_vm2, %v2319_v11  ;;  %vm2288_vm3 = vcmp.eq.f32.partialorder %v8119_v13, 0.0  ;;  %v2289_v24 = vand.u32 2147483648, %v8119_v13  ;;  %vm2486_vm13 = vcmp.eq.f32.partialorder %v7515_v46, 0.0  ;;  %v4520_v39 = vpop.eup %4519  ;;  %v399_v17 = vpop.permute.xlu1 %398 }
 0x195   : > { %11592 = vst [vmem:[#allocation89_spill] sm:$0xff] %v8234_v51  ;;  %v8251_v15 = vsel %vm403_vm1, %v8247_v63, inf  ;;  %v2280_v37 = vsel %vm2279_vm0, %v8087_v20, %v2278_v5  ;;  %v2488_v11 = vsel %vm2486_vm13, %v2487_v28, %v2485_v55  ;;  %v2504_v46 = vmul.f32 %v7763_v16, %v7554_v7  ;;  %v8258_v60 = vpop.eup %4521  ;;  %v11595_v51 = vld [vmem:[#allocation31_spill] sm:$0xff]  ;;  %v8261_v61 = vpop.xlane.xlu0 %2452  ;;  %v4236_v28 = vld [vmem:[%s5747_s28 + $0x1a0] sm:$0xff] }
 0x196   : > { %11593 = vst [vmem:[#allocation87_spill] sm:$0xff] %v8251_v15  ;;  %11594 = vst [vmem:[#allocation88_spill] sm:$0xff] %v8258_v60  ;;  %vm405_vm5 = vcmp.eq.s32.totalorder %v393_v32, 1  ;;  %1926 = vperm.xlu1 %4350, %v11595_v51   ;;  %v2283_v45 = vsel %vm2281_vm8, %v2282_v6, %v2280_v37  ;;  %v2285_v15 = vmul.f32 %v4520_v39, %v8119_v13  ;;  %v2532_v55 = vsel %vm2344_vm12, %v2488_v11, inf  ;;  %v8292_v6 = vld [vmem:[%s10956_s2 + $0x50] sm:$0xff]  ;;  %v8304_v39 = vld [vmem:[%s10956_s2 + $0x58] sm:$0xff] }
 0x197   : > { %4527 = vrsqrt.f32 %v8261_v61  ;;  %621 = vperm.xlu0 %4351, %v6987_v21   ;;  %vm11596_vm4 = vcmp.gt.f32.partialorder %v7143_v35, 0.5  ;;  %vm2300_vm0 = vcmp.eq.f32.partialorder %v8159_v40, inf  ;;  %4241 = vst.msk [vmem:[%s6474_s6 + $0x188] sm:$0xff] %vm568_vm2, %v2532_v55  ;;  %vm11127_vm1 = vcmp.gt.f32.partialorder %v8242_v41, 0.5  ;;  %v11605_v60 = vld [vmem:[#allocation40_spill] sm:$0xff] }
 0x198   : > { %v2321_v16 = vsel %vm11596_vm4, %v2283_v45, inf  ;;  %v2287_v20 = vsel %vm2286_vm14, %v8119_v13, %v2285_v15  ;;  %vm2302_vm12 = vcmp.eq.f32.partialorder %v8159_v40, 0.0  ;;  %v2303_v44 = vand.u32 2147483648, %v8159_v40  ;;  %v604_v37 = vpop.permute.xlu1 %603  ;;  %v11600_v45 = vld [vmem:[#allocation38_spill] sm:$0xff] }
 0x199   : > { %2329 = vst.msk [vmem:[%s6474_s6 + $0x90] sm:$0xff] %vm568_vm2, %v2321_v16  ;;  %v8287_v21 = vsel %vm11127_vm1, 1, %v11265_v9  ;;  %v4524_v35 = vpop.eup %4523  ;;  %v8296_v5 = vsel %vm405_vm5, %v8292_v6, inf  ;;  %v2290_v51 = vsel %vm2288_vm3, %v2289_v24, %v2287_v20  ;;  %vm2347_vm8 = vcmp.gt.f32.partialorder %v4236_v28, 0.5  ;;  %v8311_v11 = vpop.xlane.xlu0 %2458  ;;  %v11602_v16 = vld [vmem:[#allocation32_spill] sm:$0xff]  ;;  %v11609_v28 = vld [vmem:[#allocation34_spill] sm:$0xff] }
 0x19a   : > { %11597 = vst [vmem:[#allocation93_spill] sm:$0xff] %v8287_v21  ;;  %11598 = vst [vmem:[#allocation11_spill] sm:$0xff] %v8296_v5  ;;  %vm2505_vm9 = vcmp.eq.f32.partialorder %v7554_v7, inf  ;;  %v8308_v15 = vsel %vm405_vm5, %v8304_v39, inf  ;;  %1929 = vperm.xlu1 %4350, %v6992_v33   ;;  %vm11601_vm14 = vcmp.gt.f32.partialorder %v11600_v45, 0.5  ;;  %v2299_v24 = vmul.f32 %v4524_v35, %v8159_v40  ;;  %v11615_v21 = vld [vmem:[#allocation35_spill] sm:$0xff] }
 0x19b   : > { %11599 = vst [vmem:[#allocation12_spill] sm:$0xff] %v8308_v15  ;;  %v2322_v13 = vsel %vm11601_vm14, %v2290_v51, inf  ;;  %v2506_v55 = vsel %vm2505_vm9, %v7554_v7, %v2504_v46  ;;  %4529 = vrsqrt.f32 %v8311_v11  ;;  %828 = vperm.xlu0 %4351, %v11602_v16   ;;  %vm2314_vm3 = vcmp.eq.f32.partialorder %v8213_v27, inf }
 0x19c   : > { %2330 = vst.msk [vmem:[%s6474_s6 + $0x98] sm:$0xff] %vm568_vm2, %v2322_v13  ;;  %vm2316_vm13 = vcmp.eq.f32.partialorder %v8213_v27, 0.0  ;;  %v2508_v33 = vand.u32 2147483648, %v7554_v7  ;;  %vm407_vm5 = vcmp.eq.s32.totalorder %v399_v17, 1  ;;  %v2301_v32 = vsel %vm2300_vm0, %v8159_v40, %v2299_v24  ;;  %v8337_v13 = vld [vmem:[%s5747_s28 + $0xc0] sm:$0xff]  ;;  %v11604_v24 = vld [vmem:[#allocation33_spill] sm:$0xff]  ;;  %v610_v16 = vpop.permute.xlu1 %609 }
 0x19d   : > { %v2317_v46 = vand.u32 2147483648, %v8213_v27  ;;  %vm2507_vm4 = vcmp.eq.f32.partialorder %v7554_v7, 0.0  ;;  %v4526_v20 = vpop.eup %4525  ;;  %v2304_v35 = vsel %vm2302_vm12, %v2303_v44, %v2301_v32  ;;  %vm2477_vm9 = vcmp.eq.f32.partialorder %v8261_v61, inf  ;;  %v8340_v7 = vpop.xlane.xlu0 %2461  ;;  %v4238_v17 = vld [vmem:[%s5747_s28 + $0x1b0] sm:$0xff] }
 0x19e   : > { %v8334_v51 = vsel %vm2347_vm8, 1, %v11265_v9  ;;  %v2509_v45 = vsel %vm2507_vm4, %v2508_v33, %v2506_v55  ;;  %vm626_vm0 = vcmp.eq.s32.totalorder %v604_v37, 1  ;;  %1935 = vperm.xlu1 %4350, %v11604_v24   ;;  %vm11606_vm14 = vcmp.gt.f32.partialorder %v11605_v60, 0.5  ;;  %v8349_v55 = vld [vmem:[%s10956_s2 + $0x70] sm:$0xff]  ;;  %v8358_v24 = vld [vmem:[%s10956_s2 + $0x78] sm:$0xff] }
 0x19f   : > { %11603 = vst [vmem:[#allocation94_spill] sm:$0xff] %v8334_v51  ;;  %v2324_v40 = vsel %vm11606_vm14, %v2304_v35, inf  ;;  %v2313_v44 = vmul.f32 %v4526_v20, %v8213_v27  ;;  %v2535_v32 = vsel %vm2347_vm8, %v2509_v45, inf  ;;  %v8353_v33 = vsel %vm407_vm5, %v8349_v55, inf  ;;  %837 = vperm.xlu0 %4351, %v11609_v28   ;;  %v8393_v28 = vld [vmem:[%s10956_s2 + $0x8] sm:$0xff]  ;;  %v11613_v51 = vld [vmem:[#allocation45_spill] sm:$0xff] }
 0x1a0   : > { %11607 = vst [vmem:[#allocation13_spill] sm:$0xff] %v8353_v33  ;;  %v8362_v60 = vsel %vm407_vm5, %v8358_v24, inf  ;;  %4531 = vrsqrt.f32 %v8340_v7  ;;  %2332 = vst.msk [vmem:[%s6474_s6 + $0xa8] sm:$0xff] %vm568_vm2, %v2324_v40  ;;  %vm2479_vm12 = vcmp.eq.f32.partialorder %v8261_v61, 0.0  ;;  %v2480_v35 = vand.u32 2147483648, %v8261_v61  ;;  %v8381_v40 = vld [vmem:[%s10956_s2] sm:$0xff]  ;;  %v613_v15 = vpop.permute.xlu1 %612 }
 0x1a1   : > { %11608 = vst [vmem:[#allocation14_spill] sm:$0xff] %v8362_v60  ;;  %4244 = vst.msk [vmem:[%s6474_s6 + $0x1a0] sm:$0xff] %vm568_vm2, %v2535_v32  ;;  %v2315_v20 = vsel %vm2314_vm3, %v8213_v27, %v2313_v44  ;;  %vm2491_vm8 = vcmp.eq.f32.partialorder %v8311_v11, inf  ;;  %vm11126_vm5 = vcmp.gt.f32.partialorder %v8337_v13, 0.5  ;;  %v4528_v45 = vpop.eup %4527  ;;  %v8385_v32 = vsel %vm626_vm0, %v8381_v40, inf  ;;  %v11612_v33 = vld [vmem:[#allocation41_spill] sm:$0xff]  ;;  %v8400_v5 = vpop.xlane.xlu0 %2467 }
 0x1a2   : > { %11610 = vst [vmem:[#allocation15_spill] sm:$0xff] %v8385_v32  ;;  %vm628_vm4 = vcmp.eq.s32.totalorder %v610_v16, 1  ;;  %v2318_v44 = vsel %vm2316_vm13, %v2317_v46, %v2315_v20  ;;  %vm2493_vm3 = vcmp.eq.f32.partialorder %v8311_v11, 0.0  ;;  %v8397_v60 = vsel %vm626_vm0, %v8393_v28, inf  ;;  %1941 = vperm.xlu1 %4350, %v11612_v33  }
 0x1a3   : > { %11611 = vst [vmem:[#allocation91_spill] sm:$0xff] %v8397_v60  ;;  %vm11614_vm14 = vcmp.gt.f32.partialorder %v11613_v51, 0.5  ;;  %v2476_v46 = vmul.f32 %v4528_v45, %v8261_v61  ;;  %v2518_v20 = vmul.f32 %v7797_v19, %v7599_v49  ;;  %4533 = vrsqrt.f32 %v8400_v5  ;;  %843 = vperm.xlu0 %4351, %v11615_v21   ;;  %v11626_v60 = vld [vmem:[#allocation52_spill] sm:$0xff] }
 0x1a4   : > { %v2326_v27 = vsel %vm11614_vm14, %v2318_v44, inf  ;;  %v2494_v37 = vand.u32 2147483648, %v8311_v11  ;;  %v8415_v33 = vsel %vm11126_vm5, 1, %v11265_v9  ;;  %vm2349_vm13 = vcmp.gt.f32.partialorder %v4238_v17, 0.5 }
 0x1a5   : > { %2334 = vst.msk [vmem:[%s6474_s6 + $0xb8] sm:$0xff] %vm568_vm2, %v2326_v27  ;;  %11616 = vst [vmem:[#allocation92_spill] sm:$0xff] %v8415_v33  ;;  %v8419_v51 = vsel %vm628_vm4, %v8193_v26, inf  ;;  %v2478_v19 = vsel %vm2477_vm9, %v8261_v61, %v2476_v46  ;;  %vm2498_vm0 = vcmp.eq.f32.partialorder %v8340_v7, inf  ;;  %v8427_v21 = vsel %vm2349_vm13, 1, %v11265_v9  ;;  %v4530_v45 = vpop.eup %4529  ;;  %v11620_v46 = vld [vmem:[#allocation36_spill] sm:$0xff]  ;;  %v619_v33 = vpop.permute.xlu1 %618 }
 0x1a6   : > { %11617 = vst [vmem:[#allocation16_spill] sm:$0xff] %v8419_v51  ;;  %11618 = vst [vmem:[#allocation17_spill] sm:$0xff] %v8427_v21  ;;  %v8431_v44 = vsel %vm628_vm4, %v8206_v30, inf  ;;  %v2481_v27 = vsel %vm2479_vm12, %v2480_v35, %v2478_v19  ;;  %vm2500_vm14 = vcmp.eq.f32.partialorder %v8340_v7, 0.0  ;;  %vm2519_vm5 = vcmp.eq.f32.partialorder %v7599_v49, inf  ;;  %2148 = vperm.xlu1 %4350, %v11620_v46   ;;  %v8438_v23 = vpop.xlane.xlu0 %2473  ;;  %v11621_v21 = vld [vmem:[#allocation53_spill] sm:$0xff] }
 0x1a7   : > { %11619 = vst [vmem:[#allocation18_spill] sm:$0xff] %v8431_v44  ;;  %vm629_vm9 = vcmp.eq.s32.totalorder %v613_v15, 1  ;;  %vm11622_vm1 = vcmp.gt.f32.partialorder %v11621_v21, 0.5  ;;  %v2490_v16 = vmul.f32 %v4530_v45, %v8311_v11  ;;  %v2520_v29 = vsel %vm2519_vm5, %v7599_v49, %v2518_v20  ;;  %v11623_v35 = vld [vmem:[#allocation42_spill] sm:$0xff]  ;;  %v8460_v45 = vld [vmem:[%s5747_s28 + $0xd0] sm:$0xff]  ;;  %v11625_v61 = vld [vmem:[#allocation37_spill] sm:$0xff] }
 0x1a8   : > { %v2531_v47 = vsel %vm11622_vm1, %v2481_v27, inf  ;;  %4535 = vrsqrt.f32 %v8438_v23  ;;  %1050 = vperm.xlu0 %4351, %v11623_v35   ;;  %v2501_v19 = vand.u32 2147483648, %v8340_v7  ;;  %v2522_v46 = vand.u32 2147483648, %v7599_v49 }
 0x1a9   : > { %4240 = vst.msk [vmem:[%s6474_s6 + $0x180] sm:$0xff] %vm568_vm2, %v2531_v47  ;;  %v2492_v20 = vsel %vm2491_vm8, %v8311_v11, %v2490_v16  ;;  %vm2512_vm1 = vcmp.eq.f32.partialorder %v8400_v5, inf  ;;  %vm2521_vm12 = vcmp.eq.f32.partialorder %v7599_v49, 0.0  ;;  %v8464_v47 = vsel %vm629_vm9, %v8230_v8, inf  ;;  %v4249_v16 = vld [vmem:[%s5747_s28 + $0x288] sm:$0xff]  ;;  %v625_v44 = vpop.permute.xlu1 %624 }
 0x1aa   : > { %v4532_v27 = vpop.eup %4531  ;;  %11624 = vst [vmem:[#allocation19_spill] sm:$0xff] %v8464_v47  ;;  %v2495_v35 = vsel %vm2493_vm3, %v2494_v37, %v2492_v20  ;;  %vm2514_vm5 = vcmp.eq.f32.partialorder %v8400_v5, 0.0  ;;  %v2523_v21 = vsel %vm2521_vm12, %v2522_v46, %v2520_v29  ;;  %2154 = vperm.xlu1 %4350, %v11625_v61   ;;  %v8471_v49 = vpop.xlane.xlu0 %2664  ;;  %vm11627_vm8 = vcmp.gt.f32.partialorder %v11626_v60, 0.5  ;;  %v11629_v29 = vld [vmem:[#allocation43_spill] sm:$0xff]  ;;  %v8538_v20 = vld [vmem:[%s5747_s28 + $0xd8] sm:$0xff] }
 0x1ab   : > { %v2533_v51 = vsel %vm11627_vm8, %v2495_v35, inf  ;;  %v2497_v32 = vmul.f32 %v4532_v27, %v8340_v7  ;;  %v2537_v47 = vsel %vm2349_vm13, %v2523_v21, inf  ;;  %v2695_v11 = vmul.f32 %v7843_v36, %v7646_v50  ;;  %v11631_v61 = vld [vmem:[#allocation39_spill] sm:$0xff]  ;;  %v11634_v35 = vld [vmem:[#allocation46_spill] sm:$0xff] }
 0x1ac   : > { %v8481_v37 = vsel %vm629_vm9, %v8247_v63, inf  ;;  %vm631_vm4 = vcmp.eq.s32.totalorder %v619_v33, 1  ;;  %4537 = vrsqrt.f32 %v8471_v49  ;;  %1059 = vperm.xlu0 %4351, %v11629_v29   ;;  %4242 = vst.msk [vmem:[%s6474_s6 + $0x190] sm:$0xff] %vm568_vm2, %v2533_v51  ;;  %4246 = vst.msk [vmem:[%s6474_s6 + $0x1b0] sm:$0xff] %vm568_vm2, %v2537_v47  ;;  %vm2997_vm3 = vcmp.gt.f32.partialorder %v8460_v45, 0.5 }
 0x1ad   : > { %11628 = vst [vmem:[#allocation20_spill] sm:$0xff] %v8481_v37  ;;  %v2499_v60 = vsel %vm2498_vm0, %v8340_v7, %v2497_v32  ;;  %v2515_v36 = vand.u32 2147483648, %v8400_v5  ;;  %v8497_v15 = vsel %vm2997_vm3, 1, %v11265_v9  ;;  %vm2556_vm13 = vcmp.gt.f32.partialorder %v4249_v16, 0.5  ;;  %v4534_v17 = vpop.eup %4533  ;;  %v826_v46 = vpop.permute.xlu1 %825 }
 0x1ae   : > { %v2502_v51 = vsel %vm2500_vm14, %v2501_v19, %v2499_v60  ;;  %vm2526_vm9 = vcmp.eq.f32.partialorder %v8438_v23, inf  ;;  %vm2528_vm12 = vcmp.eq.f32.partialorder %v8438_v23, 0.0  ;;  %vm2696_vm8 = vcmp.eq.f32.partialorder %v7646_v50, inf  ;;  %2157 = vperm.xlu1 %4350, %v11631_v61   ;;  %v8509_v21 = vpop.xlane.xlu0 %2670 }
 0x1af   : > { %v8506_v32 = vsel %vm631_vm4, %v8292_v6, inf  ;;  %v2534_v27 = vsel %vm2346_vm15, %v2502_v51, inf  ;;  %v2511_v7 = vmul.f32 %v4534_v17, %v8400_v5  ;;  %v2697_v19 = vsel %vm2696_vm8, %v7646_v50, %v2695_v11 }
 0x1b0   : > { %11630 = vst [vmem:[#allocation21_spill] sm:$0xff] %v8506_v32  ;;  %v8517_v47 = vsel %vm631_vm4, %v8304_v39, inf  ;;  %4539 = vrsqrt.f32 %v8509_v21  ;;  %1065 = vperm.xlu0 %4351, %v11634_v35   ;;  %4243 = vst.msk [vmem:[%s6474_s6 + $0x198] sm:$0xff] %vm568_vm2, %v2534_v27  ;;  %v2529_v29 = vand.u32 2147483648, %v8438_v23  ;;  %v2699_v60 = vand.u32 2147483648, %v7646_v50  ;;  %v8541_v27 = vld [vmem:[%s5747_s28 + $0x2a0] sm:$0xff] }
 0x1b1   : > { %11633 = vst [vmem:[#allocation22_spill] sm:$0xff] %v8517_v47  ;;  %vm633_vm15 = vcmp.eq.s32.totalorder %v625_v44, 1  ;;  %v2513_v11 = vsel %vm2512_vm1, %v8400_v5, %v2511_v7  ;;  %v8530_v33 = vsel %vm2556_vm13, 1, %v11265_v9  ;;  %vm2698_vm0 = vcmp.eq.f32.partialorder %v7646_v50, 0.0  ;;  %v11635_v7 = vld [vmem:[#allocation44_spill] sm:$0xff]  ;;  %v832_v35 = vpop.permute.xlu1 %831 }
 0x1b2   : > { %v4536_v17 = vpop.eup %4535  ;;  %v2516_v51 = vsel %vm2514_vm5, %v2515_v36, %v2513_v11  ;;  %vm2689_vm14 = vcmp.eq.f32.partialorder %v8471_v49, inf  ;;  %vm2691_vm4 = vcmp.eq.f32.partialorder %v8471_v49, 0.0  ;;  %v2700_v61 = vsel %vm2698_vm0, %v2699_v60, %v2697_v19  ;;  %2163 = vperm.xlu1 %4350, %v11635_v7   ;;  %v8544_v50 = vpop.xlane.xlu0 %2673  ;;  %v11639_v7 = vld [vmem:[#allocation48_spill] sm:$0xff] }
 0x1b3   : > { %vm848_vm1 = vcmp.eq.s32.totalorder %v826_v46, 1  ;;  %v2536_v5 = vsel %vm2348_vm6, %v2516_v51, inf  ;;  %v2525_v36 = vmul.f32 %v4536_v17, %v8438_v23  ;;  %v2744_v11 = vsel %vm2556_vm13, %v2700_v61, inf }
 0x1b4   : > { %v8552_v19 = vsel %vm633_vm15, %v8349_v55, inf  ;;  %v8556_v60 = vsel %vm633_vm15, %v8358_v24, inf  ;;  %4541 = vrsqrt.f32 %v8544_v50  ;;  %1287 = vperm.xlu0 %4351, %v11639_v7   ;;  %4245 = vst.msk [vmem:[%s6474_s6 + $0x1a8] sm:$0xff] %vm568_vm2, %v2536_v5  ;;  %v2692_v47 = vand.u32 2147483648, %v8471_v49  ;;  %4257 = vst.msk [vmem:[%s6474_s6 + $0x288] sm:$0xff] %vm568_vm2, %v2744_v11  ;;  %v11642_v5 = vld [vmem:[#allocation47_spill] sm:$0xff] }
 0x1b5   : > { %11637 = vst [vmem:[#allocation23_spill] sm:$0xff] %v8552_v19  ;;  %11638 = vst [vmem:[#allocation24_spill] sm:$0xff] %v8556_v60  ;;  %v2527_v16 = vsel %vm2526_vm9, %v8438_v23, %v2525_v36  ;;  %vm2703_vm6 = vcmp.eq.f32.partialorder %v8509_v21, inf  ;;  %vm2998_vm5 = vcmp.gt.f32.partialorder %v8538_v20, 0.5  ;;  %vm2559_vm13 = vcmp.gt.f32.partialorder %v8541_v27, 0.5  ;;  %v835_v36 = vpop.permute.xlu1 %834  ;;  %v9109_v20 = vld [vmem:[%s10956_s2 + $0xd8] sm:$0xff] }
 0x1b6   : > { %v4538_v44 = vpop.eup %4537  ;;  %v8573_v17 = vsel %vm848_vm1, %v8381_v40, inf  ;;  %vm850_vm8 = vcmp.eq.s32.totalorder %v832_v35, 1  ;;  %v2530_v51 = vsel %vm2528_vm12, %v2529_v29, %v2527_v16  ;;  %vm2705_vm15 = vcmp.eq.f32.partialorder %v8509_v21, 0.0  ;;  %2169 = vperm.xlu1 %4350, %v11642_v5   ;;  %v8583_v11 = vpop.xlane.xlu0 %2679  ;;  %v11644_v29 = vld [vmem:[#allocation49_spill] sm:$0xff]  ;;  %v11648_v35 = vld [vmem:[#allocation51_spill] sm:$0xff] }
 0x1b7   : > { %11640 = vst [vmem:[#allocation25_spill] sm:$0xff] %v8573_v17  ;;  %v8580_v61 = vsel %vm848_vm1, %v8393_v28, inf  ;;  %vm11643_vm9 = vcmp.gt.f32.partialorder %v7624_v34, 0.5  ;;  %v2688_v60 = vmul.f32 %v4538_v44, %v8471_v49  ;;  %v2716_v23 = vmul.f32 %v7884_v48, %v7692_v14 }
 0x1b8   : > { %11641 = vst [vmem:[#allocation26_spill] sm:$0xff] %v8580_v61  ;;  %v2538_v7 = vsel %vm11643_vm9, %v2530_v51, inf  ;;  %4543 = vrsqrt.f32 %v8583_v11  ;;  %1296 = vperm.xlu0 %4351, %v11644_v29   ;;  %v2706_v46 = vand.u32 2147483648, %v8509_v21  ;;  %v8598_v16 = vsel %vm2998_vm5, 1, %v11265_v9 }
 0x1b9   : > { %4247 = vst.msk [vmem:[%s6474_s6 + $0x1b8] sm:$0xff] %vm568_vm2, %v2538_v7  ;;  %v8603_v34 = vsel %vm2559_vm13, 1, %v11265_v9  ;;  %v8607_v48 = vsel %vm850_vm8, %v8193_v26, inf  ;;  %v8611_v44 = vsel %vm850_vm8, %v8206_v30, inf  ;;  %v2690_v51 = vsel %vm2689_vm14, %v8471_v49, %v2688_v60  ;;  %v841_v19 = vpop.permute.xlu1 %840 }
 0x1ba   : > { %11645 = vst [vmem:[#allocation27_spill] sm:$0xff] %v8603_v34  ;;  %11646 = vst [vmem:[#allocation28_spill] sm:$0xff] %v8607_v48  ;;  %vm2710_vm12 = vcmp.eq.f32.partialorder %v8544_v50, inf  ;;  %v4540_v5 = vpop.eup %4539  ;;  %v2693_v7 = vsel %vm2691_vm4, %v2692_v47, %v2690_v51  ;;  %vm2712_vm0 = vcmp.eq.f32.partialorder %v8544_v50, 0.0  ;;  %v2713_v29 = vand.u32 2147483648, %v8544_v50  ;;  %2360 = vperm.xlu1 %4350, %v11648_v35   ;;  %v8623_v60 = vpop.xlane.xlu0 %2685  ;;  %v11649_v35 = vld [vmem:[#allocation50_spill] sm:$0xff] }
 0x1bb   : > { %11647 = vst [vmem:[#allocation29_spill] sm:$0xff] %v8611_v44  ;;  %vm2717_vm1 = vcmp.eq.f32.partialorder %v7692_v14, inf  ;;  %vm851_vm9 = vcmp.eq.s32.totalorder %v835_v36, 1  ;;  %v2743_v32 = vsel %vm2555_vm10, %v2693_v7, inf  ;;  %v2702_v49 = vmul.f32 %v4540_v5, %v8509_v21  ;;  %v4254_v5 = vld [vmem:[%s5747_s28 + $0x2b0] sm:$0xff]  ;;  %v11650_v51 = vld [vmem:[#allocation55_spill] sm:$0xff] }
 0x1bc   : > { %v2718_v47 = vsel %vm2717_vm1, %v7692_v14, %v2716_v23  ;;  %4545 = vrsqrt.f32 %v8623_v60  ;;  %1302 = vperm.xlu0 %4351, %v11649_v35   ;;  %4256 = vst.msk [vmem:[%s6474_s6 + $0x280] sm:$0xff] %vm568_vm2, %v2743_v32  ;;  %v2720_v34 = vand.u32 2147483648, %v7692_v14  ;;  %vm2724_vm10 = vcmp.eq.f32.partialorder %v8583_v11, inf  ;;  %v8645_v23 = vld [vmem:[%s5747_s28 + $0xe8] sm:$0xff] }
 0x1bd   : > { %v2704_v25 = vsel %vm2703_vm6, %v8509_v21, %v2702_v49  ;;  %vm2726_vm14 = vcmp.eq.f32.partialorder %v8583_v11, 0.0  ;;  %vm2719_vm4 = vcmp.eq.f32.partialorder %v7692_v14, 0.0  ;;  %v8650_v32 = vsel %vm851_vm9, %v8230_v8, inf  ;;  %v847_v14 = vpop.permute.xlu1 %846  ;;  %v11652_v21 = vld [vmem:[#allocation54_spill] sm:$0xff] }
 0x1be   : > { %v4542_v7 = vpop.eup %4541  ;;  %v8654_v35 = vsel %vm851_vm9, %v8247_v63, inf  ;;  %v2707_v49 = vsel %vm2705_vm15, %v2706_v46, %v2704_v25  ;;  %v2721_v37 = vsel %vm2719_vm4, %v2720_v34, %v2718_v47  ;;  %2366 = vperm.xlu1 %4350, %v11650_v51   ;;  %v8659_v44 = vpop.xlane.xlu0 %2876  ;;  %vm11651_vm6 = vcmp.gt.f32.partialorder %v7751_v54, 0.5 }
 0x1bf   : > { %v2745_v61 = vsel %vm11651_vm6, %v2707_v49, inf  ;;  %v2709_v48 = vmul.f32 %v4542_v7, %v8544_v50  ;;  %v2747_v17 = vsel %vm2559_vm13, %v2721_v37, inf  ;;  %v2730_v36 = vmul.f32 %v7909_v58, %v7730_v62  ;;  %v11655_v7 = vld [vmem:[#allocation9_spill] sm:$0xff] }
 0x1c0   : > { %4547 = vrsqrt.f32 %v8659_v44  ;;  %1499 = vperm.xlu0 %4351, %v11652_v21   ;;  %4258 = vst.msk [vmem:[%s6474_s6 + $0x290] sm:$0xff] %vm568_vm2, %v2745_v61  ;;  %v2727_v46 = vand.u32 2147483648, %v8583_v11  ;;  %4260 = vst.msk [vmem:[%s6474_s6 + $0x2a0] sm:$0xff] %vm568_vm2, %v2747_v17  ;;  %vm3000_vm8 = vcmp.gt.f32.partialorder %v8645_v23, 0.5  ;;  %vm2561_vm15 = vcmp.gt.f32.partialorder %v4254_v5, 0.5  ;;  %v11653_v61 = vld [vmem:[#allocation57_spill] sm:$0xff] }
 0x1c1   : > { %vm853_vm1 = vcmp.eq.s32.totalorder %v841_v19, 1  ;;  %v2711_v54 = vsel %vm2710_vm12, %v8544_v50, %v2709_v48  ;;  %v8682_v58 = vsel %vm3000_vm8, 1, %v11265_v9  ;;  %v8686_v37 = vsel %vm2561_vm15, 1, %v11265_v9  ;;  %v1048_v34 = vpop.permute.xlu1 %1047  ;;  %v8720_v19 = vld [vmem:[%s5747_s28 + $0xf8] sm:$0xff] }
 0x1c2   : > { %v4544_v27 = vpop.eup %4543  ;;  %v2714_v17 = vsel %vm2712_vm0, %v2713_v29, %v2711_v54  ;;  %vm2738_vm13 = vcmp.eq.f32.partialorder %v8623_v60, inf  ;;  %vm2740_vm9 = vcmp.eq.f32.partialorder %v8623_v60, 0.0  ;;  %vm2731_vm12 = vcmp.eq.f32.partialorder %v7730_v62, inf  ;;  %2369 = vperm.xlu1 %4350, %v11653_v61   ;;  %v8694_v48 = vpop.xlane.xlu0 %2882  ;;  %v4265_v61 = vld [vmem:[%s5747_s28 + $0x388] sm:$0xff] }
 0x1c3   : > { %vm855_vm4 = vcmp.eq.s32.totalorder %v847_v14, 1  ;;  %v2746_v47 = vsel %vm2558_vm11, %v2714_v17, inf  ;;  %v2723_v50 = vmul.f32 %v4544_v27, %v8583_v11  ;;  %v2732_v29 = vsel %vm2731_vm12, %v7730_v62, %v2730_v36 }
 0x1c4   : > { %v8702_v51 = vsel %vm853_vm1, %v8292_v6, inf  ;;  %v8706_v25 = vsel %vm853_vm1, %v8304_v39, inf  ;;  %4549 = vrsqrt.f32 %v8694_v48  ;;  %1508 = vperm.xlu0 %4351, %v11655_v7   ;;  %4259 = vst.msk [vmem:[%s6474_s6 + $0x298] sm:$0xff] %vm568_vm2, %v2746_v47  ;;  %v2734_v0 = vand.u32 2147483648, %v7730_v62  ;;  %v11657_v47 = vld [vmem:[#allocation59_spill] sm:$0xff] }
 0x1c5   : > { %11654 = vst [vmem:[#allocation30_spill] sm:$0xff] %v8706_v25  ;;  %v2725_v49 = vsel %vm2724_vm10, %v8583_v11, %v2723_v50  ;;  %v2741_v36 = vand.u32 2147483648, %v8623_v60  ;;  %vm2901_vm11 = vcmp.eq.f32.partialorder %v8659_v44, inf  ;;  %vm2733_vm0 = vcmp.eq.f32.partialorder %v7730_v62, 0.0  ;;  %v1054_v50 = vpop.permute.xlu1 %1053 }
 0x1c6   : > { %v4546_v21 = vpop.eup %4545  ;;  %v8724_v54 = vsel %vm855_vm4, %v8349_v55, inf  ;;  %v2728_v27 = vsel %vm2726_vm14, %v2727_v46, %v2725_v49  ;;  %vm2903_vm10 = vcmp.eq.f32.partialorder %v8659_v44, 0.0  ;;  %v2735_v17 = vsel %vm2733_vm0, %v2734_v0, %v2732_v29  ;;  %2375 = vperm.xlu1 %4350, %v11657_v47   ;;  %v8731_v62 = vpop.xlane.xlu0 %2885  ;;  %v11659_v29 = vld [vmem:[#allocation60_spill] sm:$0xff]  ;;  %v11660_v49 = vld [vmem:[#allocation61_spill] sm:$0xff] }
 0x1c7   : > { %11656 = vst [vmem:[#allocation31_spill] sm:$0xff] %v8724_v54  ;;  %vm11658_vm6 = vcmp.gt.f32.partialorder %v7866_v12, 0.5  ;;  %v2737_v25 = vmul.f32 %v4546_v21, %v8623_v60  ;;  %v2749_v54 = vsel %vm2561_vm15, %v2735_v17, inf  ;;  %v2907_v11 = vmul.f32 %v7956_v4, %v7776_v31  ;;  %v11663_v47 = vld [vmem:[#allocation68_spill] sm:$0xff] }
 0x1c8   : > { %v2748_v7 = vsel %vm11658_vm6, %v2728_v27, inf  ;;  %v8741_v46 = vsel %vm855_vm4, %v8358_v24, inf  ;;  %4551 = vrsqrt.f32 %v8731_v62  ;;  %1514 = vperm.xlu0 %4351, %v11659_v29   ;;  %v2904_v12 = vand.u32 2147483648, %v8659_v44  ;;  %4262 = vst.msk [vmem:[%s6474_s6 + $0x2b0] sm:$0xff] %vm568_vm2, %v2749_v54 }
 0x1c9   : > { %4261 = vst.msk [vmem:[%s6474_s6 + $0x2a8] sm:$0xff] %vm568_vm2, %v2748_v7  ;;  %vm3002_vm14 = vcmp.gt.f32.partialorder %v8720_v19, 0.5  ;;  %vm1070_vm15 = vcmp.eq.s32.totalorder %v1048_v34, 1  ;;  %v2739_v4 = vsel %vm2738_vm13, %v8623_v60, %v2737_v25  ;;  %vm2768_vm1 = vcmp.gt.f32.partialorder %v4265_v61, 0.5  ;;  %v1057_v25 = vpop.permute.xlu1 %1056  ;;  %v9086_v61 = vld [vmem:[%s5747_s28 + $0x1e8] sm:$0xff] }
 0x1ca   : > { %v8757_v5 = vsel %vm3002_vm14, 1, %v11265_v9  ;;  %v4548_v14 = vpop.eup %4547  ;;  %v2742_v0 = vsel %vm2740_vm9, %v2741_v36, %v2739_v4  ;;  %vm2915_vm12 = vcmp.eq.f32.partialorder %v8694_v48, inf  ;;  %vm2917_vm4 = vcmp.eq.f32.partialorder %v8694_v48, 0.0  ;;  %2381 = vperm.xlu1 %4350, %v11660_v49   ;;  %v8765_v21 = vpop.xlane.xlu0 %2891 }
 0x1cb   : > { %vm2908_vm0 = vcmp.eq.f32.partialorder %v7776_v31, inf  ;;  %vm1072_vm6 = vcmp.eq.s32.totalorder %v1054_v50, 1  ;;  %vm11661_vm13 = vcmp.gt.f32.partialorder %v7932_v38, 0.5  ;;  %v2900_v27 = vmul.f32 %v4548_v14, %v8659_v44 }
 0x1cc   : > { %v2750_v54 = vsel %vm11661_vm13, %v2742_v0, inf  ;;  %v2909_v60 = vsel %vm2908_vm0, %v7776_v31, %v2907_v11  ;;  %v8773_v36 = vsel %vm1070_vm15, %v8381_v40, inf  ;;  %v8777_v17 = vsel %vm1070_vm15, %v8393_v28, inf  ;;  %1711 = vperm.xlu0 %4351, %v11663_v47  }
 0x1cd   : > { %11662 = vst [vmem:[#allocation38_spill] sm:$0xff] %v8777_v17  ;;  %4553 = vrsqrt.f32 %v8765_v21  ;;  %4263 = vst.msk [vmem:[%s6474_s6 + $0x2b8] sm:$0xff] %vm568_vm2, %v2750_v54  ;;  %v2911_v38 = vand.u32 2147483648, %v7776_v31  ;;  %v2902_v7 = vsel %vm2901_vm11, %v8659_v44, %v2900_v27  ;;  %v2918_v11 = vand.u32 2147483648, %v8694_v48  ;;  %v1063_v0 = vpop.permute.xlu1 %1062  ;;  %v11666_v44 = vld [vmem:[#allocation62_spill] sm:$0xff] }
 0x1ce   : > { %v8790_v40 = vsel %vm2768_vm1, 1, %v11265_v9  ;;  %vm2910_vm9 = vcmp.eq.f32.partialorder %v7776_v31, 0.0  ;;  %v4550_v28 = vpop.eup %4549  ;;  %v8795_v34 = vsel %vm1072_vm6, %v8193_v26, inf  ;;  %v8799_v29 = vsel %vm1072_vm6, %v8206_v30, inf  ;;  %2572 = vperm.xlu1 %4350, %v7761_v1   ;;  %v8804_v31 = vpop.xlane.xlu0 %2897  ;;  %v4268_v54 = vld [vmem:[%s5747_s28 + $0x3a0] sm:$0xff] }
 0x1cf   : > { %11664 = vst [vmem:[#allocation32_spill] sm:$0xff] %v8799_v29  ;;  %v2905_v4 = vsel %vm2903_vm10, %v2904_v12, %v2902_v7  ;;  %v2912_v14 = vsel %vm2910_vm9, %v2911_v38, %v2909_v60  ;;  %vm1073_vm11 = vcmp.eq.s32.totalorder %v1057_v25, 1  ;;  %vm11665_vm15 = vcmp.gt.f32.partialorder %v7986_v10, 0.5  ;;  %v8820_v10 = vld [vmem:[%s5747_s28 + $0x1c0] sm:$0xff] }
 0x1d0   : > { %v2955_v26 = vsel %vm11665_vm15, %v2905_v4, inf  ;;  %v2914_v50 = vmul.f32 %v4550_v28, %v8694_v48  ;;  %v2956_v30 = vsel %vm2768_vm1, %v2912_v14, inf  ;;  %4555 = vrsqrt.f32 %v8804_v31  ;;  %1720 = vperm.xlu0 %4351, %v11666_v44   ;;  %v11667_v28 = vld [vmem:[#allocation63_spill] sm:$0xff] }
 0x1d1   : > { %4272 = vst.msk [vmem:[%s6474_s6 + $0x380] sm:$0xff] %vm568_vm2, %v2955_v26  ;;  %vm2922_vm10 = vcmp.eq.f32.partialorder %v8731_v62, inf  ;;  %vm2924_vm0 = vcmp.eq.f32.partialorder %v8731_v62, 0.0  ;;  %v2925_v1 = vand.u32 2147483648, %v8731_v62  ;;  %4273 = vst.msk [vmem:[%s6474_s6 + $0x388] sm:$0xff] %vm568_vm2, %v2956_v30  ;;  %vm2936_vm1 = vcmp.eq.f32.partialorder %v8765_v21, inf  ;;  %v1069_v4 = vpop.permute.xlu1 %1068 }
 0x1d2   : > { %v2916_v49 = vsel %vm2915_vm12, %v8694_v48, %v2914_v50  ;;  %v4552_v27 = vpop.eup %4551  ;;  %v8833_v60 = vsel %vm1073_vm11, %v8230_v8, inf  ;;  %vm2938_vm6 = vcmp.eq.f32.partialorder %v8765_v21, 0.0  ;;  %v2928_v38 = vmul.f32 %v7996_v52, %v7822_v2  ;;  %2578 = vperm.xlu1 %4350, %v11667_v28   ;;  %v8845_v14 = vpop.xlane.xlu0 %3104 }
 0x1d3   : > { %v2919_v47 = vsel %vm2917_vm4, %v2918_v11, %v2916_v49  ;;  %v8842_v7 = vsel %vm1073_vm11, %v8247_v63, inf  ;;  %vm11668_vm12 = vcmp.gt.f32.partialorder %v8044_v56, 0.5  ;;  %v2921_v48 = vmul.f32 %v4552_v27, %v8731_v62  ;;  %v11669_v11 = vld [vmem:[#allocation69_spill] sm:$0xff] }
 0x1d4   : > { %v2957_v8 = vsel %vm11668_vm12, %v2919_v47, inf  ;;  %vm11136_vm4 = vcmp.gt.f32.partialorder %v8820_v10, 0.5  ;;  %4557 = vrsqrt.f32 %v8845_v14  ;;  %1726 = vperm.xlu0 %4351, %v11669_v11   ;;  %v2939_v52 = vand.u32 2147483648, %v8765_v21 }
 0x1d5   : > { %4274 = vst.msk [vmem:[%s6474_s6 + $0x390] sm:$0xff] %vm568_vm2, %v2957_v8  ;;  %v8859_v63 = vsel %vm11136_vm4, 1, %v11265_v9  ;;  %vm2771_vm13 = vcmp.gt.f32.partialorder %v4268_v54, 0.5  ;;  %vm1075_vm9 = vcmp.eq.s32.totalorder %v1063_v0, 1  ;;  %v2923_v56 = vsel %vm2922_vm10, %v8731_v62, %v2921_v48  ;;  %v1285_v44 = vpop.permute.xlu1 %1284  ;;  %v4270_v8 = vld [vmem:[%s5747_s28 + $0x3b0] sm:$0xff] }
 0x1d6   : > { %vm2929_vm11 = vcmp.eq.f32.partialorder %v7822_v2, inf  ;;  %v2932_v25 = vand.u32 2147483648, %v7822_v2  ;;  %v2926_v50 = vsel %vm2924_vm0, %v2925_v1, %v2923_v56  ;;  %vm2950_vm15 = vcmp.eq.f32.partialorder %v8804_v31, inf  ;;  %2581 = vperm.xlu1 %4350, %v7882_v22   ;;  %v8872_v49 = vpop.xlane.xlu0 %3110 }
 0x1d7   : > { %v4554_v26 = vpop.eup %4553  ;;  %v2930_v30 = vsel %vm2929_vm11, %v7822_v2, %v2928_v38  ;;  %vm2931_vm12 = vcmp.eq.f32.partialorder %v7822_v2, 0.0  ;;  %vm1077_vm4 = vcmp.eq.s32.totalorder %v1069_v4, 1  ;;  %vm11670_vm10 = vcmp.gt.f32.partialorder %v8080_v53, 0.5 }
 0x1d8   : > { %v2958_v27 = vsel %vm11670_vm10, %v2926_v50, inf  ;;  %v2935_v62 = vmul.f32 %v4554_v26, %v8765_v21  ;;  %v2933_v47 = vsel %vm2931_vm12, %v2932_v25, %v2930_v30  ;;  %v8879_v1 = vsel %vm1075_vm9, %v8292_v6, inf  ;;  %1923 = vperm.xlu0 %4351, %v7851_v42   ;;  %v8947_v26 = vld [vmem:[%s10956_s2 + $0x80] sm:$0xff] }
 0x1d9   : > { %v8883_v2 = vsel %vm1075_vm9, %v8304_v39, inf  ;;  %4559 = vrsqrt.f32 %v8872_v49  ;;  %4275 = vst.msk [vmem:[%s6474_s6 + $0x398] sm:$0xff] %vm568_vm2, %v2958_v27  ;;  %vm2952_vm0 = vcmp.eq.f32.partialorder %v8804_v31, 0.0  ;;  %v2953_v53 = vand.u32 2147483648, %v8804_v31  ;;  %v8900_v39 = vld [vmem:[%s5747_s28 + $0x1d0] sm:$0xff]  ;;  %v1291_v11 = vpop.permute.xlu1 %1290  ;;  %v11676_v30 = vld [vmem:[#allocation66_spill] sm:$0xff] }
 0x1da   : > { %v2937_v22 = vsel %vm2936_vm1, %v8765_v21, %v2935_v62  ;;  %vm3129_vm11 = vcmp.eq.f32.partialorder %v8845_v14, inf  ;;  %v8897_v6 = vsel %vm2771_vm13, 1, %v11265_v9  ;;  %v4556_v42 = vpop.eup %4555  ;;  %v8904_v0 = vsel %vm1077_vm4, %v8349_v55, inf  ;;  %2587 = vperm.xlu1 %4350, %v7903_v57   ;;  %v8916_v56 = vpop.xlane.xlu0 %3113 }
 0x1db   : > { %11671 = vst [vmem:[#allocation33_spill] sm:$0xff] %v8904_v0  ;;  %v2940_v38 = vsel %vm2938_vm6, %v2939_v52, %v2937_v22  ;;  %vm3131_vm1 = vcmp.eq.f32.partialorder %v8845_v14, 0.0  ;;  %v2959_v28 = vsel %vm2771_vm13, %v2933_v47, inf  ;;  %v8913_v48 = vsel %vm1077_vm4, %v8358_v24, inf  ;;  %v11673_v52 = vld [vmem:[#allocation64_spill] sm:$0xff]  ;;  %v11674_v24 = vld [vmem:[#allocation67_spill] sm:$0xff] }
 0x1dc   : > { %11672 = vst [vmem:[#allocation40_spill] sm:$0xff] %v8913_v48  ;;  %v2960_v55 = vsel %vm2772_vm7, %v2940_v38, inf  ;;  %v2949_v21 = vmul.f32 %v4556_v42, %v8804_v31  ;;  %4276 = vst.msk [vmem:[%s6474_s6 + $0x3a0] sm:$0xff] %vm568_vm2, %v2959_v28  ;;  %v2942_v54 = vmul.f32 %v8013_v43, %v11673_v52  ;;  %vm1307_vm6 = vcmp.eq.s32.totalorder %v1285_v44, 1  ;;  %1932 = vperm.xlu0 %4351, %v11674_v24   ;;  %v8978_v28 = vld [vmem:[%s10956_s2 + $0xa0] sm:$0xff] }
 0x1dd   : > { %4561 = vrsqrt.f32 %v8916_v56  ;;  %4277 = vst.msk [vmem:[%s6474_s6 + $0x3a8] sm:$0xff] %vm568_vm2, %v2960_v55  ;;  %v3132_v57 = vand.u32 2147483648, %v8845_v14  ;;  %vm3209_vm4 = vcmp.gt.f32.partialorder %v8900_v39, 0.5  ;;  %vm3143_vm7 = vcmp.eq.f32.partialorder %v8872_v49, inf  ;;  %v1294_v27 = vpop.permute.xlu1 %1293  ;;  %v9272_v39 = vld [vmem:[%s5747_s28 + $0x2c0] sm:$0xff] }
 0x1de   : > { %v2951_v3 = vsel %vm2950_vm15, %v8804_v31, %v2949_v21  ;;  %v8938_v43 = vsel %vm3209_vm4, 1, %v11265_v9  ;;  %vm2773_vm13 = vcmp.gt.f32.partialorder %v4270_v8, 0.5  ;;  %v4558_v4 = vpop.eup %4557  ;;  %vm1309_vm9 = vcmp.eq.s32.totalorder %v1291_v11, 1  ;;  %2593 = vperm.xlu1 %4350, %v11676_v30   ;;  %v8954_v62 = vpop.xlane.xlu0 %3119  ;;  %v11687_v8 = vld [vmem:[#allocation74_spill] sm:$0xff]  ;;  %11712 = vst [vmem:[#allocation47_spill] sm:$0xff] %v9272_v39 }
 0x1df   : > { %v2954_v25 = vsel %vm2952_vm0, %v2953_v53, %v2951_v3  ;;  %vm3145_vm12 = vcmp.eq.f32.partialorder %v8872_v49, 0.0  ;;  %vm2943_vm10 = vcmp.eq.f32.partialorder %v11673_v52, inf  ;;  %v8951_v50 = vsel %vm1307_vm6, %v8947_v26, inf  ;;  %v8963_v53 = vld [vmem:[%s10956_s2 + $0x88] sm:$0xff] }
 0x1e0   : > { %11675 = vst [vmem:[#allocation34_spill] sm:$0xff] %v8951_v50  ;;  %vm11677_vm15 = vcmp.gt.f32.partialorder %v8242_v41, 0.5  ;;  %v3128_v47 = vmul.f32 %v4558_v4, %v8845_v14  ;;  %v2944_v22 = vsel %vm2943_vm10, %v11673_v52, %v2942_v54  ;;  %v8967_v42 = vsel %vm1307_vm6, %v8963_v53, inf  ;;  %1938 = vperm.xlu0 %4351, %v7978_v59   ;;  %v8995_v54 = vld [vmem:[%s10956_s2 + $0xa8] sm:$0xff]  ;;  %v11694_v50 = vld [vmem:[#allocation76_spill] sm:$0xff] }
 0x1e1   : > { %v2962_v31 = vsel %vm11677_vm15, %v2954_v25, inf  ;;  %11678 = vst [vmem:[#allocation41_spill] sm:$0xff] %v8967_v42  ;;  %4563 = vrsqrt.f32 %v8954_v62  ;;  %v3146_v41 = vand.u32 2147483648, %v8872_v49  ;;  %v2946_v38 = vand.u32 2147483648, %v11673_v52  ;;  %v1300_v25 = vpop.permute.xlu1 %1299 }
 0x1e2   : > { %4279 = vst.msk [vmem:[%s6474_s6 + $0x3b8] sm:$0xff] %vm568_vm2, %v2962_v31  ;;  %v8982_v44 = vsel %vm1309_vm9, %v8978_v28, inf  ;;  %v3130_v55 = vsel %vm3129_vm11, %v8845_v14, %v3128_v47  ;;  %v8989_v59 = vsel %vm2773_vm13, 1, %v11265_v9  ;;  %vm2945_vm0 = vcmp.eq.f32.partialorder %v11673_v52, 0.0  ;;  %v9005_v52 = vld [vmem:[%s5747_s28 + $0x1d8] sm:$0xff]  ;;  %2784 = vperm.xlu1 %4350, %v8031_v18   ;;  %v9008_v30 = vpop.xlane.xlu0 %3125  ;;  %v11682_v47 = vld [vmem:[#allocation72_spill] sm:$0xff] }
 0x1e3   : > { %11679 = vst [vmem:[#allocation45_spill] sm:$0xff] %v8982_v44  ;;  %v4560_v21 = vpop.eup %4559  ;;  %v8999_v24 = vsel %vm1309_vm9, %v8995_v54, inf  ;;  %v3133_v3 = vsel %vm3131_vm1, %v3132_v57, %v3130_v55  ;;  %vm3150_vm11 = vcmp.eq.f32.partialorder %v8916_v56, inf  ;;  %v2947_v4 = vsel %vm2945_vm0, %v2946_v38, %v2944_v22  ;;  %v9035_v55 = vld [vmem:[%s10956_s2 + $0xb0] sm:$0xff] }
 0x1e4   : > { %11680 = vst [vmem:[#allocation35_spill] sm:$0xff] %v8999_v24  ;;  %vm1310_vm6 = vcmp.eq.s32.totalorder %v1294_v27, 1  ;;  %vm11681_vm10 = vcmp.gt.f32.partialorder %v8337_v13, 0.5  ;;  %v3142_v31 = vmul.f32 %v4560_v21, %v8872_v49  ;;  %v2961_v14 = vsel %vm2773_vm13, %v2947_v4, inf  ;;  %2151 = vperm.xlu0 %4351, %v11682_v47   ;;  %v2988_v13 = vld [vmem:[%s5747_s28 + $0xc8] sm:$0xff]  ;;  %v11684_v4 = vld [vmem:[#allocation70_spill] sm:$0xff] }
 0x1e5   : > { %v3183_v11 = vsel %vm11681_vm10, %v3133_v3, inf  ;;  %4565 = vrsqrt.f32 %v9008_v30  ;;  %vm3152_vm1 = vcmp.eq.f32.partialorder %v8916_v56, 0.0  ;;  %v3153_v18 = vand.u32 2147483648, %v8916_v56  ;;  %4278 = vst.msk [vmem:[%s6474_s6 + $0x3b0] sm:$0xff] %vm568_vm2, %v2961_v14  ;;  %v9049_v14 = vld [vmem:[%s10956_s2 + $0xb8] sm:$0xff]  ;;  %v1306_v57 = vpop.permute.xlu1 %1305  ;;  %v11689_v24 = vld [vmem:[#allocation83_spill] sm:$0xff] }
 0x1e6   : > { %3191 = vst.msk [vmem:[%s6474_s6 + $0xc0] sm:$0xff] %vm568_vm2, %v3183_v11  ;;  %v3144_v22 = vsel %vm3143_vm7, %v8872_v49, %v3142_v31  ;;  %vm3164_vm13 = vcmp.eq.f32.partialorder %v8954_v62, inf  ;;  %vm3210_vm9 = vcmp.gt.f32.partialorder %v9005_v52, 0.5  ;;  %v9039_v21 = vsel %vm1310_vm6, %v9035_v55, inf  ;;  %v11685_v11 = vld [vmem:[#allocation77_spill] sm:$0xff]  ;;  %2790 = vperm.xlu1 %4350, %v11687_v8   ;;  %v9056_v12 = vpop.xlane.xlu0 %3316 }
 0x1e7   : > { %v4562_v38 = vpop.eup %4561  ;;  %11683 = vst [vmem:[#allocation36_spill] sm:$0xff] %v9039_v21  ;;  %v3147_v3 = vsel %vm3145_vm12, %v3146_v41, %v3144_v22  ;;  %vm3166_vm7 = vcmp.eq.f32.partialorder %v8954_v62, 0.0  ;;  %v3135_v31 = vmul.f32 %v11685_v11, %v11684_v4  ;;  %v9053_v47 = vsel %vm1310_vm6, %v9049_v14, inf  ;;  %v11688_v22 = vld [vmem:[#allocation10_spill] sm:$0xff] }
 0x1e8   : > { %11686 = vst [vmem:[#allocation53_spill] sm:$0xff] %v9053_v47  ;;  %v3185_v49 = vsel %vm2997_vm3, %v3147_v3, inf  ;;  %v3149_v41 = vmul.f32 %v4562_v38, %v8916_v56  ;;  %vm2996_vm12 = vcmp.gt.f32.partialorder %v2988_v13, 0.5  ;;  %4567 = vrsqrt.f32 %v9056_v12  ;;  %2160 = vperm.xlu0 %4351, %v11688_v22  }
 0x1e9   : > { %3193 = vst.msk [vmem:[%s6474_s6 + $0xd0] sm:$0xff] %vm568_vm2, %v3185_v49  ;;  %v3167_v27 = vand.u32 2147483648, %v8954_v62  ;;  %v9069_v8 = vsel %vm3210_vm9, 1, %v11265_v9  ;;  %v9073_v45 = vsel %vm2996_vm12, 1, %v11265_v9  ;;  %vm1312_vm3 = vcmp.eq.s32.totalorder %v1300_v25, 1  ;;  %v2991_v25 = vld [vmem:[%s5747_s28 + $0xe0] sm:$0xff] }
 0x1ea   : > { %v3151_v38 = vsel %vm3150_vm11, %v8916_v56, %v3149_v41  ;;  %vm3136_vm15 = vcmp.eq.f32.partialorder %v11684_v4, inf  ;;  %v3139_v3 = vand.u32 2147483648, %v11684_v4  ;;  %vm3178_vm0 = vcmp.eq.f32.partialorder %v9008_v30, inf  ;;  %2793 = vperm.xlu1 %4350, %v11689_v24   ;;  %v9089_v41 = vpop.permute.xlu1 %1496  ;;  %v9091_v42 = vpop.xlane.xlu0 %3322 }
 0x1eb   : > { %v4564_v11 = vpop.eup %4563  ;;  %v3154_v49 = vsel %vm3152_vm1, %v3153_v18, %v3151_v38  ;;  %v3137_v22 = vsel %vm3136_vm15, %v11684_v4, %v3135_v31  ;;  %vm3138_vm6 = vcmp.eq.f32.partialorder %v11684_v4, 0.0  ;;  %vm3180_vm11 = vcmp.eq.f32.partialorder %v9008_v30, 0.0  ;;  %v9100_v4 = vld [vmem:[%s10956_s2 + $0xd0] sm:$0xff]  ;;  %v11692_v38 = vld [vmem:[#allocation79_spill] sm:$0xff] }
 0x1ec   : > { %v3186_v44 = vsel %vm2998_vm5, %v3154_v49, inf  ;;  %v3163_v56 = vmul.f32 %v4564_v11, %v8954_v62  ;;  %v3140_v18 = vsel %vm3138_vm6, %v3139_v3, %v3137_v22  ;;  %v9104_v24 = vsel %vm1312_vm3, %v9100_v4, inf  ;;  %2166 = vperm.xlu0 %4351, %v11692_v38   ;;  %v11693_v38 = vld [vmem:[#allocation65_spill] sm:$0xff] }
 0x1ed   : > { %11690 = vst [vmem:[#allocation42_spill] sm:$0xff] %v9104_v24  ;;  %v9113_v31 = vsel %vm1312_vm3, %v9109_v20, inf  ;;  %vm1314_vm5 = vcmp.eq.s32.totalorder %v1306_v57, 1  ;;  %4569 = vrsqrt.f32 %v9091_v42  ;;  %3194 = vst.msk [vmem:[%s6474_s6 + $0xd8] sm:$0xff] %vm568_vm2, %v3186_v44  ;;  %v3181_v11 = vand.u32 2147483648, %v9008_v30 }
 0x1ee   : > { %11691 = vst [vmem:[#allocation37_spill] sm:$0xff] %v9113_v31  ;;  %v3165_v3 = vsel %vm3164_vm13, %v8954_v62, %v3163_v56  ;;  %vm3341_vm10 = vcmp.eq.f32.partialorder %v9056_v12, inf  ;;  %vm3212_vm1 = vcmp.gt.f32.partialorder %v9086_v61, 0.5  ;;  %vm3343_vm3 = vcmp.eq.f32.partialorder %v9056_v12, 0.0  ;;  %v9135_v31 = vld [vmem:[%s10956_s2 + $0xf0] sm:$0xff]  ;;  %v9144_v62 = vld [vmem:[%s10956_s2 + $0xf8] sm:$0xff] }
 0x1ef   : > { %v4566_v49 = vpop.eup %4565  ;;  %v3168_v22 = vsel %vm3166_vm7, %v3167_v27, %v3165_v3  ;;  %v3184_v44 = vsel %vm2996_vm12, %v3140_v18, inf  ;;  %v3156_v56 = vmul.f32 %v11694_v50, %v11693_v38  ;;  %v9139_v24 = vsel %vm1314_vm5, %v9135_v31, inf  ;;  %v11697_v27 = vld [vmem:[#allocation84_spill] sm:$0xff]  ;;  %v1503_v50 = vpop.permute.xlu1 %1502 }
 0x1f0   : > { %11695 = vst [vmem:[#allocation52_spill] sm:$0xff] %v9139_v24  ;;  %v9148_v13 = vsel %vm1314_vm5, %v9144_v62, inf  ;;  %2799 = vperm.xlu1 %4350, %v11697_v27   ;;  %v9151_v18 = vpop.xlane.xlu0 %3325  ;;  %v3188_v3 = vsel %vm3000_vm8, %v3168_v22, inf  ;;  %v3177_v47 = vmul.f32 %v4566_v49, %v9008_v30  ;;  %3192 = vst.msk [vmem:[%s6474_s6 + $0xc8] sm:$0xff] %vm568_vm2, %v3184_v44  ;;  %v11698_v24 = vld [vmem:[#allocation82_spill] sm:$0xff]  ;;  %v3344_v57 = vand.u32 2147483648, %v9056_v12 }
 0x1f1   : > { %11696 = vst [vmem:[#allocation43_spill] sm:$0xff] %v9148_v13  ;;  %4571 = vrsqrt.f32 %v9151_v18  ;;  %2363 = vperm.xlu0 %4351, %v11698_v24   ;;  %3196 = vst.msk [vmem:[%s6474_s6 + $0xe8] sm:$0xff] %vm568_vm2, %v3188_v3  ;;  %v9166_v27 = vsel %vm3212_vm1, 1, %v11265_v9  ;;  %vm2999_vm13 = vcmp.gt.f32.partialorder %v2991_v25, 0.5  ;;  %vm1519_vm8 = vcmp.eq.s32.totalorder %v9089_v41, 1  ;;  %v11699_v3 = vld [vmem:[#allocation93_spill] sm:$0xff] }
 0x1f2   : > { %v3179_v23 = vsel %vm3178_vm0, %v9008_v30, %v3177_v47  ;;  %vm3157_vm7 = vcmp.eq.f32.partialorder %v11693_v38, inf  ;;  %v3160_v24 = vand.u32 2147483648, %v11693_v38  ;;  %v4568_v49 = vpop.eup %4567  ;;  %vm1521_vm12 = vcmp.eq.s32.totalorder %v1503_v50, 1  ;;  %v11705_v50 = vld [vmem:[#allocation92_spill] sm:$0xff]  ;;  %v11707_v25 = vld [vmem:[#allocation73_spill] sm:$0xff] }
 0x1f3   : > { %v3182_v22 = vsel %vm3180_vm11, %v3181_v11, %v3179_v23  ;;  %v3158_v44 = vsel %vm3157_vm7, %v11693_v38, %v3156_v56  ;;  %vm3159_vm15 = vcmp.eq.f32.partialorder %v11693_v38, 0.0  ;;  %v1506_v13 = vpop.permute.xlu1 %1505  ;;  %v3340_v48 = vmul.f32 %v4568_v49, %v9056_v12  ;;  %v11701_v38 = vld [vmem:[#allocation94_spill] sm:$0xff] }
 0x1f4   : > { %2805 = vperm.xlu1 %4350, %v11699_v3   ;;  %v9179_v21 = vpop.xlane.xlu0 %3331  ;;  %v3190_v47 = vsel %vm3002_vm14, %v3182_v22, inf  ;;  %v9186_v0 = vsel %vm2999_vm13, 1, %v11265_v9  ;;  %v3161_v30 = vsel %vm3159_vm15, %v3160_v24, %v3158_v44  ;;  %v9191_v11 = vsel %vm1519_vm8, %v8947_v26, inf  ;;  %v9221_v3 = vld [vmem:[%s5747_s28 + $0x1f8] sm:$0xff] }
 0x1f5   : > { %11700 = vst [vmem:[#allocation39_spill] sm:$0xff] %v9191_v11  ;;  %4573 = vrsqrt.f32 %v9179_v21  ;;  %2372 = vperm.xlu0 %4351, %v11701_v38   ;;  %3198 = vst.msk [vmem:[%s6474_s6 + $0xf8] sm:$0xff] %vm568_vm2, %v3190_v47  ;;  %vm3355_vm14 = vcmp.eq.f32.partialorder %v9091_v42, inf  ;;  %vm3357_vm0 = vcmp.eq.f32.partialorder %v9091_v42, 0.0  ;;  %v9202_v19 = vsel %vm1519_vm8, %v8963_v53, inf  ;;  %v11728_v11 = vld [vmem:[#allocation86_spill] sm:$0xff] }
 0x1f6   : > { %11702 = vst [vmem:[#allocation56_spill] sm:$0xff] %v9202_v19  ;;  %v9206_v56 = vsel %vm1521_vm12, %v8978_v28, inf  ;;  %v9210_v23 = vsel %vm1521_vm12, %v8995_v54, inf  ;;  %v3342_v24 = vsel %vm3341_vm10, %v9056_v12, %v3340_v48  ;;  %v3358_v22 = vand.u32 2147483648, %v9091_v42 }
 0x1f7   : > { %11703 = vst [vmem:[#allocation46_spill] sm:$0xff] %v9206_v56  ;;  %11704 = vst [vmem:[#allocation44_spill] sm:$0xff] %v9210_v23  ;;  %v4570_v49 = vpop.eup %4569  ;;  %v3345_v41 = vsel %vm3343_vm3, %v3344_v57, %v3342_v24  ;;  %vm3362_vm6 = vcmp.eq.f32.partialorder %v9151_v18, inf  ;;  %v3187_v44 = vsel %vm2999_vm13, %v3161_v30, inf  ;;  %v1512_v47 = vpop.permute.xlu1 %1511  ;;  %vm11706_vm11 = vcmp.gt.f32.partialorder %v8820_v10, 0.5  ;;  %v2993_v57 = vld [vmem:[%s5747_s28 + $0xf0] sm:$0xff] }
 0x1f8   : > { %3012 = vperm.xlu1 %4350, %v11705_v50   ;;  %v9224_v38 = vpop.xlane.xlu0 %3337  ;;  %v3395_v48 = vsel %vm11706_vm11, %v3345_v41, inf  ;;  %v3354_v12 = vmul.f32 %v4570_v49, %v9091_v42  ;;  %vm3364_vm5 = vcmp.eq.f32.partialorder %v9151_v18, 0.0  ;;  %3195 = vst.msk [vmem:[%s6474_s6 + $0xe0] sm:$0xff] %vm568_vm2, %v3187_v44  ;;  %v11708_v24 = vld [vmem:[#allocation78_spill] sm:$0xff]  ;;  %v11709_v10 = vld [vmem:[#allocation17_spill] sm:$0xff]  ;;  %v3365_v49 = vand.u32 2147483648, %v9151_v18 }
 0x1f9   : > { %v3170_v30 = vmul.f32 %v11708_v24, %v11707_v25  ;;  %4575 = vrsqrt.f32 %v9224_v38  ;;  %2378 = vperm.xlu0 %4351, %v11709_v10   ;;  %4288 = vst.msk [vmem:[%s6474_s6 + $0x1c0] sm:$0xff] %vm568_vm2, %v3395_v48  ;;  %vm1522_vm10 = vcmp.eq.s32.totalorder %v1506_v13, 1  ;;  %vm3376_vm3 = vcmp.eq.f32.partialorder %v9179_v21, inf }
 0x1fa   : > { %v3356_v41 = vsel %vm3355_vm14, %v9091_v42, %v3354_v12  ;;  %vm3214_vm13 = vcmp.gt.f32.partialorder %v9221_v3, 0.5  ;;  %vm3001_vm8 = vcmp.gt.f32.partialorder %v2993_v57, 0.5  ;;  %vm3171_vm7 = vcmp.eq.f32.partialorder %v11707_v25, inf  ;;  %v11734_v3 = vld [vmem:[#allocation14_spill] sm:$0xff] }
 0x1fb   : > { %v4572_v44 = vpop.eup %4571  ;;  %v3359_v24 = vsel %vm3357_vm0, %v3358_v22, %v3356_v41  ;;  %v3174_v48 = vand.u32 2147483648, %v11707_v25  ;;  %v1518_v10 = vpop.permute.xlu1 %1517  ;;  %v3172_v29 = vsel %vm3171_vm7, %v11707_v25, %v3170_v30  ;;  %vm3173_vm12 = vcmp.eq.f32.partialorder %v11707_v25, 0.0  ;;  %v4281_v41 = vld [vmem:[%s5747_s28 + $0x1c8] sm:$0xff] }
 0x1fc   : > { %3018 = vperm.xlu1 %4350, %v8497_v15   ;;  %v3397_v12 = vsel %vm3209_vm4, %v3359_v24, inf  ;;  %v3361_v50 = vmul.f32 %v4572_v44, %v9151_v18  ;;  %v9261_v42 = vsel %vm1522_vm10, %v9035_v55, inf  ;;  %v9265_v22 = vsel %vm1522_vm10, %v9049_v14, inf }
 0x1fd   : > { %11710 = vst [vmem:[#allocation58_spill] sm:$0xff] %v9261_v42  ;;  %11711 = vst [vmem:[#allocation48_spill] sm:$0xff] %v9265_v22  ;;  %2575 = vperm.xlu0 %4351, %v8530_v33   ;;  %vm3378_vm4 = vcmp.eq.f32.partialorder %v9179_v21, 0.0  ;;  %v3175_v15 = vsel %vm3173_vm12, %v3174_v48, %v3172_v29  ;;  %v3379_v30 = vand.u32 2147483648, %v9179_v21  ;;  %v9281_v13 = vsel %vm3214_vm13, 1, %v11265_v9  ;;  %v11714_v48 = vld [vmem:[#allocation80_spill] sm:$0xff] }
 0x1fe   : > { %4290 = vst.msk [vmem:[%s6474_s6 + $0x1d0] sm:$0xff] %vm568_vm2, %v3397_v12  ;;  %v3363_v25 = vsel %vm3362_vm6, %v9151_v18, %v3361_v50  ;;  %v3189_v33 = vsel %vm3001_vm8, %v3175_v15, inf  ;;  %vm1524_vm15 = vcmp.eq.s32.totalorder %v1512_v47, 1  ;;  %v9289_v24 = vsel %vm3001_vm8, 1, %v11265_v9  ;;  %v11713_v50 = vld [vmem:[#allocation71_spill] sm:$0xff]  ;;  %v378_v15 = vpop.permute.xlu0 %377 }
 0x1ff   : > { %v4574_v44 = vpop.eup %4573  ;;  %v3366_v29 = vsel %vm3364_vm5, %v3365_v49, %v3363_v25  ;;  %3197 = vst.msk [vmem:[%s6474_s6 + $0xf0] sm:$0xff] %vm568_vm2, %v3189_v33  ;;  %v3347_v12 = vmul.f32 %v11714_v48, %v11713_v50  ;;  %v1709_v23 = vpop.permute.xlu1 %1708  ;;  %vm3419_vm14 = vcmp.gt.f32.partialorder %v9272_v39, 0.5  ;;  %vm3348_vm0 = vcmp.eq.f32.partialorder %v11713_v50, inf  ;;  %v11715_v18 = vld [vmem:[#allocation27_spill] sm:$0xff] }
 0x200   : > { %3021 = vperm.xlu1 %4350, %v8598_v16   ;;  %v3398_v19 = vsel %vm3210_vm9, %v3366_v29, inf  ;;  %v3375_v56 = vmul.f32 %v4574_v44, %v9179_v21  ;;  %vm1526_vm6 = vcmp.eq.s32.totalorder %v1518_v10, 1  ;;  %vm3208_vm11 = vcmp.gt.f32.partialorder %v4281_v41, 0.5  ;;  %v9360_v10 = vld [vmem:[%s10956_s2 + $0x18] sm:$0xff] }
 0x201   : > { %2584 = vperm.xlu0 %4351, %v11715_v18   ;;  %4291 = vst.msk [vmem:[%s6474_s6 + $0x1d8] sm:$0xff] %vm568_vm2, %v3398_v19  ;;  %v3349_v57 = vsel %vm3348_vm0, %v11713_v50, %v3347_v12  ;;  %v3351_v16 = vand.u32 2147483648, %v11713_v50  ;;  %v9308_v52 = vsel %vm1524_vm15, %v9100_v4, inf  ;;  %v9312_v49 = vsel %vm1524_vm15, %v9109_v20, inf }
 0x202   : > { %11716 = vst [vmem:[#allocation49_spill] sm:$0xff] %v9308_v52  ;;  %11717 = vst [vmem:[#allocation51_spill] sm:$0xff] %v9312_v49  ;;  %vm3390_vm9 = vcmp.eq.f32.partialorder %v9224_v38, inf  ;;  %vm3350_vm5 = vcmp.eq.f32.partialorder %v11713_v50, 0.0  ;;  %vm400_vm10 = vcmp.eq.s32.totalorder %v378_v15, 1  ;;  %v3377_v19 = vsel %vm3376_vm3, %v9179_v21, %v3375_v56  ;;  %v381_v50 = vpop.permute.xlu0 %380  ;;  %v9341_v21 = vld [vmem:[%s5747_s28 + $0x2d0] sm:$0xff] }
 0x203   : > { %v4576_v25 = vpop.eup %4575  ;;  %vm3392_vm8 = vcmp.eq.f32.partialorder %v9224_v38, 0.0  ;;  %v3393_v33 = vand.u32 2147483648, %v9224_v38  ;;  %v3352_v44 = vsel %vm3350_vm5, %v3351_v16, %v3349_v57  ;;  %v9323_v47 = vsel %vm1526_vm6, %v9135_v31, inf  ;;  %v1715_v29 = vpop.permute.xlu1 %1714  ;;  %11719 = vst [vmem:[#allocation55_spill] sm:$0xff] %v9341_v21  ;;  %v4645_v57 = vld [vmem:[%s10956_s2] sm:$0xff]  ;;  %v11729_v52 = vld [vmem:[#allocation11_spill] sm:$0xff] }
 0x204   : > { %11718 = vst [vmem:[#allocation50_spill] sm:$0xff] %v9323_v47  ;;  %3027 = vperm.xlu1 %4350, %v8682_v58   ;;  %v3380_v48 = vsel %vm3378_vm4, %v3379_v30, %v3377_v19  ;;  %v9331_v56 = vsel %vm3419_vm14, 1, %v11265_v9  ;;  %v3396_v12 = vsel %vm3208_vm11, %v3352_v44, inf  ;;  %vm1731_vm3 = vcmp.eq.s32.totalorder %v1709_v23, 1  ;;  %v4648_v19 = vld [vmem:[%s10956_s2 + $0x8] sm:$0xff]  ;;  %v4284_v15 = vld [vmem:[%s5747_s28 + $0x1e0] sm:$0xff] }
 0x205   : > { %vm401_vm7 = vcmp.eq.s32.totalorder %v381_v50, 1  ;;  %2590 = vperm.xlu0 %4351, %v8686_v37   ;;  %v3400_v58 = vsel %vm3212_vm1, %v3380_v48, inf  ;;  %v3389_v18 = vmul.f32 %v4576_v25, %v9224_v38  ;;  %4289 = vst.msk [vmem:[%s6474_s6 + $0x1c8] sm:$0xff] %vm568_vm2, %v3396_v12  ;;  %v9345_v30 = vsel %vm1526_vm6, %v9144_v62, inf  ;;  %v9354_v37 = vld [vmem:[%s10956_s2 + $0x10] sm:$0xff]  ;;  %v11721_v50 = vld [vmem:[#allocation89_spill] sm:$0xff] }
 0x206   : > { %11720 = vst [vmem:[#allocation54_spill] sm:$0xff] %v9345_v30  ;;  %v408_v16 = vsel %vm400_vm10, %v4645_v57, inf  ;;  %v410_v61 = vsel %vm401_vm7, %v9354_v37, inf  ;;  %v411_v25 = vsel %vm401_vm7, %v9360_v10, inf  ;;  %4293 = vst.msk [vmem:[%s6474_s6 + $0x1e8] sm:$0xff] %vm568_vm2, %v3400_v58  ;;  %v409_v44 = vsel %vm400_vm10, %v4648_v19, inf  ;;  %v390_v47 = vpop.permute.xlu0 %389 }
 0x207   : > { %v425_v48 = vmin.f32 %v410_v61, %v11721_v50  ;;  %v11722_v12 = vld [vmem:[#allocation87_spill] sm:$0xff]  ;;  %v9373_v39 = vsel %vm3208_vm11, 1, %v11265_v9  ;;  %v9377_v30 = vsel %vm1731_vm3, %v8947_v26, inf  ;;  %vm1733_vm1 = vcmp.eq.s32.totalorder %v1715_v29, 1  ;;  %v9380_v58 = vpop.permute.xlu1 %1717  ;;  %v11724_v61 = vld [vmem:[#allocation81_spill] sm:$0xff]  ;;  %v11725_v19 = vld [vmem:[#allocation90_spill] sm:$0xff] }
 0x208   : > { %v438_v57 = vmin.f32 %v411_v25, %v11722_v12  ;;  %11723 = vst [vmem:[#allocation57_spill] sm:$0xff] %v9377_v30  ;;  %3033 = vperm.xlu1 %4350, %v8757_v5   ;;  %vm3421_vm12 = vcmp.gt.f32.partialorder %v9341_v21, 0.5  ;;  %v3368_v25 = vmul.f32 %v11725_v19, %v11724_v61  ;;  %v9388_v41 = vsel %vm1731_vm3, %v8963_v53, inf  ;;  %v11727_v50 = vld [vmem:[#allocation85_spill] sm:$0xff]  ;;  %v9400_v19 = vld [vmem:[%s10956_s2 + $0x40] sm:$0xff]  ;;  %v11739_v21 = vld [vmem:[#allocation20_spill] sm:$0xff] }
 0x209   : > { %11726 = vst [vmem:[#allocation9_spill] sm:$0xff] %v9388_v41  ;;  %v424_v12 = vmin.f32 %v408_v16, %v11727_v50  ;;  %vm404_vm4 = vcmp.eq.s32.totalorder %v390_v47, 1  ;;  %2787 = vperm.xlu0 %4351, %v8790_v40   ;;  %v3391_v5 = vsel %vm3390_vm9, %v9224_v38, %v3389_v18  ;;  %v437_v49 = vmin.f32 %v409_v44, %v11728_v11  ;;  %v9406_v47 = vld [vmem:[%s10956_s2 + $0x48] sm:$0xff]  ;;  %v11731_v11 = vld [vmem:[#allocation12_spill] sm:$0xff]  ;;  %v11748_v41 = vld [vmem:[#allocation18_spill] sm:$0xff] }
 0x20a   : > { %v427_v22 = vmin.f32 %v425_v48, %v11729_v52  ;;  %v416_v23 = vsel %vm404_vm4, %v9400_v19, inf  ;;  %v417_v40 = vsel %vm404_vm4, %v9406_v47, inf  ;;  %v9411_v18 = vsel %vm1733_vm1, %v8978_v28, inf  ;;  %v396_v50 = vpop.permute.xlu0 %395 }
 0x20b   : > { %11730 = vst [vmem:[#allocation59_spill] sm:$0xff] %v9411_v18  ;;  %v440_v52 = vmin.f32 %v438_v57, %v11731_v11  ;;  %vm3211_vm15 = vcmp.gt.f32.partialorder %v4284_v15, 0.5  ;;  %vm3369_vm0 = vcmp.eq.f32.partialorder %v11724_v61, inf  ;;  %v9417_v16 = vsel %vm1733_vm1, %v8995_v54, inf  ;;  %v9420_v48 = vpop.permute.xlu1 %1723  ;;  %v11738_v15 = vld [vmem:[#allocation19_spill] sm:$0xff] }
 0x20c   : > { %11732 = vst [vmem:[#allocation60_spill] sm:$0xff] %v9417_v16  ;;  %v426_v44 = vmin.f32 %v424_v12, %v416_v23  ;;  %3224 = vperm.xlu1 %4350, %v8859_v63   ;;  %v3394_v42 = vsel %vm3392_vm8, %v3393_v33, %v3391_v5  ;;  %v3370_v17 = vsel %vm3369_vm0, %v11724_v61, %v3368_v25  ;;  %vm406_vm6 = vcmp.eq.s32.totalorder %v396_v50, 1  ;;  %v11733_v23 = vld [vmem:[#allocation13_spill] sm:$0xff]  ;;  %v9433_v63 = vld [vmem:[%s10956_s2 + $0x60] sm:$0xff] }
 0x20d   : > { %v439_v57 = vmin.f32 %v437_v49, %v417_v40  ;;  %2796 = vperm.xlu0 %4351, %v8897_v6   ;;  %v3402_v29 = vsel %vm3214_vm13, %v3394_v42, inf  ;;  %v3372_v12 = vand.u32 2147483648, %v11724_v61  ;;  %v429_v11 = vmin.f32 %v427_v22, %v11733_v23  ;;  %v9439_v49 = vld [vmem:[%s10956_s2 + $0x68] sm:$0xff] }
 0x20e   : > { %v420_v38 = vsel %vm406_vm6, %v9433_v63, inf  ;;  %v421_v6 = vsel %vm406_vm6, %v9439_v49, inf  ;;  %4295 = vst.msk [vmem:[%s6474_s6 + $0x1f8] sm:$0xff] %vm568_vm2, %v3402_v29  ;;  %vm3371_vm13 = vcmp.eq.f32.partialorder %v11724_v61, 0.0  ;;  %v442_v42 = vmin.f32 %v440_v52, %v11734_v3  ;;  %v607_v40 = vpop.permute.xlu0 %606  ;;  %v11735_v29 = vld [vmem:[#allocation75_spill] sm:$0xff]  ;;  %v11736_v52 = vld [vmem:[#allocation88_spill] sm:$0xff] }
 0x20f   : > { %v428_v22 = vmin.f32 %v426_v44, %v420_v38  ;;  %v441_v33 = vmin.f32 %v439_v57, %v421_v6  ;;  %v3373_v25 = vsel %vm3371_vm13, %v3372_v12, %v3370_v17  ;;  %vm1734_vm11 = vcmp.eq.s32.totalorder %v9380_v58, 1  ;;  %v1730_v5 = vpop.permute.xlu1 %1729 }
 0x210   : > { %3230 = vperm.xlu1 %4350, %v8938_v43   ;;  %v9451_v50 = vsel %vm3421_vm12, 1, %v11265_v9  ;;  %v3399_v61 = vsel %vm3211_vm15, %v3373_v25, inf  ;;  %v3382_v23 = vmul.f32 %v11736_v52, %v11735_v29  ;;  %vm627_vm9 = vcmp.eq.s32.totalorder %v607_v40, 1 }
 0x211   : > { %v430_v44 = vmin.f32 %v428_v22, %v429_v11  ;;  %v443_v57 = vmin.f32 %v441_v33, %v442_v42  ;;  %2802 = vperm.xlu0 %4351, %v8989_v59   ;;  %4292 = vst.msk [vmem:[%s6474_s6 + $0x1e0] sm:$0xff] %vm568_vm2, %v3399_v61  ;;  %v636_v12 = vsel %vm627_vm9, %v9354_v37, inf  ;;  %v637_v38 = vsel %vm627_vm9, %v9360_v10, inf  ;;  %v9475_v42 = vld [vmem:[%s5747_s28 + $0x2d8] sm:$0xff]  ;;  %v4286_v61 = vld [vmem:[%s5747_s28 + $0x1f0] sm:$0xff] }
 0x212   : > { %v9467_v6 = vsel %vm3211_vm15, 1, %v11265_v9  ;;  %v9472_v11 = vsel %vm1734_vm11, %v9035_v55, inf  ;;  %11737 = vst [vmem:[#allocation61_spill] sm:$0xff] %v9475_v42  ;;  %vm3383_vm5 = vcmp.eq.f32.partialorder %v11735_v29, inf  ;;  %v9481_v22 = vsel %vm1734_vm11, %v9049_v14, inf  ;;  %v616_v40 = vpop.permute.xlu0 %615 }
 0x213   : > { %v431_v59 = vrot.slane %v430_v44, 4  ;;  %v444_v3 = vrot.slane %v443_v57, 4  ;;  %vm1736_vm10 = vcmp.eq.s32.totalorder %v9420_v48, 1  ;;  %v651_v33 = vmin.f32 %v636_v12, %v11738_v15  ;;  %v1921_v25 = vpop.permute.xlu1 %1920  ;;  %v11742_v48 = vld [vmem:[#allocation22_spill] sm:$0xff] }
 0x214   : > { %3233 = vperm.xlu1 %4350, %v9069_v8   ;;  %v3384_v52 = vsel %vm3383_vm5, %v11735_v29, %v3382_v23  ;;  %v664_v16 = vmin.f32 %v637_v38, %v11739_v21  ;;  %v3386_v58 = vand.u32 2147483648, %v11735_v29  ;;  %vm1738_vm8 = vcmp.eq.s32.totalorder %v1730_v5, 1  ;;  %v9536_v5 = vld [vmem:[%s5747_s28 + $0x2e8] sm:$0xff] }
 0x215   : > { %v432_v43 = vmin.f32 %v430_v44, %v431_v59  ;;  %v445_v17 = vmin.f32 %v443_v57, %v444_v3  ;;  %3015 = vperm.xlu0 %4351, %v9073_v45   ;;  %vm630_vm3 = vcmp.eq.s32.totalorder %v616_v40, 1  ;;  %vm3422_vm7 = vcmp.gt.f32.partialorder %v9475_v42, 0.5  ;;  %v11741_v3 = vld [vmem:[#allocation21_spill] sm:$0xff]  ;;  %v11747_v42 = vld [vmem:[#allocation91_spill] sm:$0xff]  ;;  %11750 = vst [vmem:[#allocation63_spill] sm:$0xff] %v9536_v5 }
 0x216   : > { %vm3385_vm1 = vcmp.eq.f32.partialorder %v11735_v29, 0.0  ;;  %v9496_v8 = vsel %vm1736_vm10, %v9100_v4, inf  ;;  %vm3213_vm4 = vcmp.gt.f32.partialorder %v4286_v61, 0.5  ;;  %v9501_v45 = vsel %vm1736_vm10, %v9109_v20, inf  ;;  %v622_v38 = vpop.permute.xlu0 %621 }
 0x217   : > { %v433_v23 = vrot.slane %v432_v43, 2  ;;  %v3387_v44 = vsel %vm3385_vm1, %v3386_v58, %v3384_v52  ;;  %v446_v21 = vrot.slane %v445_v17, 2  ;;  %v642_v57 = vsel %vm630_vm3, %v9400_v19, inf  ;;  %v1927_v29 = vpop.permute.xlu1 %1926 }
 0x218   : > { %v643_v12 = vsel %vm630_vm3, %v9406_v47, inf  ;;  %3239 = vperm.xlu1 %4350, %v9166_v27   ;;  %v9508_v59 = vsel %vm1738_vm8, %v9135_v31, inf  ;;  %v653_v15 = vmin.f32 %v651_v33, %v11741_v3  ;;  %v666_v40 = vmin.f32 %v664_v16, %v11742_v48  ;;  %v11744_v16 = vld [vmem:[#allocation15_spill] sm:$0xff] }
 0x219   : > { %11740 = vst [vmem:[#allocation68_spill] sm:$0xff] %v9508_v59  ;;  %3024 = vperm.xlu0 %4351, %v9186_v0   ;;  %v9516_v52 = vsel %vm3422_vm7, 1, %v11265_v9  ;;  %v9520_v27 = vsel %vm1738_vm8, %v9144_v62, inf  ;;  %vm632_vm15 = vcmp.eq.s32.totalorder %v622_v38, 1  ;;  %v9524_v58 = vsel %vm3213_vm4, 1, %v11265_v9  ;;  %v11745_v0 = vld [vmem:[#allocation16_spill] sm:$0xff] }
 0x21a   : > { %11743 = vst [vmem:[#allocation62_spill] sm:$0xff] %v9520_v27  ;;  %v3401_v33 = vsel %vm3213_vm4, %v3387_v44, inf  ;;  %v434_v3 = vmin.f32 %v432_v43, %v433_v23  ;;  %vm1943_vm0 = vcmp.eq.s32.totalorder %v1921_v25, 1  ;;  %v11746_v48 = vmin.f32 %v11744_v16, %v11745_v0  ;;  %v829_v23 = vpop.permute.xlu0 %828  ;;  %v11751_v44 = vld [vmem:[#allocation23_spill] sm:$0xff]  ;;  %v11752_v16 = vld [vmem:[#allocation24_spill] sm:$0xff] }
 0x21b   : > { %v11749_v18 = vmin.f32 %v11747_v42, %v11748_v41  ;;  %4294 = vst.msk [vmem:[%s6474_s6 + $0x1f0] sm:$0xff] %vm568_vm2, %v3401_v33  ;;  %v447_v38 = vmin.f32 %v445_v17, %v446_v21  ;;  %vm1945_vm6 = vcmp.eq.s32.totalorder %v1927_v29, 1  ;;  %v646_v27 = vsel %vm632_vm15, %v9433_v63, inf  ;;  %v1930_v43 = vpop.permute.xlu1 %1929 }
 0x21c   : > { %v652_v59 = vmin.f32 %v11746_v48, %v642_v57  ;;  %v647_v61 = vsel %vm632_vm15, %v9439_v49, inf  ;;  %3245 = vperm.xlu1 %4350, %v9281_v13   ;;  %v655_v57 = vmin.f32 %v653_v15, %v11751_v44  ;;  %v668_v0 = vmin.f32 %v666_v40, %v11752_v16  ;;  %v9567_v40 = vld [vmem:[%s5747_s28 + $0x2c8] sm:$0xff]  ;;  %v9578_v48 = vld [vmem:[%s5747_s28 + $0x3c0] sm:$0xff] }
 0x21d   : > { %v665_v30 = vmin.f32 %v11749_v18, %v643_v12  ;;  %3030 = vperm.xlu0 %4351, %v9289_v24   ;;  %v9546_v17 = vsel %vm1943_vm0, %v8947_v26, inf  ;;  %v9550_v42 = vsel %vm1943_vm0, %v8963_v53, inf  ;;  %vm849_vm13 = vcmp.eq.s32.totalorder %v829_v23, 1  ;;  %11753 = vst [vmem:[#allocation69_spill] sm:$0xff] %v9567_v40  ;;  %11754 = vst [vmem:[#allocation64_spill] sm:$0xff] %v9578_v48 }
 0x21e   : > { %v654_v41 = vmin.f32 %v652_v59, %v646_v27  ;;  %vm11216_vm11 = vcmp.gt.f32.partialorder %v9536_v5, 0.5  ;;  %v435_v13 = vrot.slane %v434_v3, 1  ;;  %v9555_v21 = vsel %vm1945_vm6, %v8978_v28, inf  ;;  %v838_v15 = vpop.permute.xlu0 %837 }
 0x21f   : > { %v667_v18 = vmin.f32 %v665_v30, %v647_v61  ;;  %v448_v24 = vrot.slane %v447_v38, 1  ;;  %v9559_v59 = vsel %vm1945_vm6, %v8995_v54, inf  ;;  %v858_v26 = vsel %vm849_vm13, %v9354_v37, inf  ;;  %v9564_v25 = vpop.permute.xlu1 %1935  ;;  %v9810_v54 = vld [vmem:[%s5747_s28 + $0x3d8] sm:$0xff] }
 0x220   : > { %v656_v30 = vmin.f32 %v654_v41, %v655_v57  ;;  %v859_v53 = vsel %vm849_vm13, %v9360_v10, inf  ;;  %3436 = vperm.xlu1 %4350, %v9331_v56   ;;  %v873_v33 = vmin.f32 %v858_v26, %v8650_v32  ;;  %vm1946_vm9 = vcmp.eq.s32.totalorder %v1930_v43, 1  ;;  %v9618_v43 = vld [vmem:[%s5747_s28 + $0x3d0] sm:$0xff]  ;;  %11787 = vst [vmem:[#allocation94_spill] sm:$0xff] %v9810_v54 }
 0x221   : > { %v669_v12 = vmin.f32 %v667_v18, %v668_v0  ;;  %v886_v29 = vmin.f32 %v859_v53, %v8654_v35  ;;  %3227 = vperm.xlu0 %4351, %v9373_v39   ;;  %vm852_vm5 = vcmp.eq.s32.totalorder %v838_v15, 1  ;;  %v3432_v56 = vsel %vm11216_vm11, 1, %v11265_v9  ;;  %v11760_v53 = vld [vmem:[#allocation26_spill] sm:$0xff]  ;;  %v11761_v15 = vld [vmem:[#allocation29_spill] sm:$0xff]  ;;  %11763 = vst [vmem:[#allocation66_spill] sm:$0xff] %v9618_v43 }
 0x222   : > { %v657_v28 = vrot.slane %v656_v30, 4  ;;  %vm3420_vm10 = vcmp.gt.f32.partialorder %v9567_v40, 0.5  ;;  %v9583_v35 = vmin.f32 %v434_v3, %v435_v13  ;;  %v9585_v39 = vmin.f32 %v447_v38, %v448_v24  ;;  %v844_v0 = vpop.permute.xlu0 %843  ;;  %v11755_v3 = vld [vmem:[#allocation30_spill] sm:$0xff]  ;;  %v11758_v24 = vld [vmem:[#allocation28_spill] sm:$0xff] }
 0x223   : > { %v670_v27 = vrot.slane %v669_v12, 4  ;;  %v864_v44 = vsel %vm852_vm5, %v9400_v19, inf  ;;  %v865_v57 = vsel %vm852_vm5, %v9406_v47, inf  ;;  %v9590_v16 = vpop.permute.xlu1 %1941  ;;  %v9594_v41 = vsel %vm1946_vm9, %v9035_v55, inf  ;;  %v9601_v38 = vld [vmem:[%s5747_s28 + $0x2e0] sm:$0xff]  ;;  %v11795_v40 = vld [vmem:[#allocation52_spill] sm:$0xff] }
 0x224   : > { %v658_v32 = vmin.f32 %v656_v30, %v657_v28  ;;  %3442 = vperm.xlu1 %4350, %v9451_v50   ;;  %v875_v18 = vmin.f32 %v873_v33, %v8702_v51  ;;  %v888_v13 = vmin.f32 %v886_v29, %v11755_v3  ;;  %vm11217_vm8 = vcmp.gt.f32.partialorder %v9578_v48, 0.5  ;;  %11756 = vst [vmem:[#allocation67_spill] sm:$0xff] %v9601_v38  ;;  %v11793_v48 = vld [vmem:[#allocation35_spill] sm:$0xff] }
 0x225   : > { %v671_v23 = vmin.f32 %v669_v12, %v670_v27  ;;  %3236 = vperm.xlu0 %4351, %v9467_v6   ;;  %v9605_v50 = vsel %vm1946_vm9, %v9049_v14, inf  ;;  %vm1948_vm3 = vcmp.eq.s32.totalorder %v9564_v25, 1  ;;  %vm854_vm1 = vcmp.eq.s32.totalorder %v844_v0, 1  ;;  %v11757_v12 = vld [vmem:[#allocation25_spill] sm:$0xff] }
 0x226   : > { %v3428_v55 = vsel %vm3420_vm10, 1, %v11265_v9  ;;  %v659_v51 = vrot.slane %v658_v32, 2  ;;  %v11759_v6 = vmin.f32 %v11757_v12, %v11758_v24  ;;  %v11762_v28 = vmin.f32 %v11760_v53, %v11761_v15 }
 0x227   : > { %v672_v30 = vrot.slane %v671_v23, 2  ;;  %v868_v14 = vsel %vm854_vm1, %v9433_v63, inf  ;;  %v869_v33 = vsel %vm854_vm1, %v9439_v49, inf  ;;  %v2149_v29 = vpop.permute.xlu1 %2148  ;;  %v1051_v0 = vpop.permute.xlu0 %1050  ;;  %v3639_v3 = vsel %vm11217_vm8, 1, %v11265_v9 }
 0x228   : > { %v874_v26 = vmin.f32 %v11759_v6, %v864_v44  ;;  %v887_v27 = vmin.f32 %v11762_v28, %v865_v57  ;;  %3445 = vperm.xlu1 %4350, %v9516_v52   ;;  %vm3423_vm4 = vcmp.gt.f32.partialorder %v9601_v38, 0.5  ;;  %v11764_v44 = vld [vmem:[#allocation31_spill] sm:$0xff]  ;;  %v890_v57 = vmin.f32 %v888_v13, %v8741_v46 }
 0x229   : > { %v877_v12 = vmin.f32 %v875_v18, %v11764_v44  ;;  %3242 = vperm.xlu0 %4351, %v9524_v58   ;;  %v9633_v52 = vsel %vm1948_vm3, %v9100_v4, inf  ;;  %vm1950_vm15 = vcmp.eq.s32.totalorder %v9590_v16, 1  ;;  %vm1071_vm0 = vcmp.eq.s32.totalorder %v1051_v0, 1  ;;  %v9681_v44 = vld [vmem:[%s10956_s2 + $0x120] sm:$0xff] }
 0x22a   : > { %v876_v24 = vmin.f32 %v874_v26, %v868_v14  ;;  %v889_v6 = vmin.f32 %v887_v27, %v869_v33  ;;  %vm11215_vm6 = vcmp.gt.f32.partialorder %v9618_v43, 0.5  ;;  %v9637_v53 = vmin.f32 %v658_v32, %v659_v51  ;;  %v9642_v26 = vld [vmem:[%s5747_s28 + $0x2f0] sm:$0xff]  ;;  %v9650_v32 = vld [vmem:[%s5747_s28 + $0x3e0] sm:$0xff] }
 0x22b   : > { %v9639_v18 = vmin.f32 %v671_v23, %v672_v30  ;;  %11765 = vst [vmem:[#allocation72_spill] sm:$0xff] %v9642_v26  ;;  %vm2171_vm13 = vcmp.eq.s32.totalorder %v2149_v29, 1  ;;  %v1080_v58 = vsel %vm1071_vm0, %v9354_v37, inf  ;;  %v1081_v4 = vsel %vm1071_vm0, %v9360_v10, inf  ;;  %v2155_v15 = vpop.permute.xlu1 %2154  ;;  %v1060_v28 = vpop.permute.xlu0 %1059  ;;  %11766 = vst [vmem:[#allocation70_spill] sm:$0xff] %v9650_v32  ;;  %v9661_v14 = vld [vmem:[%s10956_s2 + $0x100] sm:$0xff] }
 0x22c   : > { %v878_v46 = vmin.f32 %v876_v24, %v877_v12  ;;  %v891_v13 = vmin.f32 %v889_v6, %v890_v57  ;;  %3451 = vperm.xlu1 %4350, %v3432_v56   ;;  %v3431_v27 = vsel %vm3423_vm4, 1, %v11265_v9  ;;  %v1095_v30 = vmin.f32 %v1080_v58, %v8833_v60  ;;  %v9689_v57 = vld [vmem:[%s10956_s2 + $0x128] sm:$0xff]  ;;  %v11775_v6 = vld [vmem:[#allocation33_spill] sm:$0xff] }
 0x22d   : > { %3439 = vperm.xlu0 %4351, %v3428_v55   ;;  %v3641_v37 = vsel %vm11215_vm6, 1, %v11265_v9  ;;  %v1108_v10 = vmin.f32 %v1081_v4, %v8842_v7  ;;  %vm2173_vm9 = vcmp.eq.s32.totalorder %v2155_v15, 1  ;;  %vm1074_vm5 = vcmp.eq.s32.totalorder %v1060_v28, 1  ;;  %v9670_v55 = vld [vmem:[%s10956_s2 + $0x108] sm:$0xff] }
 0x22e   : > { %v879_v23 = vrot.slane %v878_v46, 4  ;;  %v892_v51 = vrot.slane %v891_v13, 4  ;;  %vm3425_vm1 = vcmp.gt.f32.partialorder %v9642_v26, 0.5  ;;  %v9665_v60 = vsel %vm2171_vm13, %v9661_v14, inf }
 0x22f   : > { %11767 = vst [vmem:[#allocation77_spill] sm:$0xff] %v9665_v60  ;;  %v9674_v7 = vsel %vm2171_vm13, %v9670_v55, inf  ;;  %vm11169_vm0 = vcmp.gt.f32.partialorder %v9650_v32, 0.5  ;;  %v1097_v0 = vmin.f32 %v1095_v30, %v8879_v1  ;;  %v9684_v12 = vsel %vm2173_vm9, %v9681_v44, inf  ;;  %v9694_v24 = vpop.permute.xlu1 %2157  ;;  %v1066_v1 = vpop.permute.xlu0 %1065  ;;  %v9813_v32 = vld [vmem:[%s5747_s28 + $0x2f8] sm:$0xff]  ;;  %v11817_v60 = vld [vmem:[#allocation44_spill] sm:$0xff] }
 0x230   : > { %v880_v56 = vmin.f32 %v878_v46, %v879_v23  ;;  %11768 = vst [vmem:[#allocation74_spill] sm:$0xff] %v9674_v7  ;;  %v893_v33 = vmin.f32 %v891_v13, %v892_v51  ;;  %11769 = vst [vmem:[#allocation10_spill] sm:$0xff] %v9684_v12  ;;  %v9692_v29 = vsel %vm2173_vm9, %v9689_v57, inf  ;;  %3648 = vperm.xlu1 %4350, %v3639_v3   ;;  %v1086_v13 = vsel %vm1074_vm5, %v9400_v19, inf  ;;  %v11772_v23 = vld [vmem:[#allocation38_spill] sm:$0xff] }
 0x231   : > { %11770 = vst [vmem:[#allocation83_spill] sm:$0xff] %v9692_v29  ;;  %v1087_v58 = vsel %vm1074_vm5, %v9406_v47, inf  ;;  %3448 = vperm.xlu0 %4351, %v3431_v27   ;;  %v9707_v3 = vsel %vm1948_vm3, %v9109_v20, inf  ;;  %v9712_v4 = vsel %vm1950_vm15, %v9135_v31, inf  ;;  %v1110_v15 = vmin.f32 %v1108_v10, %v8883_v2  ;;  %v11773_v2 = vld [vmem:[#allocation32_spill] sm:$0xff]  ;;  %11788 = vst [vmem:[#allocation92_spill] sm:$0xff] %v9813_v32 }
 0x232   : > { %v3433_v19 = vsel %vm3425_vm1, 1, %v11265_v9  ;;  %v661_v28 = vrot.slane %v9637_v53, 1  ;;  %v674_v47 = vrot.slane %v9639_v18, 1  ;;  %v9723_v20 = vsel %vm1950_vm15, %v9144_v62, inf }
 0x233   : > { %v881_v25 = vrot.slane %v880_v56, 2  ;;  %v11771_v31 = vmin.f32 %v8773_v36, %v8795_v34  ;;  %v11774_v51 = vmin.f32 %v11772_v23, %v11773_v2  ;;  %vm1076_vm3 = vcmp.eq.s32.totalorder %v1066_v1, 1  ;;  %v9731_v10 = vpop.permute.xlu1 %2163  ;;  %v1288_v46 = vpop.permute.xlu0 %1287 }
 0x234   : > { %3654 = vperm.xlu1 %4350, %v3641_v37   ;;  %v3643_v62 = vsel %vm11169_vm0, 1, %v11265_v9  ;;  %v894_v16 = vrot.slane %v893_v33, 2  ;;  %v1099_v61 = vmin.f32 %v1097_v0, %v11775_v6  ;;  %v1090_v36 = vsel %vm1076_vm3, %v9433_v63, inf  ;;  %v9750_v0 = vld [vmem:[%s5747_s28 + $0x3c8] sm:$0xff]  ;;  %v9753_v63 = vld [vmem:[%s5747_s28 + $0x3f0] sm:$0xff] }
 0x235   : > { %v1096_v27 = vmin.f32 %v11771_v31, %v1086_v13  ;;  %v1109_v30 = vmin.f32 %v11774_v51, %v1087_v58  ;;  %v1091_v34 = vsel %vm1076_vm3, %v9439_v49, inf  ;;  %3454 = vperm.xlu0 %4351, %v3433_v19   ;;  %v11776_v13 = vld [vmem:[#allocation40_spill] sm:$0xff]  ;;  %vm1308_vm15 = vcmp.eq.s32.totalorder %v1288_v46, 1  ;;  %11779 = vst [vmem:[#allocation76_spill] sm:$0xff] %v9750_v0  ;;  %11780 = vst [vmem:[#allocation84_spill] sm:$0xff] %v9753_v63 }
 0x236   : > { %v1112_v1 = vmin.f32 %v1110_v15, %v11776_v13  ;;  %v9741_v31 = vmin.f32 %v9637_v53, %v661_v28  ;;  %v9744_v23 = vmin.f32 %v9639_v18, %v674_v47  ;;  %v9746_v2 = vmin.f32 %v880_v56, %v881_v25  ;;  %v9758_v46 = vld [vmem:[%s10956_s2 + $0x90] sm:$0xff]  ;;  %v9764_v18 = vld [vmem:[%s10956_s2 + $0x98] sm:$0xff] }
 0x237   : > { %v1098_v37 = vmin.f32 %v1096_v27, %v1090_v36  ;;  %v1111_v58 = vmin.f32 %v1109_v30, %v1091_v34  ;;  %vm2174_vm13 = vcmp.eq.s32.totalorder %v9694_v24, 1  ;;  %v1317_v53 = vsel %vm1308_vm15, %v9758_v46, inf  ;;  %v9767_v15 = vpop.permute.xlu1 %2169  ;;  %v1297_v19 = vpop.permute.xlu0 %1296  ;;  %v11781_v28 = vld [vmem:[#allocation36_spill] sm:$0xff]  ;;  %v11782_v25 = vld [vmem:[#allocation53_spill] sm:$0xff]  ;;  %v9789_v34 = vld [vmem:[%s10956_s2 + $0xc0] sm:$0xff] }
 0x238   : > { %11777 = vst [vmem:[#allocation79_spill] sm:$0xff] %v9741_v31  ;;  %11778 = vst [vmem:[#allocation65_spill] sm:$0xff] %v9744_v23  ;;  %v1318_v56 = vsel %vm1308_vm15, %v9764_v18, inf  ;;  %3660 = vperm.xlu1 %4350, %v3643_v62   ;;  %v1332_v47 = vmin.f32 %v1317_v53, %v11781_v28  ;;  %vm1311_vm9 = vcmp.eq.s32.totalorder %v1297_v19, 1  ;;  %vm11163_vm5 = vcmp.gt.f32.partialorder %v9750_v0, 0.5  ;;  %v9778_v62 = vld [vmem:[%s10956_s2 + $0x130] sm:$0xff] }
 0x239   : > { %v1100_v49 = vmin.f32 %v1098_v37, %v1099_v61  ;;  %v1113_v6 = vmin.f32 %v1111_v58, %v1112_v1  ;;  %v9769_v61 = vmin.f32 %v893_v33, %v894_v16  ;;  %v1345_v27 = vmin.f32 %v1318_v56, %v11782_v25  ;;  %v11784_v16 = vld [vmem:[#allocation42_spill] sm:$0xff]  ;;  %v9795_v1 = vld [vmem:[%s10956_s2 + $0xc8] sm:$0xff]  ;;  %v9801_v58 = vld [vmem:[%s10956_s2 + $0x138] sm:$0xff] }
 0x23a   : > { %vm11167_vm3 = vcmp.gt.f32.partialorder %v9753_v63, 0.5  ;;  %v9783_v33 = vsel %vm2174_vm13, %v9778_v62, inf  ;;  %v1334_v36 = vmin.f32 %v1332_v47, %v11784_v16  ;;  %v1323_v13 = vsel %vm1311_vm9, %v9789_v34, inf  ;;  %v11786_v28 = vld [vmem:[#allocation37_spill] sm:$0xff]  ;;  %v11796_v0 = vld [vmem:[#allocation43_spill] sm:$0xff]  ;;  %v11820_v23 = vld [vmem:[#allocation54_spill] sm:$0xff] }
 0x23b   : > { %v1101_v51 = vrot.slane %v1100_v49, 4  ;;  %v1114_v30 = vrot.slane %v1113_v6, 4  ;;  %11783 = vst [vmem:[#allocation82_spill] sm:$0xff] %v9783_v33  ;;  %v1324_v37 = vsel %vm1311_vm9, %v9795_v1, inf  ;;  %v9806_v53 = vsel %vm2174_vm13, %v9801_v58, inf  ;;  %v2361_v25 = vpop.permute.xlu1 %2360  ;;  %v1303_v16 = vpop.permute.xlu0 %1302 }
 0x23c   : > { %11785 = vst [vmem:[#allocation93_spill] sm:$0xff] %v9806_v53  ;;  %v1347_v47 = vmin.f32 %v1345_v27, %v11786_v28  ;;  %v883_v43 = vrot.slane %v9746_v2, 1  ;;  %v896_v5 = vrot.slane %v9769_v61, 1  ;;  %v3640_v24 = vsel %vm11163_vm5, 1, %v11265_v9  ;;  %v11790_v27 = vld [vmem:[#allocation45_spill] sm:$0xff]  ;;  %v11819_v53 = vld [vmem:[#allocation50_spill] sm:$0xff] }
 0x23d   : > { %v1102_v56 = vmin.f32 %v1100_v49, %v1101_v51  ;;  %v1115_v19 = vmin.f32 %v1113_v6, %v1114_v30  ;;  %v3645_v49 = vsel %vm11167_vm3, 1, %v11265_v9  ;;  %v11789_v6 = vld [vmem:[#allocation34_spill] sm:$0xff]  ;;  %v11792_v28 = vld [vmem:[#allocation41_spill] sm:$0xff]  ;;  %3651 = vperm.xlu0 %4351, %v3640_v24   ;;  %vm2383_vm15 = vcmp.eq.s32.totalorder %v2361_v25, 1 }
 0x23e   : > { %v11791_v51 = vmin.f32 %v11789_v6, %v11790_v27  ;;  %v11794_v26 = vmin.f32 %v11792_v28, %v11793_v48  ;;  %3666 = vperm.xlu1 %4350, %v3645_v49   ;;  %v1336_v29 = vmin.f32 %v1334_v36, %v11795_v40  ;;  %vm1313_vm13 = vcmp.eq.s32.totalorder %v1303_v16, 1  ;;  %v9842_v40 = vld [vmem:[%s10956_s2 + $0xe8] sm:$0xff] }
 0x23f   : > { %v1103_v7 = vrot.slane %v1102_v56, 2  ;;  %vm11168_vm9 = vcmp.gt.f32.partialorder %v9810_v54, 0.5  ;;  %vm11214_vm5 = vcmp.gt.f32.partialorder %v9813_v32, 0.5  ;;  %v1116_v63 = vrot.slane %v1115_v19, 2  ;;  %v2367_v36 = vpop.permute.xlu1 %2366  ;;  %v9866_v28 = vld [vmem:[%s5747_s28 + $0x3e8] sm:$0xff]  ;;  %v11803_v54 = vld [vmem:[#allocation48_spill] sm:$0xff] }
 0x240   : > { %v1333_v30 = vmin.f32 %v11791_v51, %v1323_v13  ;;  %v1346_v38 = vmin.f32 %v11794_v26, %v1324_v37  ;;  %v1349_v12 = vmin.f32 %v1347_v47, %v11796_v0  ;;  %v9836_v13 = vld [vmem:[%s10956_s2 + $0xe0] sm:$0xff]  ;;  %v1328_v26 = vsel %vm1313_vm13, %v9842_v40, inf  ;;  %v1500_v37 = vpop.permute.xlu0 %1499  ;;  %11801 = vst [vmem:[#allocation80_spill] sm:$0xff] %v9866_v28 }
 0x241   : > { %v1327_v48 = vsel %vm1313_vm13, %v9836_v13, inf  ;;  %v3642_v0 = vsel %vm11168_vm9, 1, %v11265_v9  ;;  %v3434_v47 = vsel %vm11214_vm5, 1, %v11265_v9  ;;  %v9853_v49 = vsel %vm2383_vm15, %v9661_v14, inf }
 0x242   : > { %v1335_v16 = vmin.f32 %v1333_v30, %v1327_v48  ;;  %v1348_v24 = vmin.f32 %v1346_v38, %v1328_v26  ;;  %11797 = vst [vmem:[#allocation73_spill] sm:$0xff] %v9853_v49  ;;  %v9857_v6 = vsel %vm2383_vm15, %v9670_v55, inf  ;;  %3657 = vperm.xlu0 %4351, %v3642_v0   ;;  %3457 = vperm.xlu1 %4350, %v3434_v47   ;;  %vm2385_vm13 = vcmp.eq.s32.totalorder %v2367_v36, 1  ;;  %v11802_v0 = vld [vmem:[#allocation58_spill] sm:$0xff] }
 0x243   : > { %11798 = vst [vmem:[#allocation78_spill] sm:$0xff] %v9857_v6  ;;  %vm1520_vm3 = vcmp.eq.s32.totalorder %v1500_v37, 1  ;;  %v9860_v51 = vsel %vm2385_vm13, %v9681_v44, inf  ;;  %v9863_v30 = vsel %vm2385_vm13, %v9689_v57, inf  ;;  %vm2176_vm9 = vcmp.eq.s32.totalorder %v9731_v10, 1  ;;  %v11811_v10 = vld [vmem:[#allocation51_spill] sm:$0xff] }
 0x244   : > { %v1337_v38 = vmin.f32 %v1335_v16, %v1336_v29  ;;  %v1350_v27 = vmin.f32 %v1348_v24, %v1349_v12  ;;  %11799 = vst [vmem:[#allocation17_spill] sm:$0xff] %v9860_v51  ;;  %11800 = vst [vmem:[#allocation71_spill] sm:$0xff] %v9863_v30  ;;  %vm2178_vm0 = vcmp.eq.s32.totalorder %v9767_v15, 1  ;;  %v9874_v12 = vpop.permute.xlu1 %2369  ;;  %v1509_v48 = vpop.permute.xlu0 %1508  ;;  %v1529_v37 = vsel %vm1520_vm3, %v9758_v46, inf  ;;  %v9885_v30 = vld [vmem:[%s5747_s28 + $0x3f8] sm:$0xff] }
 0x245   : > { %v1530_v16 = vsel %vm1520_vm3, %v9764_v18, inf  ;;  %v1104_v24 = vmin.f32 %v1102_v56, %v1103_v7  ;;  %v1544_v47 = vmin.f32 %v1529_v37, %v11802_v0  ;;  %vm11184_vm15 = vcmp.gt.f32.partialorder %v9866_v28, 0.5  ;;  %11804 = vst [vmem:[#allocation27_spill] sm:$0xff] %v9885_v30 }
 0x246   : > { %v1338_v26 = vrot.slane %v1337_v38, 4  ;;  %v1351_v36 = vrot.slane %v1350_v27, 4  ;;  %v1557_v32 = vmin.f32 %v1530_v16, %v11803_v54  ;;  %v1117_v25 = vmin.f32 %v1115_v19, %v1116_v63  ;;  %v9896_v54 = vld [vmem:[%s10956_s2 + $0x150] sm:$0xff] }
 0x247   : > { %v3644_v29 = vsel %vm11184_vm15, 1, %v11265_v9  ;;  %v9888_v6 = vmin.f32 %v9746_v2, %v883_v43  ;;  %v9891_v7 = vmin.f32 %v9769_v61, %v896_v5  ;;  %v9901_v63 = vsel %vm2176_vm9, %v9896_v54, inf  ;;  %v9908_v5 = vld [vmem:[%s10956_s2 + $0x158] sm:$0xff] }
 0x248   : > { %v1339_v51 = vmin.f32 %v1337_v38, %v1338_v26  ;;  %v1352_v49 = vmin.f32 %v1350_v27, %v1351_v36  ;;  %11807 = vst [vmem:[#allocation81_spill] sm:$0xff] %v9901_v63  ;;  %3663 = vperm.xlu0 %4351, %v3644_v29   ;;  %vm1523_vm3 = vcmp.eq.s32.totalorder %v1509_v48, 1  ;;  %v9903_v56 = vpop.permute.xlu1 %2375  ;;  %v1515_v19 = vpop.permute.xlu0 %1514  ;;  %v9913_v43 = vsel %vm2176_vm9, %v9908_v5, inf  ;;  %v11809_v2 = vld [vmem:[#allocation49_spill] sm:$0xff]  ;;  %v9921_v48 = vld [vmem:[%s10956_s2 + $0x170] sm:$0xff] }
 0x249   : > { %11805 = vst [vmem:[#allocation89_spill] sm:$0xff] %v9888_v6  ;;  %11806 = vst [vmem:[#allocation87_spill] sm:$0xff] %v9891_v7  ;;  %v1546_v61 = vmin.f32 %v1544_v47, %v11809_v2  ;;  %v1535_v38 = vsel %vm1523_vm3, %v9789_v34, inf  ;;  %v1536_v27 = vsel %vm1523_vm3, %v9795_v1, inf  ;;  %v1105_v29 = vrot.slane %v1104_v24, 1  ;;  %v9936_v2 = vld [vmem:[%s10956_s2 + $0x178] sm:$0xff] }
 0x24a   : > { %11808 = vst [vmem:[#allocation90_spill] sm:$0xff] %v9913_v43  ;;  %v9926_v26 = vsel %vm2178_vm0, %v9921_v48, inf  ;;  %v1559_v36 = vmin.f32 %v1557_v32, %v11811_v10  ;;  %vm11183_vm9 = vcmp.gt.f32.partialorder %v9885_v30, 0.5  ;;  %v1118_v37 = vrot.slane %v1117_v25, 1  ;;  %v11813_v32 = vld [vmem:[#allocation39_spill] sm:$0xff]  ;;  %v11814_v10 = vld [vmem:[#allocation46_spill] sm:$0xff] }
 0x24b   : > { %11810 = vst [vmem:[#allocation85_spill] sm:$0xff] %v9926_v26  ;;  %v1340_v16 = vrot.slane %v1339_v51, 2  ;;  %v1353_v0 = vrot.slane %v1352_v49, 2  ;;  %v3646_v47 = vsel %vm11183_vm9, 1, %v11265_v9  ;;  %v9941_v28 = vsel %vm2178_vm0, %v9936_v2, inf  ;;  %v11816_v26 = vld [vmem:[#allocation56_spill] sm:$0xff] }
 0x24c   : > { %11812 = vst [vmem:[#allocation86_spill] sm:$0xff] %v9941_v28  ;;  %v11815_v7 = vmin.f32 %v11813_v32, %v11814_v10  ;;  %v11818_v43 = vmin.f32 %v11816_v26, %v11817_v60  ;;  %3669 = vperm.xlu0 %4351, %v3646_v47   ;;  %vm1525_vm13 = vcmp.eq.s32.totalorder %v1515_v19, 1  ;;  %v9949_v9 = vpop.permute.xlu1 %2381  ;;  %v1712_v30 = vpop.permute.xlu0 %1711  ;;  %vm2386_vm3 = vcmp.eq.s32.totalorder %v9874_v12, 1 }
 0x24d   : > { %v1548_v33 = vmin.f32 %v1546_v61, %v11819_v53  ;;  %v1539_v15 = vsel %vm1525_vm13, %v9836_v13, inf  ;;  %v1540_v28 = vsel %vm1525_vm13, %v9842_v40, inf  ;;  %v1561_v32 = vmin.f32 %v1559_v36, %v11820_v23 }
 0x24e   : > { %v1545_v6 = vmin.f32 %v11815_v7, %v1535_v38  ;;  %v1558_v63 = vmin.f32 %v11818_v43, %v1536_v27  ;;  %vm1732_vm0 = vcmp.eq.s32.totalorder %v1712_v30, 1  ;;  %v9956_v60 = vmin.f32 %v1104_v24, %v1105_v29 }
 0x24f   : > { %v9958_v43 = vmin.f32 %v1117_v25, %v1118_v37  ;;  %v1341_v19 = vmin.f32 %v1339_v51, %v1340_v16  ;;  %v1354_v27 = vmin.f32 %v1352_v49, %v1353_v0  ;;  %v1741_v10 = vsel %vm1732_vm0, %v9758_v46, inf }
 0x250   : > { %v1547_v7 = vmin.f32 %v1545_v6, %v1539_v15  ;;  %v1560_v38 = vmin.f32 %v1558_v63, %v1540_v28  ;;  %11821 = vst [vmem:[#allocation11_spill] sm:$0xff] %v9956_v60  ;;  %v1742_v53 = vsel %vm1732_vm0, %v9764_v18, inf  ;;  %v2573_v61 = vpop.permute.xlu1 %2572  ;;  %v1721_v31 = vpop.permute.xlu0 %1720  ;;  %v9965_v23 = vsel %vm2386_vm3, %v9778_v62, inf  ;;  %v11827_v15 = vld [vmem:[#allocation59_spill] sm:$0xff] }
 0x251   : > { %11822 = vst [vmem:[#allocation12_spill] sm:$0xff] %v9958_v43  ;;  %11823 = vst [vmem:[#allocation13_spill] sm:$0xff] %v9965_v23  ;;  %vm2388_vm13 = vcmp.eq.s32.totalorder %v9903_v56, 1  ;;  %v1756_v6 = vmin.f32 %v1741_v10, %v9472_v11  ;;  %v1769_v51 = vmin.f32 %v1742_v53, %v9481_v22  ;;  %vm2595_vm9 = vcmp.eq.s32.totalorder %v2573_v61, 1  ;;  %v11832_v10 = vld [vmem:[#allocation60_spill] sm:$0xff] }
 0x252   : > { %v1549_v26 = vmin.f32 %v1547_v7, %v1548_v33  ;;  %v1562_v47 = vmin.f32 %v1560_v38, %v1561_v32  ;;  %vm1735_vm15 = vcmp.eq.s32.totalorder %v1721_v31, 1  ;;  %v1342_v30 = vrot.slane %v1341_v19, 1  ;;  %v11826_v31 = vld [vmem:[#allocation57_spill] sm:$0xff] }
 0x253   : > { %v1355_v28 = vrot.slane %v1354_v27, 1  ;;  %v1758_v25 = vmin.f32 %v1756_v6, %v9496_v8  ;;  %v1771_v24 = vmin.f32 %v1769_v51, %v9501_v45  ;;  %v1747_v36 = vsel %vm1735_vm15, %v9789_v34, inf  ;;  %v10150_v51 = vld [vmem:[%s10956_s2 + $0x1c8] sm:$0xff] }
 0x254   : > { %v1550_v49 = vrot.slane %v1549_v26, 4  ;;  %v1563_v33 = vrot.slane %v1562_v47, 4  ;;  %v1748_v37 = vsel %vm1735_vm15, %v9795_v1, inf  ;;  %v2579_v16 = vpop.permute.xlu1 %2578  ;;  %v1727_v11 = vpop.permute.xlu0 %1726  ;;  %v9975_v22 = vsel %vm2595_vm9, %v9661_v14, inf  ;;  %11855 = vst [vmem:[#allocation24_spill] sm:$0xff] %v10150_v51 }
 0x255   : > { %11824 = vst [vmem:[#allocation14_spill] sm:$0xff] %v9975_v22  ;;  %v9978_v0 = vsel %vm2595_vm9, %v9670_v55, inf  ;;  %v11828_v32 = vmin.f32 %v11826_v31, %v11827_v15  ;;  %vm2597_vm0 = vcmp.eq.s32.totalorder %v2579_v16, 1  ;;  %vm1737_vm15 = vcmp.eq.s32.totalorder %v1727_v11, 1 }
 0x256   : > { %v1551_v63 = vmin.f32 %v1549_v26, %v1550_v49  ;;  %v1564_v29 = vmin.f32 %v1562_v47, %v1563_v33  ;;  %11825 = vst [vmem:[#allocation75_spill] sm:$0xff] %v9978_v0  ;;  %v9984_v38 = vsel %vm2597_vm0, %v9681_v44, inf  ;;  %v9987_v26 = vsel %vm2597_vm0, %v9689_v57, inf  ;;  %v11831_v47 = vld [vmem:[#allocation9_spill] sm:$0xff]  ;;  %v11834_v49 = vld [vmem:[#allocation68_spill] sm:$0xff]  ;;  %v11871_v0 = vld [vmem:[#allocation74_spill] sm:$0xff] }
 0x257   : > { %v1757_v8 = vmin.f32 %v11828_v32, %v1747_v36  ;;  %11829 = vst [vmem:[#allocation88_spill] sm:$0xff] %v9984_v38  ;;  %11830 = vst [vmem:[#allocation19_spill] sm:$0xff] %v9987_v26  ;;  %v11833_v53 = vmin.f32 %v11831_v47, %v11832_v10  ;;  %v1760_v33 = vmin.f32 %v1758_v25, %v11834_v49  ;;  %v11835_v36 = vld [vmem:[#allocation62_spill] sm:$0xff]  ;;  %v1751_v31 = vsel %vm1737_vm15, %v9836_v13, inf  ;;  %v11872_v38 = vld [vmem:[#allocation83_spill] sm:$0xff] }
 0x258   : > { %v1552_v45 = vrot.slane %v1551_v63, 2  ;;  %v1565_v7 = vrot.slane %v1564_v29, 2  ;;  %v1773_v16 = vmin.f32 %v1771_v24, %v11835_v36  ;;  %v1752_v15 = vsel %vm1737_vm15, %v9842_v40, inf  ;;  %v2582_v32 = vpop.permute.xlu1 %2581  ;;  %v1924_v23 = vpop.permute.xlu0 %1923 }
 0x259   : > { %v1770_v61 = vmin.f32 %v11833_v53, %v1748_v37  ;;  %v1759_v47 = vmin.f32 %v1757_v8, %v1751_v31  ;;  %vm1944_vm9 = vcmp.eq.s32.totalorder %v1924_v23, 1  ;;  %v10000_v10 = vmin.f32 %v1341_v19, %v1342_v30 }
 0x25a   : > { %v1553_v43 = vmin.f32 %v1551_v63, %v1552_v45  ;;  %v10005_v11 = vsel %vm2386_vm3, %v9801_v58, inf  ;;  %v1566_v25 = vmin.f32 %v1564_v29, %v1565_v7  ;;  %vm2390_vm0 = vcmp.eq.s32.totalorder %v9949_v9, 1 }
 0x25b   : > { %v1772_v37 = vmin.f32 %v1770_v61, %v1752_v15  ;;  %v1761_v24 = vmin.f32 %v1759_v47, %v1760_v33  ;;  %v1953_v49 = vsel %vm1944_vm9, %v9758_v46, inf  ;;  %v1954_v36 = vsel %vm1944_vm9, %v9764_v18, inf }
 0x25c   : > { %v10013_v23 = vsel %vm2388_vm13, %v9896_v54, inf  ;;  %v10018_v12 = vsel %vm2388_vm13, %v9908_v5, inf  ;;  %v1968_v19 = vmin.f32 %v1953_v49, %v9594_v41  ;;  %v1981_v30 = vmin.f32 %v1954_v36, %v9605_v50  ;;  %v10022_v63 = vpop.permute.xlu1 %2587  ;;  %v1933_v29 = vpop.permute.xlu0 %1932  ;;  %v11856_v50 = vld [vmem:[#allocation93_spill] sm:$0xff] }
 0x25d   : > { %v1774_v53 = vmin.f32 %v1772_v37, %v1773_v16  ;;  %v10024_v46 = vmin.f32 %v1354_v27, %v1355_v28  ;;  %v1554_v18 = vrot.slane %v1553_v43, 1  ;;  %v10029_v8 = vsel %vm2390_vm0, %v9921_v48, inf  ;;  %v10071_v37 = vld [vmem:[%s10956_s2 + $0x198] sm:$0xff] }
 0x25e   : > { %vm1947_vm3 = vcmp.eq.s32.totalorder %v1933_v29, 1  ;;  %v1567_v45 = vrot.slane %v1566_v25, 1  ;;  %vm2598_vm15 = vcmp.eq.s32.totalorder %v2582_v32, 1  ;;  %v1970_v56 = vmin.f32 %v1968_v19, %v9633_v52  ;;  %v11840_v32 = vld [vmem:[#allocation6_spill] sm:$0xff] }
 0x25f   : > { %v1983_v41 = vmin.f32 %v1981_v30, %v9707_v3  ;;  %v10038_v27 = vsel %vm2390_vm0, %v9936_v2, inf  ;;  %v1762_v28 = vrot.slane %v1761_v24, 4  ;;  %v1775_v7 = vrot.slane %v1774_v53, 4 }
 0x260   : > { %v1959_v61 = vsel %vm1947_vm3, %v9789_v34, inf  ;;  %v1960_v33 = vsel %vm1947_vm3, %v9795_v1, inf  ;;  %v10042_v16 = vpop.permute.xlu1 %2593  ;;  %v1972_v52 = vmin.f32 %v1970_v56, %v9712_v4  ;;  %v1939_v31 = vpop.permute.xlu0 %1938  ;;  %v10048_v47 = vmin.f32 %v1553_v43, %v1554_v18  ;;  %v10063_v4 = vld [vmem:[%s10956_s2 + $0x190] sm:$0xff] }
 0x261   : > { %v1985_v3 = vmin.f32 %v1983_v41, %v9723_v20  ;;  %v10052_v9 = vsel %vm2598_vm15, %v9778_v62, inf  ;;  %v10056_v34 = vsel %vm2598_vm15, %v9801_v58, inf  ;;  %v10058_v1 = vmin.f32 %v1566_v25, %v1567_v45  ;;  %v11838_v20 = vld [vmem:[#allocation5_spill] sm:$0xff] }
 0x262   : > { %11836 = vst [vmem:[#allocation20_spill] sm:$0xff] %v10048_v47  ;;  %vm1949_vm13 = vcmp.eq.s32.totalorder %v1939_v31, 1  ;;  %vm11839_vm9 = vcmp.eq.s32.totalorder %v11838_v20, 1  ;;  %vm11841_vm0 = vcmp.eq.s32.totalorder %v11840_v32, 1  ;;  %v10076_v49 = vmin.f32 %v1761_v24, %v1762_v28  ;;  %v10168_v28 = vld [vmem:[%s10956_s2 + $0x1a0] sm:$0xff] }
 0x263   : > { %11837 = vst [vmem:[#allocation21_spill] sm:$0xff] %v10058_v1  ;;  %v3513_v43 = vsel %vm11839_vm9, %v10063_v4, inf  ;;  %v3514_v25 = vsel %vm11841_vm0, %v10071_v37, inf  ;;  %vm2600_vm3 = vcmp.eq.s32.totalorder %v10022_v63, 1  ;;  %v11842_v36 = vmin.f32 %v9546_v17, %v9555_v21  ;;  %v10094_v17 = vld [vmem:[%s10956_s2 + $0x180] sm:$0xff]  ;;  %vm11846_vm15 = vmmov %vm11839_vm9 }
 0x264   : > { %v11843_v30 = vmin.f32 %v9550_v42, %v9559_v59  ;;  %v10085_v18 = vmin.f32 %v1774_v53, %v1775_v7  ;;  %v1963_v45 = vsel %vm1949_vm13, %v9836_v13, inf  ;;  %v1964_v56 = vsel %vm1949_vm13, %v9842_v40, inf  ;;  %v2785_v31 = vpop.permute.xlu1 %2784  ;;  %v2152_v24 = vpop.permute.xlu0 %2151  ;;  %11845 = vst [vmem:[#allocation22_spill] sm:$0xff] %v10094_v17  ;;  %v10104_v13 = vld [vmem:[%s10956_s2 + $0x188] sm:$0xff]  ;;  %vm11849_vm9 = vmmov %vm11841_vm0 }
 0x265   : > { %v1969_v19 = vmin.f32 %v11842_v36, %v1959_v61  ;;  %v3530_v41 = vmin.f32 %v3513_v43, %v3514_v25  ;;  %v3511_v42 = vsel %vm11846_vm15, %v10094_v17, inf  ;;  %vm2807_vm13 = vcmp.eq.s32.totalorder %v2785_v31, 1  ;;  %11848 = vst [vmem:[#allocation15_spill] sm:$0xff] %v10104_v13  ;;  %v10119_v36 = vld [vmem:[%s10956_s2 + $0x110] sm:$0xff]  ;;  %11860 = vst [vmem:[#allocation28_spill] sm:$0xff] %v10168_v28 }
 0x266   : > { %v1982_v29 = vmin.f32 %v11843_v30, %v1960_v33  ;;  %v3512_v40 = vsel %vm11849_vm9, %v10104_v13, inf  ;;  %vm2172_vm0 = vcmp.eq.s32.totalorder %v2152_v24, 1  ;;  %v1764_v53 = vrot.slane %v10076_v49, 2  ;;  %v10126_v30 = vld [vmem:[%s10956_s2 + $0x1c0] sm:$0xff]  ;;  %v11857_v24 = vld [vmem:[#allocation81_spill] sm:$0xff] }
 0x267   : > { %v1971_v6 = vmin.f32 %v1969_v19, %v1963_v45  ;;  %3531 = vmin.xlane.f32.xlu1 %v3530_v41  ;;  %v10113_v7 = vsel %vm2600_vm3, %v9896_v54, inf  ;;  %v1777_v43 = vrot.slane %v10085_v18, 2  ;;  %v3527_v25 = vmin.f32 %v3511_v42, %v3512_v40  ;;  %11851 = vst [vmem:[#allocation91_spill] sm:$0xff] %v10126_v30  ;;  %v10142_v41 = vld [vmem:[%s10956_s2 + $0x118] sm:$0xff]  ;;  %v11854_v40 = vld [vmem:[#allocation82_spill] sm:$0xff] }
 0x268   : > { %v1984_v15 = vmin.f32 %v1982_v29, %v1964_v56  ;;  %11850 = vst [vmem:[#allocation16_spill] sm:$0xff] %v10113_v7  ;;  %v2181_v19 = vsel %vm2172_vm0, %v10119_v36, inf  ;;  %v10133_v45 = vsel %vm2807_vm13, %v9661_v14, inf  ;;  %v10137_v56 = vsel %vm2807_vm13, %v9670_v55, inf  ;;  %v10240_v7 = vld [vmem:[%s10956_s2 + $0x1b0] sm:$0xff] }
 0x269   : > { %v1973_v61 = vmin.f32 %v1971_v6, %v1972_v52  ;;  %v3519_v6 = vsel %vm11846_vm15, %v10126_v30, inf  ;;  %v2791_v52 = vpop.permute.xlu1 %2790  ;;  %11852 = vst [vmem:[#allocation18_spill] sm:$0xff] %v10133_v45  ;;  %11853 = vst [vmem:[#allocation23_spill] sm:$0xff] %v10137_v56  ;;  %v2182_v42 = vsel %vm2172_vm0, %v10142_v41, inf  ;;  %v2196_v59 = vmin.f32 %v2181_v19, %v11854_v40  ;;  %v11868_v56 = vld [vmem:[#allocation77_spill] sm:$0xff] }
 0x26a   : > { %v1986_v33 = vmin.f32 %v1984_v15, %v1985_v3  ;;  %v2161_v3 = vpop.permute.xlu0 %2160  ;;  %v3520_v14 = vsel %vm11849_vm9, %v10150_v51, inf  ;;  %vm2809_vm13 = vcmp.eq.s32.totalorder %v2791_v52, 1  ;;  %v2209_v1 = vmin.f32 %v2182_v42, %v11856_v50  ;;  %vm11861_vm0 = vmmov %vm11846_vm15 }
 0x26b   : > { %v1974_v15 = vrot.slane %v1973_v61, 4  ;;  %3528 = vmin.xlane.f32.xlu0 %v3527_v25  ;;  %v3539_v21 = vmin.f32 %v3519_v6, %v3520_v14  ;;  %v10157_v47 = vmin.f32 %v2196_v59, %v11857_v24  ;;  %v10160_v19 = vsel %vm2809_vm13, %v9681_v44, inf  ;;  %v11862_v6 = vld [vmem:[#allocation90_spill] sm:$0xff]  ;;  %vm11864_vm15 = vmmov %vm11849_vm9 }
 0x26c   : > { %v1987_v29 = vrot.slane %v1986_v33, 4  ;;  %11858 = vst [vmem:[#allocation30_spill] sm:$0xff] %v10160_v19  ;;  %v10163_v40 = vsel %vm2809_vm13, %v9689_v57, inf  ;;  %v10176_v44 = vmin.f32 %v2209_v1, %v11862_v6  ;;  %vm2175_vm9 = vcmp.eq.s32.totalorder %v2161_v3, 1  ;;  %v10193_v1 = vld [vmem:[%s10956_s2 + $0x1e0] sm:$0xff]  ;;  %vm11865_vm13 = vmmov %vm11861_vm0 }
 0x26d   : > { %v1975_v55 = vmin.f32 %v1973_v61, %v1974_v15  ;;  %11859 = vst [vmem:[#allocation25_spill] sm:$0xff] %v10163_v40  ;;  %v3515_v61 = vsel %vm11861_vm0, %v10168_v28, inf  ;;  %v10173_v50 = vpop.permute.xlu1 %2793  ;;  %3540 = vmin.xlane.f32.xlu1 %v3539_v21  ;;  %v10185_v15 = vld [vmem:[%s10956_s2 + $0x1a8] sm:$0xff]  ;;  %v3523_v21 = vsel %vm11865_vm13, %v10193_v1, inf  ;;  %v10201_v6 = vld [vmem:[%s10956_s2 + $0x140] sm:$0xff]  ;;  %v10205_v3 = vmin.f32 %v10076_v49, %v1764_v53  ;;  %vm11867_vm0 = vmmov %vm11864_vm15 }
 0x26e   : > { %v1988_v31 = vmin.f32 %v1986_v33, %v1987_v29  ;;  %v2167_v33 = vpop.permute.xlu0 %2166  ;;  %11863 = vst [vmem:[#allocation26_spill] sm:$0xff] %v10185_v15  ;;  %v3516_v29 = vsel %vm11864_vm15, %v10185_v15, inf  ;;  %v2187_v52 = vsel %vm2175_vm9, %v10201_v6, inf  ;;  %v10210_v57 = vsel %vm2600_vm3, %v9908_v5, inf  ;;  %v11869_v19 = vld [vmem:[#allocation10_spill] sm:$0xff]  ;;  %vm11874_vm3 = vmmov %vm11865_vm13 }
 0x26f   : > { %v1976_v59 = vrot.slane %v1975_v55, 2  ;;  %v3533_v24 = vmin.f32 %v3515_v61, %v3516_v29  ;;  %11866 = vst [vmem:[#allocation29_spill] sm:$0xff] %v10210_v57  ;;  %v10221_v61 = vld [vmem:[%s10956_s2 + $0x1e8] sm:$0xff]  ;;  %v11870_v45 = vmin.f32 %v11868_v56, %v11869_v19  ;;  %v11873_v22 = vmin.f32 %v11871_v0, %v11872_v38  ;;  %vm11875_vm15 = vmmov %vm11867_vm0  ;;  %v11878_v56 = vld [vmem:[#allocation85_spill] sm:$0xff] }
 0x270   : > { %v1989_v25 = vrot.slane %v1988_v31, 2  ;;  %v3524_v49 = vsel %vm11867_vm0, %v10221_v61, inf  ;;  %v2200_v19 = vmin.f32 %v10157_v47, %v11878_v56 }
 0x271   : > { %v1977_v42 = vmin.f32 %v1975_v55, %v1976_v59  ;;  %v10215_v55 = vld [vmem:[%s10956_s2 + $0x148] sm:$0xff]  ;;  %v10226_v53 = vpop.permute.xlu1 %2799  ;;  %v10229_v59 = vmin.f32 %v10085_v18, %v1777_v43  ;;  %3534 = vmin.xlane.f32.xlu0 %v3533_v24  ;;  %v3545_v40 = vmin.f32 %v3523_v21, %v3524_v49  ;;  %v2197_v26 = vmin.f32 %v11870_v45, %v2187_v52  ;;  %v10248_v43 = vld [vmem:[%s10956_s2 + $0x1b8] sm:$0xff]  ;;  %v11879_v52 = vld [vmem:[#allocation86_spill] sm:$0xff] }
 0x272   : > { %v1990_v14 = vmin.f32 %v1988_v31, %v1989_v25  ;;  %v2188_v31 = vsel %vm2175_vm9, %v10215_v55, inf  ;;  %v2364_v63 = vpop.permute.xlu0 %2363  ;;  %v3517_v18 = vsel %vm11874_vm3, %v10240_v7, inf  ;;  %v3518_v45 = vsel %vm11875_vm15, %v10248_v43, inf  ;;  %v11880_v24 = vld [vmem:[#allocation7_spill] sm:$0xff]  ;;  %v11882_v49 = vld [vmem:[#allocation8_spill] sm:$0xff] }
 0x273   : > { %v1978_v25 = vrot.slane %v1977_v42, 1  ;;  %v2210_v57 = vmin.f32 %v11873_v22, %v2188_v31  ;;  %3546 = vmin.xlane.f32.xlu1 %v3545_v40  ;;  %v3536_v38 = vmin.f32 %v3517_v18, %v3518_v45  ;;  %v2213_v21 = vmin.f32 %v10176_v44, %v11879_v52  ;;  %v10282_v18 = vld [vmem:[%s10956_s2 + $0x168] sm:$0xff] }
 0x274   : > { %v1991_v29 = vrot.slane %v1990_v14, 1  ;;  %vm2177_vm9 = vcmp.eq.s32.totalorder %v2167_v33, 1  ;;  %vm11881_vm13 = vcmp.eq.s32.totalorder %v11880_v24, 1  ;;  %vm11883_vm0 = vcmp.eq.s32.totalorder %v11882_v49, 1  ;;  %v10276_v33 = vld [vmem:[%s10956_s2 + $0x160] sm:$0xff] }
 0x275   : > { %v10253_v0 = vmin.f32 %v1977_v42, %v1978_v25  ;;  %v3723_v31 = vsel %vm11881_vm13, %v10094_v17, inf  ;;  %v3724_v42 = vsel %vm11883_vm0, %v10104_v13, inf  ;;  %v10267_v25 = vpop.permute.xlu1 %2805  ;;  %3537 = vmin.xlane.f32.xlu0 %v3536_v38  ;;  %v2191_v44 = vsel %vm2177_vm9, %v10276_v33, inf }
 0x276   : > { %v10255_v22 = vmin.f32 %v1990_v14, %v1991_v29  ;;  %v2373_v14 = vpop.permute.xlu0 %2372  ;;  %v2192_v45 = vsel %vm2177_vm9, %v10282_v18, inf  ;;  %vm2602_vm3 = vcmp.eq.s32.totalorder %v10042_v16, 1  ;;  %v2199_v56 = vmin.f32 %v2197_v26, %v2191_v44 }
 0x277   : > { %11876 = vst [vmem:[#allocation31_spill] sm:$0xff] %v10253_v0  ;;  %v2212_v52 = vmin.f32 %v2210_v57, %v2192_v45  ;;  %v3739_v29 = vmin.f32 %v3723_v31, %v3724_v42  ;;  %v1766_v38 = vrot.slane %v10205_v3, 1  ;;  %v1779_v40 = vrot.slane %v10229_v59, 1  ;;  %v10299_v0 = vld [vmem:[%s10956_s2 + $0x1d8] sm:$0xff] }
 0x278   : > { %11877 = vst [vmem:[#allocation38_spill] sm:$0xff] %v10255_v22  ;;  %v10291_v22 = vld [vmem:[%s10956_s2 + $0x1d0] sm:$0xff]  ;;  %vm11885_vm15 = vcmp.eq.s32.totalorder %v11838_v20, 1  ;;  %11886 = vst [vmem:[#allocation32_spill] sm:$0xff] %v10299_v0  ;;  %vm11887_vm9 = vcmp.eq.s32.totalorder %v11840_v32, 1  ;;  %v2201_v57 = vmin.f32 %v2199_v56, %v2200_v19  ;;  %vm2384_vm13 = vcmp.eq.s32.totalorder %v2364_v63, 1 }
 0x279   : > { %v3521_v47 = vsel %vm11885_vm15, %v10291_v22, inf  ;;  %v3522_v26 = vsel %vm11887_vm9, %v10299_v0, inf  ;;  %v2214_v31 = vmin.f32 %v2212_v52, %v2213_v21  ;;  %3740 = vmin.xlane.f32.xlu1 %v3739_v29  ;;  %v10304_v44 = vpop.permute.xlu1 %3012  ;;  %v2393_v60 = vsel %vm2384_vm13, %v10119_v36, inf }
 0x27a   : > { %v3542_v42 = vmin.f32 %v3521_v47, %v3522_v26  ;;  %v2379_v45 = vpop.permute.xlu0 %2378  ;;  %v2394_v13 = vsel %vm2384_vm13, %v10142_v41, inf  ;;  %vm11888_vm0 = vcmp.eq.s32.totalorder %v11880_v24, 1  ;;  %vm11889_vm15 = vcmp.eq.s32.totalorder %v11882_v49, 1  ;;  %v11890_v47 = vld [vmem:[#allocation13_spill] sm:$0xff]  ;;  %v10322_v26 = vld [vmem:[%s10956_s2 + $0x1f0] sm:$0xff] }
 0x27b   : > { %v3727_v17 = vsel %vm11888_vm0, %v10168_v28, inf  ;;  %v3728_v0 = vsel %vm11889_vm15, %v10185_v15, inf  ;;  %v2202_v19 = vrot.slane %v2201_v57, 4  ;;  %v2215_v21 = vrot.slane %v2214_v31, 4  ;;  %v11901_v28 = vld [vmem:[#allocation71_spill] sm:$0xff] }
 0x27c   : > { %3543 = vmin.xlane.f32.xlu0 %v3542_v42  ;;  %v2408_v63 = vmin.f32 %v2393_v60, %v11890_v47  ;;  %v2421_v29 = vmin.f32 %v2394_v13, %v10005_v11  ;;  %v10317_v56 = vmin.f32 %v10205_v3, %v1766_v38  ;;  %v3745_v52 = vmin.f32 %v3727_v17, %v3728_v0  ;;  %v10330_v42 = vld [vmem:[%s10956_s2 + $0x1f8] sm:$0xff]  ;;  %v11900_v47 = vld [vmem:[#allocation78_spill] sm:$0xff] }
 0x27d   : > { %vm11892_vm9 = vcmp.eq.s32.totalorder %v11838_v20, 1  ;;  %vm11893_vm13 = vcmp.eq.s32.totalorder %v11840_v32, 1  ;;  %v2203_v11 = vmin.f32 %v2201_v57, %v2202_v19  ;;  %v2216_v17 = vmin.f32 %v2214_v31, %v2215_v21  ;;  %v10337_v0 = vpop.permute.xlu1 %3018 }
 0x27e   : > { %11891 = vst [vmem:[#allocation33_spill] sm:$0xff] %v10317_v56  ;;  %v3525_v15 = vsel %vm11892_vm9, %v10322_v26, inf  ;;  %v3526_v60 = vsel %vm11893_vm13, %v10330_v42, inf  ;;  %v2410_v13 = vmin.f32 %v2408_v63, %v10013_v23  ;;  %v2423_v3 = vmin.f32 %v2421_v29, %v10018_v12  ;;  %v10339_v38 = vpop.permute.xlu0 %2575  ;;  %3746 = vmin.xlane.f32.xlu1 %v3745_v52  ;;  %v11898_v63 = vld [vmem:[#allocation17_spill] sm:$0xff] }
 0x27f   : > { %v10344_v20 = vsel %vm2602_vm3, %v9921_v48, inf  ;;  %v10349_v32 = vsel %vm2602_vm3, %v9936_v2, inf  ;;  %v3548_v57 = vmin.f32 %v3525_v15, %v3526_v60  ;;  %vm2387_vm0 = vcmp.eq.s32.totalorder %v2373_v14, 1 }
 0x280   : > { %11894 = vst [vmem:[#allocation40_spill] sm:$0xff] %v10349_v32  ;;  %v2204_v23 = vrot.slane %v2203_v11, 2  ;;  %v2217_v31 = vrot.slane %v2216_v17, 2  ;;  %v2399_v12 = vsel %vm2387_vm0, %v10201_v6, inf  ;;  %v2400_v19 = vsel %vm2387_vm0, %v10215_v55, inf  ;;  %vm11904_vm0 = vmmov %vm11889_vm15 }
 0x281   : > { %v10354_v21 = vmin.f32 %v10229_v59, %v1779_v40  ;;  %3549 = vmin.xlane.f32.xlu0 %v3548_v57  ;;  %vm11896_vm3 = vcmp.eq.s32.totalorder %v11880_v24, 1  ;;  %v3732_v15 = vsel %vm11889_vm15, %v10150_v51, inf  ;;  %vm2810_vm9 = vcmp.eq.s32.totalorder %v10173_v50, 1  ;;  %v10365_v60 = vpop.permute.xlu1 %3021  ;;  %v11897_v40 = vld [vmem:[#allocation73_spill] sm:$0xff] }
 0x282   : > { %v3731_v16 = vsel %vm11896_vm3, %v10126_v30, inf  ;;  %v2205_v14 = vmin.f32 %v2203_v11, %v2204_v23  ;;  %v2218_v29 = vmin.f32 %v2216_v17, %v2217_v31  ;;  %v10367_v59 = vpop.permute.xlu0 %2584  ;;  %v11899_v57 = vmin.f32 %v11897_v40, %v11898_v63  ;;  %vm11903_vm13 = vmmov %vm11896_vm3 }
 0x283   : > { %v3751_v52 = vmin.f32 %v3731_v16, %v3732_v15  ;;  %v11902_v30 = vmin.f32 %v11900_v47, %v11901_v28  ;;  %v3725_v51 = vsel %vm11903_vm13, %v10063_v4, inf  ;;  %v3726_v11 = vsel %vm11904_vm0, %v10071_v37, inf  ;;  %vm11905_vm15 = vmmov %vm11903_vm13 }
 0x284   : > { %v2409_v56 = vmin.f32 %v11899_v57, %v2399_v12  ;;  %v2206_v17 = vrot.slane %v2205_v14, 1  ;;  %v2219_v23 = vrot.slane %v2218_v29, 1  ;;  %v3742_v31 = vmin.f32 %v3725_v51, %v3726_v11  ;;  %vm11906_vm13 = vmmov %vm11904_vm0 }
 0x285   : > { %v2422_v32 = vmin.f32 %v11902_v30, %v2400_v19  ;;  %3752 = vmin.xlane.f32.xlu1 %v3751_v52  ;;  %v2412_v16 = vmin.f32 %v2410_v13, %v10029_v8  ;;  %v2425_v12 = vmin.f32 %v2423_v3, %v10038_v27  ;;  %vm2389_vm3 = vcmp.eq.s32.totalorder %v2379_v45, 1  ;;  %v10391_v15 = vpop.permute.xlu1 %3027  ;;  %v11907_v3 = vld [vmem:[#allocation87_spill] sm:$0xff] }
 0x286   : > { %v3735_v28 = vsel %vm11905_vm15, %v10193_v1, inf  ;;  %v3736_v30 = vsel %vm11906_vm13, %v10221_v61, inf  ;;  %v2207_v19 = vmin.f32 %v2205_v14, %v2206_v17  ;;  %v2220_v47 = vmin.f32 %v2218_v29, %v2219_v23  ;;  %3743 = vmin.xlane.f32.xlu0 %v3742_v31  ;;  %v10393_v8 = vpop.permute.xlu0 %2590 }
 0x287   : > { %v2403_v63 = vsel %vm2389_vm3, %v10276_v33, inf  ;;  %v2404_v51 = vsel %vm2389_vm3, %v10282_v18, inf  ;;  %vm2812_vm0 = vcmp.eq.s32.totalorder %v10226_v53, 1  ;;  %v3757_v13 = vmin.f32 %v3735_v28, %v3736_v30 }
 0x288   : > { %v2411_v27 = vmin.f32 %v2409_v56, %v2403_v63  ;;  %v2424_v45 = vmin.f32 %v2422_v32, %v2404_v51  ;;  %v1782_v52 = vmin.f32 %v11907_v3, %v10354_v21  ;;  %v10401_v14 = vsel %vm2810_vm9, %v9778_v62, inf  ;;  %v11911_v63 = vld [vmem:[#allocation32_spill] sm:$0xff] }
 0x289   : > { %v11908_v29 = vmin.f32 %v9583_v35, %v10000_v10  ;;  %v11909_v57 = vmin.f32 %v9585_v39, %v10024_v46  ;;  %v10416_v56 = vsel %vm2810_vm9, %v9801_v58, inf  ;;  %vm2814_vm3 = vcmp.eq.s32.totalorder %v10267_v25, 1  ;;  %3758 = vmin.xlane.f32.xlu1 %v3757_v13  ;;  %v10431_v58 = vpop.permute.xlu1 %3033  ;;  %v11913_v13 = vld [vmem:[#allocation29_spill] sm:$0xff] }
 0x28a   : > { %v2413_v32 = vmin.f32 %v2411_v27, %v2412_v16  ;;  %v2426_v62 = vmin.f32 %v2424_v45, %v2425_v12  ;;  %v10422_v35 = vsel %vm2812_vm0, %v9896_v54, inf  ;;  %v3729_v39 = vsel %vm11905_vm15, %v10240_v7, inf  ;;  %v2788_v46 = vpop.permute.xlu0 %2787 }
 0x28b   : > { %v10406_v40 = vmin.f32 %v11908_v29, %v2207_v19  ;;  %v10411_v11 = vmin.f32 %v11909_v57, %v2220_v47  ;;  %v3730_v10 = vsel %vm11906_vm13, %v10248_v43, inf  ;;  %vm2596_vm9 = vcmp.eq.s32.totalorder %v10339_v38, 1 }
 0x28c   : > { %v2414_v50 = vrot.slane %v2413_v32, 4  ;;  %v2427_v17 = vrot.slane %v2426_v62, 4  ;;  %v3748_v23 = vmin.f32 %v3729_v39, %v3730_v10  ;;  %v2605_v31 = vsel %vm2596_vm9, %v10119_v36, inf  ;;  %v11915_v39 = vld [vmem:[#allocation88_spill] sm:$0xff] }
 0x28d   : > { %v10437_v54 = vsel %vm2812_vm0, %v9908_v5, inf  ;;  %v10442_v16 = vsel %vm2814_vm3, %v9921_v48, inf  ;;  %v2606_v38 = vsel %vm2596_vm9, %v10142_v41, inf  ;;  %v2620_v12 = vmin.f32 %v2605_v31, %v10052_v9  ;;  %v11910_v48 = vld [vmem:[#allocation16_spill] sm:$0xff]  ;;  %vm11912_vm0 = vmmov %vm11906_vm13  ;;  %v10460_v51 = vpop.permute.xlu1 %3224 }
 0x28e   : > { %v2415_v28 = vmin.f32 %v2413_v32, %v2414_v50  ;;  %v2428_v30 = vmin.f32 %v2426_v62, %v2427_v17  ;;  %3749 = vmin.xlane.f32.xlu0 %v3748_v23  ;;  %v2633_v19 = vmin.f32 %v2606_v38, %v10056_v34  ;;  %v3733_v53 = vsel %vm11905_vm15, %v10291_v22, inf  ;;  %v2797_v34 = vpop.permute.xlu0 %2796  ;;  %v11917_v17 = vld [vmem:[#allocation75_spill] sm:$0xff] }
 0x28f   : > { %v10453_v5 = vsel %vm2814_vm3, %v9936_v2, inf  ;;  %v2622_v47 = vmin.f32 %v2620_v12, %v11910_v48  ;;  %v3734_v9 = vsel %vm11912_vm0, %v11911_v63, inf  ;;  %vm2599_vm13 = vcmp.eq.s32.totalorder %v10367_v59, 1  ;;  %v11914_v59 = vld [vmem:[#allocation14_spill] sm:$0xff]  ;;  %v11918_v23 = vld [vmem:[#allocation19_spill] sm:$0xff] }
 0x290   : > { %v2416_v27 = vrot.slane %v2415_v28, 2  ;;  %v2429_v45 = vrot.slane %v2428_v30, 2  ;;  %v2635_v29 = vmin.f32 %v2633_v19, %v11913_v13  ;;  %v3754_v57 = vmin.f32 %v3733_v53, %v3734_v9 }
 0x291   : > { %vm3035_vm9 = vcmp.eq.s32.totalorder %v10304_v44, 1  ;;  %vm3037_vm3 = vcmp.eq.s32.totalorder %v10337_v0, 1  ;;  %v2611_v2 = vsel %vm2599_vm13, %v10201_v6, inf  ;;  %v2612_v25 = vsel %vm2599_vm13, %v10215_v55, inf  ;;  %v10481_v48 = vpop.permute.xlu1 %3230 }
 0x292   : > { %v2417_v32 = vmin.f32 %v2415_v28, %v2416_v27  ;;  %v2430_v62 = vmin.f32 %v2428_v30, %v2429_v45  ;;  %3755 = vmin.xlane.f32.xlu0 %v3754_v57  ;;  %v11916_v10 = vmin.f32 %v11914_v59, %v11915_v39  ;;  %v11919_v31 = vmin.f32 %v11917_v17, %v11918_v23  ;;  %v11920_v30 = vld [vmem:[#allocation40_spill] sm:$0xff]  ;;  %v2803_v9 = vpop.permute.xlu0 %2802  ;;  %v11921_v57 = vld [vmem:[#allocation22_spill] sm:$0xff] }
 0x293   : > { %v3737_v12 = vsel %vm11905_vm15, %v10322_v26, inf  ;;  %v3738_v19 = vsel %vm11912_vm0, %v10330_v42, inf  ;;  %v2624_v28 = vmin.f32 %v2622_v47, %v10344_v20  ;;  %v2637_v53 = vmin.f32 %v2635_v29, %v11920_v30  ;;  %v11922_v59 = vld [vmem:[#allocation28_spill] sm:$0xff] }
 0x294   : > { %v2621_v50 = vmin.f32 %v11916_v10, %v2611_v2  ;;  %v2634_v38 = vmin.f32 %v11919_v31, %v2612_v25  ;;  %v2418_v27 = vrot.slane %v2417_v32, 1  ;;  %v2431_v45 = vrot.slane %v2430_v62, 1 }
 0x295   : > { %v3760_v13 = vmin.f32 %v3737_v12, %v3738_v19  ;;  %vm2601_vm13 = vcmp.eq.s32.totalorder %v10393_v8, 1  ;;  %v10487_v24 = vsel %vm3035_vm9, %v11921_v57, inf  ;;  %vm2808_vm15 = vcmp.eq.s32.totalorder %v2788_v46, 1  ;;  %v11923_v8 = vld [vmem:[#allocation26_spill] sm:$0xff]  ;;  %v10503_v46 = vpop.permute.xlu1 %3233  ;;  %v11927_v12 = vld [vmem:[#allocation65_spill] sm:$0xff] }
 0x296   : > { %v2615_v49 = vsel %vm2601_vm13, %v10276_v33, inf  ;;  %v2616_v2 = vsel %vm2601_vm13, %v10282_v18, inf  ;;  %v2419_v20 = vmin.f32 %v2417_v32, %v2418_v27  ;;  %v2432_v47 = vmin.f32 %v2430_v62, %v2431_v45  ;;  %v3016_v32 = vpop.permute.xlu0 %3015  ;;  %v11924_v62 = vld [vmem:[#allocation79_spill] sm:$0xff]  ;;  %v11928_v19 = vld [vmem:[#allocation21_spill] sm:$0xff] }
 0x297   : > { %3761 = vmin.xlane.f32.xlu0 %v3760_v13  ;;  %v2623_v29 = vmin.f32 %v2621_v50, %v2615_v49  ;;  %v2636_v25 = vmin.f32 %v2634_v38, %v2616_v2  ;;  %v10494_v39 = vsel %vm3037_vm3, %v11922_v59, inf  ;;  %v10499_v10 = vsel %vm3037_vm3, %v11923_v8, inf  ;;  %v11925_v50 = vld [vmem:[#allocation20_spill] sm:$0xff]  ;;  %v11930_v13 = vld [vmem:[#allocation15_spill] sm:$0xff] }
 0x298   : > { %v2817_v17 = vsel %vm2808_vm15, %v10119_v36, inf  ;;  %v2818_v23 = vsel %vm2808_vm15, %v10142_v41, inf  ;;  %v11926_v31 = vmin.f32 %v11924_v62, %v11925_v50  ;;  %v11929_v30 = vmin.f32 %v11927_v12, %v11928_v19  ;;  %v11931_v62 = vld [vmem:[#allocation18_spill] sm:$0xff]  ;;  %v11934_v19 = vld [vmem:[#allocation23_spill] sm:$0xff] }
 0x299   : > { %v2625_v0 = vmin.f32 %v2623_v29, %v2624_v28  ;;  %v2638_v45 = vmin.f32 %v2636_v25, %v2637_v53  ;;  %vm3038_vm3 = vcmp.eq.s32.totalorder %v10365_v60, 1  ;;  %v2832_v36 = vmin.f32 %v2817_v17, %v10401_v14  ;;  %v11932_v50 = vld [vmem:[#allocation30_spill] sm:$0xff] }
 0x29a   : > { %v10508_v38 = vmin.f32 %v11926_v31, %v2419_v20  ;;  %v10513_v27 = vmin.f32 %v11929_v30, %v2432_v47  ;;  %v2845_v41 = vmin.f32 %v2818_v23, %v10416_v56  ;;  %vm2811_vm0 = vcmp.eq.s32.totalorder %v2797_v34, 1  ;;  %v10529_v56 = vpop.permute.xlu1 %3239  ;;  %v3025_v34 = vpop.permute.xlu0 %3024  ;;  %v11935_v30 = vld [vmem:[#allocation25_spill] sm:$0xff] }
 0x29b   : > { %v10521_v49 = vsel %vm3035_vm9, %v11930_v13, inf  ;;  %v3059_v2 = vmin.f32 %v10487_v24, %v10494_v39  ;;  %v2626_v20 = vrot.slane %v2625_v0, 4  ;;  %v2639_v47 = vrot.slane %v2638_v45, 4 }
 0x29c   : > { %v2834_v28 = vmin.f32 %v2832_v36, %v10422_v35  ;;  %v2847_v53 = vmin.f32 %v2845_v41, %v10437_v54  ;;  %v2823_v29 = vsel %vm2811_vm0, %v10201_v6, inf  ;;  %v2824_v14 = vsel %vm2811_vm0, %v10215_v55, inf }
 0x29d   : > { %v3072_v44 = vmin.f32 %v10521_v49, %v10499_v10  ;;  %v3049_v25 = vsel %vm3038_vm3, %v10240_v7, inf  ;;  %v2627_v17 = vmin.f32 %v2625_v0, %v2626_v20  ;;  %v2640_v23 = vmin.f32 %v2638_v45, %v2639_v47 }
 0x29e   : > { %vm3040_vm9 = vcmp.eq.s32.totalorder %v10391_v15, 1  ;;  %v2836_v35 = vmin.f32 %v2834_v28, %v10442_v16  ;;  %v2849_v6 = vmin.f32 %v2847_v53, %v10453_v5  ;;  %vm2813_vm13 = vcmp.eq.s32.totalorder %v2803_v9, 1  ;;  %v10551_v9 = vpop.permute.xlu1 %3245  ;;  %v3031_v45 = vpop.permute.xlu0 %3030 }
 0x29f   : > { %v2628_v55 = vrot.slane %v2627_v17, 2  ;;  %v2641_v54 = vrot.slane %v2640_v23, 2  ;;  %v11933_v31 = vmin.f32 %v11931_v62, %v11932_v50  ;;  %v11936_v36 = vmin.f32 %v11934_v19, %v11935_v30  ;;  %v11937_v30 = vld [vmem:[#allocation89_spill] sm:$0xff] }
 0x2a0   : > { %v3050_v0 = vsel %vm3038_vm3, %v10248_v43, inf  ;;  %vm3042_vm15 = vcmp.eq.s32.totalorder %v10431_v58, 1  ;;  %v2827_v16 = vsel %vm2813_vm13, %v10276_v33, inf  ;;  %v2828_v5 = vsel %vm2813_vm13, %v10282_v18, inf }
 0x2a1   : > { %v2833_v12 = vmin.f32 %v11933_v31, %v2823_v29  ;;  %v2846_v41 = vmin.f32 %v11936_v36, %v2824_v14  ;;  %v2629_v20 = vmin.f32 %v2627_v17, %v2628_v55  ;;  %v2642_v47 = vmin.f32 %v2640_v23, %v2641_v54  ;;  %v11938_v36 = vld [vmem:[#allocation33_spill] sm:$0xff] }
 0x2a2   : > { %v3053_v29 = vsel %vm3040_vm9, %v10291_v22, inf  ;;  %v3054_v60 = vsel %vm3040_vm9, %v11911_v63, inf  ;;  %vm3249_vm3 = vcmp.eq.s32.totalorder %v10481_v48, 1  ;;  %vm3036_vm0 = vcmp.eq.s32.totalorder %v3016_v32, 1  ;;  %v10566_v54 = vpop.permute.xlu1 %3436  ;;  %v3228_v15 = vpop.permute.xlu0 %3227 }
 0x2a3   : > { %v2835_v28 = vmin.f32 %v2833_v12, %v2827_v16  ;;  %v2848_v53 = vmin.f32 %v2846_v41, %v2828_v5  ;;  %v2630_v33 = vrot.slane %v2629_v20, 1  ;;  %v2643_v18 = vrot.slane %v2642_v47, 1 }
 0x2a4   : > { %v3057_v17 = vsel %vm3042_vm15, %v10322_v26, inf  ;;  %vm3247_vm13 = vcmp.eq.s32.totalorder %v10460_v51, 1  ;;  %v3045_v23 = vsel %vm3036_vm0, %v10063_v4, inf  ;;  %v3046_v55 = vsel %vm3036_vm0, %v10071_v37, inf }
 0x2a5   : > { %v2837_v14 = vmin.f32 %v2835_v28, %v2836_v35  ;;  %v2850_v62 = vmin.f32 %v2848_v53, %v2849_v6  ;;  %v2631_v50 = vmin.f32 %v2629_v20, %v2630_v33  ;;  %v2644_v31 = vmin.f32 %v2642_v47, %v2643_v18  ;;  %v11940_v53 = vld [vmem:[#allocation91_spill] sm:$0xff]  ;;  %v11941_v33 = vld [vmem:[#allocation24_spill] sm:$0xff] }
 0x2a6   : > { %v10571_v35 = vsel %vm3249_vm3, %v11922_v59, inf  ;;  %v3060_v6 = vmin.f32 %v3045_v23, %v3049_v25  ;;  %v3073_v19 = vmin.f32 %v3046_v55, %v3050_v0  ;;  %vm3039_vm9 = vcmp.eq.s32.totalorder %v3025_v34, 1  ;;  %v10597_v21 = vpop.permute.xlu1 %3442  ;;  %v3237_v3 = vpop.permute.xlu0 %3236 }
 0x2a7   : > { %v2838_v32 = vrot.slane %v2837_v14, 4  ;;  %v2851_v12 = vrot.slane %v2850_v62, 4  ;;  %v11939_v41 = vmin.f32 %v11937_v30, %v11938_v36  ;;  %v10581_v5 = vmin.f32 %v1782_v52, %v2644_v31 }
 0x2a8   : > { %v3058_v28 = vsel %vm3042_vm15, %v10330_v42, inf  ;;  %v10589_v34 = vsel %vm3247_vm13, %v11921_v57, inf  ;;  %v10594_v25 = vsel %vm3249_vm3, %v11923_v8, inf  ;;  %vm3250_vm0 = vcmp.eq.s32.totalorder %v10503_v46, 1 }
 0x2a9   : > { %v10576_v16 = vmin.f32 %v11939_v41, %v2631_v50  ;;  %v2839_v20 = vmin.f32 %v2837_v14, %v2838_v32  ;;  %v2852_v47 = vmin.f32 %v2850_v62, %v2851_v12  ;;  %v3051_v58 = vsel %vm3039_vm9, %v11940_v53, inf }
 0x2aa   : > { %v3052_v18 = vsel %vm3039_vm9, %v11941_v33, inf  ;;  %v10604_v14 = vsel %vm3247_vm13, %v11930_v13, inf  ;;  %v3271_v48 = vmin.f32 %v10589_v34, %v10571_v35  ;;  %v3062_v62 = vmin.f32 %v3060_v6, %v3053_v29  ;;  %v3243_v12 = vpop.permute.xlu0 %3242 }
 0x2ab   : > { %v2840_v52 = vrot.slane %v2839_v20, 2  ;;  %v2853_v0 = vrot.slane %v2852_v47, 2  ;;  %v3075_v23 = vmin.f32 %v3073_v19, %v3054_v60  ;;  %v3284_v55 = vmin.f32 %v10604_v14, %v10594_v25  ;;  %v10620_v60 = vpop.permute.xlu1 %3445  ;;  %v11942_v25 = vld [vmem:[#allocation11_spill] sm:$0xff] }
 0x2ac   : > { %vm3252_vm15 = vcmp.eq.s32.totalorder %v10529_v56, 1  ;;  %v3261_v32 = vsel %vm3250_vm0, %v10240_v7, inf  ;;  %v3061_v51 = vmin.f32 %v3059_v2, %v3051_v58  ;;  %v3074_v29 = vmin.f32 %v3072_v44, %v3052_v18  ;;  %v11946_v58 = vld [vmem:[#allocation38_spill] sm:$0xff] }
 0x2ad   : > { %v2841_v50 = vmin.f32 %v2839_v20, %v2840_v52  ;;  %v2854_v31 = vmin.f32 %v2852_v47, %v2853_v0  ;;  %vm3041_vm3 = vcmp.eq.s32.totalorder %v3031_v45, 1  ;;  %v3064_v36 = vmin.f32 %v3062_v62, %v3057_v17  ;;  %v11943_v17 = vld [vmem:[#allocation31_spill] sm:$0xff]  ;;  %v11945_v0 = vld [vmem:[#allocation12_spill] sm:$0xff] }
 0x2ae   : > { %v3055_v19 = vsel %vm3041_vm3, %v10193_v1, inf  ;;  %v3056_v30 = vsel %vm3041_vm3, %v10221_v61, inf  ;;  %v3077_v41 = vmin.f32 %v3075_v23, %v3058_v28  ;;  %v3262_v10 = vsel %vm3250_vm0, %v10248_v43, inf  ;;  %v10630_v34 = vpop.permute.xlu0 %3439 }
 0x2af   : > { %v2842_v35 = vrot.slane %v2841_v50, 1  ;;  %v2855_v6 = vrot.slane %v2854_v31, 1  ;;  %v3063_v20 = vmin.f32 %v3061_v51, %v3055_v19  ;;  %v3076_v47 = vmin.f32 %v3074_v29, %v3056_v30  ;;  %v10628_v45 = vpop.permute.xlu1 %3451 }
 0x2b0   : > { %vm3248_vm13 = vcmp.eq.s32.totalorder %v3228_v15, 1  ;;  %v11944_v28 = vmin.f32 %v11942_v25, %v11943_v17  ;;  %v11947_v18 = vmin.f32 %v11945_v0, %v11946_v58  ;;  %v3265_v62 = vsel %vm3252_vm15, %v10291_v22, inf }
 0x2b1   : > { %v2843_v24 = vmin.f32 %v2841_v50, %v2842_v35  ;;  %v2856_v39 = vmin.f32 %v2854_v31, %v2855_v6  ;;  %v3065_v49 = vmin.f32 %v3063_v20, %v3064_v36  ;;  %v3078_v2 = vmin.f32 %v3076_v47, %v3077_v41 }
 0x2b2   : > { %v3257_v44 = vsel %vm3248_vm13, %v10063_v4, inf  ;;  %v3258_v46 = vsel %vm3248_vm13, %v10071_v37, inf  ;;  %v3266_v51 = vsel %vm3252_vm15, %v11911_v63, inf  ;;  %vm3254_vm9 = vcmp.eq.s32.totalorder %v10551_v9, 1  ;;  %v3449_v56 = vpop.permute.xlu0 %3448 }
 0x2b3   : > { %v10635_v52 = vmin.f32 %v11944_v28, %v2843_v24  ;;  %v10640_v14 = vmin.f32 %v11947_v18, %v2856_v39  ;;  %v3272_v15 = vmin.f32 %v3257_v44, %v3261_v32  ;;  %v3066_v23 = vrot.slane %v3065_v49, 4  ;;  %v3649_v32 = vpop.permute.xlu1 %3648 }
 0x2b4   : > { %v3079_v50 = vrot.slane %v3078_v2, 4  ;;  %v3285_v31 = vmin.f32 %v3258_v46, %v3262_v10  ;;  %v4702_v29 = vmov 1966171168   ;;  %vm3251_vm0 = vcmp.eq.s32.totalorder %v3237_v3, 1 }
 0x2b5   : > { %v3855_v35 = vunpack.c.l.s4 %v4702_v29  ;;  %v3067_v6 = vmin.f32 %v3065_v49, %v3066_v23  ;;  %vm3459_vm3 = vcmp.eq.s32.totalorder %v10566_v54, 1  ;;  %vm3461_vm13 = vcmp.eq.s32.totalorder %v10597_v21, 1 }
 0x2b6   : > { %v3080_v19 = vmin.f32 %v3078_v2, %v3079_v50  ;;  %v3274_v30 = vmin.f32 %v3272_v15, %v3265_v62  ;;  %v3287_v36 = vmin.f32 %v3285_v31, %v3266_v51  ;;  %v3263_v41 = vsel %vm3251_vm0, %v11940_v53, inf }
 0x2b7   : > { %v3264_v20 = vsel %vm3251_vm0, %v11941_v33, inf  ;;  %v3269_v47 = vsel %vm3254_vm9, %v10322_v26, inf  ;;  %v3270_v9 = vsel %vm3254_vm9, %v10330_v42, inf  ;;  %v3068_v24 = vrot.slane %v3067_v6, 2  ;;  %v3655_v28 = vpop.permute.xlu1 %3654 }
 0x2b8   : > { %v3081_v3 = vrot.slane %v3080_v19, 2  ;;  %v3856_v39 = vunpack.c.0.s8 %v3855_v35  ;;  %v10659_v10 = vsel %vm3459_vm3, %v11921_v57, inf  ;;  %v10664_v49 = vsel %vm3461_vm13, %v11922_v59, inf }
 0x2b9   : > { %v3273_v2 = vmin.f32 %v3271_v48, %v3263_v41  ;;  %v3069_v44 = vmin.f32 %v3067_v6, %v3068_v24  ;;  %v3286_v17 = vmin.f32 %v3284_v55, %v3264_v20  ;;  %vm3253_vm15 = vcmp.eq.s32.totalorder %v3243_v12, 1  ;;  %v3455_v55 = vpop.permute.xlu0 %3454 }
 0x2ba   : > { %v3082_v25 = vmin.f32 %v3080_v19, %v3081_v3  ;;  %v3276_v0 = vmin.f32 %v3274_v30, %v3269_v47  ;;  %v3289_v58 = vmin.f32 %v3287_v36, %v3270_v9  ;;  %v3267_v18 = vsel %vm3253_vm15, %v10193_v1, inf  ;;  %v11948_v19 = vld [vmem:[#allocation2_spill] sm:$0xff] }
 0x2bb   : > { %v3268_v46 = vsel %vm3253_vm15, %v10221_v61, inf  ;;  %v3070_v15 = vrot.slane %v3069_v44, 1  ;;  %v3275_v23 = vmin.f32 %v3273_v2, %v3267_v18  ;;  %v3468_v31 = vsel %vm3459_vm3, %v11930_v13, inf  ;;  %v3661_v6 = vpop.permute.xlu1 %3660 }
 0x2bc   : > { %v3083_v62 = vrot.slane %v3082_v25, 1  ;;  %v3288_v50 = vmin.f32 %v3286_v17, %v3268_v46  ;;  %v3472_v48 = vsel %vm3461_vm13, %v11923_v8, inf  ;;  %vm3462_vm9 = vcmp.eq.s32.totalorder %v10620_v60, 1 }
 0x2bd   : > { %vm3460_vm0 = vcmp.eq.s32.totalorder %v10630_v34, 1  ;;  %v3071_v12 = vmin.f32 %v3069_v44, %v3070_v15  ;;  %v3277_v29 = vmin.f32 %v3275_v23, %v3276_v0  ;;  %v10677_v30 = vsub.s32 %v3856_v39, %v11948_v19  ;;  %v3652_v39 = vpop.permute.xlu0 %3651 }
 0x2be   : > { %v3084_v51 = vmin.f32 %v3082_v25, %v3083_v62  ;;  %v3290_v35 = vmin.f32 %v3288_v50, %v3289_v58  ;;  %v3483_v54 = vmin.f32 %v10659_v10, %v10664_v49  ;;  %vm3464_vm3 = vcmp.eq.s32.totalorder %v10628_v45, 1 }
 0x2bf   : > { %vm3671_vm15 = vcmp.eq.s32.totalorder %v3649_v32, 1  ;;  %v10683_v21 = vmin.f32 %v10406_v40, %v3071_v12  ;;  %v3278_v41 = vrot.slane %v3277_v29, 4  ;;  %v3496_v47 = vmin.f32 %v3468_v31, %v3472_v48  ;;  %v10722_v44 = vpop.permute.xlu1 %3666 }
 0x2c0   : > { %v10686_v36 = vmin.f32 %v10411_v11, %v3084_v51  ;;  %v3291_v20 = vrot.slane %v3290_v35, 4  ;;  %v10691_v9 = vsel %vm3462_vm9, %v10240_v7, inf  ;;  %v10696_v24 = vsel %vm3462_vm9, %v10248_v43, inf }
 0x2c1   : > { %v10701_v40 = vsel %vm3460_vm0, %v10063_v4, inf  ;;  %4577 = vrsqrt.f32 %v10683_v21  ;;  %v10705_v11 = vsel %vm3464_vm3, %v10291_v22, inf  ;;  %v10710_v45 = vsel %vm3460_vm0, %v10071_v37, inf  ;;  %v3658_v18 = vpop.permute.xlu0 %3657 }
 0x2c2   : > { %vm3463_vm13 = vcmp.eq.s32.totalorder %v3449_v56, 1  ;;  %4579 = vrsqrt.f32 %v10686_v36  ;;  %v10714_v60 = vsel %vm3464_vm3, %v11911_v63, inf  ;;  %v3679_v3 = vsel %vm3671_vm15, %v11921_v57, inf }
 0x2c3   : > { %vm3673_vm9 = vcmp.eq.s32.totalorder %v3655_v28, 1  ;;  %v3279_v10 = vmin.f32 %v3277_v29, %v3278_v41  ;;  %v3292_v49 = vmin.f32 %v3290_v35, %v3291_v20  ;;  %v3484_v2 = vmin.f32 %v10701_v40, %v10691_v9  ;;  %v3458_v12 = vpop.permute.xlu1 %3457 }
 0x2c4   : > { %v3680_v34 = vsel %vm3671_vm15, %v11930_v13, inf  ;;  %v3497_v56 = vmin.f32 %v10710_v45, %v10696_v24  ;;  %v3475_v25 = vsel %vm3463_vm13, %v11940_v53, inf  ;;  %v3476_v17 = vsel %vm3463_vm13, %v11941_v33, inf }
 0x2c5   : > { %vm3465_vm0 = vcmp.eq.s32.totalorder %v3455_v55, 1  ;;  %vm3837_vm3 = vcmp.eq.f32.partialorder %v10683_v21, inf  ;;  %v3840_v57 = vand.u32 2147483648, %v10683_v21  ;;  %v3280_v0 = vrot.slane %v3279_v10, 2 }
 0x2c6   : > { %v3293_v58 = vrot.slane %v3292_v49, 2  ;;  %vm3839_vm5 = vcmp.eq.f32.partialorder %v10683_v21, 0.0  ;;  %vm3844_vm15 = vcmp.eq.f32.partialorder %v10686_v36, inf  ;;  %v3683_v13 = vsel %vm3673_vm9, %v11922_v59, inf }
 0x2c7   : > { %v3684_v32 = vsel %vm3673_vm9, %v11923_v8, inf  ;;  %vm3675_vm6 = vcmp.eq.s32.totalorder %v3661_v6, 1  ;;  %v3281_v46 = vmin.f32 %v3279_v10, %v3280_v0  ;;  %v3479_v62 = vsel %vm3465_vm0, %v10193_v1, inf }
 0x2c8   : > { %v3294_v15 = vmin.f32 %v3292_v49, %v3293_v58  ;;  %v10738_v23 = vsel %vm3465_vm0, %v10221_v61, inf  ;;  %vm3846_vm13 = vcmp.eq.f32.partialorder %v10686_v36, 0.0  ;;  %v3847_v50 = vand.u32 2147483648, %v10686_v36 }
 0x2c9   : > { %v3485_v31 = vmin.f32 %v3483_v54, %v3475_v25  ;;  %v10742_v48 = vmin.f32 %v3496_v47, %v3476_v17  ;;  %v3282_v59 = vrot.slane %v3281_v46, 1  ;;  %v3687_v8 = vsel %vm3675_vm6, %v11940_v53, inf  ;;  %v3664_v53 = vpop.permute.xlu0 %3663 }
 0x2ca   : > { %v3295_v55 = vrot.slane %v3294_v15, 1  ;;  %v3688_v28 = vsel %vm3675_vm6, %v11941_v33, inf  ;;  %v3695_v51 = vmin.f32 %v3679_v3, %v3683_v13  ;;  %v3708_v29 = vmin.f32 %v3680_v34, %v3684_v32  ;;  %v11952_v13 = vld [vmem:[#allocation3_spill] sm:$0xff]  ;;  %v11954_v32 = vld [vmem:[#allocation4_spill] sm:$0xff] }
 0x2cb   : > { %v3487_v35 = vmin.f32 %v3485_v31, %v3479_v62  ;;  %v3500_v6 = vmin.f32 %v10742_v48, %v10738_v23  ;;  %v4578_v19 = vpop.eup %4577  ;;  %v3283_v41 = vmin.f32 %v3281_v46, %v3282_v59  ;;  %vm3672_vm9 = vcmp.eq.s32.totalorder %v3652_v39, 1 }
 0x2cc   : > { %v3296_v20 = vmin.f32 %v3294_v15, %v3295_v55  ;;  %vm3674_vm0 = vcmp.eq.s32.totalorder %v3658_v18, 1  ;;  %v4580_v54 = vpop.eup %4579  ;;  %v3836_v47 = vmul.f32 %v4578_v19, %v10683_v21  ;;  %v3697_v9 = vmin.f32 %v3695_v51, %v3687_v8 }
 0x2cd   : > { %v3710_v40 = vmin.f32 %v3708_v29, %v3688_v28  ;;  %vm3466_vm11 = vcmp.eq.s32.totalorder %v3458_v12, 1  ;;  %v11949_v33 = vlaneseq  ;;  %v3843_v10 = vmul.f32 %v4580_v54, %v10686_v36 }
 0x2ce   : > { %v10756_v49 = vmin.f32 %v10508_v38, %v3283_v41  ;;  %v10759_v39 = vmin.f32 %v10513_v27, %v3296_v20  ;;  %vm3677_vm8 = vcmp.eq.s32.totalorder %v10722_v44, 1  ;;  %v3838_v34 = vsel %vm3837_vm3, %v10683_v21, %v3836_v47 }
 0x2cf   : > { %vm10750_vm6 = vcmp.lt.s32.totalorder %v11949_v33, 256  ;;  %v3681_v25 = vsel %vm3672_vm9, %v10063_v4, inf  ;;  %v3682_v17 = vsel %vm3672_vm9, %v10071_v37, inf  ;;  %v3685_v0 = vsel %vm3674_vm0, %v10240_v7, inf }
 0x2d0   : > { %v3841_v38 = vsel %vm3839_vm5, %v3840_v57, %v3838_v34  ;;  %v3845_v27 = vsel %vm3844_vm15, %v10686_v36, %v3843_v10  ;;  %4581 = vrsqrt.f32 %v10756_v49  ;;  %v3481_v58 = vsel %vm3466_vm11, %v10322_v26, inf  ;;  %v3670_v57 = vpop.permute.xlu0 %3669 }
 0x2d1   : > { %v3848_v4 = vsel %vm3846_vm13, %v3847_v50, %v3845_v27  ;;  %vm11953_vm3 = vcmp.gt.f32.partialorder %v11952_v13, 0.5  ;;  %v3686_v7 = vsel %vm3674_vm0, %v10248_v43, inf  ;;  %v3486_v21 = vmin.f32 %v3484_v2, %v10705_v11 }
 0x2d2   : > { %v3849_v37 = vsel %vm11953_vm3, %v3841_v38, inf  ;;  %vm11955_vm5 = vcmp.gt.f32.partialorder %v11954_v32, 0.5  ;;  %4583 = vrsqrt.f32 %v10759_v39  ;;  %v3691_v36 = vsel %vm3677_vm8, %v10193_v1, inf }
 0x2d3   : > { %v3850_v46 = vsel %vm11955_vm5, %v3848_v4, inf  ;;  %v3482_v15 = vsel %vm3466_vm11, %v10330_v42, inf  ;;  %v3692_v43 = vsel %vm3677_vm8, %v10221_v61, inf  ;;  %v3488_v11 = vmin.f32 %v3486_v21, %v3481_v58 }
 0x2d4   : > { %v3853_v62 = vcombine.low %v3849_v37, %v3850_v46  ;;  %v3499_v2 = vmin.f32 %v3497_v56, %v10714_v60  ;;  %v3696_v18 = vmin.f32 %v3681_v25, %v3685_v0  ;;  %v3709_v23 = vmin.f32 %v3682_v17, %v3686_v7 }
 0x2d5   : > { %vm3676_vm15 = vcmp.eq.s32.totalorder %v3664_v53, 1  ;;  %vm3678_vm13 = vcmp.eq.s32.totalorder %v3670_v57, 1  ;;  %v3489_v50 = vmin.f32 %v3487_v35, %v3488_v11  ;;  %v3699_v8 = vmin.f32 %v3697_v9, %v3691_v36 }
 0x2d6   : > { %v3860_v1 = vrot.slane %v3853_v62, %v10677_v30  ;;  %v3501_v31 = vmin.f32 %v3499_v2, %v3482_v15  ;;  %v3689_v48 = vsel %vm3676_vm15, %v10291_v22, inf  ;;  %v3690_v61 = vsel %vm3676_vm15, %v11911_v63, inf }
 0x2d7   : > { %v3698_v24 = vmin.f32 %v3696_v18, %v3689_v48  ;;  %v3693_v45 = vsel %vm3678_vm13, %v10322_v26, inf  ;;  %v3694_v60 = vsel %vm3678_vm13, %v10330_v42, inf  ;;  %v3490_v56 = vrot.slane %v3489_v50, 4 }
 0x2d8   : > { %v3867_v44 = vrot.slane %v3860_v1, %v10677_v30  ;;  %v3502_v59 = vmin.f32 %v3500_v6, %v3501_v31  ;;  %v3711_v55 = vmin.f32 %v3709_v23, %v3690_v61  ;;  %v3712_v28 = vmin.f32 %v3710_v40, %v3692_v43 }
 0x2d9   : > { %v3700_v22 = vmin.f32 %v3698_v24, %v3693_v45  ;;  %v3491_v12 = vmin.f32 %v3489_v50, %v3490_v56  ;;  %vm3876_vm11 = vcmp.eq.f32.partialorder %v10756_v49, inf  ;;  %vm3878_vm8 = vcmp.eq.f32.partialorder %v10756_v49, 0.0 }
 0x2da   : > { %3873 = vst.msk [vmem:[%s10805_s10] ss:$4 sm:$0x3] %vm10750_vm6, %v3867_v44  ;;  %v3503_v51 = vrot.slane %v3502_v59, 4  ;;  %v3713_v29 = vmin.f32 %v3711_v55, %v3694_v60  ;;  %v4582_v63 = vpop.eup %4581  ;;  %v3879_v20 = vand.u32 2147483648, %v10756_v49  ;;  %vm3883_vm9 = vcmp.eq.f32.partialorder %v10759_v39, inf }
 0x2db   : > { %v3701_v26 = vmin.f32 %v3699_v8, %v3700_v22  ;;  %v3875_v42 = vmul.f32 %v4582_v63, %v10756_v49  ;;  %v3492_v35 = vrot.slane %v3491_v12, 2  ;;  %vm3885_vm0 = vcmp.eq.f32.partialorder %v10759_v39, 0.0 }
 0x2dc   : > { %v3504_v6 = vmin.f32 %v3502_v59, %v3503_v51  ;;  %v3714_v19 = vmin.f32 %v3712_v28, %v3713_v29  ;;  %v4584_v41 = vpop.eup %4583  ;;  %v3886_v10 = vand.u32 2147483648, %v10759_v39 }
 0x2dd   : > { %v3702_v54 = vrot.slane %v3701_v26, 4  ;;  %v3877_v47 = vsel %vm3876_vm11, %v10756_v49, %v3875_v42  ;;  %v3882_v9 = vmul.f32 %v4584_v41, %v10759_v39  ;;  %v3493_v40 = vmin.f32 %v3491_v12, %v3492_v35 }
 0x2de   : > { %v3505_v53 = vrot.slane %v3504_v6, 2  ;;  %v3880_v33 = vsel %vm3878_vm8, %v3879_v20, %v3877_v47  ;;  %v3715_v25 = vrot.slane %v3714_v19, 4 }
 0x2df   : > { %v3703_v34 = vmin.f32 %v3701_v26, %v3702_v54  ;;  %v3884_v17 = vsel %vm3883_vm9, %v10759_v39, %v3882_v9  ;;  %v3888_v0 = vsel %vm11953_vm3, %v3880_v33, inf  ;;  %v3494_v38 = vrot.slane %v3493_v40, 1  ;;  %vm11956_vm9 = vmmov %vm11953_vm3 }
 0x2e0   : > { %v3506_v27 = vmin.f32 %v3504_v6, %v3505_v53  ;;  %v3887_v58 = vsel %vm3885_vm0, %v3886_v10, %v3884_v17  ;;  %v3716_v37 = vmin.f32 %v3714_v19, %v3715_v25  ;;  %vm11957_vm0 = vmmov %vm11955_vm5 }
 0x2e1   : > { %v3704_v4 = vrot.slane %v3703_v34, 2  ;;  %v3889_v49 = vsel %vm11955_vm5, %v3887_v58, inf  ;;  %v3495_v7 = vmin.f32 %v3493_v40, %v3494_v38 }
 0x2e2   : > { %v3507_v21 = vrot.slane %v3506_v27, 1  ;;  %v3892_v57 = vcombine.low %v3888_v0, %v3889_v49  ;;  %v3717_v36 = vrot.slane %v3716_v37, 2 }
 0x2e3   : > { %v3705_v46 = vmin.f32 %v3703_v34, %v3704_v4  ;;  %v3509_v39 = vmin.f32 %v10576_v16, %v3495_v7 }
 0x2e4   : > { %v3508_v15 = vmin.f32 %v3506_v27, %v3507_v21  ;;  %v3899_v62 = vrot.slane %v3892_v57, %v10677_v30  ;;  %v3718_v11 = vmin.f32 %v3716_v37, %v3717_v36 }
 0x2e5   : > { %v3706_v43 = vrot.slane %v3705_v46, 1  ;;  %4585 = vrsqrt.f32 %v3509_v39  ;;  %vm3913_vm15 = vcmp.eq.f32.partialorder %v3509_v39, inf  ;;  %v3916_v45 = vand.u32 2147483648, %v3509_v39 }
 0x2e6   : > { %v3510_v2 = vmin.f32 %v10581_v5, %v3508_v15  ;;  %v3900_v18 = vcombine.high %v3899_v62, %v3899_v62  ;;  %v3719_v1 = vrot.slane %v3718_v11, 1  ;;  %vm3915_vm13 = vcmp.eq.f32.partialorder %v3509_v39, 0.0 }
 0x2e7   : > { %v3707_v23 = vmin.f32 %v3705_v46, %v3706_v43 }
 0x2e8   : > { %4587 = vrsqrt.f32 %v3510_v2  ;;  %v3907_v50 = vrot.slane %v3900_v18, %v10677_v30  ;;  %v3720_v31 = vmin.f32 %v3718_v11, %v3719_v1  ;;  %vm3920_vm11 = vcmp.eq.f32.partialorder %v3510_v2, inf }
 0x2e9   : > { %v3721_v48 = vmin.f32 %v10635_v52, %v3707_v23  ;;  %v3923_v59 = vand.u32 2147483648, %v3510_v2  ;;  %vm3922_vm8 = vcmp.eq.f32.partialorder %v3510_v2, 0.0 }
 0x2ea   : > { %4328 = vst.msk [vmem:[%s10805_s10 + $0x1] ss:$4 sm:$0x3] %vm10750_vm6, %v3907_v50  ;;  %v3722_v16 = vmin.f32 %v10640_v14, %v3720_v31 }
 0x2eb   : > { %4589 = vrsqrt.f32 %v3721_v48  ;;  %vm3950_vm3 = vcmp.eq.f32.partialorder %v3721_v48, inf  ;;  %v3953_v51 = vand.u32 2147483648, %v3721_v48  ;;  %vm3952_vm5 = vcmp.eq.f32.partialorder %v3721_v48, 0.0 }
 0x2ec   : > { %4591 = vrsqrt.f32 %v3722_v16  ;;  %v3960_v35 = vand.u32 2147483648, %v3722_v16 }
 0x2ef   : > { %v4586_v61 = vpop.eup %4585 }
 0x2f0   : > { %v3912_v24 = vmul.f32 %v4586_v61, %v3509_v39 }
 0x2f2   : > { %v4588_v5 = vpop.eup %4587  ;;  %v3914_v60 = vsel %vm3913_vm15, %v3509_v39, %v3912_v24  ;;  %vm3957_vm15 = vcmp.eq.f32.partialorder %v3722_v16, inf }
 0x2f3   : > { %v3919_v44 = vmul.f32 %v4588_v5, %v3510_v2  ;;  %v3917_v56 = vsel %vm3915_vm13, %v3916_v45, %v3914_v60  ;;  %vm3959_vm13 = vcmp.eq.f32.partialorder %v3722_v16, 0.0 }
 0x2f4   : > { %v3925_v8 = vsel %vm11956_vm9, %v3917_v56, inf  ;;  %v3532_v20 = vpop.xlane.xlu1 %3531 }
 0x2f5   : > { %v4590_v55 = vpop.eup %4589  ;;  %v3921_v52 = vsel %vm3920_vm11, %v3510_v2, %v3919_v44  ;;  %vm11958_vm11 = vmmov %vm11956_vm9  ;;  %4593 = vrsqrt.f32 %v3532_v20  ;;  %vm3560_vm9 = vcmp.eq.f32.partialorder %v3532_v20, inf  ;;  %v3563_v27 = vand.u32 2147483648, %v3532_v20 }
 0x2f6   : > { %v3924_v14 = vsel %vm3922_vm8, %v3923_v59, %v3921_v52  ;;  %v3949_v22 = vmul.f32 %v4590_v55, %v3721_v48  ;;  %v4592_v28 = vpop.eup %4591  ;;  %vm11959_vm8 = vmmov %vm11957_vm0 }
 0x2f7   : > { %v3926_v12 = vsel %vm11957_vm0, %v3924_v14, inf  ;;  %v3956_v26 = vmul.f32 %v4592_v28, %v3722_v16  ;;  %vm3562_vm0 = vcmp.eq.f32.partialorder %v3532_v20, 0.0 }
 0x2f8   : > { %v3929_v29 = vcombine.low %v3925_v8, %v3926_v12  ;;  %v3951_v63 = vsel %vm3950_vm3, %v3721_v48, %v3949_v22  ;;  %v3529_v10 = vpop.xlane.xlu0 %3528 }
 0x2f9   : > { %v3954_v42 = vsel %vm3952_vm5, %v3953_v51, %v3951_v63  ;;  %v3958_v19 = vsel %vm3957_vm15, %v3722_v16, %v3956_v26  ;;  %4595 = vrsqrt.f32 %v3529_v10  ;;  %vm3553_vm3 = vcmp.eq.f32.partialorder %v3529_v10, inf }
 0x2fa   : > { %v3936_v6 = vrot.slane %v3929_v29, %v10677_v30  ;;  %v3962_v41 = vsel %vm11958_vm11, %v3954_v42, inf  ;;  %v3961_v54 = vsel %vm3959_vm13, %v3960_v35, %v3958_v19  ;;  %v3541_v34 = vpop.xlane.xlu1 %3540  ;;  %v3556_v3 = vand.u32 2147483648, %v3529_v10 }
 0x2fb   : > { %v3963_v9 = vsel %vm11959_vm8, %v3961_v54, inf  ;;  %4597 = vrsqrt.f32 %v3541_v34  ;;  %vm3581_vm5 = vcmp.eq.f32.partialorder %v3541_v34, inf  ;;  %v3584_v43 = vand.u32 2147483648, %v3541_v34 }
 0x2fc   : > { %v3943_v47 = vrot.slane %v3936_v6, %v10677_v30  ;;  %v3966_v40 = vcombine.low %v3962_v41, %v3963_v9 }
 0x2fe   : > { %v3944_v53 = vcombine.high %v3943_v47, %v3943_v47  ;;  %v3973_v33 = vrot.slane %v3966_v40, %v10677_v30  ;;  %v3535_v32 = vpop.xlane.xlu0 %3534 }
 0x2ff   : > { %v4594_v17 = vpop.eup %4593  ;;  %4599 = vrsqrt.f32 %v3535_v32  ;;  %vm3567_vm15 = vcmp.eq.f32.partialorder %v3535_v32, inf  ;;  %v3570_v5 = vand.u32 2147483648, %v3535_v32 }
 0x300   : > { %4329 = vst.msk [vmem:[%s10805_s10 + $0x2] ss:$4 sm:$0x3] %vm10750_vm6, %v3944_v53  ;;  %v3974_v13 = vcombine.high %v3973_v33, %v3973_v33  ;;  %v3559_v38 = vmul.f32 %v4594_v17, %v3532_v20  ;;  %v3547_v58 = vpop.xlane.xlu1 %3546 }
 0x301   : > { %4601 = vrsqrt.f32 %v3547_v58  ;;  %vm3595_vm13 = vcmp.eq.f32.partialorder %v3547_v58, inf  ;;  %v3598_v55 = vand.u32 2147483648, %v3547_v58 }
 0x302   : > { %v3981_v25 = vrot.slane %v3974_v13, %v10677_v30  ;;  %v3561_v4 = vsel %vm3560_vm9, %v3532_v20, %v3559_v38  ;;  %v3538_v49 = vpop.xlane.xlu0 %3537 }
 0x303   : > { %v3564_v37 = vsel %vm3562_vm0, %v3563_v27, %v3561_v4  ;;  %v4596_v7 = vpop.eup %4595  ;;  %4603 = vrsqrt.f32 %v3538_v49  ;;  %vm3574_vm11 = vcmp.eq.f32.partialorder %v3538_v49, inf  ;;  %v3577_v12 = vand.u32 2147483648, %v3538_v49  ;;  %v11968_v27 = vld [vmem:[#allocation63_spill] sm:$0xff] }
 0x304   : > { %v3982_v0 = vcombine.high %v3981_v25, %v3981_v25  ;;  %v3608_v30 = vsel %vm3420_vm10, %v3564_v37, inf  ;;  %v3552_v57 = vmul.f32 %v4596_v7, %v3529_v10  ;;  %vm3583_vm10 = vcmp.eq.f32.partialorder %v3541_v34, 0.0 }
 0x305   : > { %4305 = vst.msk [vmem:[%s6474_s6 + $0x2c8] sm:$0xff] %vm568_vm2, %v3608_v30  ;;  %v4598_v46 = vpop.eup %4597  ;;  %vm3576_vm8 = vcmp.eq.f32.partialorder %v3538_v49, 0.0 }
 0x306   : > { %4330 = vst.msk [vmem:[%s10805_s10 + $0x3] ss:$4 sm:$0x3] %vm10750_vm6, %v3982_v0  ;;  %v3741_v36 = vpop.xlane.xlu1 %3740  ;;  %v3554_v15 = vsel %vm3553_vm3, %v3529_v10, %v3552_v57  ;;  %vm3555_vm6 = vcmp.eq.f32.partialorder %v3529_v10, 0.0  ;;  %v3580_v39 = vmul.f32 %v4598_v46, %v3541_v34  ;;  %vm11969_vm3 = vcmp.gt.f32.partialorder %v11968_v27, 0.5  ;;  %v11970_v46 = vld [vmem:[#allocation66_spill] sm:$0xff] }
 0x307   : > { %4605 = vrsqrt.f32 %v3741_v36  ;;  %v3557_v62 = vsel %vm3555_vm6, %v3556_v3, %v3554_v15  ;;  %v3768_v47 = vand.u32 2147483648, %v3741_v36 }
 0x308   : > { %v3607_v18 = vsel %vm3419_vm14, %v3557_v62, inf  ;;  %v3582_v23 = vsel %vm3581_vm5, %v3541_v34, %v3580_v39  ;;  %vm3569_vm14 = vcmp.eq.f32.partialorder %v3535_v32, 0.0  ;;  %v11966_v34 = vld [vmem:[#allocation64_spill] sm:$0xff] }
 0x309   : > { %v10859_v11 = vpop.xlane.xlu0 %3543  ;;  %v4600_v1 = vpop.eup %4599  ;;  %4304 = vst.msk [vmem:[%s6474_s6 + $0x2c0] sm:$0xff] %vm568_vm2, %v3607_v18  ;;  %v3585_v50 = vsel %vm3583_vm10, %v3584_v43, %v3582_v23  ;;  %v11972_v43 = vld [vmem:[#allocation92_spill] sm:$0xff] }
 0x30a   : > { %4607 = vrsqrt.f32 %v10859_v11  ;;  %v3611_v48 = vsel %vm3423_vm4, %v3585_v50, inf  ;;  %v3566_v16 = vmul.f32 %v4600_v1, %v3535_v32  ;;  %vm3597_vm4 = vcmp.eq.f32.partialorder %v3547_v58, 0.0 }
 0x30b   : > { %v10868_v61 = vpop.xlane.xlu1 %3746  ;;  %v4602_v24 = vpop.eup %4601  ;;  %4308 = vst.msk [vmem:[%s6474_s6 + $0x2e0] sm:$0xff] %vm568_vm2, %v3611_v48  ;;  %vm3588_vm9 = vcmp.eq.f32.partialorder %v10859_v11, inf  ;;  %v3591_v33 = vand.u32 2147483648, %v10859_v11  ;;  %vm3590_vm0 = vcmp.eq.f32.partialorder %v10859_v11, 0.0 }
 0x30c   : > { %4609 = vrsqrt.f32 %v10868_v61  ;;  %v3568_v45 = vsel %vm3567_vm15, %v3535_v32, %v3566_v16  ;;  %v3594_v60 = vmul.f32 %v4602_v24, %v3547_v58  ;;  %vm3779_vm6 = vcmp.eq.f32.partialorder %v10868_v61, inf  ;;  %v11974_v16 = vld [vmem:[#allocation70_spill] sm:$0xff] }
 0x30d   : > { %v4604_v56 = vpop.eup %4603  ;;  %v3571_v59 = vsel %vm3569_vm14, %v3570_v5, %v3568_v45  ;;  %v3782_v4 = vand.u32 2147483648, %v10868_v61  ;;  %vm3781_vm5 = vcmp.eq.f32.partialorder %v10868_v61, 0.0  ;;  %vm11971_vm15 = vcmp.gt.f32.partialorder %v11970_v46, 0.5 }
 0x30e   : > { %v10873_v44 = vpop.xlane.xlu0 %3549  ;;  %v3609_v8 = vsel %vm3421_vm12, %v3571_v59, inf  ;;  %v3596_v14 = vsel %vm3595_vm13, %v3547_v58, %v3594_v60  ;;  %v3573_v22 = vmul.f32 %v4604_v56, %v3538_v49  ;;  %vm3765_vm12 = vcmp.eq.f32.partialorder %v3741_v36, inf }
 0x30f   : > { %4611 = vrsqrt.f32 %v10873_v44  ;;  %4306 = vst.msk [vmem:[%s6474_s6 + $0x2d0] sm:$0xff] %vm568_vm2, %v3609_v8  ;;  %v3599_v28 = vsel %vm3597_vm4, %v3598_v55, %v3596_v14  ;;  %vm3602_vm10 = vcmp.eq.f32.partialorder %v10873_v44, inf  ;;  %v3605_v30 = vand.u32 2147483648, %v10873_v44  ;;  %v11978_v14 = vld [vmem:[#allocation84_spill] sm:$0xff] }
 0x310   : > { %v3613_v26 = vsel %vm3425_vm1, %v3599_v28, inf  ;;  %v3575_v42 = vsel %vm3574_vm11, %v3538_v49, %v3573_v22  ;;  %vm3767_vm1 = vcmp.eq.f32.partialorder %v3741_v36, 0.0  ;;  %vm3604_vm14 = vcmp.eq.f32.partialorder %v10873_v44, 0.0 }
 0x311   : > { %v4606_v29 = vpop.eup %4605  ;;  %4310 = vst.msk [vmem:[%s6474_s6 + $0x2f0] sm:$0xff] %vm568_vm2, %v3613_v26  ;;  %v3578_v35 = vsel %vm3576_vm8, %v3577_v12, %v3575_v42  ;;  %vm11973_vm13 = vcmp.gt.f32.partialorder %v11972_v43, 0.5  ;;  %v11980_v26 = vld [vmem:[#allocation94_spill] sm:$0xff] }
 0x312   : > { %v10880_v51 = vpop.xlane.xlu1 %3752  ;;  %v3764_v6 = vmul.f32 %v4606_v29, %v3741_v36  ;;  %v3610_v54 = vsel %vm3422_vm7, %v3578_v35, inf  ;;  %vm11967_vm7 = vcmp.gt.f32.partialorder %v11966_v34, 0.5 }
 0x313   : > { %4613 = vrsqrt.f32 %v10880_v51  ;;  %v3744_v19 = vpop.xlane.xlu0 %3743  ;;  %4307 = vst.msk [vmem:[%s6474_s6 + $0x2d8] sm:$0xff] %vm568_vm2, %v3610_v54  ;;  %vm3793_vm4 = vcmp.eq.f32.partialorder %v10880_v51, inf  ;;  %v3796_v2 = vand.u32 2147483648, %v10880_v51  ;;  %vm3795_vm11 = vcmp.eq.f32.partialorder %v10880_v51, 0.0  ;;  %v11982_v54 = vld [vmem:[#allocation80_spill] sm:$0xff] }
 0x314   : > { %v4608_v41 = vpop.eup %4607  ;;  %4615 = vrsqrt.f32 %v3744_v19  ;;  %v3766_v9 = vsel %vm3765_vm12, %v3741_v36, %v3764_v6  ;;  %vm3772_vm8 = vcmp.eq.f32.partialorder %v3744_v19, inf  ;;  %v3775_v31 = vand.u32 2147483648, %v3744_v19 }
 0x315   : > { %v3587_v40 = vmul.f32 %v4608_v41, %v10859_v11  ;;  %v3769_v53 = vsel %vm3767_vm1, %v3768_v47, %v3766_v9  ;;  %vm11975_vm12 = vcmp.gt.f32.partialorder %v11974_v16, 0.5  ;;  %vm3774_vm1 = vcmp.eq.f32.partialorder %v3744_v19, 0.0 }
 0x316   : > { %v3759_v10 = vpop.xlane.xlu1 %3758  ;;  %v4610_v13 = vpop.eup %4609  ;;  %v3819_v25 = vsel %vm11967_vm7, %v3769_v53, inf }
 0x317   : > { %v3589_v17 = vsel %vm3588_vm9, %v10859_v11, %v3587_v40  ;;  %4617 = vrsqrt.f32 %v3759_v10  ;;  %4320 = vst.msk [vmem:[%s6474_s6 + $0x3c0] sm:$0xff] %vm568_vm2, %v3819_v25  ;;  %v3778_v32 = vmul.f32 %v4610_v13, %v10868_v61  ;;  %vm3807_vm7 = vcmp.eq.f32.partialorder %v3759_v10, inf }
 0x318   : > { %v3592_v0 = vsel %vm3590_vm0, %v3591_v33, %v3589_v17  ;;  %v3810_v59 = vand.u32 2147483648, %v3759_v10  ;;  %vm3809_vm0 = vcmp.eq.f32.partialorder %v3759_v10, 0.0 }
 0x319   : > { %v4612_v38 = vpop.eup %4611  ;;  %v3612_v58 = vsel %vm11969_vm3, %v3592_v0, inf  ;;  %v3780_v37 = vsel %vm3779_vm6, %v10868_v61, %v3778_v32  ;;  %vm11979_vm3 = vcmp.gt.f32.partialorder %v11978_v14, 0.5 }
 0x31a   : > { %4309 = vst.msk [vmem:[%s6474_s6 + $0x2e8] sm:$0xff] %vm568_vm2, %v3612_v58  ;;  %v3601_v49 = vmul.f32 %v4612_v38, %v10873_v44  ;;  %v3783_v21 = vsel %vm3781_vm5, %v3782_v4, %v3780_v37 }
 0x31b   : > { %v3750_v7 = vpop.xlane.xlu0 %3749  ;;  %v3821_v3 = vsel %vm11971_vm15, %v3783_v21, inf }
 0x31c   : > { %4619 = vrsqrt.f32 %v3750_v7  ;;  %v3603_v36 = vsel %vm3602_vm10, %v10873_v44, %v3601_v49  ;;  %4322 = vst.msk [vmem:[%s6474_s6 + $0x3d0] sm:$0xff] %vm568_vm2, %v3821_v3  ;;  %v11976_v44 = vld [vmem:[#allocation76_spill] sm:$0xff]  ;;  %vm3786_vm6 = vcmp.eq.f32.partialorder %v3750_v7, inf  ;;  %v3789_v12 = vand.u32 2147483648, %v3750_v7 }
 0x31d   : > { %v4614_v57 = vpop.eup %4613  ;;  %v3606_v15 = vsel %vm3604_vm14, %v3605_v30, %v3603_v36  ;;  %vm11977_vm9 = vcmp.gt.f32.partialorder %v11976_v44, 0.5  ;;  %vm3788_vm5 = vcmp.eq.f32.partialorder %v3750_v7, 0.0  ;;  %vm11981_vm10 = vcmp.gt.f32.partialorder %v11980_v26, 0.5 }
 0x31e   : > { %v3792_v39 = vmul.f32 %v4614_v57, %v10880_v51  ;;  %v4616_v62 = vpop.eup %4615  ;;  %v3614_v11 = vsel %vm11973_vm13, %v3606_v15, inf  ;;  %vm11983_vm13 = vcmp.gt.f32.partialorder %v11982_v54, 0.5 }
 0x31f   : > { %v3756_v18 = vpop.xlane.xlu0 %3755  ;;  %4311 = vst.msk [vmem:[%s6474_s6 + $0x2f8] sm:$0xff] %vm568_vm2, %v3614_v11  ;;  %v3771_v1 = vmul.f32 %v4616_v62, %v3744_v19 }
 0x320   : > { %v3794_v23 = vsel %vm3793_vm4, %v10880_v51, %v3792_v39  ;;  %4621 = vrsqrt.f32 %v3756_v18  ;;  %vm3800_vm15 = vcmp.eq.f32.partialorder %v3756_v18, inf  ;;  %v3803_v6 = vand.u32 2147483648, %v3756_v18 }
 0x321   : > { %v3797_v50 = vsel %vm3795_vm11, %v3796_v2, %v3794_v23  ;;  %v4618_v48 = vpop.eup %4617  ;;  %v3773_v24 = vsel %vm3772_vm8, %v3744_v19, %v3771_v1  ;;  %vm3802_vm14 = vcmp.eq.f32.partialorder %v3756_v18, 0.0 }
 0x322   : > { %v3823_v61 = vsel %vm11975_vm12, %v3797_v50, inf  ;;  %v3776_v5 = vsel %vm3774_vm1, %v3775_v31, %v3773_v24  ;;  %v3806_v45 = vmul.f32 %v4618_v48, %v3759_v10 }
 0x323   : > { %4324 = vst.msk [vmem:[%s6474_s6 + $0x3e0] sm:$0xff] %vm568_vm2, %v3823_v61  ;;  %v3820_v56 = vsel %vm11977_vm9, %v3776_v5, inf }
 0x324   : > { %v3762_v60 = vpop.xlane.xlu0 %3761  ;;  %4321 = vst.msk [vmem:[%s6474_s6 + $0x3c8] sm:$0xff] %vm568_vm2, %v3820_v56  ;;  %v3808_v55 = vsel %vm3807_vm7, %v3759_v10, %v3806_v45  ;;  %v11984_v10 = vld [vmem:[#allocation27_spill] sm:$0xff] }
 0x325   : > { %4623 = vrsqrt.f32 %v3762_v60  ;;  %v3811_v8 = vsel %vm3809_vm0, %v3810_v59, %v3808_v55  ;;  %vm3814_vm4 = vcmp.eq.f32.partialorder %v3762_v60, inf  ;;  %v3817_v40 = vand.u32 2147483648, %v3762_v60 }
 0x326   : > { %v4620_v52 = vpop.eup %4619  ;;  %v3825_v22 = vsel %vm11979_vm3, %v3811_v8, inf  ;;  %vm3816_vm11 = vcmp.eq.f32.partialorder %v3762_v60, 0.0  ;;  %vm11985_vm8 = vcmp.gt.f32.partialorder %v11984_v10, 0.5 }
 0x327   : > { %v3785_v28 = vmul.f32 %v4620_v52, %v3750_v7  ;;  %4326 = vst.msk [vmem:[%s6474_s6 + $0x3f0] sm:$0xff] %vm568_vm2, %v3825_v22 }
 0x329   : > { %v3787_v51 = vsel %vm3786_vm6, %v3750_v7, %v3785_v28 }
 0x32a   : > { %v4622_v29 = vpop.eup %4621  ;;  %v3790_v63 = vsel %vm3788_vm5, %v3789_v12, %v3787_v51 }
 0x32b   : > { %v3822_v42 = vsel %vm11981_vm10, %v3790_v63, inf  ;;  %v3799_v35 = vmul.f32 %v4622_v29, %v3756_v18 }
 0x32c   : > { %4323 = vst.msk [vmem:[%s6474_s6 + $0x3d8] sm:$0xff] %vm568_vm2, %v3822_v42 }
 0x32d   : > { %v3801_v19 = vsel %vm3800_vm15, %v3756_v18, %v3799_v35 }
 0x32e   : > { %v3804_v20 = vsel %vm3802_vm14, %v3803_v6, %v3801_v19 }
 0x32f   : > { %v4624_v41 = vpop.eup %4623  ;;  %v3824_v47 = vsel %vm11983_vm13, %v3804_v20, inf }
 0x330   : > { %v3813_v9 = vmul.f32 %v4624_v41, %v3762_v60  ;;  %4325 = vst.msk [vmem:[%s6474_s6 + $0x3e8] sm:$0xff] %vm568_vm2, %v3824_v47 }
 0x332   : > { %v3815_v53 = vsel %vm3814_vm4, %v3762_v60, %v3813_v9 }
 0x333   : > { %v3818_v33 = vsel %vm3816_vm11, %v3817_v40, %v3815_v53 }
 0x334   : > { %v3826_v13 = vsel %vm11985_vm8, %v3818_v33, inf }
 0x335   : > { %4327 = vst.msk [vmem:[%s6474_s6 + $0x3f8] sm:$0xff] %vm568_vm2, %v3826_v13 }
 0x336 PF: > { %s16_s18 = sadd.s32 1, %s4697_s18  }
 0x337   : > { %p13_p4 = scmp.ge.s32.totalorder %s16_s18, 4  }
 0x339   :  { %15 = sbr.rel (!%p13_p4) target bundleno = 1 (0x1), region = 98 }

</bundles_post_ra>
